<compile_context>
chip_gen: v7x
topology: tpu7x:2x2x1
jax: 0.10.0
libtpu: 0.0.40
codegen_flags: <defaults>
</compile_context>

<pallas_src>
import functools

import jax
import jax.numpy as jnp
from jax.experimental import pallas as pl
from jax.experimental.pallas import tpu as pltpu


# ----------------------------------------------------------------------------
# small static helpers
# ----------------------------------------------------------------------------
def _round_up(x, m):
    return (x + m - 1) // m * m


def _largest_divisor_leq(n, cap):
    """Largest divisor of n that is <= cap (keeps every tile exact -> no stat masking needed)."""
    for d in range(min(n, cap), 0, -1):
        if n % d == 0:
            return d
    return n


# ----------------------------------------------------------------------------
# Kernel 1: 3x3 conv (pad=1) for one (image, H-tile) block + partial BN stats.
# ----------------------------------------------------------------------------
def conv3x3_kernel(x_ref, w_ref, b_ref, z_ref, stats_ref, *, th, wo, ci, co):
    """x_ref:     (1, th+2, wo+2, ci) bf16  input tile with 1-row/col halo (spatial zero pad)
       w_ref:     (9*ci, co)          bf16  tap-major weight matrix
       b_ref:     (1, co)             f32   bias
       z_ref:     (1, th, wo, co)     bf16  pre-BN conv output (lane-dense, co % 128 == 0)
       stats_ref: (1, 8, co)          f32   row0 = sum, row1 = sum of squares (partial BN stats)
    """
    acc = jnp.zeros((th * wo, co), jnp.float32)
    for tap in range(9):                       # static unroll: 9 shifted-slice matmuls
        di, dj = tap // 3, tap % 3
        xs = x_ref[0, di:di + th, dj:dj + wo, :].reshape(th * wo, ci)   # bf16
        wk = w_ref[tap * ci:(tap + 1) * ci, :]                          # bf16
        acc = acc + jnp.dot(xs, wk, preferred_element_type=jnp.float32)
    y = acc + b_ref[...]                                                # (th*wo, co) f32

    z_ref[...] = y.reshape(1, th, wo, co).astype(z_ref.dtype)

    s = jnp.sum(y, axis=0, keepdims=True)                               # (1, co)
    ss = jnp.sum(y * y, axis=0, keepdims=True)                          # (1, co)
    stats_ref[...] = jnp.concatenate(
        [s, ss, jnp.zeros((6, co), jnp.float32)], axis=0)[None]


def conv3x3_pallas(x_nhwc, w_oihw, b, *, cout_pad):
    """3x3 conv, padding=1.  x_nhwc: (N, H, W, Cip) bf16 with channels already padded.
    Returns (z_flat (N*H*W, cout_pad) bf16 pre-BN, per-channel sum, per-channel sum-of-squares)."""
    N, H, W, Cip = x_nhwc.shape
    Cout = w_oihw.shape[0]
    Cop = cout_pad

    TH = _largest_divisor_leq(H, 64)           # rows of output per grid step
    T = H // TH
    G = N * T
    Wp = W + 2

    # Spatial zero-pad (conv padding=1) + halo tiles along H.  Duplication factor (TH+2)/TH,
    # not the 9x of an HBM im2col; this gather is thin XLA glue, the hot loop is in-kernel.
    xp = jnp.pad(x_nhwc, ((0, 0), (1, 1), (1, 1), (0, 0)))
    x_tiles = jnp.stack([xp[:, t * TH:t * TH + TH + 2] for t in range(T)], axis=1)
    x_tiles = x_tiles.reshape(G, TH + 2, Wp, Cip)

    # Weight (Cout, Cin, 3, 3) -> (kh, kw, Cin, Cout) -> pad channels -> (9*Cip, Cop) bf16.
    wt = jnp.transpose(w_oihw, (2, 3, 1, 0))
    wt = jnp.pad(wt, ((0, 0), (0, 0), (0, Cip - wt.shape[2]), (0, Cop - Cout)))
    w_mat = wt.reshape(9 * Cip, Cop).astype(jnp.bfloat16)
    b_mat = jnp.pad(b, (0, Cop - Cout)).reshape(1, Cop).astype(jnp.float32)

    kernel = functools.partial(conv3x3_kernel, th=TH, wo=W, ci=Cip, co=Cop)
    z, stats = pl.pallas_call(
        kernel,
        out_shape=(jax.ShapeDtypeStruct((G, TH, W, Cop), jnp.bfloat16),
                   jax.ShapeDtypeStruct((G, 8, Cop), jnp.float32)),
        grid=(G,),
        in_specs=[
            pl.BlockSpec((1, TH + 2, Wp, Cip), lambda i: (i, 0, 0, 0)),
            pl.BlockSpec((9 * Cip, Cop), lambda i: (0, 0)),
            pl.BlockSpec((1, Cop), lambda i: (0, 0)),
        ],
        out_specs=(
            pl.BlockSpec((1, TH, W, Cop), lambda i: (i, 0, 0, 0)),
            pl.BlockSpec((1, 8, Cop), lambda i: (i, 0, 0)),
        ),
        compiler_params=pltpu.CompilerParams(
            dimension_semantics=("parallel",),           # shards across v7x's 2 TensorCores
            vmem_limit_bytes=32 * 1024 * 1024),
    )(x_tiles, w_mat, b_mat)

    z_flat = z.reshape(N * H * W, Cop)          # (g, r, w) row order == (n, h, w)
    s = jnp.sum(stats[:, 0, :], axis=0)         # global per-channel sum
    ss = jnp.sum(stats[:, 1, :], axis=0)        # global per-channel sum of squares
    return z_flat, s, ss


# ----------------------------------------------------------------------------
# Kernel 2: BatchNorm(normalize, using global batch stats) + ReLU, row-tiled.
# ----------------------------------------------------------------------------
def bn_relu_kernel(z_ref, scale_ref, shift_ref, o_ref):
    y = z_ref[...].astype(jnp.float32) * scale_ref[...] + shift_ref[...]
    o_ref[...] = jnp.maximum(y, 0.0).astype(o_ref.dtype)


def bn_relu_pallas(z_flat, scale, shift, out_dtype):
    M, Cop = z_flat.shape
    TM = _largest_divisor_leq(M, 1024)
    return pl.pallas_call(
        bn_relu_kernel,
        out_shape=jax.ShapeDtypeStruct((M, Cop), out_dtype),
        grid=(M // TM,),
        in_specs=[
            pl.BlockSpec((TM, Cop), lambda i: (i, 0)),
            pl.BlockSpec((1, Cop), lambda i: (0, 0)),
            pl.BlockSpec((1, Cop), lambda i: (0, 0)),
        ],
        out_specs=pl.BlockSpec((TM, Cop), lambda i: (i, 0)),
        compiler_params=pltpu.CompilerParams(
            dimension_semantics=("parallel",),
            vmem_limit_bytes=32 * 1024 * 1024),
    )(z_flat, scale.reshape(1, Cop), shift.reshape(1, Cop))


def _bn_affine(s, ss, count, gamma, beta, cpad, eps=1e-5):
    """PyTorch training-mode BatchNorm: batch mean, biased variance, eps=1e-5 -> scale/shift."""
    g = jnp.pad(gamma.astype(jnp.float32), (0, cpad - gamma.shape[0]))
    b = jnp.pad(beta.astype(jnp.float32), (0, cpad - beta.shape[0]))
    mean = s / count
    var = jnp.maximum(ss / count - mean * mean, 0.0)
    scale = g * jax.lax.rsqrt(var + eps)
    shift = b - mean * scale
    return scale, shift


# ----------------------------------------------------------------------------
# Module forward: conv1 -> bn1 -> relu -> conv2 -> bn2 -> relu  (NCHW I/O)
# ----------------------------------------------------------------------------
@jax.jit
def conv_block_forward(inputs_nchw, params):
    N, Cin, H, W = inputs_nchw.shape
    out_c = params["c1_w"].shape[0]
    cin_p = _round_up(Cin, 8)        # sublane-aligned contraction for conv1
    cout_p = _round_up(out_c, 128)   # lane-dense stores; deep MXU K for conv2

    x = jnp.transpose(inputs_nchw, (0, 2, 3, 1)).astype(jnp.bfloat16)   # NCHW -> NHWC, bf16
    x = jnp.pad(x, ((0, 0), (0, 0), (0, 0), (0, cin_p - Cin)))          # zero channel pad

    M = N * H * W

    # conv1 + bn1(train) + relu
    z1, s1, ss1 = conv3x3_pallas(x, params["c1_w"], params["c1_b"], cout_pad=cout_p)
    scale1, shift1 = _bn_affine(s1, ss1, M, params["bn1_g"], params["bn1_b"], cout_p)
    a1 = bn_relu_pallas(z1, scale1, shift1, jnp.bfloat16)               # (M, cout_p) bf16

    # conv2 + bn2(train) + relu
    a1_nhwc = a1.reshape(N, H, W, cout_p)
    z2, s2, ss2 = conv3x3_pallas(a1_nhwc, params["c2_w"], params["c2_b"], cout_pad=cout_p)
    scale2, shift2 = _bn_affine(s2, ss2, M, params["bn2_g"], params["bn2_b"], cout_p)
    a2 = bn_relu_pallas(z2, scale2, shift2, jnp.float32)                # (M, cout_p) f32

    out = a2.reshape(N, H, W, cout_p)[:, :, :, :out_c]                  # drop channel padding
    return jnp.transpose(out, (0, 3, 1, 2))                             # NHWC -> NCHW


# ----------------------------------------------------------------------------
# Params / reference / demo
# ----------------------------------------------------------------------------
def init_params(key, in_c, out_c):
    ks = jax.random.split(key, 8)
    return {
        "c1_w": 0.1 * jax.random.normal(ks[0], (out_c, in_c, 3, 3), jnp.float32),
        "c1_b": 0.1 * jax.random.normal(ks[1], (out_c,), jnp.float32),
        "bn1_g": 1.0 + 0.1 * jax.random.normal(ks[2], (out_c,), jnp.float32),
        "bn1_b": 0.1 * jax.random.normal(ks[3], (out_c,), jnp.float32),
        "c2_w": 0.1 * jax.random.normal(ks[4], (out_c, out_c, 3, 3), jnp.float32),
        "c2_b": 0.1 * jax.random.normal(ks[5], (out_c,), jnp.float32),
        "bn2_g": 1.0 + 0.1 * jax.random.normal(ks[6], (out_c,), jnp.float32),
        "bn2_b": 0.1 * jax.random.normal(ks[7], (out_c,), jnp.float32),
    }


def conv_block_reference(x_nchw, params, eps=1e-5):
    """Pure-JAX f32 reference of the PyTorch module (training-mode BN)."""
    def conv(x, w, b):
        y = jax.lax.conv_general_dilated(
            x, w, window_strides=(1, 1), padding=((1, 1), (1, 1)),
            dimension_numbers=("NCHW", "OIHW", "NCHW"))
        return y + b[None, :, None, None]

    def bn_relu(y, g, b):
        mean = jnp.mean(y, axis=(0, 2, 3), keepdims=True)
        var = jnp.mean((y - mean) ** 2, axis=(0, 2, 3), keepdims=True)
        yn = (y - mean) * jax.lax.rsqrt(var + eps)
        return jnp.maximum(yn * g[None, :, None, None] + b[None, :, None, None], 0.0)

    h = bn_relu(conv(x_nchw, params["c1_w"], params["c1_b"]),
                params["bn1_g"], params["bn1_b"])
    h = bn_relu(conv(h, params["c2_w"], params["c2_b"]),
                params["bn2_g"], params["bn2_b"])
    return h


if __name__ == "__main__":
    key = jax.random.PRNGKey(0)
    k_in, k_par = jax.random.split(key, 2)

    in_c, out_c = 4, 8
    N, H, W = 2, 16, 16
    x = jax.random.normal(k_in, (N, in_c, H, W), jnp.float32)           # NCHW
    params = init_params(k_par, in_c, out_c)

    out = jax.block_until_ready(conv_block_forward(x, params))

    assert out.shape == (N, out_c, H, W), out.shape
    assert bool(jnp.all(jnp.isfinite(out)))
    assert bool(jnp.all(out >= 0.0))                                    # ReLU output

    ref = conv_block_reference(x, params)
    max_err = float(jnp.max(jnp.abs(out - ref)))
    assert max_err < 0.25, max_err                                      # bf16 activations

    print("KERNEL_OK")
</pallas_src>

<mosaic_0001>
module attributes {stable_mosaic.version = 11 : i64} {
  func.func @conv3x3_kernel(%arg0: i32, %arg1: memref<1x18x18x8xbf16, #tpu.memory_space<vmem>>, %arg2: memref<72x128xbf16, #tpu.memory_space<vmem>>, %arg3: memref<1x128xf32, #tpu.memory_space<vmem>>, %arg4: memref<1x16x16x128xbf16, #tpu.memory_space<vmem>>, %arg5: memref<1x8x128xf32, #tpu.memory_space<vmem>>) attributes {dimension_semantics = [#tpu.dimension_semantics<parallel>], iteration_bounds = array<i64: 2>, scalar_prefetch = 0 : i64, scratch_operands = 0 : i64, tpu.core_type = #tpu.core_type<tc>, window_params = [{transform_indices = @transform_0, window_bounds = array<i64: 1, 18, 18, 8>}, {pipeline_mode = #tpu.pipeline_mode<synchronous>, transform_indices = @transform_1, window_bounds = array<i64: 72, 128>}, {pipeline_mode = #tpu.pipeline_mode<synchronous>, transform_indices = @transform_2, window_bounds = array<i64: 1, 128>}, {transform_indices = @transform_3, window_bounds = array<i64: 1, 16, 16, 128>}, {transform_indices = @transform_4, window_bounds = array<i64: 1, 8, 128>}]} {
    %cst = arith.constant 0.000000e+00 : f32
    %0 = vector.broadcast %cst : f32 to vector<256x128xf32>
    %c0 = arith.constant 0 : index
    %c0_0 = arith.constant 0 : index
    %c0_1 = arith.constant 0 : index
    %c0_2 = arith.constant 0 : index
    %1 = vector.load %arg1[%c0, %c0_0, %c0_1, %c0_2] : memref<1x18x18x8xbf16, #tpu.memory_space<vmem>>, vector<1x16x16x8xbf16>
    %2 = vector.shape_cast %1 : vector<1x16x16x8xbf16> to vector<16x16x8xbf16>
    %3 = vector.shape_cast %2 : vector<16x16x8xbf16> to vector<256x8xbf16>
    %c0_3 = arith.constant 0 : index
    %c0_4 = arith.constant 0 : index
    %4 = vector.load %arg2[%c0_3, %c0_4] : memref<72x128xbf16, #tpu.memory_space<vmem>>, vector<8x128xbf16>
    %cst_5 = arith.constant dense<0.000000e+00> : vector<256x128xf32>
    %5 = tpu.matmul %3, %4, %cst_5 {dimension_numbers = #tpu.dot_dimension_numbers<[1], [0], [0], [1], [0, 0, 1, 1], [], []>} : vector<256x8xbf16>, vector<8x128xbf16>, vector<256x128xf32> -> vector<256x128xf32>
    %6 = arith.addf %0, %5 : vector<256x128xf32>
    %c0_6 = arith.constant 0 : index
    %c0_7 = arith.constant 0 : index
    %c1 = arith.constant 1 : index
    %c0_8 = arith.constant 0 : index
    %7 = vector.load %arg1[%c0_6, %c0_7, %c1, %c0_8] : memref<1x18x18x8xbf16, #tpu.memory_space<vmem>>, vector<1x16x16x8xbf16>
    %8 = vector.shape_cast %7 : vector<1x16x16x8xbf16> to vector<16x16x8xbf16>
    %9 = vector.shape_cast %8 : vector<16x16x8xbf16> to vector<256x8xbf16>
    %c8 = arith.constant 8 : index
    %c0_9 = arith.constant 0 : index
    %10 = vector.load %arg2[%c8, %c0_9] : memref<72x128xbf16, #tpu.memory_space<vmem>>, vector<8x128xbf16>
    %cst_10 = arith.constant dense<0.000000e+00> : vector<256x128xf32>
    %11 = tpu.matmul %9, %10, %cst_10 {dimension_numbers = #tpu.dot_dimension_numbers<[1], [0], [0], [1], [0, 0, 1, 1], [], []>} : vector<256x8xbf16>, vector<8x128xbf16>, vector<256x128xf32> -> vector<256x128xf32>
    %12 = arith.addf %6, %11 : vector<256x128xf32>
    %c0_11 = arith.constant 0 : index
    %c0_12 = arith.constant 0 : index
    %c2 = arith.constant 2 : index
    %c0_13 = arith.constant 0 : index
    %13 = vector.load %arg1[%c0_11, %c0_12, %c2, %c0_13] : memref<1x18x18x8xbf16, #tpu.memory_space<vmem>>, vector<1x16x16x8xbf16>
    %14 = vector.shape_cast %13 : vector<1x16x16x8xbf16> to vector<16x16x8xbf16>
    %15 = vector.shape_cast %14 : vector<16x16x8xbf16> to vector<256x8xbf16>
    %c16 = arith.constant 16 : index
    %c0_14 = arith.constant 0 : index
    %16 = vector.load %arg2[%c16, %c0_14] : memref<72x128xbf16, #tpu.memory_space<vmem>>, vector<8x128xbf16>
    %cst_15 = arith.constant dense<0.000000e+00> : vector<256x128xf32>
    %17 = tpu.matmul %15, %16, %cst_15 {dimension_numbers = #tpu.dot_dimension_numbers<[1], [0], [0], [1], [0, 0, 1, 1], [], []>} : vector<256x8xbf16>, vector<8x128xbf16>, vector<256x128xf32> -> vector<256x128xf32>
    %18 = arith.addf %12, %17 : vector<256x128xf32>
    %c0_16 = arith.constant 0 : index
    %c1_17 = arith.constant 1 : index
    %c0_18 = arith.constant 0 : index
    %c0_19 = arith.constant 0 : index
    %19 = vector.load %arg1[%c0_16, %c1_17, %c0_18, %c0_19] : memref<1x18x18x8xbf16, #tpu.memory_space<vmem>>, vector<1x16x16x8xbf16>
    %20 = vector.shape_cast %19 : vector<1x16x16x8xbf16> to vector<16x16x8xbf16>
    %21 = vector.shape_cast %20 : vector<16x16x8xbf16> to vector<256x8xbf16>
    %c24 = arith.constant 24 : index
    %c0_20 = arith.constant 0 : index
    %22 = vector.load %arg2[%c24, %c0_20] : memref<72x128xbf16, #tpu.memory_space<vmem>>, vector<8x128xbf16>
    %cst_21 = arith.constant dense<0.000000e+00> : vector<256x128xf32>
    %23 = tpu.matmul %21, %22, %cst_21 {dimension_numbers = #tpu.dot_dimension_numbers<[1], [0], [0], [1], [0, 0, 1, 1], [], []>} : vector<256x8xbf16>, vector<8x128xbf16>, vector<256x128xf32> -> vector<256x128xf32>
    %24 = arith.addf %18, %23 : vector<256x128xf32>
    %c0_22 = arith.constant 0 : index
    %c1_23 = arith.constant 1 : index
    %c1_24 = arith.constant 1 : index
    %c0_25 = arith.constant 0 : index
    %25 = vector.load %arg1[%c0_22, %c1_23, %c1_24, %c0_25] : memref<1x18x18x8xbf16, #tpu.memory_space<vmem>>, vector<1x16x16x8xbf16>
    %26 = vector.shape_cast %25 : vector<1x16x16x8xbf16> to vector<16x16x8xbf16>
    %27 = vector.shape_cast %26 : vector<16x16x8xbf16> to vector<256x8xbf16>
    %c32 = arith.constant 32 : index
    %c0_26 = arith.constant 0 : index
    %28 = vector.load %arg2[%c32, %c0_26] : memref<72x128xbf16, #tpu.memory_space<vmem>>, vector<8x128xbf16>
    %cst_27 = arith.constant dense<0.000000e+00> : vector<256x128xf32>
    %29 = tpu.matmul %27, %28, %cst_27 {dimension_numbers = #tpu.dot_dimension_numbers<[1], [0], [0], [1], [0, 0, 1, 1], [], []>} : vector<256x8xbf16>, vector<8x128xbf16>, vector<256x128xf32> -> vector<256x128xf32>
    %30 = arith.addf %24, %29 : vector<256x128xf32>
    %c0_28 = arith.constant 0 : index
    %c1_29 = arith.constant 1 : index
    %c2_30 = arith.constant 2 : index
    %c0_31 = arith.constant 0 : index
    %31 = vector.load %arg1[%c0_28, %c1_29, %c2_30, %c0_31] : memref<1x18x18x8xbf16, #tpu.memory_space<vmem>>, vector<1x16x16x8xbf16>
    %32 = vector.shape_cast %31 : vector<1x16x16x8xbf16> to vector<16x16x8xbf16>
    %33 = vector.shape_cast %32 : vector<16x16x8xbf16> to vector<256x8xbf16>
    %c40 = arith.constant 40 : index
    %c0_32 = arith.constant 0 : index
    %34 = vector.load %arg2[%c40, %c0_32] : memref<72x128xbf16, #tpu.memory_space<vmem>>, vector<8x128xbf16>
    %cst_33 = arith.constant dense<0.000000e+00> : vector<256x128xf32>
    %35 = tpu.matmul %33, %34, %cst_33 {dimension_numbers = #tpu.dot_dimension_numbers<[1], [0], [0], [1], [0, 0, 1, 1], [], []>} : vector<256x8xbf16>, vector<8x128xbf16>, vector<256x128xf32> -> vector<256x128xf32>
    %36 = arith.addf %30, %35 : vector<256x128xf32>
    %c0_34 = arith.constant 0 : index
    %c2_35 = arith.constant 2 : index
    %c0_36 = arith.constant 0 : index
    %c0_37 = arith.constant 0 : index
    %37 = vector.load %arg1[%c0_34, %c2_35, %c0_36, %c0_37] : memref<1x18x18x8xbf16, #tpu.memory_space<vmem>>, vector<1x16x16x8xbf16>
    %38 = vector.shape_cast %37 : vector<1x16x16x8xbf16> to vector<16x16x8xbf16>
    %39 = vector.shape_cast %38 : vector<16x16x8xbf16> to vector<256x8xbf16>
    %c48 = arith.constant 48 : index
    %c0_38 = arith.constant 0 : index
    %40 = vector.load %arg2[%c48, %c0_38] : memref<72x128xbf16, #tpu.memory_space<vmem>>, vector<8x128xbf16>
    %cst_39 = arith.constant dense<0.000000e+00> : vector<256x128xf32>
    %41 = tpu.matmul %39, %40, %cst_39 {dimension_numbers = #tpu.dot_dimension_numbers<[1], [0], [0], [1], [0, 0, 1, 1], [], []>} : vector<256x8xbf16>, vector<8x128xbf16>, vector<256x128xf32> -> vector<256x128xf32>
    %42 = arith.addf %36, %41 : vector<256x128xf32>
    %c0_40 = arith.constant 0 : index
    %c2_41 = arith.constant 2 : index
    %c1_42 = arith.constant 1 : index
    %c0_43 = arith.constant 0 : index
    %43 = vector.load %arg1[%c0_40, %c2_41, %c1_42, %c0_43] : memref<1x18x18x8xbf16, #tpu.memory_space<vmem>>, vector<1x16x16x8xbf16>
    %44 = vector.shape_cast %43 : vector<1x16x16x8xbf16> to vector<16x16x8xbf16>
    %45 = vector.shape_cast %44 : vector<16x16x8xbf16> to vector<256x8xbf16>
    %c56 = arith.constant 56 : index
    %c0_44 = arith.constant 0 : index
    %46 = vector.load %arg2[%c56, %c0_44] : memref<72x128xbf16, #tpu.memory_space<vmem>>, vector<8x128xbf16>
    %cst_45 = arith.constant dense<0.000000e+00> : vector<256x128xf32>
    %47 = tpu.matmul %45, %46, %cst_45 {dimension_numbers = #tpu.dot_dimension_numbers<[1], [0], [0], [1], [0, 0, 1, 1], [], []>} : vector<256x8xbf16>, vector<8x128xbf16>, vector<256x128xf32> -> vector<256x128xf32>
    %48 = arith.addf %42, %47 : vector<256x128xf32>
    %c0_46 = arith.constant 0 : index
    %c2_47 = arith.constant 2 : index
    %c2_48 = arith.constant 2 : index
    %c0_49 = arith.constant 0 : index
    %49 = vector.load %arg1[%c0_46, %c2_47, %c2_48, %c0_49] : memref<1x18x18x8xbf16, #tpu.memory_space<vmem>>, vector<1x16x16x8xbf16>
    %50 = vector.shape_cast %49 : vector<1x16x16x8xbf16> to vector<16x16x8xbf16>
    %51 = vector.shape_cast %50 : vector<16x16x8xbf16> to vector<256x8xbf16>
    %c64 = arith.constant 64 : index
    %c0_50 = arith.constant 0 : index
    %52 = vector.load %arg2[%c64, %c0_50] : memref<72x128xbf16, #tpu.memory_space<vmem>>, vector<8x128xbf16>
    %cst_51 = arith.constant dense<0.000000e+00> : vector<256x128xf32>
    %53 = tpu.matmul %51, %52, %cst_51 {dimension_numbers = #tpu.dot_dimension_numbers<[1], [0], [0], [1], [0, 0, 1, 1], [], []>} : vector<256x8xbf16>, vector<8x128xbf16>, vector<256x128xf32> -> vector<256x128xf32>
    %54 = arith.addf %48, %53 : vector<256x128xf32>
    %c0_52 = arith.constant 0 : index
    %c0_53 = arith.constant 0 : index
    %55 = vector.load %arg3[%c0_52, %c0_53] : memref<1x128xf32, #tpu.memory_space<vmem>>, vector<1x128xf32>
    %56 = vector.broadcast %55 : vector<1x128xf32> to vector<256x128xf32>
    %57 = arith.addf %54, %56 : vector<256x128xf32>
    %58 = vector.shape_cast %57 : vector<256x128xf32> to vector<1x16x16x128xf32>
    %59 = arith.truncf %58 : vector<1x16x16x128xf32> to vector<1x16x16x128xbf16>
    %c0_54 = arith.constant 0 : index
    %c0_55 = arith.constant 0 : index
    %c0_56 = arith.constant 0 : index
    %c0_57 = arith.constant 0 : index
    %60 = vector.load %arg4[%c0_54, %c0_55, %c0_56, %c0_57] : memref<1x16x16x128xbf16, #tpu.memory_space<vmem>>, vector<1x16x16x128xbf16>
    tpu.vector_store %arg4[%c0_54, %c0_55, %c0_56, %c0_57], %59 {strides = array<i32>} : memref<1x16x16x128xbf16, #tpu.memory_space<vmem>>, vector<1x16x16x128xbf16>,
    %cst_58 = arith.constant dense<0.000000e+00> : vector<128xf32>
    %61 = vector.multi_reduction <add>, %57, %cst_58 [0] : vector<256x128xf32> to vector<128xf32>
    %62 = vector.shape_cast %61 : vector<128xf32> to vector<1x128xf32>
    %63 = arith.mulf %57, %57 : vector<256x128xf32>
    %cst_59 = arith.constant dense<0.000000e+00> : vector<128xf32>
    %64 = vector.multi_reduction <add>, %63, %cst_59 [0] : vector<256x128xf32> to vector<128xf32>
    %65 = vector.shape_cast %64 : vector<128xf32> to vector<1x128xf32>
    %cst_60 = arith.constant 0.000000e+00 : f32
    %66 = vector.broadcast %cst_60 : f32 to vector<6x128xf32>
    %67 = tpu.concatenate %62, %65, %66 in 0 : vector<1x128xf32>, vector<1x128xf32>, vector<6x128xf32> -> vector<8x128xf32>
    %68 = vector.shape_cast %67 : vector<8x128xf32> to vector<1x8x128xf32>
    %c0_61 = arith.constant 0 : index
    %c0_62 = arith.constant 0 : index
    %c0_63 = arith.constant 0 : index
    %69 = vector.load %arg5[%c0_61, %c0_62, %c0_63] : memref<1x8x128xf32, #tpu.memory_space<vmem>>, vector<1x8x128xf32>
    tpu.vector_store %arg5[%c0_61, %c0_62, %c0_63], %68 {strides = array<i32>} : memref<1x8x128xf32, #tpu.memory_space<vmem>>, vector<1x8x128xf32>,
    return
  }
  func.func @transform_0(%arg0: i32) -> (i32, i32, i32, i32) {
    %c0_i32 = arith.constant 0 : i32
    %c0_i32_0 = arith.constant 0 : i32
    %c0_i32_1 = arith.constant 0 : i32
    %c0_i32_2 = arith.constant 0 : i32
    return %arg0, %c0_i32, %c0_i32_0, %c0_i32_1 : i32, i32, i32, i32
  }
  func.func @transform_1(%arg0: i32) -> (i32, i32) {
    %c0_i32 = arith.constant 0 : i32
    %c0_i32_0 = arith.constant 0 : i32
    %c0_i32_1 = arith.constant 0 : i32
    return %c0_i32, %c0_i32_0 : i32, i32
  }
  func.func @transform_2(%arg0: i32) -> (i32, i32) {
    %c0_i32 = arith.constant 0 : i32
    %c0_i32_0 = arith.constant 0 : i32
    %c0_i32_1 = arith.constant 0 : i32
    return %c0_i32, %c0_i32_0 : i32, i32
  }
  func.func @transform_3(%arg0: i32) -> (i32, i32, i32, i32) {
    %c0_i32 = arith.constant 0 : i32
    %c0_i32_0 = arith.constant 0 : i32
    %c0_i32_1 = arith.constant 0 : i32
    %c0_i32_2 = arith.constant 0 : i32
    return %arg0, %c0_i32, %c0_i32_0, %c0_i32_1 : i32, i32, i32, i32
  }
  func.func @transform_4(%arg0: i32) -> (i32, i32, i32) {
    %c0_i32 = arith.constant 0 : i32
    %c0_i32_0 = arith.constant 0 : i32
    %c0_i32_1 = arith.constant 0 : i32
    return %arg0, %c0_i32, %c0_i32_0 : i32, i32, i32
  }
}

module attributes {stable_mosaic.version = 11 : i64} {
  func.func @bn_relu_kernel(%arg0: i32, %arg1: memref<512x128xbf16, #tpu.memory_space<vmem>>, %arg2: memref<1x128xf32, #tpu.memory_space<vmem>>, %arg3: memref<1x128xf32, #tpu.memory_space<vmem>>, %arg4: memref<512x128xbf16, #tpu.memory_space<vmem>>) attributes {dimension_semantics = [#tpu.dimension_semantics<parallel>], iteration_bounds = array<i64: 1>, scalar_prefetch = 0 : i64, scratch_operands = 0 : i64, tpu.core_type = #tpu.core_type<tc>, window_params = [{transform_indices = @transform_0, window_bounds = array<i64: 512, 128>}, {pipeline_mode = #tpu.pipeline_mode<synchronous>, transform_indices = @transform_1, window_bounds = array<i64: 1, 128>}, {pipeline_mode = #tpu.pipeline_mode<synchronous>, transform_indices = @transform_2, window_bounds = array<i64: 1, 128>}, {transform_indices = @transform_3, window_bounds = array<i64: 512, 128>}]} {
    %c0 = arith.constant 0 : index
    %c0_0 = arith.constant 0 : index
    %0 = vector.load %arg1[%c0, %c0_0] : memref<512x128xbf16, #tpu.memory_space<vmem>>, vector<512x128xbf16>
    %1 = arith.extf %0 : vector<512x128xbf16> to vector<512x128xf32>
    %c0_1 = arith.constant 0 : index
    %c0_2 = arith.constant 0 : index
    %2 = vector.load %arg2[%c0_1, %c0_2] : memref<1x128xf32, #tpu.memory_space<vmem>>, vector<1x128xf32>
    %3 = vector.broadcast %2 : vector<1x128xf32> to vector<512x128xf32>
    %4 = arith.mulf %1, %3 : vector<512x128xf32>
    %c0_3 = arith.constant 0 : index
    %c0_4 = arith.constant 0 : index
    %5 = vector.load %arg3[%c0_3, %c0_4] : memref<1x128xf32, #tpu.memory_space<vmem>>, vector<1x128xf32>
    %6 = vector.broadcast %5 : vector<1x128xf32> to vector<512x128xf32>
    %7 = arith.addf %4, %6 : vector<512x128xf32>
    %cst = arith.constant 0.000000e+00 : f32
    %8 = vector.broadcast %cst : f32 to vector<512x128xf32>
    %9 = arith.maximumf %7, %8 : vector<512x128xf32>
    %10 = arith.truncf %9 : vector<512x128xf32> to vector<512x128xbf16>
    %c0_5 = arith.constant 0 : index
    %c0_6 = arith.constant 0 : index
    %11 = vector.load %arg4[%c0_5, %c0_6] : memref<512x128xbf16, #tpu.memory_space<vmem>>, vector<512x128xbf16>
    tpu.vector_store %arg4[%c0_5, %c0_6], %10 {strides = array<i32>} : memref<512x128xbf16, #tpu.memory_space<vmem>>, vector<512x128xbf16>,
    return
  }
  func.func @transform_0(%arg0: i32) -> (i32, i32) {
    %c0_i32 = arith.constant 0 : i32
    %c0_i32_0 = arith.constant 0 : i32
    return %arg0, %c0_i32 : i32, i32
  }
  func.func @transform_1(%arg0: i32) -> (i32, i32) {
    %c0_i32 = arith.constant 0 : i32
    %c0_i32_0 = arith.constant 0 : i32
    %c0_i32_1 = arith.constant 0 : i32
    return %c0_i32, %c0_i32_0 : i32, i32
  }
  func.func @transform_2(%arg0: i32) -> (i32, i32) {
    %c0_i32 = arith.constant 0 : i32
    %c0_i32_0 = arith.constant 0 : i32
    %c0_i32_1 = arith.constant 0 : i32
    return %c0_i32, %c0_i32_0 : i32, i32
  }
  func.func @transform_3(%arg0: i32) -> (i32, i32) {
    %c0_i32 = arith.constant 0 : i32
    %c0_i32_0 = arith.constant 0 : i32
    return %arg0, %c0_i32 : i32, i32
  }
}

module attributes {stable_mosaic.version = 11 : i64} {
  func.func @bn_relu_kernel(%arg0: i32, %arg1: memref<512x128xbf16, #tpu.memory_space<vmem>>, %arg2: memref<1x128xf32, #tpu.memory_space<vmem>>, %arg3: memref<1x128xf32, #tpu.memory_space<vmem>>, %arg4: memref<512x128xf32, #tpu.memory_space<vmem>>) attributes {dimension_semantics = [#tpu.dimension_semantics<parallel>], iteration_bounds = array<i64: 1>, scalar_prefetch = 0 : i64, scratch_operands = 0 : i64, tpu.core_type = #tpu.core_type<tc>, window_params = [{transform_indices = @transform_0, window_bounds = array<i64: 512, 128>}, {pipeline_mode = #tpu.pipeline_mode<synchronous>, transform_indices = @transform_1, window_bounds = array<i64: 1, 128>}, {pipeline_mode = #tpu.pipeline_mode<synchronous>, transform_indices = @transform_2, window_bounds = array<i64: 1, 128>}, {transform_indices = @transform_3, window_bounds = array<i64: 512, 128>}]} {
    %c0 = arith.constant 0 : index
    %c0_0 = arith.constant 0 : index
    %0 = vector.load %arg1[%c0, %c0_0] : memref<512x128xbf16, #tpu.memory_space<vmem>>, vector<512x128xbf16>
    %1 = arith.extf %0 : vector<512x128xbf16> to vector<512x128xf32>
    %c0_1 = arith.constant 0 : index
    %c0_2 = arith.constant 0 : index
    %2 = vector.load %arg2[%c0_1, %c0_2] : memref<1x128xf32, #tpu.memory_space<vmem>>, vector<1x128xf32>
    %3 = vector.broadcast %2 : vector<1x128xf32> to vector<512x128xf32>
    %4 = arith.mulf %1, %3 : vector<512x128xf32>
    %c0_3 = arith.constant 0 : index
    %c0_4 = arith.constant 0 : index
    %5 = vector.load %arg3[%c0_3, %c0_4] : memref<1x128xf32, #tpu.memory_space<vmem>>, vector<1x128xf32>
    %6 = vector.broadcast %5 : vector<1x128xf32> to vector<512x128xf32>
    %7 = arith.addf %4, %6 : vector<512x128xf32>
    %cst = arith.constant 0.000000e+00 : f32
    %8 = vector.broadcast %cst : f32 to vector<512x128xf32>
    %9 = arith.maximumf %7, %8 : vector<512x128xf32>
    %c0_5 = arith.constant 0 : index
    %c0_6 = arith.constant 0 : index
    %10 = vector.load %arg4[%c0_5, %c0_6] : memref<512x128xf32, #tpu.memory_space<vmem>>, vector<512x128xf32>
    tpu.vector_store %arg4[%c0_5, %c0_6], %9 {strides = array<i32>} : memref<512x128xf32, #tpu.memory_space<vmem>>, vector<512x128xf32>,
    return
  }
  func.func @transform_0(%arg0: i32) -> (i32, i32) {
    %c0_i32 = arith.constant 0 : i32
    %c0_i32_0 = arith.constant 0 : i32
    return %arg0, %c0_i32 : i32, i32
  }
  func.func @transform_1(%arg0: i32) -> (i32, i32) {
    %c0_i32 = arith.constant 0 : i32
    %c0_i32_0 = arith.constant 0 : i32
    %c0_i32_1 = arith.constant 0 : i32
    return %c0_i32, %c0_i32_0 : i32, i32
  }
  func.func @transform_2(%arg0: i32) -> (i32, i32) {
    %c0_i32 = arith.constant 0 : i32
    %c0_i32_0 = arith.constant 0 : i32
    %c0_i32_1 = arith.constant 0 : i32
    return %c0_i32, %c0_i32_0 : i32, i32
  }
  func.func @transform_3(%arg0: i32) -> (i32, i32) {
    %c0_i32 = arith.constant 0 : i32
    %c0_i32_0 = arith.constant 0 : i32
    return %arg0, %c0_i32 : i32, i32
  }
}

module attributes {stable_mosaic.version = 11 : i64} {
  func.func @conv3x3_kernel(%arg0: i32, %arg1: memref<1x18x18x128xbf16, #tpu.memory_space<vmem>>, %arg2: memref<1152x128xbf16, #tpu.memory_space<vmem>>, %arg3: memref<1x128xf32, #tpu.memory_space<vmem>>, %arg4: memref<1x16x16x128xbf16, #tpu.memory_space<vmem>>, %arg5: memref<1x8x128xf32, #tpu.memory_space<vmem>>) attributes {dimension_semantics = [#tpu.dimension_semantics<parallel>], iteration_bounds = array<i64: 2>, scalar_prefetch = 0 : i64, scratch_operands = 0 : i64, tpu.core_type = #tpu.core_type<tc>, window_params = [{transform_indices = @transform_0, window_bounds = array<i64: 1, 18, 18, 128>}, {pipeline_mode = #tpu.pipeline_mode<synchronous>, transform_indices = @transform_1, window_bounds = array<i64: 1152, 128>}, {pipeline_mode = #tpu.pipeline_mode<synchronous>, transform_indices = @transform_2, window_bounds = array<i64: 1, 128>}, {transform_indices = @transform_3, window_bounds = array<i64: 1, 16, 16, 128>}, {transform_indices = @transform_4, window_bounds = array<i64: 1, 8, 128>}]} {
    %cst = arith.constant 0.000000e+00 : f32
    %0 = vector.broadcast %cst : f32 to vector<256x128xf32>
    %c0 = arith.constant 0 : index
    %c0_0 = arith.constant 0 : index
    %c0_1 = arith.constant 0 : index
    %c0_2 = arith.constant 0 : index
    %1 = vector.load %arg1[%c0, %c0_0, %c0_1, %c0_2] : memref<1x18x18x128xbf16, #tpu.memory_space<vmem>>, vector<1x16x16x128xbf16>
    %2 = vector.shape_cast %1 : vector<1x16x16x128xbf16> to vector<16x16x128xbf16>
    %3 = vector.shape_cast %2 : vector<16x16x128xbf16> to vector<256x128xbf16>
    %c0_3 = arith.constant 0 : index
    %c0_4 = arith.constant 0 : index
    %4 = vector.load %arg2[%c0_3, %c0_4] : memref<1152x128xbf16, #tpu.memory_space<vmem>>, vector<128x128xbf16>
    %cst_5 = arith.constant dense<0.000000e+00> : vector<256x128xf32>
    %5 = tpu.matmul %3, %4, %cst_5 {dimension_numbers = #tpu.dot_dimension_numbers<[1], [0], [0], [1], [0, 0, 1, 1], [], []>} : vector<256x128xbf16>, vector<128x128xbf16>, vector<256x128xf32> -> vector<256x128xf32>
    %6 = arith.addf %0, %5 : vector<256x128xf32>
    %c0_6 = arith.constant 0 : index
    %c0_7 = arith.constant 0 : index
    %c1 = arith.constant 1 : index
    %c0_8 = arith.constant 0 : index
    %7 = vector.load %arg1[%c0_6, %c0_7, %c1, %c0_8] : memref<1x18x18x128xbf16, #tpu.memory_space<vmem>>, vector<1x16x16x128xbf16>
    %8 = vector.shape_cast %7 : vector<1x16x16x128xbf16> to vector<16x16x128xbf16>
    %9 = vector.shape_cast %8 : vector<16x16x128xbf16> to vector<256x128xbf16>
    %c128 = arith.constant 128 : index
    %c0_9 = arith.constant 0 : index
    %10 = vector.load %arg2[%c128, %c0_9] : memref<1152x128xbf16, #tpu.memory_space<vmem>>, vector<128x128xbf16>
    %cst_10 = arith.constant dense<0.000000e+00> : vector<256x128xf32>
    %11 = tpu.matmul %9, %10, %cst_10 {dimension_numbers = #tpu.dot_dimension_numbers<[1], [0], [0], [1], [0, 0, 1, 1], [], []>} : vector<256x128xbf16>, vector<128x128xbf16>, vector<256x128xf32> -> vector<256x128xf32>
    %12 = arith.addf %6, %11 : vector<256x128xf32>
    %c0_11 = arith.constant 0 : index
    %c0_12 = arith.constant 0 : index
    %c2 = arith.constant 2 : index
    %c0_13 = arith.constant 0 : index
    %13 = vector.load %arg1[%c0_11, %c0_12, %c2, %c0_13] : memref<1x18x18x128xbf16, #tpu.memory_space<vmem>>, vector<1x16x16x128xbf16>
    %14 = vector.shape_cast %13 : vector<1x16x16x128xbf16> to vector<16x16x128xbf16>
    %15 = vector.shape_cast %14 : vector<16x16x128xbf16> to vector<256x128xbf16>
    %c256 = arith.constant 256 : index
    %c0_14 = arith.constant 0 : index
    %16 = vector.load %arg2[%c256, %c0_14] : memref<1152x128xbf16, #tpu.memory_space<vmem>>, vector<128x128xbf16>
    %cst_15 = arith.constant dense<0.000000e+00> : vector<256x128xf32>
    %17 = tpu.matmul %15, %16, %cst_15 {dimension_numbers = #tpu.dot_dimension_numbers<[1], [0], [0], [1], [0, 0, 1, 1], [], []>} : vector<256x128xbf16>, vector<128x128xbf16>, vector<256x128xf32> -> vector<256x128xf32>
    %18 = arith.addf %12, %17 : vector<256x128xf32>
    %c0_16 = arith.constant 0 : index
    %c1_17 = arith.constant 1 : index
    %c0_18 = arith.constant 0 : index
    %c0_19 = arith.constant 0 : index
    %19 = vector.load %arg1[%c0_16, %c1_17, %c0_18, %c0_19] : memref<1x18x18x128xbf16, #tpu.memory_space<vmem>>, vector<1x16x16x128xbf16>
    %20 = vector.shape_cast %19 : vector<1x16x16x128xbf16> to vector<16x16x128xbf16>
    %21 = vector.shape_cast %20 : vector<16x16x128xbf16> to vector<256x128xbf16>
    %c384 = arith.constant 384 : index
    %c0_20 = arith.constant 0 : index
    %22 = vector.load %arg2[%c384, %c0_20] : memref<1152x128xbf16, #tpu.memory_space<vmem>>, vector<128x128xbf16>
    %cst_21 = arith.constant dense<0.000000e+00> : vector<256x128xf32>
    %23 = tpu.matmul %21, %22, %cst_21 {dimension_numbers = #tpu.dot_dimension_numbers<[1], [0], [0], [1], [0, 0, 1, 1], [], []>} : vector<256x128xbf16>, vector<128x128xbf16>, vector<256x128xf32> -> vector<256x128xf32>
    %24 = arith.addf %18, %23 : vector<256x128xf32>
    %c0_22 = arith.constant 0 : index
    %c1_23 = arith.constant 1 : index
    %c1_24 = arith.constant 1 : index
    %c0_25 = arith.constant 0 : index
    %25 = vector.load %arg1[%c0_22, %c1_23, %c1_24, %c0_25] : memref<1x18x18x128xbf16, #tpu.memory_space<vmem>>, vector<1x16x16x128xbf16>
    %26 = vector.shape_cast %25 : vector<1x16x16x128xbf16> to vector<16x16x128xbf16>
    %27 = vector.shape_cast %26 : vector<16x16x128xbf16> to vector<256x128xbf16>
    %c512 = arith.constant 512 : index
    %c0_26 = arith.constant 0 : index
    %28 = vector.load %arg2[%c512, %c0_26] : memref<1152x128xbf16, #tpu.memory_space<vmem>>, vector<128x128xbf16>
    %cst_27 = arith.constant dense<0.000000e+00> : vector<256x128xf32>
    %29 = tpu.matmul %27, %28, %cst_27 {dimension_numbers = #tpu.dot_dimension_numbers<[1], [0], [0], [1], [0, 0, 1, 1], [], []>} : vector<256x128xbf16>, vector<128x128xbf16>, vector<256x128xf32> -> vector<256x128xf32>
    %30 = arith.addf %24, %29 : vector<256x128xf32>
    %c0_28 = arith.constant 0 : index
    %c1_29 = arith.constant 1 : index
    %c2_30 = arith.constant 2 : index
    %c0_31 = arith.constant 0 : index
    %31 = vector.load %arg1[%c0_28, %c1_29, %c2_30, %c0_31] : memref<1x18x18x128xbf16, #tpu.memory_space<vmem>>, vector<1x16x16x128xbf16>
    %32 = vector.shape_cast %31 : vector<1x16x16x128xbf16> to vector<16x16x128xbf16>
    %33 = vector.shape_cast %32 : vector<16x16x128xbf16> to vector<256x128xbf16>
    %c640 = arith.constant 640 : index
    %c0_32 = arith.constant 0 : index
    %34 = vector.load %arg2[%c640, %c0_32] : memref<1152x128xbf16, #tpu.memory_space<vmem>>, vector<128x128xbf16>
    %cst_33 = arith.constant dense<0.000000e+00> : vector<256x128xf32>
    %35 = tpu.matmul %33, %34, %cst_33 {dimension_numbers = #tpu.dot_dimension_numbers<[1], [0], [0], [1], [0, 0, 1, 1], [], []>} : vector<256x128xbf16>, vector<128x128xbf16>, vector<256x128xf32> -> vector<256x128xf32>
    %36 = arith.addf %30, %35 : vector<256x128xf32>
    %c0_34 = arith.constant 0 : index
    %c2_35 = arith.constant 2 : index
    %c0_36 = arith.constant 0 : index
    %c0_37 = arith.constant 0 : index
    %37 = vector.load %arg1[%c0_34, %c2_35, %c0_36, %c0_37] : memref<1x18x18x128xbf16, #tpu.memory_space<vmem>>, vector<1x16x16x128xbf16>
    %38 = vector.shape_cast %37 : vector<1x16x16x128xbf16> to vector<16x16x128xbf16>
    %39 = vector.shape_cast %38 : vector<16x16x128xbf16> to vector<256x128xbf16>
    %c768 = arith.constant 768 : index
    %c0_38 = arith.constant 0 : index
    %40 = vector.load %arg2[%c768, %c0_38] : memref<1152x128xbf16, #tpu.memory_space<vmem>>, vector<128x128xbf16>
    %cst_39 = arith.constant dense<0.000000e+00> : vector<256x128xf32>
    %41 = tpu.matmul %39, %40, %cst_39 {dimension_numbers = #tpu.dot_dimension_numbers<[1], [0], [0], [1], [0, 0, 1, 1], [], []>} : vector<256x128xbf16>, vector<128x128xbf16>, vector<256x128xf32> -> vector<256x128xf32>
    %42 = arith.addf %36, %41 : vector<256x128xf32>
    %c0_40 = arith.constant 0 : index
    %c2_41 = arith.constant 2 : index
    %c1_42 = arith.constant 1 : index
    %c0_43 = arith.constant 0 : index
    %43 = vector.load %arg1[%c0_40, %c2_41, %c1_42, %c0_43] : memref<1x18x18x128xbf16, #tpu.memory_space<vmem>>, vector<1x16x16x128xbf16>
    %44 = vector.shape_cast %43 : vector<1x16x16x128xbf16> to vector<16x16x128xbf16>
    %45 = vector.shape_cast %44 : vector<16x16x128xbf16> to vector<256x128xbf16>
    %c896 = arith.constant 896 : index
    %c0_44 = arith.constant 0 : index
    %46 = vector.load %arg2[%c896, %c0_44] : memref<1152x128xbf16, #tpu.memory_space<vmem>>, vector<128x128xbf16>
    %cst_45 = arith.constant dense<0.000000e+00> : vector<256x128xf32>
    %47 = tpu.matmul %45, %46, %cst_45 {dimension_numbers = #tpu.dot_dimension_numbers<[1], [0], [0], [1], [0, 0, 1, 1], [], []>} : vector<256x128xbf16>, vector<128x128xbf16>, vector<256x128xf32> -> vector<256x128xf32>
    %48 = arith.addf %42, %47 : vector<256x128xf32>
    %c0_46 = arith.constant 0 : index
    %c2_47 = arith.constant 2 : index
    %c2_48 = arith.constant 2 : index
    %c0_49 = arith.constant 0 : index
    %49 = vector.load %arg1[%c0_46, %c2_47, %c2_48, %c0_49] : memref<1x18x18x128xbf16, #tpu.memory_space<vmem>>, vector<1x16x16x128xbf16>
    %50 = vector.shape_cast %49 : vector<1x16x16x128xbf16> to vector<16x16x128xbf16>
    %51 = vector.shape_cast %50 : vector<16x16x128xbf16> to vector<256x128xbf16>
    %c1024 = arith.constant 1024 : index
    %c0_50 = arith.constant 0 : index
    %52 = vector.load %arg2[%c1024, %c0_50] : memref<1152x128xbf16, #tpu.memory_space<vmem>>, vector<128x128xbf16>
    %cst_51 = arith.constant dense<0.000000e+00> : vector<256x128xf32>
    %53 = tpu.matmul %51, %52, %cst_51 {dimension_numbers = #tpu.dot_dimension_numbers<[1], [0], [0], [1], [0, 0, 1, 1], [], []>} : vector<256x128xbf16>, vector<128x128xbf16>, vector<256x128xf32> -> vector<256x128xf32>
    %54 = arith.addf %48, %53 : vector<256x128xf32>
    %c0_52 = arith.constant 0 : index
    %c0_53 = arith.constant 0 : index
    %55 = vector.load %arg3[%c0_52, %c0_53] : memref<1x128xf32, #tpu.memory_space<vmem>>, vector<1x128xf32>
    %56 = vector.broadcast %55 : vector<1x128xf32> to vector<256x128xf32>
    %57 = arith.addf %54, %56 : vector<256x128xf32>
    %58 = vector.shape_cast %57 : vector<256x128xf32> to vector<1x16x16x128xf32>
    %59 = arith.truncf %58 : vector<1x16x16x128xf32> to vector<1x16x16x128xbf16>
    %c0_54 = arith.constant 0 : index
    %c0_55 = arith.constant 0 : index
    %c0_56 = arith.constant 0 : index
    %c0_57 = arith.constant 0 : index
    %60 = vector.load %arg4[%c0_54, %c0_55, %c0_56, %c0_57] : memref<1x16x16x128xbf16, #tpu.memory_space<vmem>>, vector<1x16x16x128xbf16>
    tpu.vector_store %arg4[%c0_54, %c0_55, %c0_56, %c0_57], %59 {strides = array<i32>} : memref<1x16x16x128xbf16, #tpu.memory_space<vmem>>, vector<1x16x16x128xbf16>,
    %cst_58 = arith.constant dense<0.000000e+00> : vector<128xf32>
    %61 = vector.multi_reduction <add>, %57, %cst_58 [0] : vector<256x128xf32> to vector<128xf32>
    %62 = vector.shape_cast %61 : vector<128xf32> to vector<1x128xf32>
    %63 = arith.mulf %57, %57 : vector<256x128xf32>
    %cst_59 = arith.constant dense<0.000000e+00> : vector<128xf32>
    %64 = vector.multi_reduction <add>, %63, %cst_59 [0] : vector<256x128xf32> to vector<128xf32>
    %65 = vector.shape_cast %64 : vector<128xf32> to vector<1x128xf32>
    %cst_60 = arith.constant 0.000000e+00 : f32
    %66 = vector.broadcast %cst_60 : f32 to vector<6x128xf32>
    %67 = tpu.concatenate %62, %65, %66 in 0 : vector<1x128xf32>, vector<1x128xf32>, vector<6x128xf32> -> vector<8x128xf32>
    %68 = vector.shape_cast %67 : vector<8x128xf32> to vector<1x8x128xf32>
    %c0_61 = arith.constant 0 : index
    %c0_62 = arith.constant 0 : index
    %c0_63 = arith.constant 0 : index
    %69 = vector.load %arg5[%c0_61, %c0_62, %c0_63] : memref<1x8x128xf32, #tpu.memory_space<vmem>>, vector<1x8x128xf32>
    tpu.vector_store %arg5[%c0_61, %c0_62, %c0_63], %68 {strides = array<i32>} : memref<1x8x128xf32, #tpu.memory_space<vmem>>, vector<1x8x128xf32>,
    return
  }
  func.func @transform_0(%arg0: i32) -> (i32, i32, i32, i32) {
    %c0_i32 = arith.constant 0 : i32
    %c0_i32_0 = arith.constant 0 : i32
    %c0_i32_1 = arith.constant 0 : i32
    %c0_i32_2 = arith.constant 0 : i32
    return %arg0, %c0_i32, %c0_i32_0, %c0_i32_1 : i32, i32, i32, i32
  }
  func.func @transform_1(%arg0: i32) -> (i32, i32) {
    %c0_i32 = arith.constant 0 : i32
    %c0_i32_0 = arith.constant 0 : i32
    %c0_i32_1 = arith.constant 0 : i32
    return %c0_i32, %c0_i32_0 : i32, i32
  }
  func.func @transform_2(%arg0: i32) -> (i32, i32) {
    %c0_i32 = arith.constant 0 : i32
    %c0_i32_0 = arith.constant 0 : i32
    %c0_i32_1 = arith.constant 0 : i32
    return %c0_i32, %c0_i32_0 : i32, i32
  }
  func.func @transform_3(%arg0: i32) -> (i32, i32, i32, i32) {
    %c0_i32 = arith.constant 0 : i32
    %c0_i32_0 = arith.constant 0 : i32
    %c0_i32_1 = arith.constant 0 : i32
    %c0_i32_2 = arith.constant 0 : i32
    return %arg0, %c0_i32, %c0_i32_0, %c0_i32_1 : i32, i32, i32, i32
  }
  func.func @transform_4(%arg0: i32) -> (i32, i32, i32) {
    %c0_i32 = arith.constant 0 : i32
    %c0_i32_0 = arith.constant 0 : i32
    %c0_i32_1 = arith.constant 0 : i32
    return %arg0, %c0_i32, %c0_i32_0 : i32, i32, i32
  }
}

</mosaic_0001>

<bundles_post_ra>
// kernel: conv_block_forward.7
= control target key start
LH: loop header
LB: loop body
LE: loop exit
PB: predicated region body
PF: predicated region fallthrough
CT: control target
= control target key end

     0   :  { %s1023_s0 = inlined_call_operand.vmem [shape: bf16[512,128], index: 0, kind: input, shape index: {}]   ;;  %s1024_s1 = inlined_call_operand.vmem [shape: f32[1,128], index: 1, kind: input, shape index: {}]   ;;  %s1025_s2 = inlined_call_operand.vmem [shape: f32[1,128], index: 2, kind: input, shape index: {}]   ;;  %s1026_s3 = inlined_call_operand.vmem [shape: f32[512,128], index: 3, kind: output, shape index: {}]  }
   0x1   :  { %v419_v0 = vld [vmem:[%s1023_s0] sm:$0xff]   ;;  %v546_v4 = vld [vmem:[%s1023_s0 + $0x8] sm:$0xff]   ;;  %v547_v5 = vld [vmem:[%s1023_s0 + $0x10] sm:$0xff]  }
   0x2   :  { %v603_v1 = vld [vmem:[%s1024_s1] ss:$0 sm:$0xff]  ;;  %v420_v2 = vunpack.c.l.bf16 %v419_v0  ;;  %v421_v3 = vunpack.c.h.bf16 %v419_v0  ;;  %v548_v6 = vld [vmem:[%s1023_s0 + $0x18] sm:$0xff]   ;;  %v424_v8 = vunpack.c.l.bf16 %v546_v4  ;;  %v425_v9 = vunpack.c.h.bf16 %v546_v4  ;;  %v550_v33 = vld [vmem:[%s1023_s0 + $0x28] sm:$0xff]  }
   0x3   :  { %v617_v7 = vld [vmem:[%s1025_s2] ss:$0 sm:$0xff]  ;;  %v428_v10 = vunpack.c.l.bf16 %v547_v5  ;;  %v429_v11 = vunpack.c.h.bf16 %v547_v5  ;;  %v432_v14 = vunpack.c.l.bf16 %v548_v6  ;;  %v433_v15 = vunpack.c.h.bf16 %v548_v6  ;;  %v551_v34 = vld [vmem:[%s1023_s0 + $0x30] sm:$0xff]   ;;  %v552_v39 = vld [vmem:[%s1023_s0 + $0x38] sm:$0xff]  }
   0x4   :  { %v149_v12 = vmul.f32 %v420_v2, %v603_v1  ;;  %v150_v13 = vmul.f32 %v421_v3, %v603_v1  ;;  %v151_v16 = vmul.f32 %v424_v8, %v603_v1  ;;  %v152_v17 = vmul.f32 %v425_v9, %v603_v1  ;;  %v549_v28 = vld [vmem:[%s1023_s0 + $0x20] sm:$0xff]   ;;  %v554_v6 = vld [vmem:[%s1023_s0 + $0x48] sm:$0xff]   ;;  %v555_v8 = vld [vmem:[%s1023_s0 + $0x50] sm:$0xff]  }
   0x5   :  { %v153_v18 = vmul.f32 %v428_v10, %v603_v1  ;;  %v154_v19 = vmul.f32 %v429_v11, %v603_v1  ;;  %v155_v22 = vmul.f32 %v432_v14, %v603_v1  ;;  %v156_v23 = vmul.f32 %v433_v15, %v603_v1  ;;  %v553_v0 = vld [vmem:[%s1023_s0 + $0x40] sm:$0xff]  }
   0x6   :  { %v220_v20 = vadd.f32 %v617_v7, %v149_v12  ;;  %v221_v21 = vadd.f32 %v617_v7, %v150_v13  ;;  %v222_v24 = vadd.f32 %v617_v7, %v151_v16  ;;  %v223_v25 = vadd.f32 %v617_v7, %v152_v17  ;;  %v556_v13 = vld [vmem:[%s1023_s0 + $0x58] sm:$0xff]  }
   0x7   :  { %v224_v26 = vadd.f32 %v617_v7, %v153_v18  ;;  %v225_v27 = vadd.f32 %v617_v7, %v154_v19  ;;  %v226_v31 = vadd.f32 %v617_v7, %v155_v22  ;;  %v227_v32 = vadd.f32 %v617_v7, %v156_v23 }
   0x8   :  { %v284_v29 = vmax.f32 %v220_v20, 0.0  ;;  %v285_v30 = vmax.f32 %v221_v21, 0.0  ;;  %v286_v35 = vmax.f32 %v222_v24, 0.0  ;;  %v287_v36 = vmax.f32 %v223_v25, 0.0 }
   0x9   :  { %v288_v37 = vmax.f32 %v224_v26, 0.0  ;;  %v289_v38 = vmax.f32 %v225_v27, 0.0  ;;  %v290_v40 = vmax.f32 %v226_v31, 0.0  ;;  %v291_v41 = vmax.f32 %v227_v32, 0.0 }
   0xa   :  { %348 = vst [vmem:[%s1026_s3] sm:$0xff] %v284_v29  ;;  %349 = vst [vmem:[%s1026_s3 + $0x8] sm:$0xff] %v285_v30  ;;  %v436_v42 = vunpack.c.l.bf16 %v549_v28  ;;  %v437_v43 = vunpack.c.h.bf16 %v549_v28  ;;  %v440_v44 = vunpack.c.l.bf16 %v550_v33  ;;  %v441_v45 = vunpack.c.h.bf16 %v550_v33 }
   0xb   :  { %350 = vst [vmem:[%s1026_s3 + $0x10] sm:$0xff] %v286_v35  ;;  %351 = vst [vmem:[%s1026_s3 + $0x18] sm:$0xff] %v287_v36  ;;  %v444_v46 = vunpack.c.l.bf16 %v551_v34  ;;  %v445_v47 = vunpack.c.h.bf16 %v551_v34  ;;  %v448_v50 = vunpack.c.l.bf16 %v552_v39  ;;  %v449_v51 = vunpack.c.h.bf16 %v552_v39 }
   0xc   :  { %352 = vst [vmem:[%s1026_s3 + $0x20] sm:$0xff] %v288_v37  ;;  %353 = vst [vmem:[%s1026_s3 + $0x28] sm:$0xff] %v289_v38  ;;  %v157_v48 = vmul.f32 %v436_v42, %v603_v1  ;;  %v158_v49 = vmul.f32 %v437_v43, %v603_v1  ;;  %v159_v52 = vmul.f32 %v440_v44, %v603_v1  ;;  %v452_v16 = vunpack.c.l.bf16 %v553_v0  ;;  %v557_v38 = vld [vmem:[%s1023_s0 + $0x60] sm:$0xff]   ;;  %v558_v43 = vld [vmem:[%s1023_s0 + $0x68] sm:$0xff]  }
   0xd   :  { %354 = vst [vmem:[%s1026_s3 + $0x30] sm:$0xff] %v290_v40  ;;  %355 = vst [vmem:[%s1026_s3 + $0x38] sm:$0xff] %v291_v41  ;;  %v160_v53 = vmul.f32 %v441_v45, %v603_v1  ;;  %v161_v54 = vmul.f32 %v444_v46, %v603_v1  ;;  %v162_v55 = vmul.f32 %v445_v47, %v603_v1  ;;  %v453_v17 = vunpack.c.h.bf16 %v553_v0  ;;  %v559_v44 = vld [vmem:[%s1023_s0 + $0x70] sm:$0xff]  }
   0xe   :  { %v228_v56 = vadd.f32 %v617_v7, %v157_v48  ;;  %v229_v57 = vadd.f32 %v617_v7, %v158_v49  ;;  %v163_v58 = vmul.f32 %v448_v50, %v603_v1  ;;  %v164_v59 = vmul.f32 %v449_v51, %v603_v1  ;;  %v560_v49 = vld [vmem:[%s1023_s0 + $0x78] sm:$0xff]  }
   0xf   :  { %v230_v60 = vadd.f32 %v617_v7, %v159_v52  ;;  %v231_v61 = vadd.f32 %v617_v7, %v160_v53  ;;  %v232_v62 = vadd.f32 %v617_v7, %v161_v54  ;;  %v233_v63 = vadd.f32 %v617_v7, %v162_v55 }
  0x10   :  { %v292_v2 = vmax.f32 %v228_v56, 0.0  ;;  %v293_v3 = vmax.f32 %v229_v57, 0.0  ;;  %v234_v4 = vadd.f32 %v617_v7, %v163_v58  ;;  %v235_v5 = vadd.f32 %v617_v7, %v164_v59 }
  0x11   :  { %v294_v9 = vmax.f32 %v230_v60, 0.0  ;;  %v295_v10 = vmax.f32 %v231_v61, 0.0  ;;  %v296_v11 = vmax.f32 %v232_v62, 0.0  ;;  %v297_v12 = vmax.f32 %v233_v63, 0.0 }
  0x12   :  { %356 = vst [vmem:[%s1026_s3 + $0x40] sm:$0xff] %v292_v2  ;;  %357 = vst [vmem:[%s1026_s3 + $0x48] sm:$0xff] %v293_v3  ;;  %v298_v14 = vmax.f32 %v234_v4, 0.0  ;;  %v299_v15 = vmax.f32 %v235_v5, 0.0  ;;  %v456_v18 = vunpack.c.l.bf16 %v554_v6  ;;  %v457_v19 = vunpack.c.h.bf16 %v554_v6 }
  0x13   :  { %358 = vst [vmem:[%s1026_s3 + $0x50] sm:$0xff] %v294_v9  ;;  %359 = vst [vmem:[%s1026_s3 + $0x58] sm:$0xff] %v295_v10  ;;  %v460_v20 = vunpack.c.l.bf16 %v555_v8  ;;  %v461_v21 = vunpack.c.h.bf16 %v555_v8  ;;  %v165_v22 = vmul.f32 %v452_v16, %v603_v1  ;;  %v166_v23 = vmul.f32 %v453_v17, %v603_v1  ;;  %v562_v17 = vld [vmem:[%s1023_s0 + $0x88] sm:$0xff]  }
  0x14   :  { %360 = vst [vmem:[%s1026_s3 + $0x60] sm:$0xff] %v296_v11  ;;  %361 = vst [vmem:[%s1026_s3 + $0x68] sm:$0xff] %v297_v12  ;;  %v464_v24 = vunpack.c.l.bf16 %v556_v13  ;;  %v465_v25 = vunpack.c.h.bf16 %v556_v13  ;;  %v167_v26 = vmul.f32 %v456_v18, %v603_v1  ;;  %v168_v27 = vmul.f32 %v457_v19, %v603_v1  ;;  %v561_v12 = vld [vmem:[%s1023_s0 + $0x80] sm:$0xff]   ;;  %v563_v18 = vld [vmem:[%s1023_s0 + $0x90] sm:$0xff]  }
  0x15   :  { %362 = vst [vmem:[%s1026_s3 + $0x70] sm:$0xff] %v298_v14  ;;  %363 = vst [vmem:[%s1026_s3 + $0x78] sm:$0xff] %v299_v15  ;;  %v169_v28 = vmul.f32 %v460_v20, %v603_v1  ;;  %v170_v29 = vmul.f32 %v461_v21, %v603_v1  ;;  %v236_v30 = vadd.f32 %v617_v7, %v165_v22  ;;  %v468_v52 = vunpack.c.l.bf16 %v557_v38 }
  0x16   :  { %v237_v31 = vadd.f32 %v617_v7, %v166_v23  ;;  %v171_v32 = vmul.f32 %v464_v24, %v603_v1  ;;  %v172_v33 = vmul.f32 %v465_v25, %v603_v1  ;;  %v238_v34 = vadd.f32 %v617_v7, %v167_v26  ;;  %v564_v23 = vld [vmem:[%s1023_s0 + $0x98] sm:$0xff]  }
  0x17   :  { %v239_v35 = vadd.f32 %v617_v7, %v168_v27  ;;  %v240_v36 = vadd.f32 %v617_v7, %v169_v28  ;;  %v241_v37 = vadd.f32 %v617_v7, %v170_v29  ;;  %v300_v39 = vmax.f32 %v236_v30, 0.0 }
  0x18   :  { %v301_v40 = vmax.f32 %v237_v31, 0.0  ;;  %v242_v41 = vadd.f32 %v617_v7, %v171_v32  ;;  %v243_v42 = vadd.f32 %v617_v7, %v172_v33  ;;  %v302_v45 = vmax.f32 %v238_v34, 0.0 }
  0x19   :  { %v303_v46 = vmax.f32 %v239_v35, 0.0  ;;  %v304_v47 = vmax.f32 %v240_v36, 0.0  ;;  %v305_v48 = vmax.f32 %v241_v37, 0.0  ;;  %364 = vst [vmem:[%s1026_s3 + $0x80] sm:$0xff] %v300_v39  ;;  %v469_v53 = vunpack.c.h.bf16 %v557_v38 }
  0x1a   :  { %365 = vst [vmem:[%s1026_s3 + $0x88] sm:$0xff] %v301_v40  ;;  %v306_v50 = vmax.f32 %v242_v41, 0.0  ;;  %v307_v51 = vmax.f32 %v243_v42, 0.0  ;;  %366 = vst [vmem:[%s1026_s3 + $0x90] sm:$0xff] %v302_v45  ;;  %v472_v54 = vunpack.c.l.bf16 %v558_v43  ;;  %v473_v55 = vunpack.c.h.bf16 %v558_v43 }
  0x1b   :  { %367 = vst [vmem:[%s1026_s3 + $0x98] sm:$0xff] %v303_v46  ;;  %368 = vst [vmem:[%s1026_s3 + $0xa0] sm:$0xff] %v304_v47  ;;  %v476_v56 = vunpack.c.l.bf16 %v559_v44  ;;  %v477_v57 = vunpack.c.h.bf16 %v559_v44  ;;  %v173_v58 = vmul.f32 %v468_v52, %v603_v1  ;;  %v174_v59 = vmul.f32 %v469_v53, %v603_v1  ;;  %v566_v53 = vld [vmem:[%s1023_s0 + $0xa8] sm:$0xff]  }
  0x1c   :  { %369 = vst [vmem:[%s1026_s3 + $0xa8] sm:$0xff] %v305_v48  ;;  %370 = vst [vmem:[%s1026_s3 + $0xb0] sm:$0xff] %v306_v50  ;;  %v480_v60 = vunpack.c.l.bf16 %v560_v49  ;;  %v481_v61 = vunpack.c.h.bf16 %v560_v49  ;;  %v175_v62 = vmul.f32 %v472_v54, %v603_v1  ;;  %v176_v63 = vmul.f32 %v473_v55, %v603_v1  ;;  %v565_v48 = vld [vmem:[%s1023_s0 + $0xa0] sm:$0xff]   ;;  %v567_v54 = vld [vmem:[%s1023_s0 + $0xb0] sm:$0xff]  }
  0x1d   :  { %371 = vst [vmem:[%s1026_s3 + $0xb8] sm:$0xff] %v307_v51  ;;  %v177_v0 = vmul.f32 %v476_v56, %v603_v1  ;;  %v178_v2 = vmul.f32 %v477_v57, %v603_v1  ;;  %v244_v3 = vadd.f32 %v617_v7, %v173_v58  ;;  %v245_v4 = vadd.f32 %v617_v7, %v174_v59  ;;  %v568_v59 = vld [vmem:[%s1023_s0 + $0xb8] sm:$0xff]  }
  0x1e   :  { %v179_v5 = vmul.f32 %v480_v60, %v603_v1  ;;  %v180_v6 = vmul.f32 %v481_v61, %v603_v1  ;;  %v246_v8 = vadd.f32 %v617_v7, %v175_v62  ;;  %v247_v9 = vadd.f32 %v617_v7, %v176_v63 }
  0x1f   :  { %v248_v10 = vadd.f32 %v617_v7, %v177_v0  ;;  %v249_v11 = vadd.f32 %v617_v7, %v178_v2  ;;  %v308_v13 = vmax.f32 %v244_v3, 0.0  ;;  %v309_v14 = vmax.f32 %v245_v4, 0.0 }
  0x20   :  { %v250_v15 = vadd.f32 %v617_v7, %v179_v5  ;;  %v251_v16 = vadd.f32 %v617_v7, %v180_v6  ;;  %v310_v19 = vmax.f32 %v246_v8, 0.0  ;;  %v311_v20 = vmax.f32 %v247_v9, 0.0 }
  0x21   :  { %v312_v21 = vmax.f32 %v248_v10, 0.0  ;;  %v313_v22 = vmax.f32 %v249_v11, 0.0  ;;  %372 = vst [vmem:[%s1026_s3 + $0xc0] sm:$0xff] %v308_v13  ;;  %373 = vst [vmem:[%s1026_s3 + $0xc8] sm:$0xff] %v309_v14  ;;  %v484_v26 = vunpack.c.l.bf16 %v561_v12  ;;  %v485_v27 = vunpack.c.h.bf16 %v561_v12 }
  0x22   :  { %v314_v24 = vmax.f32 %v250_v15, 0.0  ;;  %v315_v25 = vmax.f32 %v251_v16, 0.0  ;;  %374 = vst [vmem:[%s1026_s3 + $0xd0] sm:$0xff] %v310_v19  ;;  %375 = vst [vmem:[%s1026_s3 + $0xd8] sm:$0xff] %v311_v20  ;;  %v488_v28 = vunpack.c.l.bf16 %v562_v17  ;;  %v489_v29 = vunpack.c.h.bf16 %v562_v17 }
  0x23   :  { %376 = vst [vmem:[%s1026_s3 + $0xe0] sm:$0xff] %v312_v21  ;;  %377 = vst [vmem:[%s1026_s3 + $0xe8] sm:$0xff] %v313_v22  ;;  %v492_v30 = vunpack.c.l.bf16 %v563_v18  ;;  %v493_v31 = vunpack.c.h.bf16 %v563_v18  ;;  %v181_v32 = vmul.f32 %v484_v26, %v603_v1  ;;  %v182_v33 = vmul.f32 %v485_v27, %v603_v1  ;;  %v569_v22 = vld [vmem:[%s1023_s0 + $0xc0] sm:$0xff]   ;;  %v570_v27 = vld [vmem:[%s1023_s0 + $0xc8] sm:$0xff]  }
  0x24   :  { %378 = vst [vmem:[%s1026_s3 + $0xf0] sm:$0xff] %v314_v24  ;;  %379 = vst [vmem:[%s1026_s3 + $0xf8] sm:$0xff] %v315_v25  ;;  %v496_v34 = vunpack.c.l.bf16 %v564_v23  ;;  %v497_v35 = vunpack.c.h.bf16 %v564_v23  ;;  %v183_v36 = vmul.f32 %v488_v28, %v603_v1  ;;  %v184_v37 = vmul.f32 %v489_v29, %v603_v1  ;;  %v571_v28 = vld [vmem:[%s1023_s0 + $0xd0] sm:$0xff]  }
  0x25   :  { %v185_v38 = vmul.f32 %v492_v30, %v603_v1  ;;  %v186_v39 = vmul.f32 %v493_v31, %v603_v1  ;;  %v252_v40 = vadd.f32 %v617_v7, %v181_v32  ;;  %v253_v41 = vadd.f32 %v617_v7, %v182_v33  ;;  %v572_v33 = vld [vmem:[%s1023_s0 + $0xd8] sm:$0xff]  }
  0x26   :  { %v187_v42 = vmul.f32 %v496_v34, %v603_v1  ;;  %v188_v43 = vmul.f32 %v497_v35, %v603_v1  ;;  %v254_v44 = vadd.f32 %v617_v7, %v183_v36  ;;  %v255_v45 = vadd.f32 %v617_v7, %v184_v37 }
  0x27   :  { %v256_v46 = vadd.f32 %v617_v7, %v185_v38  ;;  %v257_v47 = vadd.f32 %v617_v7, %v186_v39  ;;  %v316_v49 = vmax.f32 %v252_v40, 0.0  ;;  %v317_v50 = vmax.f32 %v253_v41, 0.0 }
  0x28   :  { %v258_v51 = vadd.f32 %v617_v7, %v187_v42  ;;  %v259_v52 = vadd.f32 %v617_v7, %v188_v43  ;;  %v318_v55 = vmax.f32 %v254_v44, 0.0  ;;  %v319_v56 = vmax.f32 %v255_v45, 0.0 }
  0x29   :  { %v320_v57 = vmax.f32 %v256_v46, 0.0  ;;  %v321_v58 = vmax.f32 %v257_v47, 0.0  ;;  %380 = vst [vmem:[%s1026_s3 + $0x100] sm:$0xff] %v316_v49  ;;  %381 = vst [vmem:[%s1026_s3 + $0x108] sm:$0xff] %v317_v50  ;;  %v500_v62 = vunpack.c.l.bf16 %v565_v48  ;;  %v501_v63 = vunpack.c.h.bf16 %v565_v48 }
  0x2a   :  { %v322_v60 = vmax.f32 %v258_v51, 0.0  ;;  %v323_v61 = vmax.f32 %v259_v52, 0.0  ;;  %382 = vst [vmem:[%s1026_s3 + $0x110] sm:$0xff] %v318_v55  ;;  %383 = vst [vmem:[%s1026_s3 + $0x118] sm:$0xff] %v319_v56  ;;  %v504_v0 = vunpack.c.l.bf16 %v566_v53  ;;  %v505_v2 = vunpack.c.h.bf16 %v566_v53 }
  0x2b   :  { %384 = vst [vmem:[%s1026_s3 + $0x120] sm:$0xff] %v320_v57  ;;  %385 = vst [vmem:[%s1026_s3 + $0x128] sm:$0xff] %v321_v58  ;;  %v508_v3 = vunpack.c.l.bf16 %v567_v54  ;;  %v509_v4 = vunpack.c.h.bf16 %v567_v54  ;;  %v189_v5 = vmul.f32 %v500_v62, %v603_v1  ;;  %v190_v6 = vmul.f32 %v501_v63, %v603_v1  ;;  %v573_v58 = vld [vmem:[%s1023_s0 + $0xe0] sm:$0xff]   ;;  %v574_v63 = vld [vmem:[%s1023_s0 + $0xe8] sm:$0xff]  }
  0x2c   :  { %386 = vst [vmem:[%s1026_s3 + $0x130] sm:$0xff] %v322_v60  ;;  %387 = vst [vmem:[%s1026_s3 + $0x138] sm:$0xff] %v323_v61  ;;  %v512_v8 = vunpack.c.l.bf16 %v568_v59  ;;  %v513_v9 = vunpack.c.h.bf16 %v568_v59  ;;  %v191_v10 = vmul.f32 %v504_v0, %v603_v1  ;;  %v192_v11 = vmul.f32 %v505_v2, %v603_v1  ;;  %v575_v0 = vld [vmem:[%s1023_s0 + $0xf0] sm:$0xff]  }
  0x2d   :  { %v193_v12 = vmul.f32 %v508_v3, %v603_v1  ;;  %v194_v13 = vmul.f32 %v509_v4, %v603_v1  ;;  %v260_v14 = vadd.f32 %v617_v7, %v189_v5  ;;  %v261_v15 = vadd.f32 %v617_v7, %v190_v6  ;;  %v576_v6 = vld [vmem:[%s1023_s0 + $0xf8] sm:$0xff]  }
  0x2e   :  { %v195_v16 = vmul.f32 %v512_v8, %v603_v1  ;;  %v196_v17 = vmul.f32 %v513_v9, %v603_v1  ;;  %v262_v18 = vadd.f32 %v617_v7, %v191_v10  ;;  %v263_v19 = vadd.f32 %v617_v7, %v192_v11 }
  0x2f   :  { %v264_v20 = vadd.f32 %v617_v7, %v193_v12  ;;  %v265_v21 = vadd.f32 %v617_v7, %v194_v13  ;;  %v324_v23 = vmax.f32 %v260_v14, 0.0  ;;  %v325_v24 = vmax.f32 %v261_v15, 0.0 }
  0x30   :  { %v266_v25 = vadd.f32 %v617_v7, %v195_v16  ;;  %v267_v26 = vadd.f32 %v617_v7, %v196_v17  ;;  %v326_v29 = vmax.f32 %v262_v18, 0.0  ;;  %v327_v30 = vmax.f32 %v263_v19, 0.0 }
  0x31   :  { %v328_v31 = vmax.f32 %v264_v20, 0.0  ;;  %v329_v32 = vmax.f32 %v265_v21, 0.0  ;;  %388 = vst [vmem:[%s1026_s3 + $0x140] sm:$0xff] %v324_v23  ;;  %389 = vst [vmem:[%s1026_s3 + $0x148] sm:$0xff] %v325_v24  ;;  %v516_v36 = vunpack.c.l.bf16 %v569_v22  ;;  %v517_v37 = vunpack.c.h.bf16 %v569_v22 }
  0x32   :  { %v330_v34 = vmax.f32 %v266_v25, 0.0  ;;  %v331_v35 = vmax.f32 %v267_v26, 0.0  ;;  %390 = vst [vmem:[%s1026_s3 + $0x150] sm:$0xff] %v326_v29  ;;  %391 = vst [vmem:[%s1026_s3 + $0x158] sm:$0xff] %v327_v30  ;;  %v520_v38 = vunpack.c.l.bf16 %v570_v27  ;;  %v521_v39 = vunpack.c.h.bf16 %v570_v27 }
  0x33   :  { %392 = vst [vmem:[%s1026_s3 + $0x160] sm:$0xff] %v328_v31  ;;  %393 = vst [vmem:[%s1026_s3 + $0x168] sm:$0xff] %v329_v32  ;;  %v524_v40 = vunpack.c.l.bf16 %v571_v28  ;;  %v525_v41 = vunpack.c.h.bf16 %v571_v28  ;;  %v197_v42 = vmul.f32 %v516_v36, %v603_v1  ;;  %v198_v43 = vmul.f32 %v517_v37, %v603_v1 }
  0x34   :  { %394 = vst [vmem:[%s1026_s3 + $0x170] sm:$0xff] %v330_v34  ;;  %395 = vst [vmem:[%s1026_s3 + $0x178] sm:$0xff] %v331_v35  ;;  %v528_v44 = vunpack.c.l.bf16 %v572_v33  ;;  %v529_v45 = vunpack.c.h.bf16 %v572_v33  ;;  %v199_v46 = vmul.f32 %v520_v38, %v603_v1  ;;  %v200_v47 = vmul.f32 %v521_v39, %v603_v1 }
  0x35   :  { %v201_v48 = vmul.f32 %v524_v40, %v603_v1  ;;  %v202_v49 = vmul.f32 %v525_v41, %v603_v1  ;;  %v268_v50 = vadd.f32 %v617_v7, %v197_v42  ;;  %v269_v51 = vadd.f32 %v617_v7, %v198_v43 }
  0x36   :  { %v203_v52 = vmul.f32 %v528_v44, %v603_v1  ;;  %v204_v53 = vmul.f32 %v529_v45, %v603_v1  ;;  %v270_v54 = vadd.f32 %v617_v7, %v199_v46  ;;  %v271_v55 = vadd.f32 %v617_v7, %v200_v47 }
  0x37   :  { %v272_v56 = vadd.f32 %v617_v7, %v201_v48  ;;  %v273_v57 = vadd.f32 %v617_v7, %v202_v49  ;;  %v332_v59 = vmax.f32 %v268_v50, 0.0  ;;  %v333_v60 = vmax.f32 %v269_v51, 0.0 }
  0x38   :  { %v274_v61 = vadd.f32 %v617_v7, %v203_v52  ;;  %v275_v62 = vadd.f32 %v617_v7, %v204_v53  ;;  %v334_v2 = vmax.f32 %v270_v54, 0.0  ;;  %v335_v3 = vmax.f32 %v271_v55, 0.0 }
  0x39   :  { %v336_v4 = vmax.f32 %v272_v56, 0.0  ;;  %v337_v5 = vmax.f32 %v273_v57, 0.0  ;;  %396 = vst [vmem:[%s1026_s3 + $0x180] sm:$0xff] %v332_v59  ;;  %397 = vst [vmem:[%s1026_s3 + $0x188] sm:$0xff] %v333_v60  ;;  %v532_v10 = vunpack.c.l.bf16 %v573_v58  ;;  %v533_v11 = vunpack.c.h.bf16 %v573_v58 }
  0x3a   :  { %v338_v8 = vmax.f32 %v274_v61, 0.0  ;;  %v339_v9 = vmax.f32 %v275_v62, 0.0  ;;  %398 = vst [vmem:[%s1026_s3 + $0x190] sm:$0xff] %v334_v2  ;;  %399 = vst [vmem:[%s1026_s3 + $0x198] sm:$0xff] %v335_v3  ;;  %v536_v12 = vunpack.c.l.bf16 %v574_v63  ;;  %v537_v13 = vunpack.c.h.bf16 %v574_v63 }
  0x3b   :  { %400 = vst [vmem:[%s1026_s3 + $0x1a0] sm:$0xff] %v336_v4  ;;  %401 = vst [vmem:[%s1026_s3 + $0x1a8] sm:$0xff] %v337_v5  ;;  %v540_v14 = vunpack.c.l.bf16 %v575_v0  ;;  %v541_v15 = vunpack.c.h.bf16 %v575_v0  ;;  %v205_v16 = vmul.f32 %v532_v10, %v603_v1  ;;  %v206_v17 = vmul.f32 %v533_v11, %v603_v1 }
  0x3c   :  { %402 = vst [vmem:[%s1026_s3 + $0x1b0] sm:$0xff] %v338_v8  ;;  %403 = vst [vmem:[%s1026_s3 + $0x1b8] sm:$0xff] %v339_v9  ;;  %v544_v18 = vunpack.c.l.bf16 %v576_v6  ;;  %v545_v19 = vunpack.c.h.bf16 %v576_v6  ;;  %v207_v20 = vmul.f32 %v536_v12, %v603_v1  ;;  %v208_v21 = vmul.f32 %v537_v13, %v603_v1 }
  0x3d   :  { %v209_v22 = vmul.f32 %v540_v14, %v603_v1  ;;  %v210_v23 = vmul.f32 %v541_v15, %v603_v1  ;;  %v276_v24 = vadd.f32 %v617_v7, %v205_v16  ;;  %v277_v25 = vadd.f32 %v617_v7, %v206_v17 }
  0x3e   :  { %v211_v26 = vmul.f32 %v544_v18, %v603_v1  ;;  %v212_v27 = vmul.f32 %v545_v19, %v603_v1  ;;  %v278_v28 = vadd.f32 %v617_v7, %v207_v20  ;;  %v279_v29 = vadd.f32 %v617_v7, %v208_v21 }
  0x3f   :  { %v280_v30 = vadd.f32 %v617_v7, %v209_v22  ;;  %v281_v31 = vadd.f32 %v617_v7, %v210_v23  ;;  %v340_v32 = vmax.f32 %v276_v24, 0.0  ;;  %v341_v33 = vmax.f32 %v277_v25, 0.0 }
  0x40   :  { %v282_v34 = vadd.f32 %v617_v7, %v211_v26  ;;  %v283_v35 = vadd.f32 %v617_v7, %v212_v27  ;;  %v342_v36 = vmax.f32 %v278_v28, 0.0  ;;  %v343_v37 = vmax.f32 %v279_v29, 0.0 }
  0x41   :  { %v344_v38 = vmax.f32 %v280_v30, 0.0  ;;  %v345_v39 = vmax.f32 %v281_v31, 0.0  ;;  %404 = vst [vmem:[%s1026_s3 + $0x1c0] sm:$0xff] %v340_v32  ;;  %405 = vst [vmem:[%s1026_s3 + $0x1c8] sm:$0xff] %v341_v33 }
  0x42   :  { %v346_v1 = vmax.f32 %v282_v34, 0.0  ;;  %v347_v40 = vmax.f32 %v283_v35, 0.0  ;;  %406 = vst [vmem:[%s1026_s3 + $0x1d0] sm:$0xff] %v342_v36  ;;  %407 = vst [vmem:[%s1026_s3 + $0x1d8] sm:$0xff] %v343_v37 }
  0x43   :  { %408 = vst [vmem:[%s1026_s3 + $0x1e0] sm:$0xff] %v344_v38  ;;  %409 = vst [vmem:[%s1026_s3 + $0x1e8] sm:$0xff] %v345_v39 }
  0x44   :  { %410 = vst [vmem:[%s1026_s3 + $0x1f0] sm:$0xff] %v346_v1  ;;  %411 = vst [vmem:[%s1026_s3 + $0x1f8] sm:$0xff] %v347_v40 }

// kernel: conv_block_forward.5
= control target key start
LH: loop header
LB: loop body
LE: loop exit
PB: predicated region body
PF: predicated region fallthrough
CT: control target
= control target key end

     0   :  { %s1502_s0 = inlined_call_operand.vmem [shape: bf16[512,128], index: 0, kind: input, shape index: {}]   ;;  %s1503_s1 = inlined_call_operand.vmem [shape: f32[1,128], index: 1, kind: input, shape index: {}]   ;;  %s1504_s2 = inlined_call_operand.vmem [shape: f32[1,128], index: 2, kind: input, shape index: {}]   ;;  %s1505_s3 = inlined_call_operand.vmem [shape: bf16[512,128], index: 3, kind: output, shape index: {}]  }
   0x1   :  { %v803_v0 = vld [vmem:[%s1502_s0] sm:$0xff]   ;;  %v1090_v4 = vld [vmem:[%s1502_s0 + $0x8] sm:$0xff]   ;;  %v1091_v5 = vld [vmem:[%s1502_s0 + $0x10] sm:$0xff]  }
   0x2   :  { %v1178_v1 = vld [vmem:[%s1503_s1] ss:$0 sm:$0xff]  ;;  %v804_v2 = vunpack.c.l.bf16 %v803_v0  ;;  %v805_v3 = vunpack.c.h.bf16 %v803_v0  ;;  %v1092_v6 = vld [vmem:[%s1502_s0 + $0x18] sm:$0xff]   ;;  %v808_v8 = vunpack.c.l.bf16 %v1090_v4  ;;  %v809_v9 = vunpack.c.h.bf16 %v1090_v4  ;;  %v1094_v33 = vld [vmem:[%s1502_s0 + $0x28] sm:$0xff]  }
   0x3   :  { %v1192_v7 = vld [vmem:[%s1504_s2] ss:$0 sm:$0xff]  ;;  %v812_v10 = vunpack.c.l.bf16 %v1091_v5  ;;  %v813_v11 = vunpack.c.h.bf16 %v1091_v5  ;;  %v816_v14 = vunpack.c.l.bf16 %v1092_v6  ;;  %v817_v15 = vunpack.c.h.bf16 %v1092_v6  ;;  %v1095_v38 = vld [vmem:[%s1502_s0 + $0x30] sm:$0xff]   ;;  %v1096_v43 = vld [vmem:[%s1502_s0 + $0x38] sm:$0xff]  }
   0x4   :  { %v149_v12 = vmul.f32 %v804_v2, %v1178_v1  ;;  %v150_v13 = vmul.f32 %v805_v3, %v1178_v1  ;;  %v151_v16 = vmul.f32 %v808_v8, %v1178_v1  ;;  %v152_v17 = vmul.f32 %v809_v9, %v1178_v1  ;;  %v1093_v28 = vld [vmem:[%s1502_s0 + $0x20] sm:$0xff]  }
   0x5   :  { %v153_v18 = vmul.f32 %v812_v10, %v1178_v1  ;;  %v154_v19 = vmul.f32 %v813_v11, %v1178_v1  ;;  %v155_v22 = vmul.f32 %v816_v14, %v1178_v1  ;;  %v156_v23 = vmul.f32 %v817_v15, %v1178_v1  ;;  %v1097_v0 = vld [vmem:[%s1502_s0 + $0x40] sm:$0xff]   ;;  %v1098_v11 = vld [vmem:[%s1502_s0 + $0x48] sm:$0xff]  }
   0x6   :  { %v220_v20 = vadd.f32 %v1192_v7, %v149_v12  ;;  %v221_v21 = vadd.f32 %v1192_v7, %v150_v13  ;;  %v222_v24 = vadd.f32 %v1192_v7, %v151_v16  ;;  %v223_v25 = vadd.f32 %v1192_v7, %v152_v17  ;;  %v1099_v16 = vld [vmem:[%s1502_s0 + $0x50] sm:$0xff]  }
   0x7   :  { %v224_v26 = vadd.f32 %v1192_v7, %v153_v18  ;;  %v225_v27 = vadd.f32 %v1192_v7, %v154_v19  ;;  %v226_v31 = vadd.f32 %v1192_v7, %v155_v22  ;;  %v227_v32 = vadd.f32 %v1192_v7, %v156_v23 }
   0x8   :  { %v284_v29 = vmax.f32 %v220_v20, 0.0  ;;  %v285_v30 = vmax.f32 %v221_v21, 0.0  ;;  %v286_v34 = vmax.f32 %v222_v24, 0.0  ;;  %v287_v35 = vmax.f32 %v223_v25, 0.0  ;;  %v1100_v25 = vld [vmem:[%s1502_s0 + $0x58] sm:$0xff]  }
   0x9   :  { %v288_v36 = vmax.f32 %v224_v26, 0.0  ;;  %v289_v37 = vmax.f32 %v225_v27, 0.0  ;;  %v290_v40 = vmax.f32 %v226_v31, 0.0  ;;  %v291_v41 = vmax.f32 %v227_v32, 0.0 }
   0xa   :  { %v933_v39 = vpack.c.bf16 %v285_v30, %v284_v29  ;;  %v820_v42 = vunpack.c.l.bf16 %v1093_v28  ;;  %v938_v44 = vpack.c.bf16 %v287_v35, %v286_v34  ;;  %v821_v46 = vunpack.c.h.bf16 %v1093_v28 }
   0xb   :  { %v943_v45 = vpack.c.bf16 %v289_v37, %v288_v36  ;;  %v824_v47 = vunpack.c.l.bf16 %v1094_v33  ;;  %v948_v48 = vpack.c.bf16 %v291_v41, %v290_v40  ;;  %v825_v50 = vunpack.c.h.bf16 %v1094_v33 }
   0xc   :  { %934 = vst [vmem:[%s1505_s3] sm:$0xff] %v933_v39   ;;  %v157_v49 = vmul.f32 %v820_v42, %v1178_v1  ;;  %v828_v51 = vunpack.c.l.bf16 %v1095_v38  ;;  %1121 = vst [vmem:[%s1505_s3 + $0x8] sm:$0xff] %v938_v44   ;;  %v158_v52 = vmul.f32 %v821_v46, %v1178_v1  ;;  %v829_v54 = vunpack.c.h.bf16 %v1095_v38  ;;  %v1101_v38 = vld [vmem:[%s1502_s0 + $0x60] sm:$0xff]  }
   0xd   :  { %1122 = vst [vmem:[%s1505_s3 + $0x10] sm:$0xff] %v943_v45   ;;  %v159_v53 = vmul.f32 %v824_v47, %v1178_v1  ;;  %v832_v55 = vunpack.c.l.bf16 %v1096_v43  ;;  %1123 = vst [vmem:[%s1505_s3 + $0x18] sm:$0xff] %v948_v48   ;;  %v160_v57 = vmul.f32 %v825_v50, %v1178_v1  ;;  %v833_v59 = vunpack.c.h.bf16 %v1096_v43 }
   0xe   :  { %v228_v56 = vadd.f32 %v1192_v7, %v157_v49  ;;  %v161_v58 = vmul.f32 %v828_v51, %v1178_v1  ;;  %v229_v60 = vadd.f32 %v1192_v7, %v158_v52  ;;  %v162_v62 = vmul.f32 %v829_v54, %v1178_v1  ;;  %v1102_v51 = vld [vmem:[%s1502_s0 + $0x68] sm:$0xff]  }
   0xf   :  { %v230_v61 = vadd.f32 %v1192_v7, %v159_v53  ;;  %v163_v63 = vmul.f32 %v832_v55, %v1178_v1  ;;  %v231_v3 = vadd.f32 %v1192_v7, %v160_v57  ;;  %v164_v5 = vmul.f32 %v833_v59, %v1178_v1 }
  0x10   :  { %v292_v2 = vmax.f32 %v228_v56, 0.0  ;;  %v232_v4 = vadd.f32 %v1192_v7, %v161_v58  ;;  %v293_v6 = vmax.f32 %v229_v60, 0.0  ;;  %v233_v9 = vadd.f32 %v1192_v7, %v162_v62  ;;  %v1103_v60 = vld [vmem:[%s1502_s0 + $0x70] sm:$0xff]  }
  0x11   :  { %v294_v8 = vmax.f32 %v230_v61, 0.0  ;;  %v234_v10 = vadd.f32 %v1192_v7, %v163_v63  ;;  %v295_v12 = vmax.f32 %v231_v3, 0.0  ;;  %v235_v14 = vadd.f32 %v1192_v7, %v164_v5 }
  0x12   :  { %v296_v13 = vmax.f32 %v232_v4, 0.0  ;;  %v836_v15 = vunpack.c.l.bf16 %v1097_v0  ;;  %v953_v17 = vpack.c.bf16 %v293_v6, %v292_v2  ;;  %v297_v18 = vmax.f32 %v233_v9, 0.0  ;;  %v1104_v2 = vld [vmem:[%s1502_s0 + $0x78] sm:$0xff]  }
  0x13   :  { %v298_v19 = vmax.f32 %v234_v10, 0.0  ;;  %v837_v20 = vunpack.c.h.bf16 %v1097_v0  ;;  %v958_v21 = vpack.c.bf16 %v295_v12, %v294_v8  ;;  %v299_v22 = vmax.f32 %v235_v14, 0.0  ;;  %v1105_v12 = vld [vmem:[%s1502_s0 + $0x80] sm:$0xff]  }
  0x14   :  { %v165_v23 = vmul.f32 %v836_v15, %v1178_v1  ;;  %v840_v24 = vunpack.c.l.bf16 %v1098_v11  ;;  %1124 = vst [vmem:[%s1505_s3 + $0x20] sm:$0xff] %v953_v17   ;;  %v963_v26 = vpack.c.bf16 %v297_v18, %v296_v13  ;;  %v841_v28 = vunpack.c.h.bf16 %v1098_v11 }
  0x15   :  { %v166_v27 = vmul.f32 %v837_v20, %v1178_v1  ;;  %v844_v29 = vunpack.c.l.bf16 %v1099_v16  ;;  %1125 = vst [vmem:[%s1505_s3 + $0x28] sm:$0xff] %v958_v21   ;;  %v968_v30 = vpack.c.bf16 %v299_v22, %v298_v19  ;;  %v845_v33 = vunpack.c.h.bf16 %v1099_v16 }
  0x16   :  { %v236_v31 = vadd.f32 %v1192_v7, %v165_v23  ;;  %v167_v32 = vmul.f32 %v840_v24, %v1178_v1  ;;  %1126 = vst [vmem:[%s1505_s3 + $0x30] sm:$0xff] %v963_v26   ;;  %v168_v35 = vmul.f32 %v841_v28, %v1178_v1  ;;  %v848_v37 = vunpack.c.l.bf16 %v1100_v25 }
  0x17   :  { %v237_v34 = vadd.f32 %v1192_v7, %v166_v27  ;;  %v169_v36 = vmul.f32 %v844_v29, %v1178_v1  ;;  %1127 = vst [vmem:[%s1505_s3 + $0x38] sm:$0xff] %v968_v30   ;;  %v170_v41 = vmul.f32 %v845_v33, %v1178_v1  ;;  %v849_v42 = vunpack.c.h.bf16 %v1100_v25  ;;  %v1106_v29 = vld [vmem:[%s1502_s0 + $0x88] sm:$0xff]  }
  0x18   :  { %v300_v39 = vmax.f32 %v236_v31, 0.0  ;;  %v238_v40 = vadd.f32 %v1192_v7, %v167_v32  ;;  %v239_v44 = vadd.f32 %v1192_v7, %v168_v35  ;;  %v171_v46 = vmul.f32 %v848_v37, %v1178_v1 }
  0x19   :  { %v301_v43 = vmax.f32 %v237_v34, 0.0  ;;  %v240_v45 = vadd.f32 %v1192_v7, %v169_v36  ;;  %v241_v48 = vadd.f32 %v1192_v7, %v170_v41  ;;  %v172_v49 = vmul.f32 %v849_v42, %v1178_v1  ;;  %v1107_v34 = vld [vmem:[%s1502_s0 + $0x90] sm:$0xff]  }
  0x1a   :  { %v302_v47 = vmax.f32 %v238_v40, 0.0  ;;  %v852_v50 = vunpack.c.l.bf16 %v1101_v38  ;;  %v303_v53 = vmax.f32 %v239_v44, 0.0  ;;  %v242_v55 = vadd.f32 %v1192_v7, %v171_v46 }
  0x1b   :  { %v973_v52 = vpack.c.bf16 %v301_v43, %v300_v39  ;;  %v304_v54 = vmax.f32 %v240_v45, 0.0  ;;  %v305_v56 = vmax.f32 %v241_v48, 0.0  ;;  %v243_v57 = vadd.f32 %v1192_v7, %v172_v49  ;;  %v1108_v43 = vld [vmem:[%s1502_s0 + $0x98] sm:$0xff]  }
  0x1c   :  { %v853_v58 = vunpack.c.h.bf16 %v1101_v38  ;;  %v173_v59 = vmul.f32 %v852_v50, %v1178_v1  ;;  %v978_v61 = vpack.c.bf16 %v303_v53, %v302_v47  ;;  %v306_v62 = vmax.f32 %v242_v55, 0.0 }
  0x1d   :  { %1128 = vst [vmem:[%s1505_s3 + $0x40] sm:$0xff] %v973_v52   ;;  %v856_v63 = vunpack.c.l.bf16 %v1102_v51  ;;  %v857_v0 = vunpack.c.h.bf16 %v1102_v51  ;;  %v983_v3 = vpack.c.bf16 %v305_v56, %v304_v54  ;;  %v307_v4 = vmax.f32 %v243_v57, 0.0  ;;  %v1109_v56 = vld [vmem:[%s1502_s0 + $0xa0] sm:$0xff]  }
  0x1e   :  { %v174_v5 = vmul.f32 %v853_v58, %v1178_v1  ;;  %v244_v6 = vadd.f32 %v1192_v7, %v173_v59  ;;  %1129 = vst [vmem:[%s1505_s3 + $0x48] sm:$0xff] %v978_v61   ;;  %v860_v10 = vunpack.c.l.bf16 %v1103_v60  ;;  %v861_v11 = vunpack.c.h.bf16 %v1103_v60 }
  0x1f   :  { %v175_v8 = vmul.f32 %v856_v63, %v1178_v1  ;;  %v176_v9 = vmul.f32 %v857_v0, %v1178_v1  ;;  %1130 = vst [vmem:[%s1505_s3 + $0x50] sm:$0xff] %v983_v3   ;;  %v988_v13 = vpack.c.bf16 %v307_v4, %v306_v62  ;;  %v864_v16 = vunpack.c.l.bf16 %v1104_v2 }
  0x20   :  { %v245_v14 = vadd.f32 %v1192_v7, %v174_v5  ;;  %v308_v15 = vmax.f32 %v244_v6, 0.0  ;;  %v177_v19 = vmul.f32 %v860_v10, %v1178_v1  ;;  %v178_v20 = vmul.f32 %v861_v11, %v1178_v1 }
  0x21   :  { %v246_v17 = vadd.f32 %v1192_v7, %v175_v8  ;;  %v247_v18 = vadd.f32 %v1192_v7, %v176_v9  ;;  %1131 = vst [vmem:[%s1505_s3 + $0x58] sm:$0xff] %v988_v13   ;;  %v865_v22 = vunpack.c.h.bf16 %v1104_v2  ;;  %v179_v23 = vmul.f32 %v864_v16, %v1178_v1  ;;  %v1110_v2 = vld [vmem:[%s1502_s0 + $0xa8] sm:$0xff]   ;;  %v1111_v16 = vld [vmem:[%s1502_s0 + $0xb0] sm:$0xff]  }
  0x22   :  { %v309_v21 = vmax.f32 %v245_v14, 0.0  ;;  %v868_v24 = vunpack.c.l.bf16 %v1105_v12  ;;  %v248_v27 = vadd.f32 %v1192_v7, %v177_v19  ;;  %v249_v28 = vadd.f32 %v1192_v7, %v178_v20 }
  0x23   :  { %v310_v25 = vmax.f32 %v246_v17, 0.0  ;;  %v311_v26 = vmax.f32 %v247_v18, 0.0  ;;  %v180_v31 = vmul.f32 %v865_v22, %v1178_v1  ;;  %v250_v32 = vadd.f32 %v1192_v7, %v179_v23 }
  0x24   :  { %v993_v30 = vpack.c.bf16 %v309_v21, %v308_v15  ;;  %v869_v33 = vunpack.c.h.bf16 %v1105_v12  ;;  %v312_v36 = vmax.f32 %v248_v27, 0.0  ;;  %v313_v37 = vmax.f32 %v249_v28, 0.0  ;;  %v1112_v21 = vld [vmem:[%s1502_s0 + $0xb8] sm:$0xff]  }
  0x25   :  { %v998_v35 = vpack.c.bf16 %v311_v26, %v310_v25  ;;  %v181_v38 = vmul.f32 %v868_v24, %v1178_v1  ;;  %v251_v39 = vadd.f32 %v1192_v7, %v180_v31  ;;  %v314_v40 = vmax.f32 %v250_v32, 0.0 }
  0x26   :  { %1132 = vst [vmem:[%s1505_s3 + $0x60] sm:$0xff] %v993_v30   ;;  %v182_v41 = vmul.f32 %v869_v33, %v1178_v1  ;;  %v872_v42 = vunpack.c.l.bf16 %v1106_v29  ;;  %v1003_v44 = vpack.c.bf16 %v313_v37, %v312_v36  ;;  %v873_v46 = vunpack.c.h.bf16 %v1106_v29 }
  0x27   :  { %1133 = vst [vmem:[%s1505_s3 + $0x68] sm:$0xff] %v998_v35   ;;  %v252_v45 = vadd.f32 %v1192_v7, %v181_v38  ;;  %v876_v47 = vunpack.c.l.bf16 %v1107_v34  ;;  %v315_v48 = vmax.f32 %v251_v39, 0.0  ;;  %v877_v51 = vunpack.c.h.bf16 %v1107_v34  ;;  %v1113_v34 = vld [vmem:[%s1502_s0 + $0xc0] sm:$0xff]  }
  0x28   :  { %v253_v49 = vadd.f32 %v1192_v7, %v182_v41  ;;  %v183_v50 = vmul.f32 %v872_v42, %v1178_v1  ;;  %1134 = vst [vmem:[%s1505_s3 + $0x70] sm:$0xff] %v1003_v44   ;;  %v184_v53 = vmul.f32 %v873_v46, %v1178_v1  ;;  %v880_v55 = vunpack.c.l.bf16 %v1108_v43 }
  0x29   :  { %v316_v52 = vmax.f32 %v252_v45, 0.0  ;;  %v185_v54 = vmul.f32 %v876_v47, %v1178_v1  ;;  %v1008_v57 = vpack.c.bf16 %v315_v48, %v314_v40  ;;  %v186_v60 = vmul.f32 %v877_v51, %v1178_v1  ;;  %v1114_v47 = vld [vmem:[%s1502_s0 + $0xc8] sm:$0xff]  }
  0x2a   :  { %v317_v58 = vmax.f32 %v253_v49, 0.0  ;;  %v254_v59 = vadd.f32 %v1192_v7, %v183_v50  ;;  %v255_v61 = vadd.f32 %v1192_v7, %v184_v53  ;;  %v881_v63 = vunpack.c.h.bf16 %v1108_v43 }
  0x2b   :  { %v256_v62 = vadd.f32 %v1192_v7, %v185_v54  ;;  %v187_v0 = vmul.f32 %v880_v55, %v1178_v1  ;;  %1135 = vst [vmem:[%s1505_s3 + $0x78] sm:$0xff] %v1008_v57   ;;  %v257_v5 = vadd.f32 %v1192_v7, %v186_v60  ;;  %v884_v6 = vunpack.c.l.bf16 %v1109_v56 }
  0x2c   :  { %v1013_v3 = vpack.c.bf16 %v317_v58, %v316_v52  ;;  %v318_v4 = vmax.f32 %v254_v59, 0.0  ;;  %v319_v8 = vmax.f32 %v255_v61, 0.0  ;;  %v188_v10 = vmul.f32 %v881_v63, %v1178_v1  ;;  %v1115_v52 = vld [vmem:[%s1502_s0 + $0xd0] sm:$0xff]   ;;  %v1116_v61 = vld [vmem:[%s1502_s0 + $0xd8] sm:$0xff]  }
  0x2d   :  { %v320_v9 = vmax.f32 %v256_v62, 0.0  ;;  %v258_v11 = vadd.f32 %v1192_v7, %v187_v0  ;;  %v321_v12 = vmax.f32 %v257_v5, 0.0  ;;  %v885_v13 = vunpack.c.h.bf16 %v1109_v56 }
  0x2e   :  { %1136 = vst [vmem:[%s1505_s3 + $0x80] sm:$0xff] %v1013_v3   ;;  %v189_v14 = vmul.f32 %v884_v6, %v1178_v1  ;;  %v888_v15 = vunpack.c.l.bf16 %v1110_v2  ;;  %v1018_v17 = vpack.c.bf16 %v319_v8, %v318_v4  ;;  %v259_v18 = vadd.f32 %v1192_v7, %v188_v10 }
  0x2f   :  { %v322_v19 = vmax.f32 %v258_v11, 0.0  ;;  %v889_v20 = vunpack.c.h.bf16 %v1110_v2  ;;  %v1023_v22 = vpack.c.bf16 %v321_v12, %v320_v9  ;;  %v190_v23 = vmul.f32 %v885_v13, %v1178_v1  ;;  %v1117_v12 = vld [vmem:[%s1502_s0 + $0xe0] sm:$0xff]  }
  0x30   :  { %v260_v24 = vadd.f32 %v1192_v7, %v189_v14  ;;  %v191_v25 = vmul.f32 %v888_v15, %v1178_v1  ;;  %1137 = vst [vmem:[%s1505_s3 + $0x88] sm:$0xff] %v1018_v17   ;;  %v323_v26 = vmax.f32 %v259_v18, 0.0  ;;  %v892_v28 = vunpack.c.l.bf16 %v1111_v16 }
  0x31   :  { %v192_v27 = vmul.f32 %v889_v20, %v1178_v1  ;;  %v893_v29 = vunpack.c.h.bf16 %v1111_v16  ;;  %1138 = vst [vmem:[%s1505_s3 + $0x90] sm:$0xff] %v1023_v22   ;;  %v261_v30 = vadd.f32 %v1192_v7, %v190_v23  ;;  %v896_v33 = vunpack.c.l.bf16 %v1112_v21 }
  0x32   :  { %v324_v31 = vmax.f32 %v260_v24, 0.0  ;;  %v262_v32 = vadd.f32 %v1192_v7, %v191_v25  ;;  %v1028_v35 = vpack.c.bf16 %v323_v26, %v322_v19  ;;  %v193_v37 = vmul.f32 %v892_v28, %v1178_v1 }
  0x33   :  { %v263_v36 = vadd.f32 %v1192_v7, %v192_v27  ;;  %v194_v38 = vmul.f32 %v893_v29, %v1178_v1  ;;  %v325_v39 = vmax.f32 %v261_v30, 0.0  ;;  %v897_v41 = vunpack.c.h.bf16 %v1112_v21  ;;  %v1118_v21 = vld [vmem:[%s1502_s0 + $0xe8] sm:$0xff]  }
  0x34   :  { %v326_v40 = vmax.f32 %v262_v32, 0.0  ;;  %v195_v42 = vmul.f32 %v896_v33, %v1178_v1  ;;  %1139 = vst [vmem:[%s1505_s3 + $0x98] sm:$0xff] %v1028_v35   ;;  %v264_v44 = vadd.f32 %v1192_v7, %v193_v37  ;;  %v900_v46 = vunpack.c.l.bf16 %v1113_v34 }
  0x35   :  { %v327_v43 = vmax.f32 %v263_v36, 0.0  ;;  %v265_v45 = vadd.f32 %v1192_v7, %v194_v38  ;;  %v1033_v48 = vpack.c.bf16 %v325_v39, %v324_v31  ;;  %v196_v49 = vmul.f32 %v897_v41, %v1178_v1  ;;  %v1120_v39 = vld [vmem:[%s1502_s0 + $0xf8] sm:$0xff]  }
  0x36   :  { %v266_v50 = vadd.f32 %v1192_v7, %v195_v42  ;;  %v901_v51 = vunpack.c.h.bf16 %v1113_v34  ;;  %v328_v54 = vmax.f32 %v264_v44, 0.0  ;;  %v197_v56 = vmul.f32 %v900_v46, %v1178_v1  ;;  %v1119_v34 = vld [vmem:[%s1502_s0 + $0xf0] sm:$0xff]  }
  0x37   :  { %v1038_v53 = vpack.c.bf16 %v327_v43, %v326_v40  ;;  %v329_v55 = vmax.f32 %v265_v45, 0.0  ;;  %1140 = vst [vmem:[%s1505_s3 + $0xa0] sm:$0xff] %v1033_v48   ;;  %v267_v57 = vadd.f32 %v1192_v7, %v196_v49  ;;  %v904_v60 = vunpack.c.l.bf16 %v1114_v47 }
  0x38   :  { %v330_v58 = vmax.f32 %v266_v50, 0.0  ;;  %v198_v59 = vmul.f32 %v901_v51, %v1178_v1  ;;  %v268_v63 = vadd.f32 %v1192_v7, %v197_v56  ;;  %v905_v0 = vunpack.c.h.bf16 %v1114_v47 }
  0x39   :  { %1141 = vst [vmem:[%s1505_s3 + $0xa8] sm:$0xff] %v1038_v53   ;;  %v1043_v62 = vpack.c.bf16 %v329_v55, %v328_v54  ;;  %v908_v2 = vunpack.c.l.bf16 %v1115_v52  ;;  %v331_v3 = vmax.f32 %v267_v57, 0.0  ;;  %v199_v5 = vmul.f32 %v904_v60, %v1178_v1 }
  0x3a   :  { %v269_v4 = vadd.f32 %v1192_v7, %v198_v59  ;;  %v909_v6 = vunpack.c.h.bf16 %v1115_v52  ;;  %v332_v8 = vmax.f32 %v268_v63, 0.0  ;;  %v200_v9 = vmul.f32 %v905_v0, %v1178_v1 }
  0x3b   :  { %1142 = vst [vmem:[%s1505_s3 + $0xb0] sm:$0xff] %v1043_v62   ;;  %v201_v10 = vmul.f32 %v908_v2, %v1178_v1  ;;  %v912_v11 = vunpack.c.l.bf16 %v1116_v61  ;;  %v1048_v13 = vpack.c.bf16 %v331_v3, %v330_v58  ;;  %v270_v15 = vadd.f32 %v1192_v7, %v199_v5 }
  0x3c   :  { %v333_v14 = vmax.f32 %v269_v4, 0.0  ;;  %v202_v16 = vmul.f32 %v909_v6, %v1178_v1  ;;  %v271_v17 = vadd.f32 %v1192_v7, %v200_v9  ;;  %v913_v19 = vunpack.c.h.bf16 %v1116_v61 }
  0x3d   :  { %v272_v18 = vadd.f32 %v1192_v7, %v201_v10  ;;  %v203_v20 = vmul.f32 %v912_v11, %v1178_v1  ;;  %1143 = vst [vmem:[%s1505_s3 + $0xb8] sm:$0xff] %v1048_v13   ;;  %v334_v23 = vmax.f32 %v270_v15, 0.0  ;;  %v916_v25 = vunpack.c.l.bf16 %v1117_v12 }
  0x3e   :  { %v1053_v22 = vpack.c.bf16 %v333_v14, %v332_v8  ;;  %v273_v24 = vadd.f32 %v1192_v7, %v202_v16  ;;  %v335_v26 = vmax.f32 %v271_v17, 0.0  ;;  %v204_v28 = vmul.f32 %v913_v19, %v1178_v1 }
  0x3f   :  { %v336_v27 = vmax.f32 %v272_v18, 0.0  ;;  %v274_v29 = vadd.f32 %v1192_v7, %v203_v20  ;;  %v917_v31 = vunpack.c.h.bf16 %v1117_v12  ;;  %v205_v32 = vmul.f32 %v916_v25, %v1178_v1 }
  0x40   :  { %1144 = vst [vmem:[%s1505_s3 + $0xc0] sm:$0xff] %v1053_v22   ;;  %v337_v30 = vmax.f32 %v273_v24, 0.0  ;;  %v920_v33 = vunpack.c.l.bf16 %v1118_v21  ;;  %v1058_v35 = vpack.c.bf16 %v335_v26, %v334_v23  ;;  %v275_v36 = vadd.f32 %v1192_v7, %v204_v28 }
  0x41   :  { %v338_v37 = vmax.f32 %v274_v29, 0.0  ;;  %v921_v38 = vunpack.c.h.bf16 %v1118_v21  ;;  %v206_v41 = vmul.f32 %v917_v31, %v1178_v1  ;;  %v276_v42 = vadd.f32 %v1192_v7, %v205_v32 }
  0x42   :  { %v1063_v40 = vpack.c.bf16 %v337_v30, %v336_v27  ;;  %v207_v43 = vmul.f32 %v920_v33, %v1178_v1  ;;  %1145 = vst [vmem:[%s1505_s3 + $0xc8] sm:$0xff] %v1058_v35   ;;  %v339_v44 = vmax.f32 %v275_v36, 0.0  ;;  %v924_v46 = vunpack.c.l.bf16 %v1119_v34 }
  0x43   :  { %v208_v45 = vmul.f32 %v921_v38, %v1178_v1  ;;  %v925_v47 = vunpack.c.h.bf16 %v1119_v34  ;;  %v277_v48 = vadd.f32 %v1192_v7, %v206_v41  ;;  %v340_v49 = vmax.f32 %v276_v42, 0.0 }
  0x44   :  { %1146 = vst [vmem:[%s1505_s3 + $0xd0] sm:$0xff] %v1063_v40   ;;  %v278_v50 = vadd.f32 %v1192_v7, %v207_v43  ;;  %v928_v51 = vunpack.c.l.bf16 %v1120_v39  ;;  %v1068_v52 = vpack.c.bf16 %v339_v44, %v338_v37  ;;  %v209_v54 = vmul.f32 %v924_v46, %v1178_v1 }
  0x45   :  { %v279_v53 = vadd.f32 %v1192_v7, %v208_v45  ;;  %v210_v55 = vmul.f32 %v925_v47, %v1178_v1  ;;  %v341_v56 = vmax.f32 %v277_v48, 0.0  ;;  %v929_v58 = vunpack.c.h.bf16 %v1120_v39 }
  0x46   :  { %v342_v57 = vmax.f32 %v278_v50, 0.0  ;;  %v211_v59 = vmul.f32 %v928_v51, %v1178_v1  ;;  %1147 = vst [vmem:[%s1505_s3 + $0xd8] sm:$0xff] %v1068_v52   ;;  %v280_v61 = vadd.f32 %v1192_v7, %v209_v54 }
  0x47   :  { %v343_v60 = vmax.f32 %v279_v53, 0.0  ;;  %v281_v62 = vadd.f32 %v1192_v7, %v210_v55  ;;  %v1073_v63 = vpack.c.bf16 %v341_v56, %v340_v49  ;;  %v212_v0 = vmul.f32 %v929_v58, %v1178_v1 }
  0x48   :  { %v282_v2 = vadd.f32 %v1192_v7, %v211_v59  ;;  %v344_v4 = vmax.f32 %v280_v61, 0.0 }
  0x49   :  { %v1078_v3 = vpack.c.bf16 %v343_v60, %v342_v57  ;;  %v345_v5 = vmax.f32 %v281_v62, 0.0  ;;  %1148 = vst [vmem:[%s1505_s3 + $0xe0] sm:$0xff] %v1073_v63   ;;  %v283_v6 = vadd.f32 %v1192_v7, %v212_v0 }
  0x4a   :  { %v346_v8 = vmax.f32 %v282_v2, 0.0 }
  0x4b   :  { %1149 = vst [vmem:[%s1505_s3 + $0xe8] sm:$0xff] %v1078_v3   ;;  %v1083_v9 = vpack.c.bf16 %v345_v5, %v344_v4  ;;  %v347_v10 = vmax.f32 %v283_v6, 0.0 }
  0x4d   :  { %1150 = vst [vmem:[%s1505_s3 + $0xf0] sm:$0xff] %v1083_v9   ;;  %v1088_v1 = vpack.c.bf16 %v347_v10, %v346_v8 }
  0x4f   :  { %1151 = vst [vmem:[%s1505_s3 + $0xf8] sm:$0xff] %v1088_v1  }

// kernel: conv_block_forward.4
= control target key start
LH: loop header
LB: loop body
LE: loop exit
PB: predicated region body
PF: predicated region fallthrough
CT: control target
= control target key end

     0   :  { %s6731_s15 = smov 0   ;;  %s8529_s0 = inlined_call_operand.vmem [shape: bf16[2,18,18,8], index: 0, kind: input, shape index: {}]   ;;  %s8530_s1 = inlined_call_operand.vmem [shape: bf16[72,128], index: 1, kind: input, shape index: {}]   ;;  %s8531_s2 = inlined_call_operand.vmem [shape: f32[1,128], index: 2, kind: input, shape index: {}]   ;;  %s8532_s3 = inlined_call_operand.vmem [shape: bf16[2,16,16,128], index: 3, kind: output, shape index: {0}]   ;;  %s8533_s4 = inlined_call_operand.vmem [shape: f32[2,8,128], index: 4, kind: output, shape index: {1}]  }
   0x1 LB: > { %s5157_s16 = sadd.s32 4294967295, %s6704_s15   ;;  %p5161_p0 = scmp.ge.s32.totalorder %s6704_s15, 1  ;;  %s6704_s15 = sphi %s6731_s15, %s15_s15  }
   0x2   : > { %p165_p1 = scmp.lt.s32.totalorder %s6704_s15, 3 }
   0x4   : > { %p166_p2 = pnand %p5161_p0, %p165_p1 }
   0x6   : > { %169 = sbr.rel (%p166_p2) target bundleno = 607 (0x25f), region = 32 }
   0xd   : > { %v646_v0 = vld [vmem:[%s8530_s1 + $0x4] sm:$0xf]  ;;  %vm744_vm0 = vcmask 1043456   ;;  %v2447_v1 = vld [vmem:[%s8530_s1 + $0x10] sm:$0xf]  ;;  %p195_p3 = scmp.lt.s32.totalorder %s5157_s16, 1 }
   0xe   : > { %6574 = vmatprep.subr.msk.bf16.mxu1 %vm744_vm0, %v646_v0  ;;  %6578 = vmatprep.subr.msk.bf16.mxu0 %vm744_vm0, %v2447_v1  ;;  %v746_v2 = vsel %vm744_vm0, %v646_v0, 0  ;;  %v6749_v3 = vsel %vm744_vm0, %v2447_v1, 0  ;;  %v242_v4 = vld [vmem:[%s8530_s1] sm:$0xf]  ;;  %v2916_v5 = vld [vmem:[%s8530_s1 + $0x14] sm:$0xf] }
   0xf   : > { %8547 = vst [vmem:[#allocation2_spill] sm:$0xff] %v6749_v3  ;;  %6011 = vmatpush3.bf16.msra.mxu1 %v746_v2  ;;  %6147 = vmatpush3.bf16.msra.mxu0 %v6749_v3  ;;  %s8602_s16 = smov (!%p195_p3, %s5157_s16), 1  ;;  %vm259_vm1 = vsmask.f32 3328  ;;  %vm260_vm2 = vsmask.f32 7440 }
  0x10   : > { %6575 = vmatprep.subr.msk.bf16.mxu1 %vm744_vm0, %v242_v4  ;;  %6580 = vmatprep.subr.msk.bf16.mxu0 %vm744_vm0, %v2916_v5  ;;  %s6584_s25 = smul.u32 216, %s8602_s16  ;;  %vm695_vm3 = vcmask 64512   ;;  %v6779_v17 = vsel %vm744_vm0, %v242_v4, 0  ;;  %v6785_v26 = vld [vmem:[%s8530_s1 + $0x18] sm:$0xf]  ;;  %vm6792_vm4 = vmor %vm259_vm1, %vm260_vm2  ;;  %v6798_v37 = vsel %vm744_vm0, %v2916_v5, 0 }
  0x11   : > { %v6802_v41 = vsel %vm744_vm0, %v6785_v26, 0  ;;  %vm1249_vm5 = vcmask 1042432   ;;  %vm1250_vm6 = vcmask 1046532   ;;  %s5729_s21 = sshll.u32 %s8602_s16, 7  ;;  %vm5066_vm8 = vcmask 1040384  }
  0x12   : > { %s6766_s28 = scalar_lea.vmem %s8529_s0, %s6584_s25  ;;  %vm7018_vm7 = vmor %vm1249_vm5, %vm1250_vm6  ;;  %s8468_s24 = scalar_lea.vmem %s8532_s3, %s5729_s21  ;;  %vm5068_vm9 = vcmask 1041408  }
  0x13   : > { %v210_v6 = vld [vmem:[%s6766_s28] sm:$0xf]  ;;  %v211_v7 = vld [vmem:[%s6766_s28 + $0x4] sm:$0xf]  ;;  %v243_v8 = vld [vmem:[%s6766_s28 + $0x8] sm:$0x1] }
  0x14   : > { %v263_v9 = vshrl.u32 %v210_v6, 16  ;;  %v266_v10 = vshll.u32 %v210_v6, 16  ;;  %v272_v11 = vshll.u32 %v211_v7, 16  ;;  %v276_v12 = vshrl.u32 %v211_v7, 16  ;;  %v5342_v13 = vld [vmem:[%s6766_s28 + $0xc] sm:$0xf] }
  0x15   : > { %v282_v14 = vshll.u32 %v243_v8, 16  ;;  %v6773_v15 = vld [vmem:[%s6766_s28 + $0x10] sm:$0xf]  ;;  %v6776_v16 = vld [vmem:[%s6766_s28 + $0x14] sm:$0x1]  ;;  %v2064_v23 = vshrl.u32 %v5342_v13, 16 }
  0x16   : > { %v265_v18 = vrot.slane %v263_v9, 4  ;;  %v268_v19 = vrot.slane %v266_v10, 5  ;;  %v274_v20 = vrot.slane %v272_v11, 5  ;;  %v278_v21 = vrot.slane %v276_v12, 4  ;;  %v212_v31 = vld [vmem:[%s6766_s28 + $0xc] sm:$0xf] }
  0x17   : > { %v284_v22 = vrot.slane %v282_v14, 5  ;;  %v2067_v24 = vshll.u32 %v5342_v13, 16  ;;  %v2073_v25 = vshll.u32 %v6773_v15, 16  ;;  %v2077_v29 = vshrl.u32 %v6773_v15, 16  ;;  %v213_v36 = vld [vmem:[%s6766_s28 + $0x10] sm:$0xf] }
  0x18   : > { %v269_v27 = vor.u32 %v268_v19, %v265_v18  ;;  %v279_v28 = vor.u32 %v278_v21, %v274_v20  ;;  %v2083_v30 = vshll.u32 %v6776_v16, 16  ;;  %v2066_v33 = vrot.slane %v2064_v23, 4  ;;  %v244_v44 = vld [vmem:[%s6766_s28 + $0x14] sm:$0x1]  ;;  %v5345_v55 = vld [vmem:[%s6766_s28 + $0x18] sm:$0xf] }
  0x19   : > { %v2069_v34 = vrot.slane %v2067_v24, 5  ;;  %v2075_v35 = vrot.slane %v2073_v25, 5  ;;  %v2079_v40 = vrot.slane %v2077_v29, 4  ;;  %v287_v45 = vshrl.u32 %v212_v31, 16  ;;  %v6811_v60 = vld [vmem:[%s6766_s28 + $0x1c] sm:$0xf] }
  0x1a   : > { %v270_v38 = vrot.slane %v269_v27, 4  ;;  %v280_v39 = vrot.slane %v279_v28, 4  ;;  %v2085_v43 = vrot.slane %v2083_v30, 5  ;;  %v290_v46 = vshll.u32 %v212_v31, 16  ;;  %v6819_v1 = vld [vmem:[%s6766_s28 + $0x20] sm:$0x1] }
  0x1b   : > { %v2070_v42 = vor.u32 %v2069_v34, %v2066_v33  ;;  %v2080_v49 = vor.u32 %v2079_v40, %v2075_v35  ;;  %v296_v50 = vshll.u32 %v213_v36, 16  ;;  %v289_v53 = vrot.slane %v287_v45, 4  ;;  %v214_v18 = vld [vmem:[%s6766_s28 + $0x18] sm:$0xf]  ;;  %v215_v23 = vld [vmem:[%s6766_s28 + $0x1c] sm:$0xf] }
  0x1c   : > { %v275_v47 = vsel %vm6792_vm4, %v270_v38, %v274_v20  ;;  %v285_v48 = vsel %vm6792_vm4, %v280_v39, %v284_v22  ;;  %v292_v54 = vrot.slane %v290_v46, 5  ;;  %v300_v58 = vshrl.u32 %v213_v36, 16  ;;  %v245_v31 = vld [vmem:[%s6766_s28 + $0x20] sm:$0x1]  ;;  %v5348_v40 = vld [vmem:[%s6766_s28 + $0x24] sm:$0xf] }
  0x1d   : > { %v5166_v51 = vcombine.low %v275_v47, %v285_v48  ;;  %v2071_v52 = vrot.slane %v2070_v42, 4  ;;  %v2081_v56 = vrot.slane %v2080_v49, 4  ;;  %v298_v57 = vrot.slane %v296_v50, 5  ;;  %v6842_v46 = vld [vmem:[%s6766_s28 + $0x28] sm:$0xf]  ;;  %s5165_s25 = sshll.u32 %s8602_s16, 3 }
  0x1e   : > { %v306_v59 = vshll.u32 %v244_v44, 16  ;;  %v2806_v62 = vrot.slane %v6773_v15, 5  ;;  %v2809_v63 = vrot.slane %v6776_v16, 5  ;;  %v293_v0 = vor.u32 %v292_v54, %v289_v53  ;;  %v6851_v54 = vld [vmem:[%s6766_s28 + $0x2c] sm:$0x1] }
  0x1f   : > { %6012 = vmatprep.mubr.msk.bf16.mxu1 %vm695_vm3, %v5166_v51  ;;  %v2076_v61 = vsel %vm6792_vm4, %v2071_v52, %v2075_v35  ;;  %v2086_v2 = vsel %vm6792_vm4, %v2081_v56, %v2085_v43  ;;  %v302_v4 = vrot.slane %v300_v58, 4  ;;  %v2088_v6 = vshrl.u32 %v5345_v55, 16  ;;  %v1364_v51 = vld [vmem:[%s8530_s1 + $0x8] sm:$0xf]  ;;  %v7051_v16 = vld [vmem:[%s6766_s28 + $0x7c] sm:$0xf] }
  0x20   : > { %v308_v5 = vrot.slane %v306_v59, 5  ;;  %v5390_v7 = vcombine.low %v2076_v61, %v2086_v2  ;;  %v294_v8 = vrot.slane %v293_v0, 4  ;;  %v2091_v9 = vshll.u32 %v5345_v55, 16  ;;  %v216_v0 = vld [vmem:[%s6766_s28 + $0x24] sm:$0xf] }
  0x21   : > { %v2097_v10 = vshll.u32 %v6811_v60, 16  ;;  %v303_v11 = vor.u32 %v302_v4, %v298_v57  ;;  %v2090_v12 = vrot.slane %v2088_v6, 4  ;;  %v2101_v13 = vshrl.u32 %v6811_v60, 16 }
  0x22   : > { %v2107_v14 = vshll.u32 %v6819_v1, 16  ;;  %6148 = vmatprep.mubr.msk.bf16.mxu0 %vm695_vm3, %v5390_v7  ;;  %v299_v19 = vsel %vm6792_vm4, %v294_v8, %v298_v57  ;;  %v2093_v20 = vrot.slane %v2091_v9, 5  ;;  %v2813_v22 = vrot.slane %v6811_v60, 5  ;;  %v217_v7 = vld [vmem:[%s6766_s28 + $0x28] sm:$0xf] }
  0x23   : > { %v2099_v21 = vrot.slane %v2097_v10, 5  ;;  %v304_v24 = vrot.slane %v303_v11, 4  ;;  %v2103_v25 = vrot.slane %v2101_v13, 4  ;;  %v2816_v28 = vrot.slane %v6819_v1, 5  ;;  %v246_v13 = vld [vmem:[%s6766_s28 + $0x2c] sm:$0x1] }
  0x24   : > { %v2109_v27 = vrot.slane %v2107_v14, 5  ;;  %v2094_v29 = vor.u32 %v2093_v20, %v2090_v12  ;;  %v6835_v30 = vrot.slane %v2813_v22, 4  ;;  %v311_v33 = vshrl.u32 %v214_v18, 16 }
  0x25   : > { %v314_v34 = vshll.u32 %v214_v18, 16  ;;  %v309_v35 = vsel %vm6792_vm4, %v304_v24, %v308_v5  ;;  %v2104_v36 = vor.u32 %v2103_v25, %v2099_v21  ;;  %v320_v38 = vshll.u32 %v215_v23, 16  ;;  %v5351_v24 = vld [vmem:[%s6766_s28 + $0x30] sm:$0xf] }
  0x26   : > { %v324_v39 = vshrl.u32 %v215_v23, 16  ;;  %v5167_v42 = vcombine.low %v299_v19, %v309_v35  ;;  %v2095_v43 = vrot.slane %v2094_v29, 4  ;;  %v313_v44 = vrot.slane %v311_v33, 4  ;;  %v6871_v33 = vld [vmem:[%s6766_s28 + $0x34] sm:$0xf] }
  0x27   : > { %v316_v45 = vrot.slane %v314_v34, 5  ;;  %v2105_v47 = vrot.slane %v2104_v36, 4  ;;  %v322_v48 = vrot.slane %v320_v38, 5  ;;  %v330_v50 = vshll.u32 %v245_v31, 16 }
  0x28   : > { %v326_v49 = vrot.slane %v324_v39, 4  ;;  %6013 = vmatmul.mubr.msk.bf16.vlgmr.msra.gmra.mrb[0].mxu1 %vm695_vm3, %v5167_v42  ;;  %v2100_v52 = vsel %vm6792_vm4, %v2095_v43, %v2099_v21  ;;  %v2112_v55 = vshrl.u32 %v5348_v40, 16  ;;  %v2115_v56 = vshll.u32 %v5348_v40, 16  ;;  %v6879_v40 = vld [vmem:[%s6766_s28 + $0x38] sm:$0x1] }
  0x29   : > { %v317_v53 = vor.u32 %v316_v45, %v313_v44  ;;  %6045 = vmatpush3.bf16.msra.mxu1 %v6779_v17  ;;  %v2110_v57 = vsel %vm6792_vm4, %v2105_v47, %v2109_v27  ;;  %v332_v59 = vrot.slane %v330_v50, 5  ;;  %v2121_v61 = vshll.u32 %v6842_v46, 16 }
  0x2a   : > { %v327_v58 = vor.u32 %v326_v49, %v322_v48  ;;  %v5391_v2 = vcombine.low %v2100_v52, %v2110_v57  ;;  %v2114_v5 = vrot.slane %v2112_v55, 4  ;;  %v2117_v6 = vrot.slane %v2115_v56, 5  ;;  %6576 = vmatprep.subr.msk.bf16.mxu1 %vm744_vm0, %v1364_v51  ;;  %v218_v52 = vld [vmem:[%s6766_s28 + $0x30] sm:$0xf] }
  0x2b   : > { %v318_v4 = vrot.slane %v317_v53, 4  ;;  %v2123_v9 = vrot.slane %v2121_v61, 5  ;;  %v2125_v17 = vshrl.u32 %v6842_v46, 16  ;;  %v2131_v10 = vshll.u32 %v6851_v54, 16 }
  0x2c   : > { %v328_v8 = vrot.slane %v327_v58, 4  ;;  %6149 = vmatmul.mubr.msk.bf16.vlgmr.msra.gmra.mrb[0].mxu0 %vm695_vm3, %v5391_v2  ;;  %v2118_v12 = vor.u32 %v2117_v6, %v2114_v5  ;;  %v335_v14 = vshrl.u32 %v216_v0, 16  ;;  %v338_v18 = vshll.u32 %v216_v0, 16  ;;  %v219_v58 = vld [vmem:[%s6766_s28 + $0x34] sm:$0xf] }
  0x2d   : > { %v323_v11 = vsel %vm6792_vm4, %v318_v4, %v322_v48  ;;  %6181 = vmatpush3.bf16.msra.mxu0 %v6798_v37  ;;  %v2127_v20 = vrot.slane %v2125_v17, 4  ;;  %v2133_v21 = vrot.slane %v2131_v10, 5  ;;  %v344_v23 = vshll.u32 %v217_v7, 16  ;;  %v247_v4 = vld [vmem:[%s6766_s28 + $0x38] sm:$0x1] }
  0x2e   : > { %v333_v19 = vsel %vm6792_vm4, %v328_v8, %v332_v59  ;;  %v2119_v27 = vrot.slane %v2118_v12, 4  ;;  %v337_v29 = vrot.slane %v335_v14, 4  ;;  %v340_v31 = vrot.slane %v338_v18, 5  ;;  %6581 = vmatprep.subr.msk.bf16.mxu0 %vm744_vm0, %v6785_v26  ;;  %v5354_v12 = vld [vmem:[%s6766_s28 + $0x3c] sm:$0xf] }
  0x2f   : > { %v5168_v25 = vcombine.low %v323_v11, %v333_v19  ;;  %v2128_v34 = vor.u32 %v2127_v20, %v2123_v9  ;;  %v346_v35 = vrot.slane %v344_v23, 5  ;;  %v348_v37 = vshrl.u32 %v217_v7, 16  ;;  %v6896_v20 = vld [vmem:[%s6766_s28 + $0x40] sm:$0xf] }
  0x30   : > { %v354_v36 = vshll.u32 %v246_v13, 16  ;;  %v2124_v38 = vsel %vm6792_vm4, %v2119_v27, %v2123_v9  ;;  %v341_v39 = vor.u32 %v340_v31, %v337_v29  ;;  %v2136_v42 = vshrl.u32 %v5351_v24, 16 }
  0x31   : > { %6016 = vmatprep.mubr.msk.bf16.mxu1 %vm695_vm3, %v5168_v25  ;;  %v2139_v43 = vshll.u32 %v5351_v24, 16  ;;  %v2129_v44 = vrot.slane %v2128_v34, 4  ;;  %v350_v45 = vrot.slane %v348_v37, 4  ;;  %v2145_v26 = vshll.u32 %v6871_v33, 16  ;;  %v6901_v34 = vld [vmem:[%s6766_s28 + $0x44] sm:$0x1] }
  0x32   : > { %v356_v47 = vrot.slane %v354_v36, 5  ;;  %v342_v48 = vrot.slane %v341_v39, 4  ;;  %v2138_v49 = vrot.slane %v2136_v42, 4  ;;  %v2149_v51 = vshrl.u32 %v6871_v33, 16  ;;  %v220_v42 = vld [vmem:[%s6766_s28 + $0x3c] sm:$0xf] }
  0x33   : > { %v2141_v50 = vrot.slane %v2139_v43, 5  ;;  %v2134_v53 = vsel %vm6792_vm4, %v2129_v44, %v2133_v21  ;;  %v351_v55 = vor.u32 %v350_v45, %v346_v35  ;;  %v2147_v56 = vrot.slane %v2145_v26, 5  ;;  %v221_v26 = vld [vmem:[%s6766_s28 + $0x40] sm:$0xf] }
  0x34   : > { %v2155_v57 = vshll.u32 %v6879_v40, 16  ;;  %v5392_v59 = vcombine.low %v2124_v38, %v2134_v53  ;;  %v347_v61 = vsel %vm6792_vm4, %v342_v48, %v346_v35  ;;  %v2151_v2 = vrot.slane %v2149_v51, 4 }
  0x35   : > { %v2142_v0 = vor.u32 %v2141_v50, %v2138_v49  ;;  %v352_v5 = vrot.slane %v351_v55, 4  ;;  %v359_v7 = vshrl.u32 %v218_v52, 16  ;;  %v362_v8 = vshll.u32 %v218_v52, 16 }
  0x36   : > { %v2157_v6 = vrot.slane %v2155_v57, 5  ;;  %6152 = vmatprep.mubr.msk.bf16.mxu0 %vm695_vm3, %v5392_v59  ;;  %v2152_v17 = vor.u32 %v2151_v2, %v2147_v56  ;;  %v368_v10 = vshll.u32 %v219_v58, 16  ;;  %v372_v11 = vshrl.u32 %v219_v58, 16  ;;  %v5357_v2 = vld [vmem:[%s6766_s28 + $0x48] sm:$0xf] }
  0x37   : > { %v2143_v9 = vrot.slane %v2142_v0, 4  ;;  %v357_v13 = vsel %vm6792_vm4, %v352_v5, %v356_v47  ;;  %v361_v14 = vrot.slane %v359_v7, 4  ;;  %v364_v18 = vrot.slane %v362_v8, 5  ;;  %v6919_v8 = vld [vmem:[%s6766_s28 + $0x4c] sm:$0xf] }
  0x38   : > { %v378_v19 = vshll.u32 %v247_v4, 16  ;;  %v5169_v21 = vcombine.low %v347_v61, %v357_v13  ;;  %v2153_v24 = vrot.slane %v2152_v17, 4  ;;  %v370_v25 = vrot.slane %v368_v10, 5  ;;  %v248_v61 = vld [vmem:[%s6766_s28 + $0x44] sm:$0x1] }
  0x39   : > { %v2148_v23 = vsel %vm6792_vm4, %v2143_v9, %v2147_v56  ;;  %v365_v27 = vor.u32 %v364_v18, %v361_v14  ;;  %v374_v29 = vrot.slane %v372_v11, 4  ;;  %v2160_v35 = vshrl.u32 %v5354_v12, 16 }
  0x3a   : > { %v380_v31 = vrot.slane %v378_v19, 5  ;;  %6017 = vmatmul.mubr.msk.bf16.gmra.mrb[4].mxu1 %vm695_vm3, %v5169_v21  ;;  %v2158_v37 = vsel %vm6792_vm4, %v2153_v24, %v2157_v6  ;;  %v2163_v36 = vshll.u32 %v5354_v12, 16  ;;  %v2169_v38 = vshll.u32 %v6896_v20, 16 }
  0x3b   : > { %v2173_v39 = vshrl.u32 %v6896_v20, 16  ;;  %v5393_v43 = vcombine.low %v2148_v23, %v2158_v37  ;;  %v366_v44 = vrot.slane %v365_v27, 4  ;;  %v375_v45 = vor.u32 %v374_v29, %v370_v25  ;;  %v6927_v23 = vld [vmem:[%s6766_s28 + $0x50] sm:$0x1]  ;;  %v6931_v27 = vld [vmem:[%s6766_s28 + $0x48] sm:$0xf] }
  0x3c   : > { %v2162_v47 = vrot.slane %v2160_v35, 4  ;;  %v2165_v48 = vrot.slane %v2163_v36, 5  ;;  %v2171_v49 = vrot.slane %v2169_v38, 5  ;;  %v2179_v51 = vshll.u32 %v6901_v34, 16  ;;  %v6934_v36 = vld [vmem:[%s6766_s28 + $0x4c] sm:$0xf] }
  0x3d   : > { %v2175_v50 = vrot.slane %v2173_v39, 4  ;;  %6153 = vmatmul.mubr.msk.bf16.gmra.mrb[4].mxu0 %vm695_vm3, %v5393_v43  ;;  %v371_v52 = vsel %vm6792_vm4, %v366_v44, %v370_v25  ;;  %v376_v53 = vrot.slane %v375_v45, 4  ;;  %v383_v55 = vshrl.u32 %v220_v42, 16 }
  0x3e   : > { %v386_v56 = vshll.u32 %v220_v42, 16  ;;  %v2166_v57 = vor.u32 %v2165_v48, %v2162_v47  ;;  %v2181_v59 = vrot.slane %v2179_v51, 5  ;;  %v392_v0 = vshll.u32 %v221_v26, 16 }
  0x3f   : > { %v2176_v58 = vor.u32 %v2175_v50, %v2171_v49  ;;  %v381_v4 = vsel %vm6792_vm4, %v376_v53, %v380_v31  ;;  %v385_v5 = vrot.slane %v383_v55, 4  ;;  %v396_v7 = vshrl.u32 %v221_v26, 16  ;;  %v249_v26 = vld [vmem:[%s6766_s28 + $0x50] sm:$0x1]  ;;  %v5360_v53 = vld [vmem:[%s6766_s28 + $0x54] sm:$0xf] }
  0x40   : > { %v388_v6 = vrot.slane %v386_v56, 5  ;;  %v5170_v9 = vcombine.low %v371_v52, %v381_v4  ;;  %v2167_v17 = vrot.slane %v2166_v57, 4  ;;  %v394_v11 = vrot.slane %v392_v0, 5  ;;  %v6950_v4 = vld [vmem:[%s6766_s28 + $0x58] sm:$0xf] }
  0x41   : > { %v2177_v10 = vrot.slane %v2176_v58, 4  ;;  %v398_v13 = vrot.slane %v396_v7, 4  ;;  %v402_v14 = vshll.u32 %v248_v61, 16  ;;  %v2184_v18 = vshrl.u32 %v5357_v2, 16 }
  0x42   : > { %v389_v12 = vor.u32 %v388_v6, %v385_v5  ;;  %6020 = vmatprep.mubr.msk.bf16.mxu1 %vm695_vm3, %v5170_v9  ;;  %v2172_v19 = vsel %vm6792_vm4, %v2167_v17, %v2171_v49  ;;  %v2187_v24 = vshll.u32 %v5357_v2, 16  ;;  %v2193_v25 = vshll.u32 %v6919_v8, 16 }
  0x43   : > { %v2182_v21 = vsel %vm6792_vm4, %v2177_v10, %v2181_v59  ;;  %v399_v35 = vor.u32 %v398_v13, %v394_v11  ;;  %v404_v37 = vrot.slane %v402_v14, 5  ;;  %v2186_v38 = vrot.slane %v2184_v18, 4 }
  0x44   : > { %v5394_v29 = vcombine.low %v2172_v19, %v2182_v21  ;;  %v390_v31 = vrot.slane %v389_v12, 4  ;;  %v2189_v39 = vrot.slane %v2187_v24, 5  ;;  %v2195_v42 = vrot.slane %v2193_v25, 5  ;;  %v6956_v12 = vld [vmem:[%s6766_s28 + $0x5c] sm:$0x1] }
  0x45   : > { %v2197_v43 = vshrl.u32 %v6919_v8, 16  ;;  %v400_v45 = vrot.slane %v399_v35, 4  ;;  %v2203_v47 = vshll.u32 %v6927_v23, 16  ;;  %v407_v48 = vshrl.u32 %v6931_v27, 16  ;;  %v6960_v24 = vld [vmem:[%s6766_s28 + $0x54] sm:$0xf] }
  0x46   : > { %6156 = vmatprep.mubr.msk.bf16.mxu0 %vm695_vm3, %v5394_v29  ;;  %v395_v44 = vsel %vm6792_vm4, %v390_v31, %v394_v11  ;;  %v2190_v49 = vor.u32 %v2189_v39, %v2186_v38  ;;  %v410_v51 = vshll.u32 %v6931_v27, 16  ;;  %v416_v52 = vshll.u32 %v6934_v36, 16 }
  0x47   : > { %v2199_v50 = vrot.slane %v2197_v43, 4  ;;  %v405_v55 = vsel %vm6792_vm4, %v400_v45, %v404_v37  ;;  %v2205_v56 = vrot.slane %v2203_v47, 5  ;;  %v409_v57 = vrot.slane %v407_v48, 4  ;;  %v6966_v37 = vld [vmem:[%s6766_s28 + $0x58] sm:$0xf] }
  0x48   : > { %v420_v58 = vshrl.u32 %v6934_v36, 16  ;;  %v5171_v59 = vcombine.low %v395_v44, %v405_v55  ;;  %v2191_v61 = vrot.slane %v2190_v49, 4  ;;  %v412_v2 = vrot.slane %v410_v51, 5 }
  0x49   : > { %v2200_v0 = vor.u32 %v2199_v50, %v2195_v42  ;;  %v418_v5 = vrot.slane %v416_v52, 5  ;;  %v426_v7 = vshll.u32 %v249_v26, 16  ;;  %v2208_v9 = vshrl.u32 %v5360_v53, 16  ;;  %v250_v26 = vld [vmem:[%s6766_s28 + $0x5c] sm:$0x1] }
  0x4a   : > { %v422_v6 = vrot.slane %v420_v58, 4  ;;  %6021 = vmatmul.mubr.msk.bf16.gmra.mrb[8].mxu1 %vm695_vm3, %v5171_v59  ;;  %v2196_v17 = vsel %vm6792_vm4, %v2191_v61, %v2195_v42  ;;  %v413_v11 = vor.u32 %v412_v2, %v409_v57  ;;  %v2211_v13 = vshll.u32 %v5360_v53, 16  ;;  %v5363_v53 = vld [vmem:[%s6766_s28 + $0x60] sm:$0xf]  ;;  %v6980_v59 = vld [vmem:[%s6766_s28 + $0x64] sm:$0xf] }
  0x4b   : > { %v2201_v10 = vrot.slane %v2200_v0, 4  ;;  %v428_v18 = vrot.slane %v426_v7, 5  ;;  %v2210_v19 = vrot.slane %v2208_v9, 4  ;;  %v2217_v21 = vshll.u32 %v6950_v4, 16  ;;  %v6987_v9 = vld [vmem:[%s6766_s28 + $0x68] sm:$0x1] }
  0x4c   : > { %v423_v14 = vor.u32 %v422_v6, %v418_v5  ;;  %v414_v29 = vrot.slane %v413_v11, 4  ;;  %v2213_v31 = vrot.slane %v2211_v13, 5  ;;  %v2221_v35 = vshrl.u32 %v6950_v4, 16 }
  0x4d   : > { %v2206_v25 = vsel %vm6792_vm4, %v2201_v10, %v2205_v56  ;;  %v2219_v42 = vrot.slane %v2217_v21, 5  ;;  %v2227_v43 = vshll.u32 %v6956_v12, 16  ;;  %v431_v48 = vshrl.u32 %v6960_v24, 16 }
  0x4e   : > { %v5395_v38 = vcombine.low %v2196_v17, %v2206_v25  ;;  %v424_v39 = vrot.slane %v423_v14, 4  ;;  %v419_v44 = vsel %vm6792_vm4, %v414_v29, %v418_v5  ;;  %v2214_v45 = vor.u32 %v2213_v31, %v2210_v19  ;;  %v6991_v19 = vld [vmem:[%s6766_s28 + $0x60] sm:$0xf] }
  0x4f   : > { %v2223_v47 = vrot.slane %v2221_v35, 4  ;;  %v2229_v50 = vrot.slane %v2227_v43, 5  ;;  %v434_v51 = vshll.u32 %v6960_v24, 16  ;;  %v440_v52 = vshll.u32 %v6966_v37, 16  ;;  %v6997_v35 = vld [vmem:[%s6766_s28 + $0x64] sm:$0xf] }
  0x50   : > { %6157 = vmatmul.mubr.msk.bf16.gmra.mrb[8].mxu0 %vm695_vm3, %v5395_v38  ;;  %v429_v49 = vsel %vm6792_vm4, %v424_v39, %v428_v18  ;;  %v2215_v56 = vrot.slane %v2214_v45, 4  ;;  %v433_v58 = vrot.slane %v431_v48, 4  ;;  %v444_v2 = vshrl.u32 %v6966_v37, 16 }
  0x51   : > { %v5172_v55 = vcombine.low %v419_v44, %v429_v49  ;;  %v2224_v57 = vor.u32 %v2223_v47, %v2219_v42  ;;  %v436_v61 = vrot.slane %v434_v51, 5  ;;  %v442_v0 = vrot.slane %v440_v52, 5 }
  0x52   : > { %v450_v5 = vshll.u32 %v250_v26, 16  ;;  %v2220_v6 = vsel %vm6792_vm4, %v2215_v56, %v2219_v42  ;;  %v2232_v17 = vshrl.u32 %v5363_v53, 16  ;;  %v2235_v10 = vshll.u32 %v5363_v53, 16 }
  0x53   : > { %6024 = vmatprep.mubr.msk.bf16.mxu1 %vm695_vm3, %v5172_v55  ;;  %v2225_v7 = vrot.slane %v2224_v57, 4  ;;  %v437_v11 = vor.u32 %v436_v61, %v433_v58  ;;  %v446_v13 = vrot.slane %v444_v2, 4  ;;  %v2241_v18 = vshll.u32 %v6980_v59, 16  ;;  %v5422_v58 = vld [vmem:[%s6766_s28 + $0xc] sm:$0xe] }
  0x54   : > { %v452_v14 = vrot.slane %v450_v5, 5  ;;  %v2234_v25 = vrot.slane %v2232_v17, 4  ;;  %v2237_v29 = vrot.slane %v2235_v10, 5  ;;  %v2245_v31 = vshrl.u32 %v6980_v59, 16 }
  0x55   : > { %v2230_v21 = vsel %vm6792_vm4, %v2225_v7, %v2229_v50  ;;  %v438_v39 = vrot.slane %v437_v11, 4  ;;  %v447_v42 = vor.u32 %v446_v13, %v442_v0  ;;  %v2243_v43 = vrot.slane %v2241_v18, 5  ;;  %v251_v50 = vld [vmem:[%s6766_s28 + $0x68] sm:$0x1] }
  0x56   : > { %v5396_v38 = vcombine.low %v2220_v6, %v2230_v21  ;;  %v2238_v44 = vor.u32 %v2237_v29, %v2234_v25  ;;  %v2247_v45 = vrot.slane %v2245_v31, 4  ;;  %v2251_v47 = vshll.u32 %v6987_v9, 16  ;;  %v7025_v29 = vld [vmem:[%s6766_s28 + $0x70] sm:$0xf] }
  0x57   : > { %v455_v26 = vshrl.u32 %v6991_v19, 16  ;;  %v443_v48 = vsel %vm6792_vm4, %v438_v39, %v442_v0  ;;  %v448_v49 = vrot.slane %v447_v42, 4  ;;  %v458_v51 = vshll.u32 %v6991_v19, 16  ;;  %v7012_v0 = vld [vmem:[%s6766_s28 + $0x6c] sm:$0xf] }
  0x58   : > { %6160 = vmatprep.mubr.msk.bf16.mxu0 %vm695_vm3, %v5396_v38  ;;  %v464_v52 = vshll.u32 %v6997_v35, 16  ;;  %v2239_v53 = vrot.slane %v2238_v44, 4  ;;  %v2248_v55 = vor.u32 %v2247_v45, %v2243_v43  ;;  %v2253_v56 = vrot.slane %v2251_v47, 5 }
  0x59   : > { %v457_v57 = vrot.slane %v455_v26, 4  ;;  %v453_v61 = vsel %vm6792_vm4, %v448_v49, %v452_v14  ;;  %v460_v2 = vrot.slane %v458_v51, 5  ;;  %v468_v6 = vshrl.u32 %v6997_v35, 16  ;;  %v252_v26 = vld [vmem:[%s6766_s28 + $0x74] sm:$0x1] }
  0x5a   : > { %v466_v5 = vrot.slane %v464_v52, 5  ;;  %v5173_v7 = vcombine.low %v443_v48, %v453_v61  ;;  %v2244_v17 = vsel %vm6792_vm4, %v2239_v53, %v2243_v43  ;;  %v2249_v10 = vrot.slane %v2248_v55, 4  ;;  %v5423_v48 = vld [vmem:[%s6766_s28 + $0x18] sm:$0xe] }
  0x5b   : > { %v474_v11 = vshll.u32 %v251_v50, 16  ;;  %v461_v14 = vor.u32 %v460_v2, %v457_v57  ;;  %v470_v18 = vrot.slane %v468_v6, 4  ;;  %v5438_v21 = vrot.slane %v5422_v58, 9  ;;  %v7044_v53 = vld [vmem:[%s6766_s28 + $0x78] sm:$0xf] }
  0x5c   : > { %v2808_v25 = vrot.slane %v2806_v62, 4  ;;  %6025 = vmatmul.mubr.msk.bf16.gmra.mrb[12].mxu1 %vm695_vm3, %v5173_v7  ;;  %v2254_v31 = vsel %vm6792_vm4, %v2249_v10, %v2253_v56  ;;  %v479_v39 = vshrl.u32 %v7012_v0, 16  ;;  %v482_v42 = vshll.u32 %v7012_v0, 16  ;;  %v253_v57 = vld [vmem:[%s6766_s28 + $0x80] sm:$0x1] }
  0x5d   : > { %v476_v38 = vrot.slane %v474_v11, 5  ;;  %v5397_v43 = vcombine.low %v2244_v17, %v2254_v31  ;;  %v462_v44 = vrot.slane %v461_v14, 4  ;;  %v471_v45 = vor.u32 %v470_v18, %v466_v5  ;;  %v5424_v10 = vld [vmem:[%s6766_s28 + $0x24] sm:$0xe] }
  0x5e   : > { %v2807_v47 = vsel %vm7018_vm7, %v5438_v21, %v2806_v62  ;;  %v2810_v49 = vsel %vm7018_vm7, %v2808_v25, %v2809_v63  ;;  %v481_v50 = vrot.slane %v479_v39, 4  ;;  %v484_v51 = vrot.slane %v482_v42, 5  ;;  %v7070_v39 = vld [vmem:[%s6766_s28 + $0x84] sm:$0xf] }
  0x5f   : > { %v488_v52 = vshll.u32 %v7025_v29, 16  ;;  %6161 = vmatmul.mubr.msk.bf16.gmra.mrb[12].mxu0 %vm695_vm3, %v5397_v43  ;;  %v467_v15 = vsel %vm6792_vm4, %v462_v44, %v466_v5  ;;  %v472_v62 = vrot.slane %v471_v45, 4  ;;  %v5454_v55 = vcombine.low %v2807_v47, %v2810_v49  ;;  %v7078_v43 = vld [vmem:[%s6766_s28 + $0x88] sm:$0xf] }
  0x60   : > { %v492_v56 = vshrl.u32 %v7025_v29, 16  ;;  %v485_v63 = vor.u32 %v484_v51, %v481_v50  ;;  %v498_v61 = vshll.u32 %v252_v26, 16  ;;  %v5439_v2 = vrot.slane %v5423_v48, 9 }
  0x61   : > { %v490_v58 = vrot.slane %v488_v52, 5  ;;  %v477_v6 = vsel %vm6792_vm4, %v472_v62, %v476_v38  ;;  %6182 = vmatprep.mubr.msk.bf16.mxu0 %vm695_vm3, %v5454_v55  ;;  %v2817_v5 = vsel %vm7018_vm7, %v6835_v30, %v2816_v28  ;;  %v503_v17 = vshrl.u32 %v7044_v53, 16  ;;  %v254_v52 = vld [vmem:[%s6766_s28 + $0x8c] sm:$0x1] }
  0x62   : > { %v494_v7 = vrot.slane %v492_v56, 4  ;;  %v5174_v11 = vcombine.low %v467_v15, %v477_v6  ;;  %v486_v14 = vrot.slane %v485_v63, 4  ;;  %v500_v18 = vrot.slane %v498_v61, 5 }
  0x63   : > { %v2814_v21 = vsel %vm7018_vm7, %v5439_v2, %v2813_v22  ;;  %v505_v38 = vrot.slane %v503_v17, 4  ;;  %v506_v1 = vshll.u32 %v7044_v53, 16  ;;  %v512_v30 = vshll.u32 %v7051_v16, 16  ;;  %v7083_v22 = vld [vmem:[%s8530_s1 + $0x1c] sm:$0xf] }
  0x64   : > { %v495_v25 = vor.u32 %v494_v7, %v490_v58  ;;  %v5455_v31 = vcombine.low %v2814_v21, %v2817_v5  ;;  %6028 = vmatprep.mubr.msk.bf16.mxu1 %vm695_vm3, %v5174_v11  ;;  %v491_v28 = vsel %vm6792_vm4, %v486_v14, %v490_v58  ;;  %v516_v60 = vshrl.u32 %v7051_v16, 16  ;;  %v7102_v5 = vld [vmem:[%s6766_s28 + $0x90] sm:$0xf] }
  0x65   : > { %v522_v42 = vshll.u32 %v253_v57, 16  ;;  %v508_v45 = vrot.slane %v506_v1, 5  ;;  %v5440_v47 = vrot.slane %v5424_v10, 9  ;;  %v2820_v26 = vrot.slane %v6842_v46, 5  ;;  %v5425_v57 = vld [vmem:[%s6766_s28 + $0x30] sm:$0xe] }
  0x66   : > { %v496_v44 = vrot.slane %v495_v25, 4  ;;  %v514_v48 = vrot.slane %v512_v30, 5  ;;  %v518_v49 = vrot.slane %v516_v60, 4  ;;  %v2823_v51 = vrot.slane %v6851_v54, 5  ;;  %v7114_v30 = vld [vmem:[%s6766_s28 + $0x94] sm:$0xf] }
  0x67   : > { %v524_v50 = vrot.slane %v522_v42, 5  ;;  %6183 = vmatmul.mubr.msk.bf16.vlgmr.msra.gmra.mrb[0].mxu0 %vm695_vm3, %v5455_v31  ;;  %v509_v62 = vor.u32 %v508_v45, %v505_v38  ;;  %v2821_v55 = vsel %vm7018_vm7, %v5440_v47, %v2820_v26  ;;  %v2822_v56 = vrot.slane %v2820_v26, 4  ;;  %v255_v60 = vld [vmem:[%s6766_s28 + $0x98] sm:$0x1]  ;;  %v5426_v26 = vld [vmem:[%s6766_s28 + $0x3c] sm:$0xe] }
  0x68   : > { %v501_v15 = vsel %vm6792_vm4, %v496_v44, %v500_v18  ;;  %6215 = vmatpush3.bf16.msra.mxu0 %v6802_v41  ;;  %v519_v46 = vor.u32 %v518_v49, %v514_v48  ;;  %v527_v58 = vshrl.u32 %v7070_v39, 16  ;;  %v530_v54 = vshll.u32 %v7070_v39, 16 }
  0x69   : > { %v5175_v63 = vcombine.low %v491_v28, %v501_v15  ;;  %v510_v61 = vrot.slane %v509_v62, 4  ;;  %v2824_v2 = vsel %vm7018_vm7, %v2822_v56, %v2823_v51  ;;  %v536_v6 = vshll.u32 %v7078_v43, 16  ;;  %6582 = vmatprep.subr.msk.bf16.mxu0 %vm744_vm0, %v7083_v22 }
  0x6a   : > { %v540_v7 = vshrl.u32 %v7078_v43, 16  ;;  %v520_v41 = vrot.slane %v519_v46, 4  ;;  %v5456_v17 = vcombine.low %v2821_v55, %v2824_v2  ;;  %v529_v10 = vrot.slane %v527_v58, 4  ;;  %v7134_v46 = vld [vmem:[%s6766_s28 + $0xa0] sm:$0xf] }
  0x6b   : > { %6029 = vmatmul.mubr.msk.bf16.gmra.mrb[16].mxu1 %vm695_vm3, %v5175_v63  ;;  %v532_v11 = vrot.slane %v530_v54, 5  ;;  %v515_v14 = vsel %vm6792_vm4, %v510_v61, %v514_v48  ;;  %v538_v18 = vrot.slane %v536_v6, 5  ;;  %v546_v25 = vshll.u32 %v254_v52, 16  ;;  %v7123_v52 = vld [vmem:[%s6766_s28 + $0x9c] sm:$0xf] }
  0x6c   : > { %v542_v21 = vrot.slane %v540_v7, 4  ;;  %v525_v31 = vsel %vm6792_vm4, %v520_v41, %v524_v50  ;;  %6186 = vmatprep.mubr.msk.bf16.mxu0 %vm695_vm3, %v5456_v17  ;;  %v5441_v1 = vrot.slane %v5425_v57, 9  ;;  %v2827_v28 = vrot.slane %v6871_v33, 5 }
  0x6d   : > { %v533_v38 = vor.u32 %v532_v11, %v529_v10  ;;  %v5176_v42 = vcombine.low %v515_v14, %v525_v31  ;;  %v548_v45 = vrot.slane %v546_v25, 5  ;;  %v2830_v47 = vrot.slane %v6879_v40, 5  ;;  %v256_v10 = vld [vmem:[%s6766_s28 + $0xa4] sm:$0x1]  ;;  %v5427_v11 = vld [vmem:[%s6766_s28 + $0x48] sm:$0xe] }
  0x6e   : > { %v543_v44 = vor.u32 %v542_v21, %v538_v18  ;;  %v2828_v49 = vsel %vm7018_vm7, %v5441_v1, %v2827_v28  ;;  %v2829_v50 = vrot.slane %v2827_v28, 4  ;;  %v551_v51 = vshrl.u32 %v7102_v5, 16 }
  0x6f   : > { %v534_v48 = vrot.slane %v533_v38, 4  ;;  %6032 = vmatprep.mubr.msk.bf16.mxu1 %vm695_vm3, %v5176_v42  ;;  %v554_v15 = vshll.u32 %v7102_v5, 16  ;;  %v560_v62 = vshll.u32 %v7114_v30, 16  ;;  %v564_v40 = vshrl.u32 %v7114_v30, 16 }
  0x70   : > { %v544_v33 = vrot.slane %v543_v44, 4  ;;  %v2831_v56 = vsel %vm7018_vm7, %v2829_v50, %v2830_v47  ;;  %v553_v57 = vrot.slane %v551_v51, 4  ;;  %v570_v63 = vshll.u32 %v255_v60, 16 }
  0x71   : > { %v539_v55 = vsel %vm6792_vm4, %v534_v48, %v538_v18  ;;  %v5457_v54 = vcombine.low %v2828_v49, %v2831_v56  ;;  %v556_v61 = vrot.slane %v554_v15, 5  ;;  %v562_v2 = vrot.slane %v560_v62, 5  ;;  %v7160_v56 = vld [vmem:[%s6766_s28 + $0xac] sm:$0xf] }
  0x72   : > { %v549_v58 = vsel %vm6792_vm4, %v544_v33, %v548_v45  ;;  %v566_v7 = vrot.slane %v564_v40, 4  ;;  %v572_v41 = vrot.slane %v570_v63, 5  ;;  %v5442_v17 = vrot.slane %v5426_v26, 9  ;;  %v7155_v33 = vld [vmem:[%s6766_s28 + $0xa8] sm:$0xf] }
  0x73   : > { %v5177_v6 = vcombine.low %v539_v55, %v549_v58  ;;  %6187 = vmatmul.mubr.msk.bf16.gmra.mrb[4].mxu0 %vm695_vm3, %v5457_v54  ;;  %v557_v14 = vor.u32 %v556_v61, %v553_v57  ;;  %v2834_v18 = vrot.slane %v6896_v20, 5  ;;  %v2837_v21 = vrot.slane %v6901_v34, 5  ;;  %v257_v61 = vld [vmem:[%s6766_s28 + $0xb0] sm:$0x1] }
  0x74   : > { %v575_v25 = vshrl.u32 %v7123_v52, 16  ;;  %v567_v31 = vor.u32 %v566_v7, %v562_v2  ;;  %v578_v38 = vshll.u32 %v7123_v52, 16  ;;  %v584_v1 = vshll.u32 %v7134_v46, 16 }
  0x75   : > { %6033 = vmatmul.mubr.msk.bf16.gmra.mrb[20].mxu1 %vm695_vm3, %v5177_v6  ;;  %v588_v28 = vshrl.u32 %v7134_v46, 16  ;;  %v558_v60 = vrot.slane %v557_v14, 4  ;;  %v2835_v42 = vsel %vm7018_vm7, %v5442_v17, %v2834_v18  ;;  %v2836_v20 = vrot.slane %v2834_v18, 4  ;;  %v7175_v14 = vld [vmem:[%s6766_s28 + $0xb4] sm:$0xf] }
  0x76   : > { %v577_v44 = vrot.slane %v575_v25, 4  ;;  %v568_v34 = vrot.slane %v567_v31, 4  ;;  %v580_v45 = vrot.slane %v578_v38, 5  ;;  %v586_v47 = vrot.slane %v584_v1, 5 }
  0x77   : > { %v590_v26 = vrot.slane %v588_v28, 4  ;;  %v563_v48 = vsel %vm6792_vm4, %v558_v60, %v562_v2  ;;  %v2838_v49 = vsel %vm7018_vm7, %v2836_v20, %v2837_v21  ;;  %v594_v50 = vshll.u32 %v256_v10, 16  ;;  %v5428_v2 = vld [vmem:[%s6766_s28 + $0x54] sm:$0xe] }
  0x78   : > { %v5443_v51 = vrot.slane %v5427_v11, 9  ;;  %v573_v15 = vsel %vm6792_vm4, %v568_v34, %v572_v41  ;;  %v5458_v62 = vcombine.low %v2835_v42, %v2838_v49  ;;  %v581_v40 = vor.u32 %v580_v45, %v577_v44  ;;  %v7184_v42 = vld [vmem:[%s6766_s28 + $0xb8] sm:$0xf]  ;;  %v258_v49 = vld [vmem:[%s6766_s28 + $0xbc] sm:$0x1] }
  0x79   : > { %v591_v55 = vor.u32 %v590_v26, %v586_v47  ;;  %v5178_v57 = vcombine.low %v563_v48, %v573_v15  ;;  %v596_v63 = vrot.slane %v594_v50, 5  ;;  %v2841_v58 = vrot.slane %v6919_v8, 5 }
  0x7a   : > { %v2844_v54 = vrot.slane %v6927_v23, 5  ;;  %6190 = vmatprep.mubr.msk.bf16.mxu0 %vm695_vm3, %v5458_v62  ;;  %v582_v6 = vrot.slane %v581_v40, 4  ;;  %v599_v41 = vshrl.u32 %v7155_v33, 16  ;;  %v602_v17 = vshll.u32 %v7155_v33, 16 }
  0x7b   : > { %v592_v7 = vrot.slane %v591_v55, 4  ;;  %6036 = vmatprep.mubr.msk.bf16.mxu1 %vm695_vm3, %v5178_v57  ;;  %v2842_v10 = vsel %vm7018_vm7, %v5443_v51, %v2841_v58  ;;  %v2843_v11 = vrot.slane %v2841_v58, 4  ;;  %v608_v8 = vshll.u32 %v7160_v56, 16  ;;  %v5429_v55 = vld [vmem:[%s6766_s28 + $0x60] sm:$0xe] }
  0x7c   : > { %v612_v23 = vshrl.u32 %v7160_v56, 16  ;;  %v587_v18 = vsel %vm6792_vm4, %v582_v6, %v586_v47  ;;  %v601_v25 = vrot.slane %v599_v41, 4  ;;  %v604_v31 = vrot.slane %v602_v17, 5  ;;  %v5430_v6 = vld [vmem:[%s6766_s28 + $0x6c] sm:$0xe] }
  0x7d   : > { %v597_v21 = vsel %vm6792_vm4, %v592_v7, %v596_v63  ;;  %v2845_v1 = vsel %vm7018_vm7, %v2843_v11, %v2844_v54  ;;  %v610_v28 = vrot.slane %v608_v8, 5  ;;  %v618_v34 = vshll.u32 %v257_v61, 16  ;;  %v5367_v11 = vld [vmem:[%s6766_s28 + $0x70] sm:$0xf]  ;;  %v5368_v8 = vld [vmem:[%s6766_s28 + $0x74] sm:$0x1] }
  0x7e   : > { %v5179_v38 = vcombine.low %v587_v18, %v597_v21  ;;  %v614_v60 = vrot.slane %v612_v23, 4  ;;  %v5459_v20 = vcombine.low %v2842_v10, %v2845_v1  ;;  %v605_v44 = vor.u32 %v604_v31, %v601_v25 }
  0x7f   : > { %v5444_v45 = vrot.slane %v5428_v2, 9  ;;  %v2848_v26 = vrot.slane %v6950_v4, 5  ;;  %v2851_v48 = vrot.slane %v6956_v12, 5  ;;  %v623_v50 = vshrl.u32 %v7175_v14, 16 }
  0x80   : > { %6037 = vmatmul.mubr.msk.bf16.gmra.mrb[24].mxu1 %vm695_vm3, %v5179_v38  ;;  %v615_v47 = vor.u32 %v614_v60, %v610_v28  ;;  %6191 = vmatmul.mubr.msk.bf16.gmra.mrb[8].mxu0 %vm695_vm3, %v5459_v20  ;;  %v606_v51 = vrot.slane %v605_v44, 4  ;;  %v620_v15 = vrot.slane %v618_v34, 5  ;;  %v626_v62 = vshll.u32 %v7175_v14, 16 }
  0x81   : > { %v632_v40 = vshll.u32 %v7184_v42, 16  ;;  %v2849_v4 = vsel %vm7018_vm7, %v5444_v45, %v2848_v26  ;;  %v2850_v12 = vrot.slane %v2848_v26, 4  ;;  %v625_v63 = vrot.slane %v623_v50, 4 }
  0x82   : > { %v616_v57 = vrot.slane %v615_v47, 4  ;;  %v611_v58 = vsel %vm6792_vm4, %v606_v51, %v610_v28  ;;  %v628_v54 = vrot.slane %v626_v62, 5  ;;  %v636_v2 = vshrl.u32 %v7184_v42, 16  ;;  %v5431_v47 = vld [vmem:[%s6766_s28 + $0x78] sm:$0xe] }
  0x83   : > { %v634_v61 = vrot.slane %v632_v40, 5  ;;  %v2852_v41 = vsel %vm7018_vm7, %v2850_v12, %v2851_v48  ;;  %v642_v17 = vshll.u32 %v258_v49, 16  ;;  %v5445_v10 = vrot.slane %v5429_v55, 9  ;;  %v6641_v51 = vld [vmem:[%s6766_s28] sm:$0xf] }
  0x84   : > { %v621_v7 = vsel %vm6792_vm4, %v616_v57, %v620_v15  ;;  %v5460_v18 = vcombine.low %v2849_v4, %v2852_v41  ;;  %v629_v21 = vor.u32 %v628_v54, %v625_v63  ;;  %v638_v25 = vrot.slane %v636_v2, 4  ;;  %v7222_v15 = vld [vmem:[%s6766_s28 + $0x4] sm:$0xf]  ;;  %v7226_v40 = vld [vmem:[%s6766_s28 + $0x7c] sm:$0xf] }
  0x85   : > { %v5180_v23 = vcombine.low %v611_v58, %v621_v7  ;;  %v644_v31 = vrot.slane %v642_v17, 5  ;;  %v2855_v38 = vrot.slane %v6980_v59, 5  ;;  %v2858_v1 = vrot.slane %v6987_v9, 5  ;;  %v7229_v55 = vld [vmem:[%s6766_s28 + $0x80] sm:$0x1] }
  0x86   : > { %v5446_v28 = vrot.slane %v5430_v6, 9  ;;  %6194 = vmatprep.mubr.msk.bf16.mxu0 %vm695_vm3, %v5460_v18  ;;  %v630_v60 = vrot.slane %v629_v21, 4  ;;  %v639_v20 = vor.u32 %v638_v25, %v634_v61  ;;  %v2862_v44 = vrot.slane %v5367_v11, 5  ;;  %v5373_v57 = vld [vmem:[%s6766_s28 + $0x88] sm:$0xf] }
  0x87   : > { %6040 = vmatprep.mubr.msk.bf16.mxu1 %vm695_vm3, %v5180_v23  ;;  %v2865_v34 = vrot.slane %v5368_v8, 5  ;;  %v2856_v45 = vsel %vm7018_vm7, %v5445_v10, %v2855_v38  ;;  %v2857_v59 = vrot.slane %v2855_v38, 4  ;;  %v5198_v62 = vcombine.low %v6641_v51, %v7222_v15  ;;  %v5374_v54 = vld [vmem:[%s6766_s28 + $0x8c] sm:$0x1]  ;;  %v5376_v17 = vld [vmem:[%s6766_s28 + $0x94] sm:$0xf] }
  0x88   : > { %v635_v9 = vsel %vm6792_vm4, %v630_v60, %v634_v61  ;;  %v640_v26 = vrot.slane %v639_v20, 4  ;;  %v2863_v48 = vsel %vm7018_vm7, %v5446_v28, %v2862_v44  ;;  %v2864_v49 = vrot.slane %v2862_v44, 4  ;;  %v5432_v61 = vld [vmem:[%s6766_s28 + $0x84] sm:$0xe]  ;;  %v5433_v23 = vld [vmem:[%s6766_s28 + $0x90] sm:$0xe] }
  0x89   : > { %v2859_v50 = vsel %vm7018_vm7, %v2857_v59, %v2858_v1  ;;  %v5447_v58 = vrot.slane %v5431_v47, 9  ;;  %v2869_v7 = vrot.slane %v7226_v40, 5  ;;  %v2872_v41 = vrot.slane %v7229_v55, 5  ;;  %v5377_v25 = vld [vmem:[%s6766_s28 + $0x98] sm:$0x1] }
  0x8a   : > { %v645_v4 = vsel %vm6792_vm4, %v640_v26, %v644_v31  ;;  %v5461_v12 = vcombine.low %v2856_v45, %v2859_v50  ;;  %v2866_v63 = vsel %vm7018_vm7, %v2864_v49, %v2865_v34  ;;  %v5448_v10 = vrot.slane %v5432_v61, 9  ;;  %v5379_v31 = vld [vmem:[%s6766_s28 + $0xa0] sm:$0xf]  ;;  %v5380_v60 = vld [vmem:[%s6766_s28 + $0xa4] sm:$0x1] }
  0x8b   : > { %v5181_v2 = vcombine.low %v635_v9, %v645_v4  ;;  %v5462_v6 = vcombine.low %v2863_v48, %v2866_v63  ;;  %v2876_v11 = vrot.slane %v5373_v57, 5  ;;  %v2879_v8 = vrot.slane %v5374_v54, 5  ;;  %v5434_v20 = vld [vmem:[%s6766_s28 + $0x9c] sm:$0xe]  ;;  %v6643_v44 = vld [vmem:[%s6766_s28 + $0xc] sm:$0xf] }
  0x8c   : > { %6195 = vmatmul.mubr.msk.bf16.gmra.mrb[12].mxu0 %vm695_vm3, %v5461_v12  ;;  %v2870_v18 = vsel %vm7018_vm7, %v5447_v58, %v2869_v7  ;;  %v2871_v21 = vrot.slane %v2869_v7, 4  ;;  %v2883_v28 = vrot.slane %v5376_v17, 5  ;;  %v7256_v34 = vld [vmem:[%s6766_s28 + $0x10] sm:$0xf]  ;;  %v6645_v47 = vld [vmem:[%s6766_s28 + $0x18] sm:$0xf] }
  0x8d   : > { %6041 = vmatmul.mubr.msk.bf16.gmra.mrb[28].mxu1 %vm695_vm3, %v5181_v2  ;;  %6198 = vmatprep.mubr.msk.bf16.mxu0 %vm695_vm3, %v5462_v6  ;;  %v2877_v38 = vsel %vm7018_vm7, %v5448_v10, %v2876_v11  ;;  %v2878_v1 = vrot.slane %v2876_v11, 4  ;;  %v5199_v45 = vcombine.low %v6643_v44, %v7256_v34  ;;  %v7263_v9 = vld [vmem:[%s6766_s28 + $0x1c] sm:$0xf]  ;;  %v5449_v48 = vrot.slane %v5433_v23, 9  ;;  %v5382_v57 = vld [vmem:[%s6766_s28 + $0xac] sm:$0xf] }
  0x8e   : > { %6046 = vmatprep.mubr.msk.bf16.mxu1 %vm695_vm3, %v5198_v62  ;;  %v2873_v59 = vsel %vm7018_vm7, %v2871_v21, %v2872_v41  ;;  %v5200_v26 = vcombine.low %v6645_v47, %v7263_v9  ;;  %v2885_v51 = vrot.slane %v2883_v28, 4  ;;  %v2886_v62 = vrot.slane %v5377_v25, 5  ;;  %v6647_v54 = vld [vmem:[%s8530_s1 + $0x8] sm:$0xf]  ;;  %v5385_v2 = vld [vmem:[%s6766_s28 + $0xb8] sm:$0xf] }
  0x8f   : > { %v5463_v49 = vcombine.low %v2870_v18, %v2873_v59  ;;  %v2880_v50 = vsel %vm7018_vm7, %v2878_v1, %v2879_v8  ;;  %v5450_v12 = vrot.slane %v5434_v20, 9  ;;  %v2890_v63 = vrot.slane %v5379_v31, 5  ;;  %v7278_v7 = vld [vmem:[%s8530_s1 + $0xc] sm:$0xf]  ;;  %v5383_v10 = vld [vmem:[%s6766_s28 + $0xb0] sm:$0x1] }
  0x90   : > { %v5464_v4 = vcombine.low %v2877_v38, %v2880_v50  ;;  %v2893_v58 = vrot.slane %v5380_v60, 5  ;;  %v1462_v61 = vsel %vm744_vm0, %v6647_v54, 0  ;;  %v2884_v41 = vsel %vm7018_vm7, %v5449_v48, %v2883_v28  ;;  %v5435_v11 = vld [vmem:[%s6766_s28 + $0xa8] sm:$0xe]  ;;  %v5386_v25 = vld [vmem:[%s6766_s28 + $0xbc] sm:$0x1] }
  0x91   : > { %v2892_v6 = vrot.slane %v2890_v63, 4  ;;  %v2887_v17 = vsel %vm7018_vm7, %v2885_v51, %v2886_v62  ;;  %v2897_v8 = vrot.slane %v5382_v57, 5  ;;  %v2891_v23 = vsel %vm7018_vm7, %v5450_v12, %v2890_v63  ;;  %v5436_v31 = vld [vmem:[%s6766_s28 + $0xb4] sm:$0xe]  ;;  %v6648_v38 = vld [vmem:[%s6766_s28 + $0x24] sm:$0xf] }
  0x92   : > { %v2904_v21 = vrot.slane %v5385_v2, 5  ;;  %v7299_v1 = vld [vmem:[%s6766_s28 + $0x28] sm:$0xf]  ;;  %v5465_v60 = vcombine.low %v2884_v41, %v2887_v17  ;;  %v5451_v44 = vrot.slane %v5435_v11, 9  ;;  %v2900_v59 = vrot.slane %v5383_v10, 5 }
  0x93   : > { %v2894_v18 = vsel %vm7018_vm7, %v2892_v6, %v2893_v58  ;;  %v5201_v28 = vcombine.low %v6648_v38, %v7299_v1  ;;  %v6650_v47 = vld [vmem:[%s6766_s28 + $0x30] sm:$0xf]  ;;  %v2907_v51 = vrot.slane %v5386_v25, 5  ;;  %v5388_v62 = vld [vmem:[%s6766_s28 + $0xc4] sm:$0xf]  ;;  %v2293_v25 = vshrl.u32 %v7226_v40, 16 }
  0x94   : > { %6199 = vmatmul.mubr.msk.bf16.gmra.mrb[16].mxu0 %vm695_vm3, %v5463_v49  ;;  %v5466_v20 = vcombine.low %v2891_v23, %v2894_v18  ;;  %v5452_v49 = vrot.slane %v5436_v31, 9  ;;  %v2906_v50 = vrot.slane %v2904_v21, 4  ;;  %v2898_v57 = vsel %vm7018_vm7, %v5451_v44, %v2897_v8  ;;  %v5437_v12 = vld [vmem:[%s6766_s28 + $0xc0] sm:$0xe]  ;;  %v6652_v41 = vld [vmem:[%s6766_s28 + $0x3c] sm:$0xf] }
  0x95   : > { %6047 = vmatmul.mubr.msk.bf16.vlgmr.msra.gmra.mrb[0].mxu1 %vm695_vm3, %v5199_v45  ;;  %6202 = vmatprep.mubr.msk.bf16.mxu0 %vm695_vm3, %v5464_v4  ;;  %v2899_v45 = vrot.slane %v2897_v8, 4  ;;  %v2911_v63 = vrot.slane %v5388_v62, 5  ;;  %v5453_v6 = vrot.slane %v5437_v12, 9  ;;  %v7324_v17 = vld [vmem:[%s6766_s28 + $0x40] sm:$0xf]  ;;  %v5204_v18 = vcombine.low %v6931_v27, %v6934_v36  ;;  %v6604_v62 = vld [vmem:[%s6766_s28 + $0x24] sm:$0xff]  }
  0x96   : > { %6079 = vmatpush3.bf16.msra.mxu1 %v1462_v61  ;;  %6050 = vmatprep.mubr.msk.bf16.mxu1 %vm695_vm3, %v5200_v26  ;;  %v7304_v26 = vld [vmem:[%s6766_s28 + $0x34] sm:$0xf]  ;;  %v2905_v58 = vsel %vm7018_vm7, %v5452_v49, %v2904_v21  ;;  %v2908_v54 = vsel %vm7018_vm7, %v2906_v50, %v2907_v51  ;;  %v5389_v61 = vld [vmem:[%s6766_s28 + $0xc8] sm:$0x1]  ;;  %v5203_v10 = vcombine.low %v6652_v41, %v7324_v17  ;;  %v2289_v21 = vshll.u32 %v7226_v40, 16 }
  0x97   : > { %6577 = vmatprep.subr.msk.bf16.mxu1 %vm744_vm0, %v7278_v7  ;;  %v5202_v48 = vcombine.low %v6650_v47, %v7304_v26  ;;  %v2901_v4 = vsel %vm7018_vm7, %v2899_v45, %v2900_v59  ;;  %v5468_v11 = vcombine.low %v2905_v58, %v2908_v54  ;;  %v2913_v8 = vrot.slane %v2911_v63, 4  ;;  %v1201_v45 = vld [vmem:[%s6766_s28] sm:$0xe]  ;;  %v1202_v59 = vld [vmem:[%s6766_s28 + $0xc] sm:$0xe] }
  0x98   : > { %v5467_v2 = vcombine.low %v2898_v57, %v2901_v4  ;;  %v2914_v23 = vrot.slane %v5389_v61, 5  ;;  %v2912_v31 = vsel %vm7018_vm7, %v5453_v6, %v2911_v63  ;;  %v7339_v27 = vrot.slane %v2289_v21, 5  ;;  %v1205_v41 = vld [vmem:[%s6766_s28 + $0x30] sm:$0xe] }
  0x99   : > { %v2295_v36 = vrot.slane %v2293_v25, 4  ;;  %v5206_v44 = vcombine.low %v6991_v19, %v6997_v35  ;;  %v2299_v47 = vshll.u32 %v7229_v55, 16  ;;  %v5230_v19 = vrot.slane %v1201_v45, 9 }
  0x9a   : > { %v2915_v38 = vsel %vm7018_vm7, %v2913_v8, %v2914_v23  ;;  %8552 = vst [vmem:[#allocation3_spill] sm:$0xff] %v7339_v27  ;;  %v5231_v35 = vrot.slane %v1202_v59, 9  ;;  %v1268_v4 = vrot.slane %v7263_v9, 5  ;;  %v1275_v12 = vrot.slane %v7299_v1, 5  ;;  %v1206_v8 = vld [vmem:[%s6766_s28 + $0x3c] sm:$0xe] }
  0x9b   : > { %v5469_v40 = vcombine.low %v2912_v31, %v2915_v38  ;;  %v2296_v49 = vor.u32 %v2295_v36, %v7339_v27  ;;  %v7359_v51 = vrot.slane %v2299_v47, 5  ;;  %v5207_v58 = vcombine.low %v7012_v0, %v7025_v29  ;;  %v1207_v31 = vld [vmem:[%s6766_s28 + $0x48] sm:$0xe]  ;;  %v6658_v59 = vld [vmem:[%s6766_s28 + $0x38] sm:$0x1] }
  0x9c   : > { %6203 = vmatmul.mubr.msk.bf16.gmra.mrb[20].mxu0 %vm695_vm3, %v5465_v60  ;;  %v5205_v60 = vcombine.low %v6960_v24, %v6966_v37  ;;  %v6655_v24 = vld [vmem:[%s6766_s28 + $0x14] sm:$0x1]  ;;  %v4097_v54 = vsel %vm744_vm0, %v7083_v22, 0  ;;  %v5208_v61 = vcombine.low %v7044_v53, %v7051_v16  ;;  %v5209_v6 = vcombine.low %v7070_v39, %v7078_v43  ;;  %v6656_v16 = vld [vmem:[%s6766_s28 + $0x20] sm:$0x1] }
  0x9d   : > { %6051 = vmatmul.mubr.msk.bf16.gmra.mrb[4].mxu1 %vm695_vm3, %v5201_v28  ;;  %6206 = vmatprep.mubr.msk.bf16.mxu0 %vm695_vm3, %v5466_v20  ;;  %v1261_v28 = vrot.slane %v7256_v34, 5  ;;  %v6602_v20 = vld [vmem:[%s6766_s28 + $0x18] sm:$0xff]   ;;  %v6654_v34 = vld [vmem:[%s6766_s28 + $0x8] sm:$0x1]  ;;  %v1264_v37 = vrot.slane %v6655_v24, 5  ;;  %8553 = vst [vmem:[#allocation4_spill] sm:$0xff] %v7359_v51  ;;  %v5210_v9 = vcombine.low %v7102_v5, %v7114_v30 }
  0x9e   : > { %6054 = vmatprep.mubr.msk.bf16.mxu1 %vm695_vm3, %v5202_v48  ;;  %v1254_v48 = vrot.slane %v7222_v15, 5  ;;  %v1257_v50 = vrot.slane %v6654_v34, 5  ;;  %v1203_v15 = vld [vmem:[%s6766_s28 + $0x18] sm:$0xe]  ;;  %v7364_v63 = vrot.slane %v2296_v49, 4  ;;  %v1271_v22 = vrot.slane %v6656_v16, 5 }
  0x9f   : > { %v1263_v55 = vrot.slane %v1261_v28, 4  ;;  %v5232_v1 = vrot.slane %v1203_v15, 9  ;;  %v7386_v29 = vsel %vm7018_vm7, %v5231_v35, %v1261_v28  ;;  %v1277_v25 = vrot.slane %v1275_v12, 4  ;;  %v5550_v24 = vld [vmem:[%s6766_s28 + $0x18] sm:$0xf] }
  0xa0   : > { %v1256_v57 = vrot.slane %v1254_v48, 4  ;;  %8554 = vst [vmem:[#allocation5_spill] sm:$0xff] %v7364_v63  ;;  %v7382_v0 = vsel %vm7018_vm7, %v5230_v19, %v1254_v48  ;;  %v1285_v47 = vrot.slane %v6658_v59, 5  ;;  %v7423_v49 = vsel %vm744_vm0, %v7278_v7, 0  ;;  %v5551_v7 = vld [vmem:[%s6766_s28 + $0x1c] sm:$0xf] }
  0xa1   : > { %v7390_v53 = vsel %vm7018_vm7, %v1263_v55, %v1264_v37  ;;  %v7427_v34 = vsel %vm7018_vm7, %v5232_v1, %v1268_v4  ;;  %v6608_v37 = vld [vmem:[%s6766_s28 + $0x3c] sm:$0xff]   ;;  %v5235_v35 = vrot.slane %v1206_v8, 9  ;;  %v6659_v55 = vld [vmem:[%s6766_s28 + $0x44] sm:$0x1]  ;;  %v3619_v8 = vshll.u32 %v5550_v24, 16 }
  0xa2   : > { %v7401_v23 = vsel %vm7018_vm7, %v1256_v57, %v1257_v50  ;;  %v1208_v50 = vld [vmem:[%s6766_s28 + $0x54] sm:$0xe]  ;;  %v1292_v15 = vrot.slane %v6659_v55, 5  ;;  %v5554_v39 = vld [vmem:[%s6766_s28 + $0x28] sm:$0xf] }
  0xa3   : > { %v6666_v5 = vld [vmem:[%s6766_s28 + $0x70] sm:$0xf] }
  0xa4   : > { %6207 = vmatmul.mubr.msk.bf16.gmra.mrb[24].mxu0 %vm695_vm3, %v5467_v2  ;;  %v1204_v2 = vld [vmem:[%s6766_s28 + $0x24] sm:$0xe]  ;;  %v1317_v30 = vrot.slane %v6666_v5, 5 }
  0xa5   : > { %6055 = vmatmul.mubr.msk.bf16.gmra.mrb[8].mxu1 %vm695_vm3, %v5203_v10  ;;  %6210 = vmatprep.mubr.msk.bf16.mxu0 %vm695_vm3, %v5468_v11  ;;  %v1282_v10 = vrot.slane %v7304_v26, 5  ;;  %v6606_v11 = vld [vmem:[%s6766_s28 + $0x30] sm:$0xff]   ;;  %v7397_v26 = vld [vmem:[%s8530_s1 + $0x20] sm:$0xf]  ;;  %v5233_v21 = vrot.slane %v1204_v2, 9 }
  0xa6   : > { %6058 = vmatprep.mubr.msk.bf16.mxu1 %vm695_vm3, %v5204_v18  ;;  %v1270_v18 = vrot.slane %v1268_v4, 4  ;;  %v1319_v48 = vrot.slane %v1317_v30, 4 }
  0xa7   : > { %v1284_v45 = vrot.slane %v1282_v10, 4  ;;  %v7434_v19 = vsel %vm7018_vm7, %v5233_v21, %v1275_v12  ;;  %v3629_v21 = vshrl.u32 %v5551_v7, 16 }
  0xa8   : > { %v7443_v4 = vsel %vm7018_vm7, %v1270_v18, %v1271_v22  ;;  %v3616_v22 = vshrl.u32 %v5550_v24, 16  ;;  %v3625_v18 = vshll.u32 %v5551_v7, 16  ;;  %v5553_v24 = vld [vmem:[%s6766_s28 + $0x24] sm:$0xf] }
  0xa9   : > { %v7456_v1 = vsel %vm7018_vm7, %v1284_v45, %v1285_v47 }
  0xaa   : > { %v3618_v43 = vrot.slane %v3616_v22, 4  ;;  %v7498_v7 = vrot.slane %v3625_v18, 5  ;;  %v3643_v22 = vshll.u32 %v5553_v24, 16  ;;  %v3653_v18 = vshrl.u32 %v5554_v39, 16 }
  0xac   : > { %6211 = vmatmul.mubr.msk.bf16.gmra.mrb[28].mxu0 %vm695_vm3, %v5469_v40  ;;  %v6657_v40 = vld [vmem:[%s6766_s28 + $0x2c] sm:$0x1]  ;;  %v3645_v27 = vrot.slane %v3643_v22, 5 }
  0xad   : > { %6059 = vmatmul.mubr.msk.bf16.gmra.mrb[12].mxu1 %vm695_vm3, %v5205_v60  ;;  %6216 = vmatprep.mubr.msk.bf16.mxu0 %vm695_vm3, %v6602_v20  ;;  %v1278_v28 = vrot.slane %v6657_v40, 5  ;;  %v1289_v60 = vrot.slane %v7324_v17, 5  ;;  %v6662_v40 = vld [vmem:[%s6766_s28 + $0x50] sm:$0x1]  ;;  %v6667_v17 = vld [vmem:[%s6766_s28 + $0x74] sm:$0x1] }
  0xae   : > { %6062 = vmatprep.mubr.msk.bf16.mxu1 %vm695_vm3, %v5206_v44  ;;  %v5234_v44 = vrot.slane %v1205_v41, 9  ;;  %v5237_v41 = vrot.slane %v1208_v50, 9  ;;  %v1209_v50 = vld [vmem:[%s6766_s28 + $0x60] sm:$0xe]  ;;  %v5555_v20 = vld [vmem:[%s6766_s28 + $0x2c] sm:$0x1] }
  0xaf   : > { %v1291_v12 = vrot.slane %v1289_v60, 4  ;;  %v7469_v45 = vsel %vm7018_vm7, %v5235_v35, %v1289_v60  ;;  %v6663_v35 = vld [vmem:[%s6766_s28 + $0x5c] sm:$0x1] }
  0xb0   : > { %v7452_v2 = vsel %vm7018_vm7, %v5234_v44, %v1282_v10  ;;  %v1306_v55 = vrot.slane %v6663_v35, 5  ;;  %v1210_v35 = vld [vmem:[%s6766_s28 + $0x6c] sm:$0xe] }
  0xb1   : > { %v7473_v59 = vsel %vm7018_vm7, %v1291_v12, %v1292_v15  ;;  %v6664_v15 = vld [vmem:[%s6766_s28 + $0x64] sm:$0xf]  ;;  %v3631_v12 = vrot.slane %v3629_v21, 4  ;;  %v5239_v5 = vrot.slane %v1210_v35, 9 }
  0xb2   : > { %v6614_v21 = vld [vmem:[%s6766_s28 + $0x60] sm:$0xff]  }
  0xb4   : > { %6217 = vmatmul.mubr.msk.bf16.vlgmr.msra.gmra.mrb[0].mxu0 %vm695_vm3, %v6604_v62  ;;  %v6660_v62 = vld [vmem:[%s6766_s28 + $0x4c] sm:$0xf] }
  0xb5   : > { %6063 = vmatmul.mubr.msk.bf16.gmra.mrb[16].mxu1 %vm695_vm3, %v5207_v58  ;;  %6249 = vmatpush3.bf16.msra.mxu0 %v4097_v54  ;;  %v1296_v57 = vrot.slane %v6660_v62, 5  ;;  %v7447_v58 = vsel %vm7018_vm7, %v1277_v25, %v1278_v28  ;;  %v5236_v54 = vrot.slane %v1207_v31, 9  ;;  %v1299_v28 = vrot.slane %v6662_v40, 5 }
  0xb6   : > { %6066 = vmatprep.mubr.msk.bf16.mxu1 %vm695_vm3, %v5208_v61  ;;  %6220 = vmatprep.mubr.msk.bf16.mxu0 %vm695_vm3, %v6606_v11  ;;  %v6610_v61 = vld [vmem:[%s6766_s28 + $0x48] sm:$0xff]   ;;  %v6661_v11 = vld [vmem:[%s6766_s28 + $0x58] sm:$0xf]  ;;  %v1310_v62 = vrot.slane %v6664_v15, 5  ;;  %v5557_v15 = vld [vmem:[%s6766_s28 + $0x34] sm:$0xf] }
  0xb7   : > { %6583 = vmatprep.subr.msk.bf16.mxu0 %vm744_vm0, %v7397_v26  ;;  %v1303_v16 = vrot.slane %v6661_v11, 5  ;;  %v1298_v31 = vrot.slane %v1296_v57, 4  ;;  %v7477_v47 = vsel %vm7018_vm7, %v5236_v54, %v1296_v57  ;;  %v5552_v57 = vld [vmem:[%s6766_s28 + $0x20] sm:$0x1]  ;;  %v5556_v54 = vld [vmem:[%s6766_s28 + $0x30] sm:$0xf] }
  0xb8   : > { %v5238_v11 = vrot.slane %v1209_v50, 9  ;;  %v3667_v50 = vshll.u32 %v5556_v54, 16  ;;  %v3635_v25 = vshll.u32 %v5552_v57, 16  ;;  %v3673_v36 = vshll.u32 %v5557_v15, 16 }
  0xb9   : > { %v7488_v60 = vsel %vm7018_vm7, %v5237_v41, %v1303_v16  ;;  %v7504_v41 = vsel %vm7018_vm7, %v1298_v31, %v1299_v28  ;;  %v1312_v31 = vrot.slane %v1310_v62, 4  ;;  %v3664_v28 = vshrl.u32 %v5556_v54, 16 }
  0xba   : > { %v7546_v35 = vrot.slane %v3673_v36, 5 }
  0xbc   : > { %6221 = vmatmul.mubr.msk.bf16.gmra.mrb[4].mxu0 %vm695_vm3, %v6608_v37  ;;  %v1305_v37 = vrot.slane %v1303_v16, 4  ;;  %v6665_v16 = vld [vmem:[%s6766_s28 + $0x68] sm:$0x1] }
  0xbd   : > { %6067 = vmatmul.mubr.msk.bf16.gmra.mrb[20].mxu1 %vm695_vm3, %v5209_v6  ;;  %6224 = vmatprep.mubr.msk.bf16.mxu0 %vm695_vm3, %v6610_v61  ;;  %v3621_v6 = vrot.slane %v3619_v8, 5  ;;  %v6612_v61 = vld [vmem:[%s6766_s28 + $0x54] sm:$0xff]   ;;  %v1313_v40 = vrot.slane %v6665_v16, 5  ;;  %v3649_v8 = vshll.u32 %v5554_v39, 16  ;;  %v3632_v16 = vor.u32 %v3631_v12, %v7498_v7 }
  0xbe   : > { %6070 = vmatprep.mubr.msk.bf16.mxu1 %vm695_vm3, %v5210_v9  ;;  %v3640_v9 = vshrl.u32 %v5553_v24, 16  ;;  %v7513_v44 = vsel %vm7018_vm7, %v1305_v37, %v1306_v55  ;;  %v1320_v24 = vrot.slane %v6667_v17, 5  ;;  %v3677_v39 = vshrl.u32 %v5557_v15, 16 }
  0xbf   : > { %v3622_v10 = vor.u32 %v3621_v6, %v3618_v43  ;;  %v7519_v37 = vrot.slane %v3649_v8, 5  ;;  %v3655_v55 = vrot.slane %v3653_v18, 4  ;;  %v8555_v43 = vcombine.low %v7123_v52, %v7134_v46  ;;  %v6668_v8 = vld [vmem:[%s6766_s28 + $0x7c] sm:$0xf]  ;;  %v7555_v18 = vld [vmem:[%s6766_s28 + $0x38] sm:$0x1] }
  0xc0   : > { %v3642_v38 = vrot.slane %v3640_v9, 4  ;;  %v7528_v17 = vsel %vm7018_vm7, %v5238_v11, %v1310_v62  ;;  %v7532_v57 = vsel %vm7018_vm7, %v1312_v31, %v1313_v40  ;;  %v3666_v6 = vrot.slane %v3664_v28, 4  ;;  %8557 = vst [vmem:[#allocation6_spill] sm:$0xff] %v7555_v18 }
  0xc1   : > { %v3669_v12 = vrot.slane %v3667_v50, 5  ;;  %v8556_v52 = vcombine.low %v7155_v33, %v7160_v56  ;;  %v3623_v46 = vrot.slane %v3622_v10, 4  ;;  %v3633_v54 = vrot.slane %v3632_v16, 4  ;;  %v6616_v33 = vld [vmem:[%s6766_s28 + $0x6c] sm:$0xff]   ;;  %v1212_v16 = vld [vmem:[%s6766_s28 + $0x84] sm:$0xe] }
  0xc2   : > { %v3659_v62 = vshll.u32 %v5555_v20, 16  ;;  %v7540_v11 = vsel %vm7018_vm7, %v5239_v5, %v1317_v30  ;;  %v7544_v40 = vsel %vm7018_vm7, %v1319_v48, %v1320_v24  ;;  %v3679_v9 = vrot.slane %v3677_v39, 4  ;;  %v6617_v48 = vld [vmem:[%s6766_s28 + $0x78] sm:$0xff]  }
  0xc3   : > { %v3646_v10 = vor.u32 %v3645_v27, %v3642_v38  ;;  %v3656_v20 = vor.u32 %v3655_v55, %v7519_v37  ;;  %v1324_v30 = vrot.slane %v6668_v8, 5  ;;  %v3670_v38 = vor.u32 %v3669_v12, %v3666_v6  ;;  %v5559_v5 = vld [vmem:[%s6766_s28 + $0x3c] sm:$0xf] }
  0xc4   : > { %6225 = vmatmul.mubr.msk.bf16.gmra.mrb[8].mxu0 %vm695_vm3, %v6612_v61  ;;  %v3637_v61 = vrot.slane %v3635_v25, 5  ;;  %v1211_v25 = vld [vmem:[%s6766_s28 + $0x78] sm:$0xe]  ;;  %v7571_v50 = vrot.slane %v3659_v62, 5  ;;  %v3680_v39 = vor.u32 %v3679_v9, %v7546_v35  ;;  %v3683_v55 = vshll.u32 %v7555_v18, 16 }
  0xc5   : > { %6071 = vmatmul.mubr.msk.bf16.gmra.mrb[24].mxu1 %vm695_vm3, %v8555_v43  ;;  %6228 = vmatprep.mubr.msk.bf16.mxu0 %vm695_vm3, %v6614_v21  ;;  %v3628_v21 = vsel %vm6792_vm4, %v3623_v46, %v7498_v7  ;;  %v5240_v24 = vrot.slane %v1211_v25, 9  ;;  %v6669_v43 = vld [vmem:[%s6766_s28 + $0x88] sm:$0xf]  ;;  %v7579_v7 = vld [vmem:[%s6766_s28 + $0x40] sm:$0xf]  ;;  %v3647_v12 = vrot.slane %v3646_v10, 4  ;;  %v8559_v62 = vcombine.low %v7175_v14, %v7184_v42 }
  0xc6   : > { %6074 = vmatprep.mubr.msk.bf16.mxu1 %vm695_vm3, %v8556_v52  ;;  %v3638_v31 = vsel %vm6792_vm4, %v3633_v54, %v3637_v61  ;;  %v1331_v6 = vrot.slane %v6669_v43, 5  ;;  %8558 = vst [vmem:[#allocation7_spill] sm:$0xff] %v7579_v7  ;;  %v3657_v52 = vrot.slane %v3656_v20, 4  ;;  %v1326_v46 = vrot.slane %v1324_v30, 4  ;;  %v6670_v54 = vld [vmem:[%s6766_s28 + $0x80] sm:$0x1] }
  0xc7   : > { %v1327_v61 = vrot.slane %v6670_v54, 5  ;;  %v3671_v9 = vrot.slane %v3670_v38, 4  ;;  %v5241_v25 = vrot.slane %v1212_v16, 9  ;;  %v3688_v8 = vshrl.u32 %v5559_v5, 16  ;;  %v6618_v10 = vld [vmem:[%s6766_s28 + $0x84] sm:$0xff]  }
  0xc8   : > { %v3691_v43 = vshll.u32 %v5559_v5, 16  ;;  %v7593_v20 = vcombine.low %v3628_v21, %v3638_v31  ;;  %v7597_v14 = vsel %vm744_vm0, %v7397_v26, 0  ;;  %v3701_v38 = vshrl.u32 %v7579_v7, 16  ;;  %v6619_v21 = vld [vmem:[%s6766_s28 + $0x90] sm:$0xff]   ;;  %v6675_v18 = vld [vmem:[%s6766_s28 + $0xa0] sm:$0xf] }
  0xc9   : > { %v3681_v16 = vrot.slane %v3680_v39, 4  ;;  %v3685_v5 = vrot.slane %v3683_v55, 5  ;;  %v1333_v54 = vrot.slane %v1331_v6, 4  ;;  %v3652_v31 = vsel %vm6792_vm4, %v3647_v12, %v7519_v37 }
  0xca   : > { %v3662_v26 = vsel %vm6792_vm4, %v3657_v52, %v7571_v50  ;;  %v7612_v39 = vsel %vm7018_vm7, %v5240_v24, %v1324_v30  ;;  %v7616_v55 = vsel %vm7018_vm7, %v1326_v46, %v1327_v61  ;;  %v3676_v37 = vsel %vm6792_vm4, %v3671_v9, %v7546_v35  ;;  %v5565_v30 = vld [vmem:[%s6766_s28 + $0x54] sm:$0xf]  ;;  %v7633_v24 = vld [vmem:[%s6766_s28 + $0x58] sm:$0xf]  ;;  %v7638_v61 = vld [vmem:[%s6766_s28 + $0x90] sm:$0xe] }
  0xcb   : > { %v7629_v12 = vsel %vm7018_vm7, %v5241_v25, %v1331_v6  ;;  %v3690_v50 = vrot.slane %v3688_v8, 4  ;;  %v3693_v52 = vrot.slane %v3691_v43, 5  ;;  %v3703_v46 = vrot.slane %v3701_v38, 4 }
  0xcc   : > { %6229 = vmatmul.mubr.msk.bf16.gmra.mrb[12].mxu0 %vm695_vm3, %v6616_v33  ;;  %v8560_v33 = vcombine.low %v7382_v0, %v7401_v23  ;;  %v6671_v0 = vld [vmem:[%s6766_s28 + $0x8c] sm:$0x1]  ;;  %v3686_v36 = vsel %vm6792_vm4, %v3681_v16, %v3685_v5  ;;  %v3736_v25 = vshrl.u32 %v5565_v30, 16  ;;  %v3739_v8 = vshll.u32 %v5565_v30, 16 }
  0xcd   : > { %6075 = vmatmul.mubr.msk.bf16.gmra.mrb[28].mxu1 %vm695_vm3, %v8559_v62  ;;  %6232 = vmatprep.mubr.msk.bf16.mxu0 %vm695_vm3, %v6617_v48  ;;  %v3697_v48 = vshll.u32 %v7579_v7, 16  ;;  %v1334_v23 = vrot.slane %v6671_v0, 5  ;;  %v5562_v62 = vld [vmem:[%s6766_s28 + $0x48] sm:$0xf]  ;;  %v7622_v0 = vld [vmem:[%s6766_s28 + $0x4c] sm:$0xf]  ;;  %v8562_v38 = vcombine.low %v7386_v29, %v7390_v53  ;;  %v7656_v16 = vcombine.low %v3652_v31, %v3662_v26 }
  0xce   : > { %6080 = vmatprep.mubr.msk.bf16.mxu1 %vm695_vm3, %v8560_v33  ;;  %v7619_v33 = vld [vmem:[%s6766_s28 + $0x44] sm:$0x1]  ;;  %v3712_v27 = vshrl.u32 %v5562_v62, 16  ;;  %v3715_v15 = vshll.u32 %v5562_v62, 16  ;;  %v3721_v6 = vshll.u32 %v7622_v0, 16  ;;  %v3725_v9 = vshrl.u32 %v7622_v0, 16 }
  0xcf   : > { %8561 = vst [vmem:[#allocation8_spill] sm:$0xff] %v7619_v33  ;;  %v7635_v28 = vrot.slane %v3697_v48, 5  ;;  %v7644_v35 = vsel %vm7018_vm7, %v1333_v54, %v1334_v23  ;;  %v3745_v43 = vshll.u32 %v7633_v24, 16  ;;  %v3749_v48 = vshrl.u32 %v7633_v24, 16  ;;  %v5568_v31 = vld [vmem:[%s6766_s28 + $0x60] sm:$0xf] }
  0xd0   : > { %v3707_v5 = vshll.u32 %v7619_v33, 16  ;;  %v5242_v54 = vrot.slane %v7638_v61, 9  ;;  %v8563_v23 = vcombine.low %v7427_v34, %v7443_v4  ;;  %v7667_v29 = vcombine.low %v3676_v37, %v3686_v36  ;;  %v6620_v26 = vld [vmem:[%s6766_s28 + $0x9c] sm:$0xff]   ;;  %v6621_v30 = vld [vmem:[%s6766_s28 + $0xa8] sm:$0xff]   ;;  %v6672_v36 = vld [vmem:[%s8530_s1 + $0x10] sm:$0xf] }
  0xd1   : > { %v3694_v53 = vor.u32 %v3693_v52, %v3690_v50  ;;  %v3714_v62 = vrot.slane %v3712_v27, 4  ;;  %v7678_v34 = vrot.slane %v3721_v6, 5  ;;  %v3727_v4 = vrot.slane %v3725_v9, 4  ;;  %v6673_v6 = vld [vmem:[%s6766_s28 + $0x94] sm:$0xf] }
  0xd2   : > { %v3738_v27 = vrot.slane %v3736_v25, 4  ;;  %v3741_v37 = vrot.slane %v3739_v8, 5  ;;  %v7687_v50 = vrot.slane %v3745_v43, 5  ;;  %v3751_v52 = vrot.slane %v3749_v48, 4  ;;  %v7693_v9 = vld [vmem:[%s6766_s28 + $0x64] sm:$0xf] }
  0xd3   : > { %8564 = vst [vmem:[#allocation9_spill] sm:$0xff] %v7693_v9  ;;  %v3760_v61 = vshrl.u32 %v5568_v31, 16  ;;  %v7695_v22 = vrot.slane %v3694_v53, 4  ;;  %v1345_v25 = vrot.slane %v6675_v18, 5  ;;  %v3728_v43 = vor.u32 %v3727_v4, %v7678_v34 }
  0xd4   : > { %6233 = vmatmul.mubr.msk.bf16.gmra.mrb[16].mxu0 %vm695_vm3, %v6618_v10  ;;  %v3763_v10 = vshll.u32 %v5568_v31, 16  ;;  %v3742_v31 = vor.u32 %v3741_v37, %v3738_v27  ;;  %v3752_v53 = vor.u32 %v3751_v52, %v7687_v50  ;;  %v8565_v18 = vcombine.low %v7434_v19, %v7447_v58  ;;  %v6622_v37 = vld [vmem:[%s6766_s28 + $0xb4] sm:$0xff]  }
  0xd5   : > { %6081 = vmatmul.mubr.msk.bf16.vlgmr.msra.gmra.mrb[0].mxu1 %vm695_vm3, %v8562_v38  ;;  %6236 = vmatprep.mubr.msk.bf16.mxu0 %vm695_vm3, %v6619_v21  ;;  %v3717_v21 = vrot.slane %v3715_v15, 5  ;;  %v7676_v38 = vld [vmem:[%s6766_s28 + $0x50] sm:$0x1]  ;;  %v7685_v15 = vld [vmem:[%s6766_s28 + $0x5c] sm:$0x1]  ;;  %v8566_v27 = vcombine.low %v7452_v2, %v7456_v1  ;;  %v1347_v52 = vrot.slane %v1345_v25, 4 }
  0xd6   : > { %6113 = vmatpush3.bf16.msra.mxu1 %v7423_v49  ;;  %6084 = vmatprep.mubr.msk.bf16.mxu1 %vm695_vm3, %v8563_v23  ;;  %v3704_v49 = vor.u32 %v3703_v46, %v7635_v28  ;;  %v7689_v46 = vrot.slane %v3707_v5, 5  ;;  %v1338_v23 = vrot.slane %v6673_v6, 5  ;;  %v3731_v48 = vshll.u32 %v7676_v38, 16  ;;  %v1214_v5 = vld [vmem:[%s6766_s28 + $0x9c] sm:$0xe] }
  0xd7   : > { %6579 = vmatprep.subr.msk.bf16.mxu1 %vm744_vm0, %v6672_v36  ;;  %v6674_v36 = vld [vmem:[%s6766_s28 + $0x98] sm:$0x1]  ;;  %v3718_v7 = vor.u32 %v3717_v21, %v3714_v62  ;;  %v3755_v6 = vshll.u32 %v7685_v15, 16  ;;  %v3773_v62 = vshrl.u32 %v7693_v9, 16  ;;  %v3765_v4 = vrot.slane %v3763_v10, 5 }
  0xd8   : > { %v1341_v33 = vrot.slane %v6674_v36, 5  ;;  %v3705_v8 = vrot.slane %v3704_v49, 4  ;;  %v3769_v36 = vshll.u32 %v7693_v9, 16  ;;  %v7714_v21 = vsel %vm7018_vm7, %v5242_v54, %v1338_v23  ;;  %v7725_v2 = vld [vmem:[%s6766_s28 + $0x68] sm:$0x1] }
  0xd9   : > { %v3762_v49 = vrot.slane %v3760_v61, 4  ;;  %v3719_v19 = vrot.slane %v3718_v7, 4  ;;  %v5243_v58 = vrot.slane %v1214_v5, 9  ;;  %v3729_v3 = vrot.slane %v3728_v43, 4  ;;  %8567 = vst [vmem:[#allocation10_spill] sm:$0xff] %v7725_v2  ;;  %v6623_v5 = vld [vmem:[%s6766_s28 + $0xc0] sm:$0xff]  }
  0xda   : > { %v3733_v54 = vrot.slane %v3731_v48, 5  ;;  %v3757_v63 = vrot.slane %v3755_v6, 5  ;;  %v1352_v61 = vrot.slane %v7160_v56, 5  ;;  %v3743_v10 = vrot.slane %v3742_v31, 4  ;;  %v1216_v31 = vld [vmem:[%s6766_s28 + $0xb4] sm:$0xe] }
  0xdb   : > { %v3753_v51 = vrot.slane %v3752_v53, 4  ;;  %v7727_v1 = vrot.slane %v3769_v36, 5  ;;  %v3775_v7 = vrot.slane %v3773_v62, 4  ;;  %v3700_v43 = vsel %vm6792_vm4, %v7695_v22, %v7635_v28  ;;  %v6677_v62 = vld [vmem:[%s6766_s28 + $0xb0] sm:$0x1] }
  0xdc   : > { %6237 = vmatmul.mubr.msk.bf16.gmra.mrb[20].mxu0 %vm695_vm3, %v6620_v26  ;;  %v1340_v26 = vrot.slane %v1338_v23, 4  ;;  %v1215_v23 = vld [vmem:[%s6766_s28 + $0xa8] sm:$0xe]  ;;  %v3710_v48 = vsel %vm6792_vm4, %v3705_v8, %v7689_v46  ;;  %v3766_v6 = vor.u32 %v3765_v4, %v3762_v49  ;;  %v3724_v53 = vsel %vm6792_vm4, %v3719_v19, %v7678_v34  ;;  %v5571_v46 = vld [vmem:[%s6766_s28 + $0x6c] sm:$0xf] }
  0xdd   : > { %6085 = vmatmul.mubr.msk.bf16.gmra.mrb[4].mxu1 %vm695_vm3, %v8565_v18  ;;  %6240 = vmatprep.mubr.msk.bf16.mxu0 %vm695_vm3, %v6621_v30  ;;  %v6676_v18 = vld [vmem:[%s6766_s28 + $0xa4] sm:$0x1]  ;;  %v7747_v36 = vsel %vm7018_vm7, %v5243_v58, %v1345_v25  ;;  %v5244_v28 = vrot.slane %v1215_v23, 9  ;;  %v1354_v8 = vrot.slane %v1352_v61, 4  ;;  %v3779_v49 = vshll.u32 %v7725_v2, 16 }
  0xde   : > { %6088 = vmatprep.mubr.msk.bf16.mxu1 %vm695_vm3, %v8566_v27  ;;  %v1348_v30 = vrot.slane %v6676_v18, 5  ;;  %v7739_v56 = vsel %vm7018_vm7, %v1340_v26, %v1341_v33  ;;  %v3734_v33 = vsel %vm6792_vm4, %v3729_v3, %v3733_v54  ;;  %v1355_v26 = vrot.slane %v6677_v62, 5  ;;  %v5574_v18 = vld [vmem:[%s6766_s28 + $0x78] sm:$0xf]  ;;  %v7802_v54 = vld [vmem:[%s6766_s28 + $0xbc] sm:$0x1] }
  0xdf   : > { %v3748_v34 = vsel %vm6792_vm4, %v3743_v10, %v7687_v50  ;;  %v3758_v25 = vsel %vm6792_vm4, %v3753_v51, %v3757_v63  ;;  %v3776_v4 = vor.u32 %v3775_v7, %v7727_v1  ;;  %v5245_v27 = vrot.slane %v1216_v31, 9  ;;  %v7776_v51 = vld [vmem:[%s6766_s28 + $0x70] sm:$0xf]  ;;  %v7806_v10 = vld [vmem:[%s6766_s28 + $0x7c] sm:$0xf] }
  0xe0   : > { %v7751_v22 = vsel %vm7018_vm7, %v1347_v52, %v1348_v30  ;;  %v8569_v3 = vcombine.low %v7469_v45, %v7473_v59  ;;  %v7772_v19 = vrot.slane %v3766_v6, 4  ;;  %v1359_v50 = vrot.slane %v7184_v42, 5  ;;  %8570 = vst [vmem:[#allocation12_spill] sm:$0xff] %v7776_v51  ;;  %8572 = vst [vmem:[#allocation13_spill] sm:$0xff] %v7806_v10  ;;  %v5577_v7 = vld [vmem:[%s6766_s28 + $0x84] sm:$0xf] }
  0xe1   : > { %8568 = vst [vmem:[#allocation11_spill] sm:$0xff] %v7751_v22  ;;  %v3784_v63 = vshrl.u32 %v5571_v46, 16  ;;  %v8571_v45 = vcombine.low %v7477_v47, %v7504_v41  ;;  %v7784_v58 = vcombine.low %v3724_v53, %v3734_v33  ;;  %v7790_v42 = vsel %vm7018_vm7, %v5244_v28, %v1352_v61  ;;  %v6624_v61 = vld [vmem:[%s6766_s28 + $0xcc] sm:$0xff]   ;;  %v7818_v31 = vld [vmem:[%s6766_s28 + $0x88] sm:$0xf] }
  0xe2   : > { %v7793_v30 = vcombine.low %v3748_v34, %v3758_v25  ;;  %v7797_v47 = vsel %vm7018_vm7, %v1354_v8, %v1355_v26  ;;  %v7799_v41 = vrot.slane %v3779_v49, 5  ;;  %v3793_v6 = vshll.u32 %v7776_v51, 16  ;;  %8573 = vst [vmem:[#allocation14_spill] sm:$0xff] %v7818_v31  ;;  %v5580_v62 = vld [vmem:[%s6766_s28 + $0x90] sm:$0xf] }
  0xe3   : > { %v7824_v28 = vrot.slane %v1359_v50, 4  ;;  %v7826_v33 = vrot.slane %v3784_v63, 4  ;;  %v3797_v8 = vshrl.u32 %v7776_v51, 16  ;;  %v3808_v26 = vshrl.u32 %v5574_v18, 16  ;;  %v7833_v25 = vld [vmem:[%s6766_s28 + $0x94] sm:$0xf] }
  0xe4   : > { %6241 = vmatmul.mubr.msk.bf16.gmra.mrb[24].mxu0 %vm695_vm3, %v6622_v37  ;;  %v7770_v37 = vcombine.low %v3700_v43, %v3710_v48  ;;  %v7814_v43 = vsel %vm7018_vm7, %v5245_v27, %v1359_v50  ;;  %v3787_v48 = vshll.u32 %v5571_v46, 16  ;;  %v3811_v49 = vshll.u32 %v5574_v18, 16  ;;  %8574 = vst [vmem:[#allocation15_spill] sm:$0xff] %v7833_v25  ;;  %v7871_v2 = vld [vmem:[%s6766_s28 + $0x8c] sm:$0x1] }
  0xe5   : > { %6089 = vmatmul.mubr.msk.bf16.gmra.mrb[8].mxu1 %vm695_vm3, %v8569_v3  ;;  %6244 = vmatprep.mubr.msk.bf16.mxu0 %vm695_vm3, %v6623_v5  ;;  %v7810_v5 = vrot.slane %v3776_v4, 4  ;;  %v3817_v46 = vshll.u32 %v7806_v10, 16  ;;  %v3821_v34 = vshrl.u32 %v7806_v10, 16  ;;  %v3832_v4 = vshrl.u32 %v5577_v7, 16 }
  0xe6   : > { %6092 = vmatprep.mubr.msk.bf16.mxu1 %vm695_vm3, %v8571_v45  ;;  %v3835_v27 = vshll.u32 %v5577_v7, 16  ;;  %v3841_v3 = vshll.u32 %v7818_v31, 16  ;;  %v3845_v50 = vshrl.u32 %v7818_v31, 16  ;;  %v7843_v45 = vld [vmem:[%s6766_s28 + $0x74] sm:$0x1]  ;;  %v3789_v18 = vrot.slane %v3787_v48, 5 }
  0xe7   : > { %v3856_v52 = vshrl.u32 %v5580_v62, 16  ;;  %v3859_v53 = vshll.u32 %v5580_v62, 16  ;;  %v8575_v7 = vcombine.low %v7488_v60, %v7513_v44  ;;  %v3799_v59 = vrot.slane %v3797_v8, 4  ;;  %v5583_v48 = vld [vmem:[%s6766_s28 + $0x9c] sm:$0xf] }
  0xe8   : > { %v3865_v63 = vshll.u32 %v7833_v25, 16  ;;  %v3869_v23 = vshrl.u32 %v7833_v25, 16  ;;  %v8576_v62 = vcombine.low %v7528_v17, %v7532_v57  ;;  %v7861_v44 = vld [vmem:[%s6766_s28 + $0x80] sm:$0x1]  ;;  %v3810_v60 = vrot.slane %v3808_v26, 4 }
  0xe9   : > { %8577 = vst [vmem:[#allocation16_spill] sm:$0xff] %v7861_v44  ;;  %v3834_v31 = vrot.slane %v3832_v4, 4  ;;  %v3837_v8 = vrot.slane %v3835_v27, 5  ;;  %v7865_v10 = vrot.slane %v3841_v3, 5  ;;  %v3847_v51 = vrot.slane %v3845_v50, 4 }
  0xea   : > { %v7868_v25 = vld [vmem:[%s6766_s28 + $0xa0] sm:$0xf]  ;;  %v3858_v17 = vrot.slane %v3856_v52, 4  ;;  %v3861_v57 = vrot.slane %v3859_v53, 5  ;;  %v3883_v9 = vshll.u32 %v5583_v48, 16  ;;  %v3790_v26 = vor.u32 %v3789_v18, %v7826_v33 }
  0xeb   : > { %v3827_v27 = vshll.u32 %v7861_v44, 16  ;;  %v7880_v3 = vld [vmem:[%s6766_s28 + $0x98] sm:$0x1]  ;;  %v3889_v50 = vshll.u32 %v7868_v25, 16  ;;  %v3893_v52 = vshrl.u32 %v7868_v25, 16  ;;  %v3838_v22 = vor.u32 %v3837_v8, %v3834_v31 }
  0xec   : > { %6245 = vmatmul.mubr.msk.bf16.gmra.mrb[28].mxu0 %vm695_vm3, %v6624_v61  ;;  %v7851_v61 = vrot.slane %v3793_v6, 5  ;;  %v3823_v6 = vrot.slane %v3821_v34, 4  ;;  %v3871_v34 = vrot.slane %v3869_v23, 4  ;;  %v3851_v33 = vshll.u32 %v7871_v2, 16 }
  0xed   : > { %6093 = vmatmul.mubr.msk.bf16.gmra.mrb[12].mxu1 %vm695_vm3, %v8575_v7  ;;  %6250 = vmatprep.mubr.msk.bf16.mxu0 %vm695_vm3, %v7593_v20  ;;  %v3813_v7 = vrot.slane %v3811_v49, 5  ;;  %v7863_v20 = vrot.slane %v3817_v46, 5  ;;  %v3803_v49 = vshll.u32 %v7843_v45, 16  ;;  %v7875_v46 = vrot.slane %v3865_v63, 5 }
  0xee   : > { %6096 = vmatprep.mubr.msk.bf16.mxu1 %vm695_vm3, %v8576_v62  ;;  %v3880_v62 = vshrl.u32 %v5583_v48, 16  ;;  %v3800_v4 = vor.u32 %v3799_v59, %v7851_v61  ;;  %v3848_v23 = vor.u32 %v3847_v51, %v7865_v10  ;;  %v3862_v59 = vor.u32 %v3861_v57, %v3858_v17  ;;  %v7913_v57 = vld [vmem:[%s6766_s28 + $0xa4] sm:$0x1] }
  0xef   : > { %v3814_v53 = vor.u32 %v3813_v7, %v3810_v60  ;;  %v3824_v48 = vor.u32 %v3823_v6, %v7863_v20  ;;  %v3885_v18 = vrot.slane %v3883_v9, 5  ;;  %v8578_v44 = vcombine.low %v7540_v11, %v7544_v40 }
  0xf0   : > { %v3882_v63 = vrot.slane %v3880_v62, 4  ;;  %v8579_v31 = vrot.slane %v7802_v54, 5  ;;  %v3805_v51 = vrot.slane %v3803_v49, 5  ;;  %v3872_v60 = vor.u32 %v3871_v34, %v7875_v46  ;;  %v7916_v34 = vld [vmem:[%s6766_s28 + $0xac] sm:$0xf] }
  0xf1   : > { %v3875_v9 = vshll.u32 %v7880_v3, 16  ;;  %v8580_v11 = vcombine.low %v7612_v39, %v7616_v55  ;;  %v3791_v40 = vrot.slane %v3790_v26, 4  ;;  %v7909_v54 = vrot.slane %v3889_v50, 5 }
  0xf2   : > { %v3815_v7 = vrot.slane %v3814_v53, 4  ;;  %v3825_v6 = vrot.slane %v3824_v48, 4  ;;  %v3829_v8 = vrot.slane %v3827_v27, 5  ;;  %v3853_v17 = vrot.slane %v3851_v33, 5  ;;  %v7926_v48 = vld [vmem:[%s6766_s28 + $0xb0] sm:$0x1] }
  0xf3   : > { %v3839_v39 = vrot.slane %v3838_v22, 4  ;;  %v3849_v55 = vrot.slane %v3848_v23, 4  ;;  %v3863_v62 = vrot.slane %v3862_v59, 4  ;;  %v3886_v49 = vor.u32 %v3885_v18, %v3882_v63 }
  0xf4   : > { %6251 = vmatmul.mubr.msk.bf16.vlgmr.msra.gmra.mrb[0].mxu0 %vm695_vm3, %v7656_v16  ;;  %v7899_v16 = vsel %vm7018_vm7, %v7824_v28, %v8579_v31  ;;  %v3895_v28 = vrot.slane %v3893_v52, 4  ;;  %v3877_v26 = vrot.slane %v3875_v9, 5  ;;  %v3796_v52 = vsel %vm6792_vm4, %v3791_v40, %v7851_v61 }
  0xf5   : > { %6097 = vmatmul.mubr.msk.bf16.gmra.mrb[16].mxu1 %vm695_vm3, %v8578_v44  ;;  %6283 = vmatpush3.bf16.msra.mxu0 %v7597_v14  ;;  %v3801_v14 = vrot.slane %v3800_v4, 4  ;;  %v5586_v44 = vld [vmem:[%s6766_s28 + $0xa8] sm:$0xf]  ;;  %v3899_v22 = vshll.u32 %v7913_v57, 16  ;;  %v3820_v33 = vsel %vm6792_vm4, %v3815_v7, %v7863_v20  ;;  %v3830_v23 = vsel %vm6792_vm4, %v3825_v6, %v3829_v8 }
  0xf6   : > { %6100 = vmatprep.mubr.msk.bf16.mxu1 %vm695_vm3, %v8580_v11  ;;  %6254 = vmatprep.mubr.msk.bf16.mxu0 %vm695_vm3, %v7667_v29  ;;  %v3873_v29 = vrot.slane %v3872_v60, 4  ;;  %v3904_v4 = vshrl.u32 %v5586_v44, 16  ;;  %v3907_v50 = vshll.u32 %v5586_v44, 16  ;;  %v3896_v53 = vor.u32 %v3895_v28, %v7909_v54  ;;  %v5634_v11 = vld [vmem:[%s6766_s28 + $0x48] sm:$0xe] }
  0xf7   : > { %v3806_v27 = vsel %vm6792_vm4, %v3801_v14, %v3805_v51  ;;  %v3913_v59 = vshll.u32 %v7916_v34, 16  ;;  %v3917_v61 = vshrl.u32 %v7916_v34, 16  ;;  %v3844_v63 = vsel %vm6792_vm4, %v3839_v39, %v7865_v10  ;;  %v7991_v39 = vld [vmem:[%s6766_s28 + $0xb8] sm:$0xf] }
  0xf8   : > { %v3854_v18 = vsel %vm6792_vm4, %v3849_v55, %v3853_v17  ;;  %v3868_v20 = vsel %vm6792_vm4, %v3863_v62, %v7875_v46  ;;  %v3887_v31 = vrot.slane %v3886_v49, 4  ;;  %v8581_v51 = vcombine.low %v7629_v12, %v7644_v35 }
  0xf9   : > { %v3906_v10 = vrot.slane %v3904_v4, 4  ;;  %v3909_v60 = vrot.slane %v3907_v50, 5  ;;  %v3923_v9 = vshll.u32 %v7926_v48, 16  ;;  %v8582_v46 = vcombine.low %v7714_v21, %v7739_v56  ;;  %v5589_v21 = vld [vmem:[%s6766_s28 + $0xb4] sm:$0xf] }
  0xfa   : > { %v5260_v12 = vcombine.low %v7790_v42, %v7797_v47  ;;  %v8583_v35 = vsel %vm6792_vm4, %v7810_v5, %v7799_v41  ;;  %v3897_v14 = vrot.slane %v3896_v53, 4  ;;  %v3901_v28 = vrot.slane %v3899_v22, 5  ;;  %v5636_v4 = vld [vmem:[%s6766_s28 + $0x60] sm:$0xe]  ;;  %v5637_v53 = vld [vmem:[%s6766_s28 + $0x6c] sm:$0xe] }
  0xfb   : > { %v5261_v56 = vcombine.low %v7814_v43, %v7899_v16  ;;  %v7974_v44 = vcombine.low %v3796_v52, %v3806_v27  ;;  %v7976_v42 = vrot.slane %v3913_v59, 5  ;;  %v3919_v47 = vrot.slane %v3917_v61, 4  ;;  %v8592_v16 = vld [vmem:[#allocation4_spill] sm:$0xff] }
  0xfc   : > { %6255 = vmatmul.mubr.msk.bf16.gmra.mrb[4].mxu0 %vm695_vm3, %v7770_v37  ;;  %v3878_v37 = vsel %vm6792_vm4, %v3873_v29, %v3877_v26  ;;  %v7978_v41 = vcombine.low %v3820_v33, %v3830_v23  ;;  %v7980_v5 = vcombine.low %v3844_v63, %v3854_v18  ;;  %v3892_v6 = vsel %vm6792_vm4, %v3887_v31, %v7909_v54  ;;  %v8585_v23 = vld [vmem:[#allocation11_spill] sm:$0xff]  ;;  %v5592_v63 = vld [vmem:[%s6766_s28 + $0xc0] sm:$0xf]  ;;  %v8587_v18 = vld [vmem:[#allocation9_spill] sm:$0xff] }
  0xfd   : > { %6101 = vmatmul.mubr.msk.bf16.gmra.mrb[20].mxu1 %vm695_vm3, %v8581_v51  ;;  %6258 = vmatprep.mubr.msk.bf16.mxu0 %vm695_vm3, %v7784_v58  ;;  %v8584_v58 = vsel %vm6792_vm4, %v7772_v19, %v7727_v1  ;;  %v7982_v7 = vcombine.low %v3868_v20, %v3878_v37  ;;  %v5650_v1 = vrot.slane %v5634_v11, 9  ;;  %v5635_v19 = vld [vmem:[%s6766_s28 + $0x54] sm:$0xe]  ;;  %v3910_v8 = vor.u32 %v3909_v60, %v3906_v10  ;;  %v8588_v31 = vld [vmem:[#allocation10_spill] sm:$0xff] }
  0xfe   : > { %6104 = vmatprep.mubr.msk.bf16.mxu1 %vm695_vm3, %v8582_v46  ;;  %v5604_v40 = vcombine.low %v8584_v58, %v8583_v35  ;;  %v7988_v17 = vrot.slane %v3923_v9, 5  ;;  %v3928_v55 = vshrl.u32 %v5589_v21, 16  ;;  %v3902_v62 = vsel %vm6792_vm4, %v3897_v14, %v3901_v28  ;;  %v8589_v9 = vld [vmem:[#allocation12_spill] sm:$0xff]  ;;  %v8040_v35 = vld [vmem:[%s6766_s28 + $0xbc] sm:$0x1] }
  0xff   : > { %v3931_v49 = vshll.u32 %v5589_v21, 16  ;;  %v4386_v29 = vrot.slane %v7622_v0, 5  ;;  %v4389_v26 = vrot.slane %v7676_v38, 5  ;;  %v3920_v50 = vor.u32 %v3919_v47, %v7976_v42  ;;  %v8043_v58 = vld [vmem:[%s6766_s28 + $0xc4] sm:$0xf] }
 0x100   : > { %v5651_v52 = vrot.slane %v5635_v19, 9  ;;  %v4393_v54 = vrot.slane %v7633_v24, 5  ;;  %v4396_v27 = vrot.slane %v7685_v15, 5  ;;  %v3937_v22 = vshll.u32 %v7991_v39, 16  ;;  %v5638_v19 = vld [vmem:[%s6766_s28 + $0x78] sm:$0xe] }
 0x101   : > { %v3941_v33 = vshrl.u32 %v7991_v39, 16  ;;  %v8008_v0 = vsel %vm7018_vm7, %v5650_v1, %v4386_v29  ;;  %v4388_v38 = vrot.slane %v4386_v29, 4  ;;  %v8586_v59 = vcombine.low %v7747_v36, %v8585_v23  ;;  %v8590_v23 = vld [vmem:[#allocation13_spill] sm:$0xff] }
 0x102   : > { %v8015_v24 = vcombine.low %v3892_v6, %v3902_v62  ;;  %v8019_v15 = vsel %vm7018_vm7, %v5651_v52, %v4393_v54  ;;  %v5652_v61 = vrot.slane %v5636_v4, 9  ;;  %v4400_v20 = vrot.slane %v8587_v18, 5  ;;  %v6625_v6 = vld [vmem:[%s6766_s28 + $0xc] sm:$0xff]  }
 0x103   : > { %v8025_v36 = vsel %vm7018_vm7, %v4388_v38, %v4389_v26  ;;  %v4403_v51 = vrot.slane %v8588_v31, 5  ;;  %v5653_v37 = vrot.slane %v5637_v53, 9  ;;  %v4407_v11 = vrot.slane %v8589_v9, 5 }
 0x104   : > { %6259 = vmatmul.mubr.msk.bf16.gmra.mrb[8].mxu0 %vm695_vm3, %v7793_v30  ;;  %v4395_v30 = vrot.slane %v4393_v54, 4  ;;  %v5666_v10 = vcombine.low %v8008_v0, %v8025_v36  ;;  %v4410_v46 = vrot.slane %v7843_v45, 5  ;;  %v8049_v14 = vsel %vm7018_vm7, %v5652_v61, %v4400_v20 }
 0x105   : > { %6105 = vmatmul.mubr.msk.bf16.gmra.mrb[24].mxu1 %vm695_vm3, %v8586_v59  ;;  %6262 = vmatprep.mubr.msk.bf16.mxu0 %vm695_vm3, %v5604_v40  ;;  %v4402_v28 = vrot.slane %v4400_v20, 4  ;;  %v8051_v21 = vrot.slane %v3928_v55, 4  ;;  %v3952_v47 = vshrl.u32 %v5592_v63, 16  ;;  %v8055_v45 = vsel %vm7018_vm7, %v5653_v37, %v4407_v11  ;;  %v5369_v55 = vld [vmem:[%s6766_s28 + $0x78] sm:$0xf]  ;;  %v8591_v59 = vld [vmem:[#allocation16_spill] sm:$0xff] }
 0x106   : > { %6108 = vmatprep.mubr.msk.bf16.mxu1 %vm695_vm3, %v5260_v12  ;;  %v8033_v60 = vsel %vm7018_vm7, %v4395_v30, %v4396_v27  ;;  %v8037_v12 = vrot.slane %v3910_v8, 4  ;;  %v4409_v1 = vrot.slane %v4407_v11, 4  ;;  %v8059_v8 = vrot.slane %v3920_v50, 4 }
 0x107   : > { %v5667_v40 = vcombine.low %v8019_v15, %v8033_v60  ;;  %v8061_v62 = vrot.slane %v3931_v49, 5  ;;  %v3955_v29 = vshll.u32 %v5592_v63, 16  ;;  %v8065_v26 = vsel %vm7018_vm7, %v4402_v28, %v4403_v51  ;;  %v8594_v28 = vld [vmem:[#allocation14_spill] sm:$0xff] }
 0x108   : > { %v8068_v4 = vrot.slane %v3937_v22, 5  ;;  %v8070_v52 = vrot.slane %v3941_v33, 4  ;;  %v5668_v54 = vcombine.low %v8049_v14, %v8065_v26  ;;  %v8076_v27 = vsel %vm7018_vm7, %v4409_v1, %v4410_v46  ;;  %v5639_v33 = vld [vmem:[%s6766_s28 + $0x84] sm:$0xe]  ;;  %v6626_v1 = vld [vmem:[%s6766_s28 + $0x18] sm:$0xff]  }
 0x109   : > { %v3947_v49 = vshll.u32 %v8040_v35, 16  ;;  %v3961_v50 = vshll.u32 %v8043_v58, 16  ;;  %v5669_v53 = vcombine.low %v8055_v45, %v8076_v27  ;;  %v5654_v22 = vrot.slane %v5638_v19, 9  ;;  %v6688_v60 = vld [vmem:[%s6766_s28 + $0xa0] sm:$0xf] }
 0x10a   : > { %v3954_v38 = vrot.slane %v3952_v47, 4  ;;  %v4417_v30 = vrot.slane %v8591_v59, 5  ;;  %v2280_v61 = vshrl.u32 %v5369_v55, 16  ;;  %v3957_v63 = vrot.slane %v3955_v29, 5  ;;  %v5595_v29 = vld [vmem:[%s6766_s28 + $0xcc] sm:$0xf] }
 0x10b   : > { %v3965_v18 = vshrl.u32 %v8043_v58, 16  ;;  %v2283_v43 = vshll.u32 %v5369_v55, 16  ;;  %v5655_v37 = vrot.slane %v5639_v33, 9  ;;  %v3916_v9 = vsel %vm6792_vm4, %v8037_v12, %v7976_v42  ;;  %v8119_v55 = vld [vmem:[%s6766_s28 + $0xd0] sm:$0xf] }
 0x10c   : > { %6263 = vmatmul.mubr.msk.bf16.gmra.mrb[12].mxu0 %vm695_vm3, %v7974_v44  ;;  %v4414_v44 = vrot.slane %v8590_v23, 5  ;;  %v2282_v51 = vrot.slane %v2280_v61, 4  ;;  %v3934_v11 = vor.u32 %v8061_v62, %v8051_v21  ;;  %v4421_v47 = vrot.slane %v8594_v28, 5  ;;  %v6627_v21 = vld [vmem:[%s6766_s28 + $0x24] sm:$0xff]   ;;  %v6692_v27 = vld [vmem:[%s6766_s28 + $0xac] sm:$0xf] }
 0x10d   : > { %6109 = vmatmul.mubr.msk.bf16.gmra.mrb[28].mxu1 %vm695_vm3, %v5261_v56  ;;  %6266 = vmatprep.mubr.msk.bf16.mxu0 %vm695_vm3, %v7978_v41  ;;  %v8593_v56 = vld [vmem:[#allocation5_spill] sm:$0xff]  ;;  %v2285_v46 = vrot.slane %v2283_v43, 5  ;;  %v3926_v19 = vsel %vm6792_vm4, %v8059_v8, %v7988_v17  ;;  %v4424_v12 = vrot.slane %v7871_v2, 5  ;;  %v8127_v62 = vrot.slane %v3961_v50, 5  ;;  %v5640_v8 = vld [vmem:[%s6766_s28 + $0x90] sm:$0xe] }
 0x10e   : > { %6114 = vmatprep.mubr.msk.bf16.mxu1 %vm695_vm3, %v6625_v6  ;;  %v2302_v41 = vsel %vm6792_vm4, %v8593_v56, %v8592_v16  ;;  %v8101_v20 = vsel %vm7018_vm7, %v5654_v22, %v4414_v44  ;;  %v4416_v31 = vrot.slane %v4414_v44, 4  ;;  %v3944_v6 = vor.u32 %v8070_v52, %v8068_v4  ;;  %v8133_v52 = vld [vmem:[%s6766_s28 + $0xc8] sm:$0x1]  ;;  %v8596_v16 = vld [vmem:[#allocation2_spill] sm:$0xff] }
 0x10f   : > { %v3967_v22 = vrot.slane %v3965_v18, 4  ;;  %v2286_v17 = vor.u32 %v2285_v46, %v2282_v51  ;;  %v3949_v23 = vrot.slane %v3947_v49, 5  ;;  %v3958_v44 = vor.u32 %v3957_v63, %v3954_v38  ;;  %v8597_v51 = vld [vmem:[#allocation3_spill] sm:$0xff] }
 0x110   : > { %v8123_v42 = vsel %vm7018_vm7, %v4416_v31, %v4417_v30  ;;  %v8137_v59 = vsel %vm7018_vm7, %v5655_v37, %v4421_v47  ;;  %v4423_v30 = vrot.slane %v4421_v47, 4  ;;  %v3976_v2 = vshrl.u32 %v5595_v29, 16 }
 0x111   : > { %v5670_v33 = vcombine.low %v8101_v20, %v8123_v42  ;;  %v3979_v50 = vshll.u32 %v5595_v29, 16  ;;  %v3985_v61 = vshll.u32 %v8119_v55, 16  ;;  %v2287_v18 = vrot.slane %v2286_v17, 4  ;;  %v6628_v29 = vld [vmem:[%s6766_s28 + $0x30] sm:$0xff]  }
 0x112   : > { %v3989_v49 = vshrl.u32 %v8119_v55, 16  ;;  %v8148_v38 = vsel %vm7018_vm7, %v4423_v30, %v4424_v12  ;;  %v5656_v63 = vrot.slane %v5640_v8, 9  ;;  %v3968_v56 = vor.u32 %v3967_v22, %v8127_v62 }
 0x113   : > { %v3971_v31 = vshll.u32 %v8133_v52, 16  ;;  %v5671_v37 = vcombine.low %v8137_v59, %v8148_v38  ;;  %v5610_v46 = vcombine.low %v3916_v9, %v3926_v19  ;;  %v3935_v28 = vrot.slane %v3934_v11, 4  ;;  %v5641_v11 = vld [vmem:[%s6766_s28 + $0x9c] sm:$0xe] }
 0x114   : > { %6267 = vmatmul.mubr.msk.bf16.gmra.mrb[16].mxu0 %vm695_vm3, %v7980_v5  ;;  %v8595_v5 = vld [vmem:[#allocation15_spill] sm:$0xff]  ;;  %v3945_v47 = vrot.slane %v3944_v6, 4  ;;  %v3959_v12 = vrot.slane %v3958_v44, 4  ;;  %v4431_v8 = vrot.slane %v7880_v3, 5  ;;  %v3978_v30 = vrot.slane %v3976_v2, 4  ;;  %v6629_v19 = vld [vmem:[%s6766_s28 + $0x3c] sm:$0xff]  }
 0x115   : > { %6115 = vmatmul.mubr.msk.bf16.vlgmr.msra.gmra.mrb[0].mxu1 %vm695_vm3, %v6626_v1  ;;  %6270 = vmatprep.mubr.msk.bf16.mxu0 %vm695_vm3, %v7982_v7  ;;  %v4428_v43 = vrot.slane %v8595_v5, 5  ;;  %v2292_v7 = vsel %vm6792_vm4, %v2287_v18, %v8597_v51  ;;  %v3981_v18 = vrot.slane %v3979_v50, 5  ;;  %v8171_v5 = vrot.slane %v3985_v61, 5 }
 0x116   : > { %6317 = vmatpush3.bf16.msra.mxu1 %v8596_v16  ;;  %6118 = vmatprep.mubr.msk.bf16.mxu1 %vm695_vm3, %v6627_v21  ;;  %v8160_v1 = vcombine.low %v2292_v7, %v2302_v41  ;;  %v8164_v21 = vld [vmem:[%s6766_s28 + $0xd4] sm:$0x1]  ;;  %v3991_v9 = vrot.slane %v3989_v49, 4  ;;  %v3969_v41 = vrot.slane %v3968_v56, 4  ;;  %v3973_v6 = vrot.slane %v3971_v31, 5 }
 0x117   : > { %v8168_v22 = vsel %vm7018_vm7, %v5656_v63, %v4428_v43  ;;  %v4430_v17 = vrot.slane %v4428_v43, 4  ;;  %v3940_v63 = vsel %vm6792_vm4, %v3935_v28, %v8068_v4  ;;  %v3950_v2 = vsel %vm6792_vm4, %v3945_v47, %v3949_v23  ;;  %v6679_v16 = vld [vmem:[%s6766_s28 + $0x1c] sm:$0xf]  ;;  %v5642_v28 = vld [vmem:[%s6766_s28 + $0xa8] sm:$0xe] }
 0x118   : > { %v3995_v50 = vshll.u32 %v8164_v21, 16  ;;  %v5657_v61 = vrot.slane %v5641_v11, 9  ;;  %v4435_v49 = vrot.slane %v7868_v25, 5  ;;  %v3964_v4 = vsel %vm6792_vm4, %v3959_v12, %v8127_v62  ;;  %v5630_v62 = vld [vmem:[%s6766_s28 + $0x18] sm:$0xe]  ;;  %v6630_v47 = vld [vmem:[%s6766_s28 + $0x48] sm:$0xff]  }
 0x119   : > { %v8177_v44 = vsel %vm7018_vm7, %v4430_v17, %v4431_v8  ;;  %v3992_v43 = vor.u32 %v3991_v9, %v8171_v5  ;;  %v4438_v23 = vrot.slane %v7913_v57, 5  ;;  %v3974_v25 = vsel %vm6792_vm4, %v3969_v41, %v3973_v6  ;;  %v6680_v11 = vld [vmem:[%s6766_s28 + $0x20] sm:$0x1] }
 0x11a   : > { %v5672_v3 = vcombine.low %v8168_v22, %v8177_v44  ;;  %v4358_v56 = vrot.slane %v6679_v16, 5  ;;  %v8203_v31 = vsel %vm7018_vm7, %v5657_v61, %v4435_v49  ;;  %v4437_v51 = vrot.slane %v4435_v49, 4  ;;  %v5643_v49 = vld [vmem:[%s6766_s28 + $0xb4] sm:$0xe] }
 0x11b   : > { %v5611_v7 = vcombine.low %v3940_v63, %v3950_v2  ;;  %v3993_v17 = vrot.slane %v3992_v43, 4  ;;  %v5658_v41 = vrot.slane %v5642_v28, 9  ;;  %v4442_v6 = vrot.slane %v7916_v34, 5  ;;  %v5631_v2 = vld [vmem:[%s6766_s28 + $0x24] sm:$0xe] }
 0x11c   : > { %6271 = vmatmul.mubr.msk.bf16.gmra.mrb[20].mxu0 %vm695_vm3, %v8015_v24  ;;  %v3982_v24 = vor.u32 %v3981_v18, %v3978_v30  ;;  %v8208_v57 = vsel %vm7018_vm7, %v4437_v51, %v4438_v23  ;;  %v6631_v30 = vld [vmem:[%s6766_s28 + $0x54] sm:$0xff]   ;;  %v5646_v18 = vrot.slane %v5630_v62, 9  ;;  %v4360_v9 = vrot.slane %v4358_v56, 4  ;;  %v6683_v28 = vld [vmem:[%s6766_s28 + $0x2c] sm:$0x1] }
 0x11d   : > { %6119 = vmatmul.mubr.msk.bf16.gmra.mrb[4].mxu1 %vm695_vm3, %v6628_v29  ;;  %6274 = vmatprep.mubr.msk.bf16.mxu0 %vm695_vm3, %v5610_v46  ;;  %v3997_v46 = vrot.slane %v3995_v50, 5  ;;  %v5612_v29 = vcombine.low %v3964_v4, %v3974_v25  ;;  %v5673_v8 = vcombine.low %v8203_v31, %v8208_v57  ;;  %v4445_v63 = vrot.slane %v7926_v48, 5  ;;  %v6681_v50 = vld [vmem:[%s6766_s28 + $0x28] sm:$0xf]  ;;  %v5632_v25 = vld [vmem:[%s6766_s28 + $0x30] sm:$0xe] }
 0x11e   : > { %6122 = vmatprep.mubr.msk.bf16.mxu1 %vm695_vm3, %v6629_v19  ;;  %v3983_v12 = vrot.slane %v3982_v24, 4  ;;  %v4361_v19 = vrot.slane %v6680_v11, 5  ;;  %v4365_v61 = vrot.slane %v6681_v50, 5  ;;  %v8231_v48 = vsel %vm7018_vm7, %v5658_v41, %v4442_v6  ;;  %v6633_v11 = vld [vmem:[%s6766_s28 + $0x6c] sm:$0xff]   ;;  %v8598_v41 = vld [vmem:[#allocation6_spill] sm:$0xff] }
 0x11f   : > { %v3998_v34 = vsel %vm6792_vm4, %v3993_v17, %v3997_v46  ;;  %v4444_v24 = vrot.slane %v4442_v6, 4  ;;  %v4359_v43 = vsel %vm7018_vm7, %v5646_v18, %v4358_v56  ;;  %v5647_v51 = vrot.slane %v5631_v2, 9  ;;  %v5644_v50 = vld [vmem:[%s6766_s28 + $0xc0] sm:$0xe]  ;;  %v6697_v31 = vld [vmem:[%s6766_s28 + $0xc8] sm:$0x1] }
 0x120   : > { %v3988_v4 = vsel %vm6792_vm4, %v3983_v12, %v8171_v5  ;;  %v4362_v23 = vsel %vm7018_vm7, %v4360_v9, %v4361_v19  ;;  %v6682_v5 = vld [vmem:[%s6766_s28 + $0x34] sm:$0xf]  ;;  %v6632_v12 = vld [vmem:[%s6766_s28 + $0x60] sm:$0xff]   ;;  %v5648_v18 = vrot.slane %v5632_v25, 9  ;;  %v4452_v9 = vrot.slane %v8040_v35, 5 }
 0x121   : > { %v4372_v16 = vrot.slane %v6682_v5, 5  ;;  %v8242_v62 = vsel %vm7018_vm7, %v4444_v24, %v4445_v63  ;;  %v5613_v46 = vcombine.low %v3988_v4, %v3998_v34  ;;  %v5662_v17 = vcombine.low %v4359_v43, %v4362_v23  ;;  %v5633_v24 = vld [vmem:[%s6766_s28 + $0x3c] sm:$0xe] }
 0x122   : > { %v5674_v56 = vcombine.low %v8231_v48, %v8242_v62  ;;  %v4375_v6 = vrot.slane %v8598_v41, 5  ;;  %v4366_v35 = vsel %vm7018_vm7, %v5647_v51, %v4365_v61  ;;  %v5660_v5 = vrot.slane %v5644_v50, 9 }
 0x123   : > { %v4374_v19 = vrot.slane %v4372_v16, 4  ;;  %v4373_v23 = vsel %vm7018_vm7, %v5648_v18, %v4372_v16  ;;  %v4459_v51 = vrot.slane %v8133_v52, 5  ;;  %v2443_v57 = vshll.u32 %v6697_v31, 16 }
 0x124   : > { %6275 = vmatmul.mubr.msk.bf16.gmra.mrb[24].mxu0 %vm695_vm3, %v5611_v7  ;;  %v5659_v7 = vrot.slane %v5643_v49, 9 }
 0x125   : > { %6123 = vmatmul.mubr.msk.bf16.gmra.mrb[8].mxu1 %vm695_vm3, %v6630_v47  ;;  %6278 = vmatprep.mubr.msk.bf16.mxu0 %vm695_vm3, %v5612_v29  ;;  %v4368_v47 = vrot.slane %v6683_v28, 5  ;;  %v4449_v29 = vrot.slane %v7991_v39, 5  ;;  %v8599_v39 = vld [vmem:[#allocation7_spill] sm:$0xff]  ;;  %v4376_v25 = vsel %vm7018_vm7, %v4374_v19, %v4375_v6  ;;  %v5649_v28 = vrot.slane %v5633_v24, 9 }
 0x126   : > { %6126 = vmatprep.mubr.msk.bf16.mxu1 %vm695_vm3, %v6631_v30  ;;  %v4367_v30 = vrot.slane %v4365_v61, 4  ;;  %v4379_v49 = vrot.slane %v8599_v39, 5  ;;  %v4456_v61 = vrot.slane %v8043_v58, 5  ;;  %v6684_v39 = vld [vmem:[%s6766_s28 + $0x70] sm:$0xf]  ;;  %v4463_v24 = vrot.slane %v8119_v55, 5 }
 0x127   : > { %v8254_v63 = vsel %vm7018_vm7, %v5659_v7, %v4449_v29  ;;  %v4451_v2 = vrot.slane %v4449_v29, 4  ;;  %v5366_v7 = vld [vmem:[%s6766_s28 + $0x6c] sm:$0xf]  ;;  %v8600_v29 = vld [vmem:[#allocation8_spill] sm:$0xff] }
 0x128   : > { %v4369_v34 = vsel %vm7018_vm7, %v4367_v30, %v4368_v47  ;;  %v4381_v47 = vrot.slane %v4379_v49, 4  ;;  %v6634_v30 = vld [vmem:[%s6766_s28 + $0x78] sm:$0xff]   ;;  %v8285_v16 = vsel %vm7018_vm7, %v5660_v5, %v4456_v61  ;;  %v4458_v18 = vrot.slane %v4456_v61, 4 }
 0x129   : > { %v8261_v4 = vsel %vm7018_vm7, %v4451_v2, %v4452_v9  ;;  %v5664_v9 = vcombine.low %v4373_v23, %v4376_v25  ;;  %v2256_v19 = vshrl.u32 %v5366_v7, 16  ;;  %v2259_v41 = vshll.u32 %v5366_v7, 16 }
 0x12a   : > { %v5675_v43 = vcombine.low %v8254_v63, %v8261_v4  ;;  %v8290_v58 = vsel %vm7018_vm7, %v4458_v18, %v4459_v51  ;;  %v4380_v6 = vsel %vm7018_vm7, %v5649_v28, %v4379_v49  ;;  %v4466_v49 = vrot.slane %v8164_v21, 5  ;;  %v6636_v51 = vld [vmem:[%s6766_s28 + $0x90] sm:$0xff]   ;;  %v6637_v21 = vld [vmem:[%s6766_s28 + $0x9c] sm:$0xff]  }
 0x12b   : > { %v5676_v50 = vcombine.low %v8285_v16, %v8290_v58  ;;  %v2258_v23 = vrot.slane %v2256_v19, 4  ;;  %v2261_v25 = vrot.slane %v2259_v41, 5  ;;  %v4465_v7 = vrot.slane %v4463_v24, 4 }
 0x12c   : > { %6279 = vmatmul.mubr.msk.bf16.gmra.mrb[28].mxu0 %vm695_vm3, %v5613_v46  ;;  %v5663_v46 = vcombine.low %v4366_v35, %v4369_v34  ;;  %v2265_v35 = vshll.u32 %v6684_v39, 16  ;;  %v2269_v34 = vshrl.u32 %v6684_v39, 16 }
 0x12d   : > { %6127 = vmatmul.mubr.msk.bf16.gmra.mrb[12].mxu1 %vm695_vm3, %v6632_v12  ;;  %6284 = vmatprep.mubr.msk.bf16.mxu0 %vm695_vm3, %v5662_v17  ;;  %v4382_v12 = vrot.slane %v8600_v29, 5  ;;  %v5645_v17 = vld [vmem:[%s6766_s28 + $0xcc] sm:$0xe]  ;;  %v8312_v55 = vsel %vm7018_vm7, %v4465_v7, %v4466_v49 }
 0x12e   : > { %6130 = vmatprep.mubr.msk.bf16.mxu1 %vm695_vm3, %v6633_v11  ;;  %v6635_v11 = vld [vmem:[%s6766_s28 + $0x84] sm:$0xff]   ;;  %v5661_v52 = vrot.slane %v5645_v17, 9  ;;  %v2271_v28 = vrot.slane %v2269_v34, 4  ;;  %v6685_v17 = vld [vmem:[%s6766_s28 + $0x74] sm:$0x1] }
 0x12f   : > { %v4383_v2 = vsel %vm7018_vm7, %v4381_v47, %v4382_v12  ;;  %v5372_v47 = vld [vmem:[%s6766_s28 + $0x84] sm:$0xf]  ;;  %v2262_v12 = vor.u32 %v2261_v25, %v2258_v23  ;;  %v6639_v34 = vld [vmem:[%s6766_s28 + $0xb4] sm:$0xff]  }
 0x130   : > { %v8307_v5 = vsel %vm7018_vm7, %v5661_v52, %v4463_v24  ;;  %v5665_v61 = vcombine.low %v4380_v6, %v4383_v2  ;;  %v2307_v18 = vshll.u32 %v5372_v47, 16  ;;  %v5375_v6 = vld [vmem:[%s6766_s28 + $0x90] sm:$0xf]  ;;  %v6638_v2 = vld [vmem:[%s6766_s28 + $0xa8] sm:$0xff]  }
 0x131   : > { %v5677_v29 = vcombine.low %v8307_v5, %v8312_v55  ;;  %v2263_v52 = vrot.slane %v2262_v12, 4  ;;  %v2328_v23 = vshrl.u32 %v5375_v6, 16  ;;  %v2331_v25 = vshll.u32 %v5375_v6, 16 }
 0x132   : > { %v2361_v12 = vshll.u32 %v6688_v60, 16 }
 0x133   : > { %v2333_v14 = vrot.slane %v2331_v25, 5  ;;  %v6691_v25 = vld [vmem:[%s6766_s28 + $0xa4] sm:$0x1] }
 0x134   : > { %6285 = vmatmul.mubr.msk.bf16.vlgmr.msra.gmra.mrb[0].mxu0 %vm695_vm3, %v5663_v46  ;;  %v2267_v46 = vrot.slane %v2265_v35, 5  ;;  %v5378_v35 = vld [vmem:[%s6766_s28 + $0x9c] sm:$0xf]  ;;  %v8354_v6 = vrot.slane %v2361_v12, 5 }
 0x135   : > { %6131 = vmatmul.mubr.msk.bf16.gmra.mrb[16].mxu1 %vm695_vm3, %v6634_v30  ;;  %6288 = vmatprep.mubr.msk.bf16.mxu0 %vm695_vm3, %v5664_v9  ;;  %v2275_v30 = vshll.u32 %v6685_v17, 16  ;;  %v2304_v9 = vshrl.u32 %v5372_v47, 16  ;;  %v2355_v47 = vshll.u32 %v5378_v35, 16  ;;  %v6689_v17 = vld [vmem:[%s6766_s28 + $0x8c] sm:$0x1] }
 0x136   : > { %6134 = vmatprep.mubr.msk.bf16.mxu1 %vm695_vm3, %v6635_v11  ;;  %v2272_v13 = vor.u32 %v2271_v28, %v2267_v46  ;;  %v6686_v11 = vld [vmem:[%s6766_s28 + $0x88] sm:$0xf]  ;;  %v2268_v7 = vsel %vm6792_vm4, %v2263_v52, %v2267_v46 }
 0x137   : > { %v2313_v19 = vshll.u32 %v6686_v11, 16  ;;  %v2317_v41 = vshrl.u32 %v6686_v11, 16  ;;  %v2277_v0 = vrot.slane %v2275_v30, 5  ;;  %v2306_v36 = vrot.slane %v2304_v9, 4 }
 0x138   : > { %v2273_v39 = vrot.slane %v2272_v13, 4  ;;  %v2323_v30 = vshll.u32 %v6689_v17, 16  ;;  %v2330_v9 = vrot.slane %v2328_v23, 4  ;;  %v2357_v11 = vrot.slane %v2355_v47, 5 }
 0x139   : > { %v8331_v24 = vrot.slane %v2313_v19, 5  ;;  %v2319_v49 = vrot.slane %v2317_v41, 4  ;;  %v6640_v19 = vld [vmem:[%s6766_s28 + $0xc0] sm:$0xff]  }
 0x13a   : > { %v2278_v46 = vsel %vm6792_vm4, %v2273_v39, %v2277_v0  ;;  %v5381_v39 = vld [vmem:[%s6766_s28 + $0xa8] sm:$0xf] }
 0x13b   : > { %v2320_v13 = vor.u32 %v2319_v49, %v8331_v24  ;;  %v5398_v41 = vcombine.low %v2268_v7, %v2278_v46  ;;  %v2371_v7 = vshll.u32 %v6691_v25, 16  ;;  %v2379_v45 = vshll.u32 %v5381_v39, 16 }
 0x13c   : > { %6289 = vmatmul.mubr.msk.bf16.gmra.mrb[4].mxu0 %vm695_vm3, %v5665_v61  ;;  %v6687_v61 = vld [vmem:[%s6766_s28 + $0x94] sm:$0xf] }
 0x13d   : > { %6135 = vmatmul.mubr.msk.bf16.gmra.mrb[20].mxu1 %vm695_vm3, %v6636_v51  ;;  %6292 = vmatprep.mubr.msk.bf16.mxu0 %vm695_vm3, %v5666_v10  ;;  %v2309_v10 = vrot.slane %v2307_v18, 5  ;;  %v2337_v51 = vshll.u32 %v6687_v61, 16  ;;  %v2341_v28 = vshrl.u32 %v6687_v61, 16  ;;  %v2321_v0 = vrot.slane %v2320_v13, 4 }
 0x13e   : > { %6138 = vmatprep.mubr.msk.bf16.mxu1 %vm695_vm3, %v6637_v21  ;;  %v2352_v21 = vshrl.u32 %v5378_v35, 16  ;;  %v6690_v35 = vld [vmem:[%s6766_s28 + $0x98] sm:$0x1]  ;;  %v2376_v61 = vshrl.u32 %v5381_v39, 16  ;;  %v5387_v39 = vld [vmem:[%s6766_s28 + $0xc0] sm:$0xf] }
 0x13f   : > { %v2310_v15 = vor.u32 %v2309_v10, %v2306_v36  ;;  %v8351_v26 = vrot.slane %v2337_v51, 5  ;;  %v2325_v36 = vrot.slane %v2323_v30, 5  ;;  %v2334_v10 = vor.u32 %v2333_v14, %v2330_v9  ;;  %v5384_v51 = vld [vmem:[%s6766_s28 + $0xb4] sm:$0xf] }
 0x140   : > { %v2354_v18 = vrot.slane %v2352_v21, 4  ;;  %v2389_v21 = vshrl.u32 %v6692_v27, 16  ;;  %v2400_v20 = vshrl.u32 %v5384_v51, 16  ;;  %v2403_v42 = vshll.u32 %v5384_v51, 16 }
 0x141   : > { %v2311_v52 = vrot.slane %v2310_v15, 4  ;;  %v2326_v46 = vsel %vm6792_vm4, %v2321_v0, %v2325_v36  ;;  %v2335_v15 = vrot.slane %v2334_v10, 4  ;;  %v2373_v30 = vrot.slane %v2371_v7, 5 }
 0x142   : > { %v2358_v23 = vor.u32 %v2357_v11, %v2354_v18  ;;  %v2378_v9 = vrot.slane %v2376_v61, 4  ;;  %v2391_v11 = vrot.slane %v2389_v21, 4  ;;  %v6696_v61 = vld [vmem:[%s6766_s28 + $0xbc] sm:$0x1] }
 0x143   : > { %v2316_v47 = vsel %vm6792_vm4, %v2311_v52, %v8331_v24  ;;  %v2340_v0 = vsel %vm6792_vm4, %v2335_v15, %v8351_v26  ;;  %v2419_v22 = vshll.u32 %v6696_v61, 16 }
 0x144   : > { %6293 = vmatmul.mubr.msk.bf16.gmra.mrb[8].mxu0 %vm695_vm3, %v5667_v40  ;;  %v2365_v40 = vshrl.u32 %v6688_v60, 16  ;;  %v2359_v17 = vrot.slane %v2358_v23, 4  ;;  %v5400_v24 = vcombine.low %v2316_v47, %v2326_v46 }
 0x145   : > { %6139 = vmatmul.mubr.msk.bf16.gmra.mrb[24].mxu1 %vm695_vm3, %v6638_v2  ;;  %6296 = vmatprep.mubr.msk.bf16.mxu0 %vm695_vm3, %v5668_v54  ;;  %v2343_v54 = vrot.slane %v2341_v28, 4 }
 0x146   : > { %6142 = vmatprep.mubr.msk.bf16.mxu1 %vm695_vm3, %v6639_v34  ;;  %v2367_v2 = vrot.slane %v2365_v40, 4  ;;  %v2347_v34 = vshll.u32 %v6690_v35, 16  ;;  %v2364_v10 = vsel %vm6792_vm4, %v2359_v17, %v8354_v6  ;;  %v2445_v17 = vrot.slane %v2443_v57, 5 }
 0x147   : > { %v2344_v49 = vor.u32 %v2343_v54, %v8351_v26  ;;  %v2381_v54 = vrot.slane %v2379_v45, 5  ;;  %v6694_v26 = vld [vmem:[%s6766_s28 + $0xb0] sm:$0x1] }
 0x148   : > { %v2368_v28 = vor.u32 %v2367_v2, %v8354_v6  ;;  %v2349_v60 = vrot.slane %v2347_v34, 5  ;;  %v2395_v35 = vshll.u32 %v6694_v26, 16  ;;  %v2424_v34 = vshrl.u32 %v5387_v39, 16 }
 0x149   : > { %v2345_v13 = vrot.slane %v2344_v49, 4  ;;  %v2382_v38 = vor.u32 %v2381_v54, %v2378_v9  ;;  %v2427_v6 = vshll.u32 %v5387_v39, 16  ;;  %v6695_v49 = vld [vmem:[%s6766_s28 + $0xc4] sm:$0xf]  ;;  %v8459_v39 = vld [vmem:[%s8531_s2] ss:$0 sm:$0xff] }
 0x14a   : > { %v2369_v14 = vrot.slane %v2368_v28, 4  ;;  %v2433_v23 = vshll.u32 %v6695_v49, 16  ;;  %v2437_v25 = vshrl.u32 %v6695_v49, 16  ;;  %v2397_v45 = vrot.slane %v2395_v35, 5 }
 0x14b   : > { %v2350_v36 = vsel %vm6792_vm4, %v2345_v13, %v2349_v60  ;;  %v2383_v51 = vrot.slane %v2382_v38, 4  ;;  %v2421_v60 = vrot.slane %v2419_v22, 5 }
 0x14c   : > { %6297 = vmatmul.mubr.msk.bf16.gmra.mrb[12].mxu0 %vm695_vm3, %v5669_v53  ;;  %v2385_v53 = vshll.u32 %v6692_v27, 16  ;;  %v2374_v59 = vsel %vm6792_vm4, %v2369_v14, %v2373_v30  ;;  %v5401_v44 = vcombine.low %v2340_v0, %v2350_v36  ;;  %v2426_v27 = vrot.slane %v2424_v34, 4 }
 0x14d   : > { %6143 = vmatmul.mubr.msk.bf16.gmra.mrb[28].mxu1 %vm695_vm3, %v6640_v19  ;;  %6300 = vmatprep.mubr.msk.bf16.mxu0 %vm695_vm3, %v5670_v33  ;;  %v6693_v33 = vld [vmem:[%s6766_s28 + $0xb8] sm:$0xf]  ;;  %v2402_v19 = vrot.slane %v2400_v20, 4  ;;  %v2435_v21 = vrot.slane %v2433_v23, 5  ;;  %v2439_v47 = vrot.slane %v2437_v25, 4  ;;  %s208_s28 = scalar_lea.vmem %s8533_s4, %s5165_s25 }
 0x14e   : > { %6164 = vmatprep.mubr.msk.bf16.mxu1 %vm695_vm3, %v5398_v41  ;;  %v2409_v12 = vshll.u32 %v6693_v33, 16  ;;  %v2413_v40 = vshrl.u32 %v6693_v33, 16  ;;  %v2387_v18 = vrot.slane %v2385_v53, 5  ;;  %v2405_v41 = vrot.slane %v2403_v42, 5 }
 0x14f   : > { %v2429_v53 = vrot.slane %v2427_v6, 5 }
 0x150   : > { %v2411_v52 = vrot.slane %v2409_v12, 5  ;;  %v2415_v2 = vrot.slane %v2413_v40, 4  ;;  %v2388_v20 = vsel %vm6792_vm4, %v2383_v51, %v2387_v18  ;;  %v2440_v12 = vor.u32 %v2439_v47, %v2435_v21 }
 0x151   : > { %v2430_v33 = vor.u32 %v2429_v53, %v2426_v27 }
 0x152   : > { %v2416_v7 = vor.u32 %v2415_v2, %v2411_v52  ;;  %v2441_v13 = vrot.slane %v2440_v12, 4 }
 0x153   : > { %v2431_v40 = vrot.slane %v2430_v33, 4 }
 0x154   : > { %6301 = vmatmul.mubr.msk.bf16.gmra.mrb[16].mxu0 %vm695_vm3, %v5671_v37  ;;  %v2392_v37 = vor.u32 %v2391_v11, %v2387_v18  ;;  %v2417_v15 = vrot.slane %v2416_v7, 4  ;;  %v2446_v9 = vsel %vm6792_vm4, %v2441_v13, %v2445_v17 }
 0x155   : > { %6165 = vmatmul.mubr.msk.bf16.vlgmr.msra.gmra.mrb[16].mxu1 %vm695_vm3, %v8160_v1  ;;  %6304 = vmatprep.mubr.msk.bf16.mxu0 %vm695_vm3, %v5672_v3  ;;  %v2406_v1 = vor.u32 %v2405_v41, %v2402_v19  ;;  %v5402_v3 = vcombine.low %v2364_v10, %v2374_v59  ;;  %v2436_v30 = vsel %vm6792_vm4, %v2431_v40, %v2435_v21 }
 0x156   : > { %6168 = vmatprep.mubr.msk.bf16.mxu1 %vm695_vm3, %v5400_v24  ;;  %v2393_v28 = vrot.slane %v2392_v37, 4  ;;  %v2422_v48 = vsel %vm6792_vm4, %v2417_v15, %v2421_v60  ;;  %v5405_v14 = vcombine.low %v2436_v30, %v2446_v9 }
 0x157   : > { %v2407_v46 = vrot.slane %v2406_v1, 4 }
 0x158   : > { %v2398_v42 = vsel %vm6792_vm4, %v2393_v28, %v2397_v45 }
 0x159   : > { %v5403_v62 = vcombine.low %v2388_v20, %v2398_v42 }
 0x15c   : > { %6305 = vmatmul.mubr.msk.bf16.gmra.mrb[20].mxu0 %vm695_vm3, %v5673_v8  ;;  %v2412_v8 = vsel %vm6792_vm4, %v2407_v46, %v2411_v52 }
 0x15d   : > { %6169 = vmatmul.mubr.msk.bf16.gmra.mrb[20].mxu1 %vm695_vm3, %v5401_v44  ;;  %6308 = vmatprep.mubr.msk.bf16.mxu0 %vm695_vm3, %v5674_v56  ;;  %v5404_v56 = vcombine.low %v2412_v8, %v2422_v48 }
 0x15e   : > { %6172 = vmatprep.mubr.msk.bf16.mxu1 %vm695_vm3, %v5402_v3 }
 0x164   : > { %6309 = vmatmul.mubr.msk.bf16.gmra.mrb[24].mxu0 %vm695_vm3, %v5675_v43 }
 0x165   : > { %6173 = vmatmul.mubr.msk.bf16.gmra.mrb[24].mxu1 %vm695_vm3, %v5403_v62  ;;  %6312 = vmatprep.mubr.msk.bf16.mxu0 %vm695_vm3, %v5676_v50 }
 0x166   : > { %6176 = vmatprep.mubr.msk.bf16.mxu1 %vm695_vm3, %v5404_v56 }
 0x16c   : > { %6313 = vmatmul.mubr.msk.bf16.gmra.mrb[28].mxu0 %vm695_vm3, %v5677_v29 }
 0x16d   : > { %6177 = vmatmul.mubr.msk.bf16.gmra.mrb[28].mxu1 %vm695_vm3, %v5405_v14 }
 0x1e8   : > { %v6116_v63 = vpop.f32.mrb[0].mxu1 }
 0x1e9   : > { %v1856_v4 = vpop.f32.mrb[1].mxu1 }
 0x1ea   : > { %v6117_v43 = vpop.f32.mrb[2].mxu1 }
 0x1eb   : > { %v1859_v16 = vpop.f32.mrb[3].mxu1 }
 0x1f0   : > { %v6120_v58 = vpop.f32.mrb[4].mxu1 }
 0x1f1   : > { %v1872_v50 = vpop.f32.mrb[5].mxu1 }
 0x1f2   : > { %v6121_v54 = vpop.f32.mrb[6].mxu1 }
 0x1f3   : > { %v1875_v18 = vpop.f32.mrb[7].mxu1 }
 0x1f8   : > { %v6124_v11 = vpop.f32.mrb[8].mxu1 }
 0x1f9   : > { %v8442_v32 = vpop.f32.mrb[9].mxu1 }
 0x1fa   : > { %v8444_v24 = vpop.f32.mrb[10].mxu1 }
 0x1fb   : > { %v8446_v19 = vpop.f32.mrb[11].mxu1 }
 0x200   : > { %v8448_v5 = vpop.f32.mrb[12].mxu1 }
 0x201   : > { %v8450_v55 = vpop.f32.mrb[13].mxu1 }
 0x202   : > { %v8452_v29 = vpop.f32.mrb[14].mxu1 }
 0x203   : > { %v8454_v41 = vpop.f32.mrb[15].mxu1 }
 0x207   : > { %v6286_v52 = vpop.f32.mrb[0].mxu0 }
 0x208   : > { %v6318_v2 = vadd.f32 %v6286_v52, %v6116_v63  ;;  %v4602_v0 = vpop.f32.mrb[1].mxu0 }
 0x209   : > { %v6319_v36 = vadd.f32 %v4602_v0, %v1856_v4  ;;  %v6287_v10 = vpop.f32.mrb[2].mxu0 }
 0x20a   : > { %v6320_v59 = vadd.f32 %v6287_v10, %v6117_v43  ;;  %v4605_v38 = vpop.f32.mrb[3].mxu0  ;;  %v4770_v35 = vadd.f32 %v6318_v2, %v8459_v39 }
 0x20b   : > { %v4768_v37 = vadd.f32 %v6319_v36, %v8459_v39  ;;  %v6321_v26 = vadd.f32 %v4605_v38, %v1859_v16 }
 0x20c   : > { %v4771_v34 = vadd.f32 %v6320_v59, %v8459_v39  ;;  %v4999_v3 = vmul.f32 %v4770_v35, %v4770_v35 }
 0x20d   : > { %v4769_v6 = vadd.f32 %v6321_v26, %v8459_v39  ;;  %v4997_v23 = vmul.f32 %v4768_v37, %v4768_v37 }
 0x20e   : > { %v5770_v49 = vpack.c.bf16 %v4771_v34, %v4770_v35  ;;  %v5000_v53 = vmul.f32 %v4771_v34, %v4771_v34 }
 0x20f   : > { %v5765_v25 = vpack.c.bf16 %v4769_v6, %v4768_v37  ;;  %v4960_v1 = vadd.f32 %v4769_v6, %v4768_v37  ;;  %v4998_v7 = vmul.f32 %v4769_v6, %v4769_v6  ;;  %v6290_v61 = vpop.f32.mrb[4].mxu0 }
 0x210   : > { %5842 = vst [vmem:[%s8468_s24 + $0x8] sm:$0xff] %v5770_v49   ;;  %v6322_v22 = vadd.f32 %v6290_v61, %v6120_v58  ;;  %v4618_v44 = vpop.f32.mrb[5].mxu0 }
 0x211   : > { %5766 = vst [vmem:[%s8468_s24] sm:$0xff] %v5765_v25   ;;  %v4961_v51 = vadd.f32 %v4960_v1, %v4770_v35  ;;  %v5029_v28 = vadd.f32 %v4998_v7, %v4997_v23  ;;  %v6323_v45 = vadd.f32 %v4618_v44, %v1872_v50  ;;  %v6291_v27 = vpop.f32.mrb[6].mxu0 }
 0x212   : > { %v6324_v21 = vadd.f32 %v6291_v27, %v6121_v54  ;;  %v4621_v47 = vpop.f32.mrb[7].mxu0  ;;  %v4774_v42 = vadd.f32 %v6322_v22, %v8459_v39 }
 0x213   : > { %v5030_v46 = vadd.f32 %v5029_v28, %v4999_v3  ;;  %v4772_v15 = vadd.f32 %v6323_v45, %v8459_v39  ;;  %v4962_v60 = vadd.f32 %v4961_v51, %v4771_v34  ;;  %v6325_v20 = vadd.f32 %v4621_v47, %v1875_v18 }
 0x214   : > { %v4775_v33 = vadd.f32 %v6324_v21, %v8459_v39  ;;  %v5003_v14 = vmul.f32 %v4774_v42, %v4774_v42 }
 0x215   : > { %v4963_v12 = vadd.f32 %v4962_v60, %v4772_v15  ;;  %v5001_v31 = vmul.f32 %v4772_v15, %v4772_v15  ;;  %v5031_v57 = vadd.f32 %v5030_v46, %v5000_v53  ;;  %v4773_v8 = vadd.f32 %v6325_v20, %v8459_v39 }
 0x216   : > { %v5780_v48 = vpack.c.bf16 %v4775_v33, %v4774_v42  ;;  %v5004_v58 = vmul.f32 %v4775_v33, %v4775_v33 }
 0x217   : > { %v5032_v62 = vadd.f32 %v5031_v57, %v5001_v31  ;;  %v5775_v56 = vpack.c.bf16 %v4773_v8, %v4772_v15  ;;  %v4964_v40 = vadd.f32 %v4963_v12, %v4773_v8  ;;  %v5002_v13 = vmul.f32 %v4773_v8, %v4773_v8  ;;  %v6294_v17 = vpop.f32.mrb[8].mxu0 }
 0x218   : > { %5844 = vst [vmem:[%s8468_s24 + $0x18] sm:$0xff] %v5780_v48   ;;  %v6326_v30 = vadd.f32 %v6294_v17, %v6124_v11  ;;  %v4634_v9 = vpop.f32.mrb[9].mxu0 }
 0x219   : > { %5843 = vst [vmem:[%s8468_s24 + $0x10] sm:$0xff] %v5775_v56   ;;  %v4965_v63 = vadd.f32 %v4964_v40, %v4774_v42  ;;  %v5033_v4 = vadd.f32 %v5032_v62, %v5002_v13  ;;  %v6327_v43 = vadd.f32 %v4634_v9, %v8442_v32  ;;  %v6295_v16 = vpop.f32.mrb[10].mxu0 }
 0x21a   : > { %v6328_v50 = vadd.f32 %v6295_v16, %v8444_v24  ;;  %v4637_v54 = vpop.f32.mrb[11].mxu0  ;;  %v4778_v11 = vadd.f32 %v6326_v30, %v8459_v39 }
 0x21b   : > { %v5034_v18 = vadd.f32 %v5033_v4, %v5003_v14  ;;  %v4776_v52 = vadd.f32 %v6327_v43, %v8459_v39  ;;  %v4966_v2 = vadd.f32 %v4965_v63, %v4775_v33  ;;  %v6329_v0 = vadd.f32 %v4637_v54, %v8446_v19 }
 0x21c   : > { %v4779_v36 = vadd.f32 %v6328_v50, %v8459_v39  ;;  %v5007_v23 = vmul.f32 %v4778_v11, %v4778_v11 }
 0x21d   : > { %v4967_v10 = vadd.f32 %v4966_v2, %v4776_v52  ;;  %v5005_v59 = vmul.f32 %v4776_v52, %v4776_v52  ;;  %v5035_v32 = vadd.f32 %v5034_v18, %v5004_v58  ;;  %v4777_v38 = vadd.f32 %v6329_v0, %v8459_v39 }
 0x21e   : > { %v5790_v37 = vpack.c.bf16 %v4779_v36, %v4778_v11  ;;  %v5008_v22 = vmul.f32 %v4779_v36, %v4779_v36 }
 0x21f   : > { %v5036_v24 = vadd.f32 %v5035_v32, %v5005_v59  ;;  %v5785_v26 = vpack.c.bf16 %v4777_v38, %v4776_v52  ;;  %v4968_v35 = vadd.f32 %v4967_v10, %v4777_v38  ;;  %v5006_v34 = vmul.f32 %v4777_v38, %v4777_v38  ;;  %v6298_v6 = vpop.f32.mrb[12].mxu0 }
 0x220   : > { %5846 = vst [vmem:[%s8468_s24 + $0x28] sm:$0xff] %v5790_v37   ;;  %v6330_v49 = vadd.f32 %v6298_v6, %v8448_v5  ;;  %v4650_v19 = vpop.f32.mrb[13].mxu0 }
 0x221   : > { %5845 = vst [vmem:[%s8468_s24 + $0x20] sm:$0xff] %v5785_v26   ;;  %v4969_v25 = vadd.f32 %v4968_v35, %v4778_v11  ;;  %v5037_v1 = vadd.f32 %v5036_v24, %v5006_v34  ;;  %v6331_v7 = vadd.f32 %v4650_v19, %v8450_v55  ;;  %v6299_v61 = vpop.f32.mrb[14].mxu0 }
 0x222   : > { %v6332_v44 = vadd.f32 %v6299_v61, %v8452_v29  ;;  %v4653_v3 = vpop.f32.mrb[15].mxu0  ;;  %v4782_v5 = vadd.f32 %v6330_v49, %v8459_v39 }
 0x223   : > { %v5038_v51 = vadd.f32 %v5037_v1, %v5007_v23  ;;  %v4780_v28 = vadd.f32 %v6331_v7, %v8459_v39  ;;  %v4970_v45 = vadd.f32 %v4969_v25, %v4779_v36  ;;  %v6333_v27 = vadd.f32 %v4653_v3, %v8454_v41 }
 0x224   : > { %v4783_v53 = vadd.f32 %v6332_v44, %v8459_v39  ;;  %v5011_v41 = vmul.f32 %v4782_v5, %v4782_v5 }
 0x225   : > { %v4971_v21 = vadd.f32 %v4970_v45, %v4780_v28  ;;  %v5009_v47 = vmul.f32 %v4780_v28, %v4780_v28  ;;  %v5039_v55 = vadd.f32 %v5038_v51, %v5008_v22  ;;  %v4781_v46 = vadd.f32 %v6333_v27, %v8459_v39 }
 0x226   : > { %v5800_v15 = vpack.c.bf16 %v4783_v53, %v4782_v5  ;;  %v5012_v30 = vmul.f32 %v4783_v53, %v4783_v53 }
 0x227   : > { %v5040_v29 = vadd.f32 %v5039_v55, %v5009_v47  ;;  %v5795_v60 = vpack.c.bf16 %v4781_v46, %v4780_v28  ;;  %v4972_v20 = vadd.f32 %v4971_v21, %v4781_v46  ;;  %v5010_v42 = vmul.f32 %v4781_v46, %v4781_v46  ;;  %v6302_v33 = vpop.f32.mrb[16].mxu0 }
 0x228   : > { %5848 = vst [vmem:[%s8468_s24 + $0x38] sm:$0xff] %v5800_v15   ;;  %v6166_v12 = vpop.f32.mrb[16].mxu1  ;;  %v4666_v31 = vpop.f32.mrb[17].mxu0 }
 0x229   : > { %5847 = vst [vmem:[%s8468_s24 + $0x30] sm:$0xff] %v5795_v60   ;;  %v4973_v57 = vadd.f32 %v4972_v20, %v4782_v5  ;;  %v5041_v8 = vadd.f32 %v5040_v29, %v5010_v42  ;;  %v6334_v48 = vadd.f32 %v6302_v33, %v6166_v12  ;;  %v2645_v62 = vpop.f32.mrb[17].mxu1  ;;  %v6303_v56 = vpop.f32.mrb[18].mxu0 }
 0x22a   : > { %v6335_v40 = vadd.f32 %v4666_v31, %v2645_v62  ;;  %v6167_v13 = vpop.f32.mrb[18].mxu1  ;;  %v4669_v17 = vpop.f32.mrb[19].mxu0 }
 0x22b   : > { %v5042_v9 = vadd.f32 %v5041_v8, %v5011_v41  ;;  %v4974_v14 = vadd.f32 %v4973_v57, %v4783_v53  ;;  %v6336_v63 = vadd.f32 %v6303_v56, %v6167_v13  ;;  %v2648_v4 = vpop.f32.mrb[19].mxu1  ;;  %v4786_v58 = vadd.f32 %v6334_v48, %v8459_v39 }
 0x22c   : > { %v4784_v43 = vadd.f32 %v6335_v40, %v8459_v39  ;;  %v6337_v16 = vadd.f32 %v4669_v17, %v2648_v4 }
 0x22d   : > { %v5043_v50 = vadd.f32 %v5042_v9, %v5012_v30  ;;  %v4787_v54 = vadd.f32 %v6336_v63, %v8459_v39  ;;  %v5015_v34 = vmul.f32 %v4786_v58, %v4786_v58 }
 0x22e   : > { %v4975_v18 = vadd.f32 %v4974_v14, %v4784_v43  ;;  %v5013_v52 = vmul.f32 %v4784_v43, %v4784_v43  ;;  %v4785_v2 = vadd.f32 %v6337_v16, %v8459_v39 }
 0x22f   : > { %v5810_v0 = vpack.c.bf16 %v4787_v54, %v4786_v58  ;;  %v6306_v11 = vpop.f32.mrb[20].mxu0  ;;  %v5016_v1 = vmul.f32 %v4787_v54, %v4787_v54 }
 0x230   : > { %v5044_v36 = vadd.f32 %v5043_v50, %v5013_v52  ;;  %v5805_v10 = vpack.c.bf16 %v4785_v2, %v4784_v43  ;;  %v4976_v59 = vadd.f32 %v4975_v18, %v4785_v2  ;;  %v5014_v32 = vmul.f32 %v4785_v2, %v4785_v2  ;;  %v6170_v38 = vpop.f32.mrb[20].mxu1  ;;  %v4682_v37 = vpop.f32.mrb[21].mxu0 }
 0x231   : > { %5850 = vst [vmem:[%s8468_s24 + $0x48] sm:$0xff] %v5810_v0   ;;  %v6338_v24 = vadd.f32 %v6306_v11, %v6170_v38  ;;  %v2661_v26 = vpop.f32.mrb[21].mxu1  ;;  %v6307_v35 = vpop.f32.mrb[22].mxu0 }
 0x232   : > { %5849 = vst [vmem:[%s8468_s24 + $0x40] sm:$0xff] %v5805_v10   ;;  %v4977_v6 = vadd.f32 %v4976_v59, %v4786_v58  ;;  %v5045_v49 = vadd.f32 %v5044_v36, %v5014_v32  ;;  %v6339_v19 = vadd.f32 %v4682_v37, %v2661_v26  ;;  %v6171_v23 = vpop.f32.mrb[22].mxu1  ;;  %v4685_v25 = vpop.f32.mrb[23].mxu0 }
 0x233   : > { %v6340_v7 = vadd.f32 %v6307_v35, %v6171_v23  ;;  %v2664_v61 = vpop.f32.mrb[23].mxu1  ;;  %v4790_v28 = vadd.f32 %v6338_v24, %v8459_v39 }
 0x234   : > { %v5046_v22 = vadd.f32 %v5045_v49, %v5015_v34  ;;  %v4788_v44 = vadd.f32 %v6339_v19, %v8459_v39  ;;  %v4978_v3 = vadd.f32 %v4977_v6, %v4787_v54  ;;  %v6341_v51 = vadd.f32 %v4685_v25, %v2664_v61 }
 0x235   : > { %v4791_v45 = vadd.f32 %v6340_v7, %v8459_v39  ;;  %v5019_v41 = vmul.f32 %v4790_v28, %v4790_v28 }
 0x236   : > { %v4979_v27 = vadd.f32 %v4978_v3, %v4788_v44  ;;  %v5017_v5 = vmul.f32 %v4788_v44, %v4788_v44  ;;  %v5047_v53 = vadd.f32 %v5046_v22, %v5016_v1  ;;  %v4789_v21 = vadd.f32 %v6341_v51, %v8459_v39 }
 0x237   : > { %v5820_v47 = vpack.c.bf16 %v4791_v45, %v4790_v28  ;;  %v6310_v55 = vpop.f32.mrb[24].mxu0  ;;  %v5020_v40 = vmul.f32 %v4791_v45, %v4791_v45 }
 0x238   : > { %v5048_v46 = vadd.f32 %v5047_v53, %v5017_v5  ;;  %v5815_v15 = vpack.c.bf16 %v4789_v21, %v4788_v44  ;;  %v4980_v29 = vadd.f32 %v4979_v27, %v4789_v21  ;;  %v5018_v60 = vmul.f32 %v4789_v21, %v4789_v21  ;;  %v6174_v20 = vpop.f32.mrb[24].mxu1  ;;  %v4698_v42 = vpop.f32.mrb[25].mxu0 }
 0x239   : > { %5852 = vst [vmem:[%s8468_s24 + $0x58] sm:$0xff] %v5820_v47   ;;  %v6342_v33 = vadd.f32 %v6310_v55, %v6174_v20  ;;  %v2677_v12 = vpop.f32.mrb[25].mxu1  ;;  %v6311_v31 = vpop.f32.mrb[26].mxu0 }
 0x23a   : > { %5851 = vst [vmem:[%s8468_s24 + $0x50] sm:$0xff] %v5815_v15   ;;  %v4981_v57 = vadd.f32 %v4980_v29, %v4790_v28  ;;  %v5049_v8 = vadd.f32 %v5048_v46, %v5018_v60  ;;  %v6343_v48 = vadd.f32 %v4698_v42, %v2677_v12  ;;  %v6175_v62 = vpop.f32.mrb[26].mxu1  ;;  %v4701_v56 = vpop.f32.mrb[27].mxu0 }
 0x23b   : > { %v6344_v13 = vadd.f32 %v6311_v31, %v6175_v62  ;;  %v2680_v17 = vpop.f32.mrb[27].mxu1  ;;  %v4794_v4 = vadd.f32 %v6342_v33, %v8459_v39 }
 0x23c   : > { %v5050_v30 = vadd.f32 %v5049_v8, %v5019_v41  ;;  %v4792_v9 = vadd.f32 %v6343_v48, %v8459_v39  ;;  %v4982_v14 = vadd.f32 %v4981_v57, %v4791_v45  ;;  %v6345_v63 = vadd.f32 %v4701_v56, %v2680_v17 }
 0x23d   : > { %v4795_v43 = vadd.f32 %v6344_v13, %v8459_v39  ;;  %v5023_v24 = vmul.f32 %v4794_v4, %v4794_v4 }
 0x23e   : > { %v4983_v16 = vadd.f32 %v4982_v14, %v4792_v9  ;;  %v5021_v58 = vmul.f32 %v4792_v9, %v4792_v9  ;;  %v5051_v50 = vadd.f32 %v5050_v30, %v5020_v40  ;;  %v4793_v54 = vadd.f32 %v6345_v63, %v8459_v39 }
 0x23f   : > { %v5830_v18 = vpack.c.bf16 %v4795_v43, %v4794_v4  ;;  %v6314_v52 = vpop.f32.mrb[28].mxu0  ;;  %v5024_v19 = vmul.f32 %v4795_v43, %v4795_v43 }
 0x240   : > { %v5052_v2 = vadd.f32 %v5051_v50, %v5021_v58  ;;  %v5825_v0 = vpack.c.bf16 %v4793_v54, %v4792_v9  ;;  %v4984_v11 = vadd.f32 %v4983_v16, %v4793_v54  ;;  %v5022_v36 = vmul.f32 %v4793_v54, %v4793_v54  ;;  %v6178_v10 = vpop.f32.mrb[28].mxu1  ;;  %v4714_v59 = vpop.f32.mrb[29].mxu0 }
 0x241   : > { %5854 = vst [vmem:[%s8468_s24 + $0x68] sm:$0xff] %v5830_v18   ;;  %v6346_v32 = vadd.f32 %v6314_v52, %v6178_v10  ;;  %v2693_v38 = vpop.f32.mrb[29].mxu1  ;;  %v6315_v37 = vpop.f32.mrb[30].mxu0 }
 0x242   : > { %5853 = vst [vmem:[%s8468_s24 + $0x60] sm:$0xff] %v5825_v0   ;;  %v4985_v26 = vadd.f32 %v4984_v11, %v4794_v4  ;;  %v5053_v35 = vadd.f32 %v5052_v2, %v5022_v36  ;;  %v6347_v34 = vadd.f32 %v4714_v59, %v2693_v38  ;;  %v6179_v6 = vpop.f32.mrb[30].mxu1  ;;  %v4717_v49 = vpop.f32.mrb[31].mxu0 }
 0x243   : > { %v6348_v23 = vadd.f32 %v6315_v37, %v6179_v6  ;;  %v2696_v25 = vpop.f32.mrb[31].mxu1  ;;  %v4798_v44 = vadd.f32 %v6346_v32, %v8459_v39 }
 0x244   : > { %v5054_v1 = vadd.f32 %v5053_v35, %v5023_v24  ;;  %v4796_v7 = vadd.f32 %v6347_v34, %v8459_v39  ;;  %v4986_v61 = vadd.f32 %v4985_v26, %v4795_v43  ;;  %v6349_v22 = vadd.f32 %v4717_v49, %v2696_v25 }
 0x245   : > { %v4799_v3 = vadd.f32 %v6348_v23, %v8459_v39  ;;  %v5027_v46 = vmul.f32 %v4798_v44, %v4798_v44 }
 0x246   : > { %v4987_v51 = vadd.f32 %v4986_v61, %v4796_v7  ;;  %v5025_v28 = vmul.f32 %v4796_v7, %v4796_v7  ;;  %v5055_v45 = vadd.f32 %v5054_v1, %v5024_v19  ;;  %v4797_v27 = vadd.f32 %v6349_v22, %v8459_v39 }
 0x247   : > { %v5840_v5 = vpack.c.bf16 %v4799_v3, %v4798_v44  ;;  %v5028_v60 = vmul.f32 %v4799_v3, %v4799_v3 }
 0x248   : > { %v5056_v53 = vadd.f32 %v5055_v45, %v5025_v28  ;;  %v5835_v21 = vpack.c.bf16 %v4797_v27, %v4796_v7  ;;  %v4988_v47 = vadd.f32 %v4987_v51, %v4797_v27  ;;  %v5026_v55 = vmul.f32 %v4797_v27, %v4797_v27 }
 0x249   : > { %5856 = vst [vmem:[%s8468_s24 + $0x78] sm:$0xff] %v5840_v5  }
 0x24a   : > { %5855 = vst [vmem:[%s8468_s24 + $0x70] sm:$0xff] %v5835_v21   ;;  %v4989_v15 = vadd.f32 %v4988_v47, %v4798_v44  ;;  %v5057_v29 = vadd.f32 %v5056_v53, %v5026_v55 }
 0x24c   : > { %v4990_v20 = vadd.f32 %v4989_v15, %v4799_v3  ;;  %v5058_v42 = vadd.f32 %v5057_v29, %v5027_v46 }
 0x24e   : > { %v4991_v33 = vrot.slane %v4990_v20, 4  ;;  %v5059_v12 = vadd.f32 %v5058_v42, %v5028_v60 }
 0x250   : > { %v4992_v31 = vadd.f32 %v4991_v33, %v4990_v20  ;;  %v5060_v41 = vrot.slane %v5059_v12, 4 }
 0x252   : > { %v4993_v57 = vrot.slane %v4992_v31, 2  ;;  %v5061_v39 = vadd.f32 %v5060_v41, %v5059_v12 }
 0x254   : > { %v4994_v8 = vadd.f32 %v4993_v57, %v4992_v31  ;;  %v5062_v48 = vrot.slane %v5061_v39, 2 }
 0x256   : > { %v4995_v62 = vrot.slane %v4994_v8, 1  ;;  %v5063_v56 = vadd.f32 %v5062_v48, %v5061_v39 }
 0x258   : > { %v5064_v40 = vrot.slane %v5063_v56, 1  ;;  %v4996_v13 = vadd.f32 %v4995_v62, %v4994_v8 }
 0x25a   : > { %v5065_v17 = vadd.f32 %v5064_v40, %v5063_v56 }
 0x25c   : > { %v5067_v30 = vsel %vm5066_vm8, %v4996_v13, %v5065_v17 }
 0x25d   : > { %v5069_v9 = vsel %vm5068_vm9, %v5067_v30, 0.0 }
 0x25e   : > { %5070 = vst [vmem:[%s208_s28] sm:$0xff] %v5069_v9 }
 0x25f PF: > { %s15_s15 = sadd.s32 1, %s6704_s15  }
 0x260   : > { %p12_p4 = scmp.ge.s32.totalorder %s15_s15, 4  }
 0x262   :  { %14 = sbr.rel (!%p12_p4) target bundleno = 1 (0x1), region = 76 }

// kernel: conv_block_forward.6
= control target key start
LH: loop header
LB: loop body
LE: loop exit
PB: predicated region body
PF: predicated region fallthrough
CT: control target
= control target key end

     0   :  { %s7187_s15 = smov 0   ;;  %s9046_s0 = inlined_call_operand.vmem [shape: bf16[2,18,18,128], index: 0, kind: input, shape index: {}]   ;;  %s9047_s1 = inlined_call_operand.vmem [shape: bf16[1152,128], index: 1, kind: input, shape index: {}]   ;;  %s9048_s2 = inlined_call_operand.vmem [shape: f32[1,128], index: 2, kind: input, shape index: {}]   ;;  %s9049_s3 = inlined_call_operand.vmem [shape: bf16[2,16,16,128], index: 3, kind: output, shape index: {0}]   ;;  %s9050_s4 = inlined_call_operand.vmem [shape: f32[2,8,128], index: 4, kind: output, shape index: {1}]  }
   0x1 LB: > { %s5407_s16 = sadd.s32 4294967295, %s7160_s15   ;;  %p5411_p0 = scmp.ge.s32.totalorder %s7160_s15, 1  ;;  %s7160_s15 = sphi %s7187_s15, %s15_s15  }
   0x2   : > { %p165_p1 = scmp.lt.s32.totalorder %s7160_s15, 3 }
   0x4   : > { %p166_p2 = pnand %p5411_p0, %p165_p1 }
   0x6   : > { %169 = sbr.rel (%p166_p2) target bundleno = 607 (0x25f), region = 32 }
   0xd   : > { %v6964_v0 = vld [vmem:[%s9047_s1 + $0x40] sm:$0xff]   ;;  %p195_p3 = scmp.lt.s32.totalorder %s5407_s16, 1  ;;  %v6966_v2 = vld [vmem:[%s9047_s1 + $0x48] sm:$0xff]   ;;  %v6968_v4 = vld [vmem:[%s9047_s1 + $0x50] sm:$0xff]   ;;  %vm274_vm0 = vsmask.f32 3328 }
   0xe   : > { %v6965_v1 = vld [vmem:[%s9047_s1 + $0x100] sm:$0xff]   ;;  %6251 = vmatprep.subr.bf16.mxu1 %v6964_v0  ;;  %v6967_v3 = vld [vmem:[%s9047_s1 + $0x108] sm:$0xff]   ;;  %v6969_v5 = vld [vmem:[%s9047_s1 + $0x110] sm:$0xff]   ;;  %vm275_vm1 = vsmask.f32 7440  ;;  %vm1303_vm3 = vcmask 1042432  }
   0xf   : > { %6443 = vmatprep.subr.bf16.mxu0 %v6965_v1  ;;  %6252 = vmatpush3.bf16.msra.mxu1 %v6964_v0  ;;  %s9118_s16 = smov (!%p195_p3, %s5407_s16), 1  ;;  %v6970_v6 = vld [vmem:[%s9047_s1 + $0x58] sm:$0xff]   ;;  %v6972_v8 = vld [vmem:[%s9047_s1 + $0x60] sm:$0xff]   ;;  %v6974_v10 = vld [vmem:[%s9047_s1 + $0x68] sm:$0xff]   ;;  %vm1304_vm4 = vcmask 1046532   ;;  %vm5316_vm6 = vcmask 1040384  }
  0x10   : > { %6444 = vmatpush3.bf16.msra.mxu0 %v6965_v1  ;;  %6253 = vmatprep.subr.bf16.mxu1 %v6966_v2  ;;  %v6971_v7 = vld [vmem:[%s9047_s1 + $0x118] sm:$0xff]   ;;  %s6955_s7 = smul.u32 216, %s9118_s16  ;;  %v6973_v9 = vld [vmem:[%s9047_s1 + $0x120] sm:$0xff]   ;;  %v6975_v11 = vld [vmem:[%s9047_s1 + $0x128] sm:$0xff]   ;;  %s5907_s20 = sshll.u32 %s9118_s16, 7  ;;  %vm5318_vm7 = vcmask 1041408  }
  0x11   : > { %6445 = vmatprep.subr.bf16.mxu0 %v6967_v3  ;;  %v6976_v25 = vld [vmem:[%s9047_s1 + $0x70] sm:$0xff]   ;;  %v6978_v36 = vld [vmem:[%s9047_s1 + $0x78] sm:$0xff]   ;;  %vm7263_vm2 = vmor %vm274_vm0, %vm275_vm1  ;;  %s8985_s23 = scalar_lea.vmem %s9049_s3, %s5907_s20  ;;  %s5415_s24 = sshll.u32 %s9118_s16, 3 }
  0x12   : > { %s7231_s14 = scalar_lea.vmem %s9046_s0, %s6955_s7  ;;  %v6977_v30 = vld [vmem:[%s9047_s1 + $0x130] sm:$0xff]   ;;  %v6979_v51 = vld [vmem:[%s9047_s1 + $0x138] sm:$0xff]   ;;  %vm7509_vm5 = vmor %vm1303_vm3, %vm1304_vm4  ;;  %s208_s27 = scalar_lea.vmem %s9050_s4, %s5415_s24 }
  0x13   : > { %6254 = vmatpush3.bf16.msra.mxu1 %v6966_v2  ;;  %v210_v12 = vld [vmem:[%s7231_s14] sm:$0xf]  ;;  %v211_v13 = vld [vmem:[%s7231_s14 + $0x4] sm:$0xf]  ;;  %v258_v14 = vld [vmem:[%s7231_s14 + $0x8] sm:$0x1] }
  0x14   : > { %6446 = vmatpush3.bf16.msra.mxu0 %v6967_v3  ;;  %6255 = vmatprep.subr.bf16.mxu1 %v6968_v4  ;;  %v278_v15 = vshrl.u32 %v210_v12, 16  ;;  %v281_v16 = vshll.u32 %v210_v12, 16  ;;  %v287_v17 = vshll.u32 %v211_v13, 16  ;;  %v291_v18 = vshrl.u32 %v211_v13, 16  ;;  %v5560_v20 = vld [vmem:[%s7231_s14 + $0xc] sm:$0xf] }
  0x15   : > { %6447 = vmatprep.subr.bf16.mxu0 %v6969_v5  ;;  %v297_v19 = vshll.u32 %v258_v14, 16  ;;  %v7244_v23 = vld [vmem:[%s7231_s14 + $0x10] sm:$0xf]  ;;  %v7247_v24 = vld [vmem:[%s7231_s14 + $0x14] sm:$0x1]  ;;  %v2174_v29 = vshrl.u32 %v5560_v20, 16 }
  0x16   : > { %v280_v21 = vrot.slane %v278_v15, 4  ;;  %v283_v22 = vrot.slane %v281_v16, 5  ;;  %v289_v26 = vrot.slane %v287_v17, 5  ;;  %v293_v27 = vrot.slane %v291_v18, 4  ;;  %v212_v35 = vld [vmem:[%s7231_s14 + $0xc] sm:$0xf] }
  0x17   : > { %6256 = vmatpush3.bf16.msra.mxu1 %v6968_v4  ;;  %v299_v28 = vrot.slane %v297_v19, 5  ;;  %v2177_v32 = vshll.u32 %v5560_v20, 16  ;;  %v2183_v33 = vshll.u32 %v7244_v23, 16  ;;  %v2187_v34 = vshrl.u32 %v7244_v23, 16  ;;  %v213_v42 = vld [vmem:[%s7231_s14 + $0x10] sm:$0xf] }
  0x18   : > { %6448 = vmatpush3.bf16.msra.mxu0 %v6969_v5  ;;  %6257 = vmatprep.subr.bf16.mxu1 %v6970_v6  ;;  %v284_v31 = vor.u32 %v283_v22, %v280_v21  ;;  %v294_v38 = vor.u32 %v293_v27, %v289_v26  ;;  %v2176_v39 = vrot.slane %v2174_v29, 4  ;;  %v2193_v40 = vshll.u32 %v7247_v24, 16  ;;  %v259_v55 = vld [vmem:[%s7231_s14 + $0x14] sm:$0x1]  ;;  %v5563_v57 = vld [vmem:[%s7231_s14 + $0x18] sm:$0xf] }
  0x19   : > { %6449 = vmatprep.subr.bf16.mxu0 %v6971_v7  ;;  %v2947_v41 = vrot.slane %v7247_v24, 5  ;;  %v2179_v44 = vrot.slane %v2177_v32, 5  ;;  %v2185_v45 = vrot.slane %v2183_v33, 5  ;;  %v2189_v46 = vrot.slane %v2187_v34, 4  ;;  %v7280_v62 = vld [vmem:[%s7231_s14 + $0x1c] sm:$0xf] }
  0x1a   : > { %v285_v43 = vrot.slane %v284_v31, 4  ;;  %v295_v47 = vrot.slane %v294_v38, 4  ;;  %v2195_v48 = vrot.slane %v2193_v40, 5  ;;  %v302_v49 = vshrl.u32 %v212_v35, 16  ;;  %v6980_v3 = vld [vmem:[%s9047_s1] sm:$0xff]  }
  0x1b   : > { %6258 = vmatpush3.bf16.msra.mxu1 %v6970_v6  ;;  %v305_v50 = vshll.u32 %v212_v35, 16  ;;  %v2180_v53 = vor.u32 %v2179_v44, %v2176_v39  ;;  %v2190_v54 = vor.u32 %v2189_v46, %v2185_v45  ;;  %v311_v56 = vshll.u32 %v213_v42, 16  ;;  %v7288_v4 = vld [vmem:[%s9047_s1 + $0x140] sm:$0xff]   ;;  %v214_v21 = vld [vmem:[%s7231_s14 + $0x18] sm:$0xf]  ;;  %v6983_v46 = vld [vmem:[%s9047_s1 + $0x8] sm:$0xff]  }
  0x1c   : > { %6450 = vmatpush3.bf16.msra.mxu0 %v6971_v7  ;;  %6259 = vmatprep.subr.bf16.mxu1 %v6972_v8  ;;  %v290_v52 = vsel %vm7263_vm2, %v285_v43, %v289_v26  ;;  %v300_v58 = vsel %vm7263_vm2, %v295_v47, %v299_v28  ;;  %v304_v59 = vrot.slane %v302_v49, 4  ;;  %v315_v61 = vshrl.u32 %v213_v42, 16  ;;  %v215_v28 = vld [vmem:[%s7231_s14 + $0x1c] sm:$0xf]  ;;  %v260_v33 = vld [vmem:[%s7231_s14 + $0x20] sm:$0x1] }
  0x1d   : > { %6451 = vmatprep.subr.bf16.mxu0 %v6973_v9  ;;  %v307_v60 = vrot.slane %v305_v50, 5  ;;  %v5416_v63 = vcombine.low %v290_v52, %v300_v58  ;;  %v2181_v0 = vrot.slane %v2180_v53, 4  ;;  %v2191_v1 = vrot.slane %v2190_v54, 4  ;;  %v5566_v39 = vld [vmem:[%s7231_s14 + $0x24] sm:$0xf] }
  0x1e   : > { %v313_v2 = vrot.slane %v311_v56, 5  ;;  %v317_v6 = vrot.slane %v315_v61, 4  ;;  %v321_v7 = vshll.u32 %v259_v55, 16  ;;  %v2201_v12 = vshll.u32 %v5563_v57, 16  ;;  %v216_v52 = vld [vmem:[%s7231_s14 + $0x24] sm:$0xf] }
  0x1f   : > { %6260 = vmatpush3.bf16.msra.mxu1 %v6972_v8  ;;  %v308_v5 = vor.u32 %v307_v60, %v304_v59  ;;  %v7291_v8 = vld [vmem:[%s7231_s14 + $0x20] sm:$0x1]  ;;  %6267 = vmatprep.mubr.bf16.mxu1 %v5416_v63  ;;  %v2207_v19 = vshll.u32 %v7280_v62, 16  ;;  %v2211_v20 = vshrl.u32 %v7280_v62, 16  ;;  %v2951_v27 = vrot.slane %v7280_v62, 5  ;;  %v6982_v63 = vld [vmem:[%s9047_s1 + $0x148] sm:$0xff]  }
  0x20   : > { %6452 = vmatpush3.bf16.msra.mxu0 %v6973_v9  ;;  %6261 = vmatprep.subr.bf16.mxu1 %v6974_v10  ;;  %v2186_v9 = vsel %vm7263_vm2, %v2181_v0, %v2185_v45  ;;  %v318_v15 = vor.u32 %v317_v6, %v313_v2  ;;  %v323_v16 = vrot.slane %v321_v7, 5  ;;  %v2203_v18 = vrot.slane %v2201_v12, 5  ;;  %v7316_v45 = vld [vmem:[%s7231_s14 + $0x28] sm:$0xf] }
  0x21   : > { %6453 = vmatprep.subr.bf16.mxu0 %v6975_v11  ;;  %v309_v14 = vrot.slane %v308_v5, 4  ;;  %v2217_v26 = vshll.u32 %v7291_v8, 16  ;;  %v2213_v31 = vrot.slane %v2211_v20, 4  ;;  %v2954_v32 = vrot.slane %v7291_v8, 5  ;;  %v217_v5 = vld [vmem:[%s7231_s14 + $0x28] sm:$0xf] }
  0x22   : > { %v326_v38 = vshrl.u32 %v214_v21, 16  ;;  %v329_v44 = vshll.u32 %v214_v21, 16  ;;  %v339_v49 = vshrl.u32 %v215_v28, 16  ;;  %v345_v50 = vshll.u32 %v260_v33, 16  ;;  %v7347_v33 = vld [vmem:[%s7231_s14 + $0x34] sm:$0xf] }
  0x23   : > { %6262 = vmatpush3.bf16.msra.mxu1 %v6974_v10  ;;  %v2196_v10 = vsel %vm7263_vm2, %v2191_v1, %v2195_v48  ;;  %v314_v22 = vsel %vm7263_vm2, %v309_v14, %v313_v2  ;;  %v2219_v35 = vrot.slane %v2217_v26, 5  ;;  %v335_v48 = vshll.u32 %v215_v28, 16 }
  0x24   : > { %6454 = vmatpush3.bf16.msra.mxu0 %v6975_v11  ;;  %6263 = vmatprep.subr.bf16.mxu1 %v6976_v25  ;;  %v2198_v11 = vshrl.u32 %v5563_v57, 16  ;;  %v5608_v13 = vcombine.low %v2186_v9, %v2196_v10  ;;  %v328_v47 = vrot.slane %v326_v38, 4  ;;  %v331_v55 = vrot.slane %v329_v44, 5 }
  0x25   : > { %6455 = vmatprep.subr.bf16.mxu0 %v6977_v30  ;;  %v2222_v56 = vshrl.u32 %v5566_v39, 16  ;;  %v337_v57 = vrot.slane %v335_v48, 5  ;;  %v341_v58 = vrot.slane %v339_v49, 4  ;;  %v347_v59 = vrot.slane %v345_v50, 5  ;;  %v6985_v48 = vld [vmem:[%s9047_s1 + $0x158] sm:$0xff]  }
  0x26   : > { %v2200_v17 = vrot.slane %v2198_v11, 4  ;;  %6459 = vmatprep.mubr.bf16.mxu0 %v5608_v13  ;;  %v2225_v60 = vshll.u32 %v5566_v39, 16  ;;  %v332_v0 = vor.u32 %v331_v55, %v328_v47  ;;  %v2231_v2 = vshll.u32 %v7316_v45, 16  ;;  %v261_v11 = vld [vmem:[%s7231_s14 + $0x2c] sm:$0x1] }
  0x27   : > { %6264 = vmatpush3.bf16.msra.mxu1 %v6976_v25  ;;  %v319_v25 = vrot.slane %v318_v15, 4  ;;  %v2224_v1 = vrot.slane %v2222_v56, 4  ;;  %v342_v7 = vor.u32 %v341_v58, %v337_v57  ;;  %v2235_v10 = vshrl.u32 %v7316_v45, 16 }
  0x28   : > { %6456 = vmatpush3.bf16.msra.mxu0 %v6977_v30  ;;  %6265 = vmatprep.subr.bf16.mxu1 %v6978_v36  ;;  %v2204_v29 = vor.u32 %v2203_v18, %v2200_v17  ;;  %v2209_v30 = vrot.slane %v2207_v19, 5  ;;  %v2227_v9 = vrot.slane %v2225_v60, 5  ;;  %v333_v12 = vrot.slane %v332_v0, 4  ;;  %v6992_v60 = vld [vmem:[%s9047_s1 + $0x20] sm:$0xff]  }
  0x29   : > { %6457 = vmatprep.subr.bf16.mxu0 %v6979_v51  ;;  %v324_v34 = vsel %vm7263_vm2, %v319_v25, %v323_v16  ;;  %v2233_v13 = vrot.slane %v2231_v2, 5  ;;  %v350_v15 = vshrl.u32 %v216_v52, 16  ;;  %v5569_v16 = vld [vmem:[%s7231_s14 + $0x30] sm:$0xf]  ;;  %v343_v17 = vrot.slane %v342_v7, 4 }
  0x2a   : > { %v5417_v40 = vcombine.low %v314_v22, %v324_v34  ;;  %v2205_v42 = vrot.slane %v2204_v29, 4  ;;  %v2214_v43 = vor.u32 %v2213_v31, %v2209_v30  ;;  %v2228_v18 = vor.u32 %v2227_v9, %v2224_v1  ;;  %v6989_v34 = vld [vmem:[%s9047_s1 + $0x18] sm:$0xff]  }
  0x2b   : > { %6266 = vmatpush3.bf16.msra.mxu1 %v6978_v36  ;;  %v7312_v36 = vrot.slane %v2951_v27, 4  ;;  %v2237_v19 = vrot.slane %v2235_v10, 4  ;;  %v353_v20 = vshll.u32 %v216_v52, 16  ;;  %v338_v21 = vsel %vm7263_vm2, %v333_v12, %v337_v57  ;;  %v262_v2 = vld [vmem:[%s7231_s14 + $0x38] sm:$0x1] }
  0x2c   : > { %6458 = vmatpush3.bf16.msra.mxu0 %v6979_v51  ;;  %6299 = vmatprep.subr.bf16.mxu1 %v6980_v3  ;;  %v7322_v51 = vld [vmem:[%s7231_s14 + $0x2c] sm:$0x1]  ;;  %v2210_v53 = vsel %vm7263_vm2, %v2205_v42, %v2209_v30  ;;  %v2215_v54 = vrot.slane %v2214_v43, 4  ;;  %v352_v25 = vrot.slane %v350_v15, 4  ;;  %v359_v26 = vshll.u32 %v217_v5, 16 }
  0x2d   : > { %6491 = vmatprep.subr.bf16.mxu0 %v7288_v4  ;;  %v2241_v14 = vshll.u32 %v7322_v51, 16  ;;  %v348_v28 = vsel %vm7263_vm2, %v343_v17, %v347_v59  ;;  %v2229_v29 = vrot.slane %v2228_v18, 4  ;;  %v2238_v30 = vor.u32 %v2237_v19, %v2233_v13  ;;  %v219_v59 = vld [vmem:[%s7231_s14 + $0x34] sm:$0xf]  ;;  %v5572_v9 = vld [vmem:[%s7231_s14 + $0x3c] sm:$0xf] }
  0x2e   : > { %6268 = vmatmul.mubr.bf16.vlgmr.msra.gmra.mrb[0].mxu1 %v5417_v40  ;;  %v2220_v61 = vsel %vm7263_vm2, %v2215_v54, %v2219_v35  ;;  %v355_v31 = vrot.slane %v353_v20, 5  ;;  %v5418_v35 = vcombine.low %v338_v21, %v348_v28  ;;  %v361_v38 = vrot.slane %v359_v26, 5  ;;  %v218_v54 = vld [vmem:[%s7231_s14 + $0x30] sm:$0xf]  ;;  %v7381_v19 = vld [vmem:[%s7231_s14 + $0x40] sm:$0xf] }
  0x2f   : > { %6300 = vmatpush3.bf16.msra.mxu1 %v6980_v3  ;;  %v6986_v3 = vld [vmem:[%s9047_s1 + $0x10] sm:$0xff]   ;;  %v5609_v6 = vcombine.low %v2210_v53, %v2220_v61  ;;  %v2243_v22 = vrot.slane %v2241_v14, 5  ;;  %v363_v39 = vshrl.u32 %v217_v5, 16  ;;  %v369_v40 = vshll.u32 %v261_v11, 16  ;;  %v6994_v14 = vld [vmem:[%s9047_s1 + $0x28] sm:$0xff]   ;;  %v6987_v20 = vld [vmem:[%s9047_s1 + $0x160] sm:$0xff]  }
  0x30   : > { %6301 = vmatprep.subr.bf16.mxu1 %v6983_v46  ;;  %v2234_v42 = vsel %vm7263_vm2, %v2229_v29, %v2233_v13  ;;  %v2239_v43 = vrot.slane %v2238_v30, 4  ;;  %v356_v44 = vor.u32 %v355_v31, %v352_v25  ;;  %v2246_v47 = vshrl.u32 %v5569_v16, 16  ;;  %6271 = vmatprep.mubr.bf16.mxu1 %v5418_v35  ;;  %v7389_v28 = vld [vmem:[%s7231_s14 + $0x44] sm:$0x1]  ;;  %v6996_v35 = vld [vmem:[%s9047_s1 + $0x30] sm:$0xff]  }
  0x31   : > { %6460 = vmatmul.mubr.bf16.vlgmr.msra.gmra.mrb[0].mxu0 %v5609_v6  ;;  %v365_v49 = vrot.slane %v363_v39, 4  ;;  %v371_v50 = vrot.slane %v369_v40, 5  ;;  %v2249_v52 = vshll.u32 %v5569_v16, 16  ;;  %v2255_v53 = vshll.u32 %v7347_v33, 16 }
  0x32   : > { %6492 = vmatpush3.bf16.msra.mxu0 %v7288_v4  ;;  %v6984_v4 = vld [vmem:[%s9047_s1 + $0x150] sm:$0xff]   ;;  %v2244_v55 = vsel %vm7263_vm2, %v2239_v43, %v2243_v22  ;;  %v357_v56 = vrot.slane %v356_v44, 4  ;;  %v2248_v57 = vrot.slane %v2246_v47, 4  ;;  %v2259_v58 = vshrl.u32 %v7347_v33, 16 }
  0x33   : > { %6302 = vmatpush3.bf16.msra.mxu1 %v6983_v46  ;;  %6493 = vmatprep.subr.bf16.mxu0 %v6982_v63  ;;  %v7358_v46 = vld [vmem:[%s7231_s14 + $0x38] sm:$0x1]  ;;  %v5610_v61 = vcombine.low %v2234_v42, %v2244_v55  ;;  %v2251_v0 = vrot.slane %v2249_v52, 5  ;;  %v2257_v1 = vrot.slane %v2255_v53, 5  ;;  %v374_v7 = vshrl.u32 %v218_v54, 16 }
  0x34   : > { %6303 = vmatprep.subr.bf16.mxu1 %v6986_v3  ;;  %v362_v5 = vsel %vm7263_vm2, %v357_v56, %v361_v38  ;;  %v2265_v6 = vshll.u32 %v7358_v46, 16  ;;  %v377_v12 = vshll.u32 %v218_v54, 16  ;;  %v383_v13 = vshll.u32 %v219_v59, 16  ;;  %v221_v55 = vld [vmem:[%s7231_s14 + $0x40] sm:$0xf] }
  0x35   : > { %6463 = vmatprep.mubr.bf16.mxu0 %v5610_v61  ;;  %v2252_v11 = vor.u32 %v2251_v0, %v2248_v57  ;;  %v376_v17 = vrot.slane %v374_v7, 4  ;;  %v387_v18 = vshrl.u32 %v219_v59, 16  ;;  %v2270_v40 = vshrl.u32 %v5572_v9, 16 }
  0x36   : > { %6494 = vmatpush3.bf16.msra.mxu0 %v6982_v63  ;;  %v366_v63 = vor.u32 %v365_v49, %v361_v38  ;;  %v2267_v16 = vrot.slane %v2265_v6, 5  ;;  %v379_v25 = vrot.slane %v377_v12, 5  ;;  %v385_v26 = vrot.slane %v383_v13, 5 }
  0x37   : > { %6304 = vmatpush3.bf16.msra.mxu1 %v6986_v3  ;;  %6495 = vmatprep.subr.bf16.mxu0 %v6984_v4  ;;  %v2261_v3 = vrot.slane %v2259_v58, 4  ;;  %v2253_v22 = vrot.slane %v2252_v11, 4  ;;  %v389_v31 = vrot.slane %v387_v18, 4  ;;  %v2273_v42 = vshll.u32 %v5572_v9, 16  ;;  %v5575_v9 = vld [vmem:[%s7231_s14 + $0x48] sm:$0xf] }
  0x38   : > { %6305 = vmatprep.subr.bf16.mxu1 %v6989_v34  ;;  %v367_v10 = vrot.slane %v366_v63, 4  ;;  %v380_v39 = vor.u32 %v379_v25, %v376_v17  ;;  %v2279_v49 = vshll.u32 %v7381_v19, 16  ;;  %v2272_v53 = vrot.slane %v2270_v40, 4  ;;  %v263_v63 = vld [vmem:[%s7231_s14 + $0x44] sm:$0x1] }
  0x39   : > { %v2262_v15 = vor.u32 %v2261_v3, %v2257_v1  ;;  %v2258_v38 = vsel %vm7263_vm2, %v2253_v22, %v2257_v1  ;;  %v390_v44 = vor.u32 %v389_v31, %v385_v26  ;;  %v2275_v54 = vrot.slane %v2273_v42, 5  ;;  %v7422_v22 = vld [vmem:[%s7231_s14 + $0x50] sm:$0x1]  ;;  %v6991_v31 = vld [vmem:[%s9047_s1 + $0x178] sm:$0xff]  }
  0x3a   : > { %6496 = vmatpush3.bf16.msra.mxu0 %v6984_v4  ;;  %v372_v21 = vsel %vm7263_vm2, %v367_v10, %v371_v50  ;;  %v393_v4 = vshll.u32 %v262_v2, 16  ;;  %v381_v52 = vrot.slane %v380_v39, 4  ;;  %v2281_v57 = vrot.slane %v2279_v49, 5  ;;  %v6998_v2 = vld [vmem:[%s9047_s1 + $0x38] sm:$0xff]  }
  0x3b   : > { %6306 = vmatpush3.bf16.msra.mxu1 %v6989_v34  ;;  %6497 = vmatprep.subr.bf16.mxu0 %v6985_v48  ;;  %v5419_v29 = vcombine.low %v362_v5, %v372_v21  ;;  %v2263_v30 = vrot.slane %v2262_v15, 4  ;;  %v220_v34 = vld [vmem:[%s7231_s14 + $0x3c] sm:$0xf]  ;;  %v391_v56 = vrot.slane %v390_v44, 4  ;;  %v2283_v58 = vshrl.u32 %v7381_v19, 16  ;;  %v6990_v15 = vld [vmem:[%s9047_s1 + $0x170] sm:$0xff]  }
  0x3c   : > { %6307 = vmatprep.subr.bf16.mxu1 %v6992_v60  ;;  %v395_v47 = vrot.slane %v393_v4, 5  ;;  %v2289_v59 = vshll.u32 %v7389_v28, 16  ;;  %v2276_v61 = vor.u32 %v2275_v54, %v2272_v53  ;;  %v398_v0 = vshrl.u32 %v220_v34, 16  ;;  %v7433_v4 = vld [vmem:[%s9047_s1 + $0x80] sm:$0xff]   ;;  %v223_v53 = vld [vmem:[%s7231_s14 + $0x4c] sm:$0xf] }
  0x3d   : > { %6272 = vmatmul.mubr.bf16.gmra.mrb[4].mxu1 %v5419_v29  ;;  %v2268_v43 = vsel %vm7263_vm2, %v2263_v30, %v2267_v16  ;;  %v401_v1 = vshll.u32 %v220_v34, 16  ;;  %v2285_v3 = vrot.slane %v2283_v58, 4  ;;  %v407_v7 = vshll.u32 %v221_v55, 16  ;;  %v222_v30 = vld [vmem:[%s7231_s14 + $0x48] sm:$0xf] }
  0x3e   : > { %6498 = vmatpush3.bf16.msra.mxu0 %v6985_v48  ;;  %v5611_v50 = vcombine.low %v2258_v38, %v2268_v43  ;;  %v6988_v48 = vld [vmem:[%s9047_s1 + $0x168] sm:$0xff]   ;;  %v396_v5 = vsel %vm7263_vm2, %v391_v56, %v395_v47  ;;  %v2291_v6 = vrot.slane %v2289_v59, 5  ;;  %v2277_v11 = vrot.slane %v2276_v61, 4  ;;  %v264_v54 = vld [vmem:[%s7231_s14 + $0x50] sm:$0x1] }
  0x3f   : > { %6308 = vmatpush3.bf16.msra.mxu1 %v6992_v60  ;;  %6499 = vmatprep.subr.bf16.mxu0 %v6987_v20  ;;  %v386_v60 = vsel %vm7263_vm2, %v381_v52, %v385_v26  ;;  %v400_v12 = vrot.slane %v398_v0, 4  ;;  %v403_v13 = vrot.slane %v401_v1, 5  ;;  %v2286_v16 = vor.u32 %v2285_v3, %v2281_v57  ;;  %v5578_v58 = vld [vmem:[%s7231_s14 + $0x54] sm:$0xf]  ;;  %v7447_v0 = vld [vmem:[%s7231_s14 + $0x58] sm:$0xf] }
  0x40   : > { %6309 = vmatprep.subr.bf16.mxu1 %v6994_v14  ;;  %6464 = vmatmul.mubr.bf16.gmra.mrb[4].mxu0 %v5611_v50  ;;  %v5420_v10 = vcombine.low %v386_v60, %v396_v5  ;;  %v409_v17 = vrot.slane %v407_v7, 5  ;;  %v411_v18 = vshrl.u32 %v221_v55, 16  ;;  %v417_v21 = vshll.u32 %v263_v63, 16 }
  0x41   : > { %v404_v25 = vor.u32 %v403_v13, %v400_v12  ;;  %v2294_v26 = vshrl.u32 %v5575_v9, 16  ;;  %v2297_v29 = vshll.u32 %v5575_v9, 16  ;;  %v2287_v34 = vrot.slane %v2286_v16, 4 }
  0x42   : > { %6500 = vmatpush3.bf16.msra.mxu0 %v6987_v20  ;;  %6275 = vmatprep.mubr.bf16.mxu1 %v5420_v10  ;;  %v2282_v20 = vsel %vm7263_vm2, %v2277_v11, %v2281_v57  ;;  %v419_v38 = vrot.slane %v417_v21, 5  ;;  %v2313_v52 = vshll.u32 %v7422_v22, 16  ;;  %v422_v61 = vshrl.u32 %v222_v30, 16 }
  0x43   : > { %6310 = vmatpush3.bf16.msra.mxu1 %v6994_v14  ;;  %v7416_v14 = vld [vmem:[%s7231_s14 + $0x4c] sm:$0xf]  ;;  %6501 = vmatprep.subr.bf16.mxu0 %v6988_v48  ;;  %v405_v40 = vrot.slane %v404_v25, 4  ;;  %v2296_v42 = vrot.slane %v2294_v26, 4  ;;  %v2299_v43 = vrot.slane %v2297_v29, 5  ;;  %v2292_v47 = vsel %vm7263_vm2, %v2287_v34, %v2291_v6  ;;  %v7452_v6 = vld [vmem:[%s9047_s1 + $0x180] sm:$0xff]  }
  0x44   : > { %6311 = vmatprep.subr.bf16.mxu1 %v6996_v35  ;;  %v2303_v39 = vshll.u32 %v7416_v14, 16  ;;  %v2307_v44 = vshrl.u32 %v7416_v14, 16  ;;  %v5612_v55 = vcombine.low %v2282_v20, %v2292_v47  ;;  %v2315_v60 = vrot.slane %v2313_v52, 5  ;;  %v7459_v20 = vld [vmem:[%s7231_s14 + $0x5c] sm:$0x1] }
  0x45   : > { %v2300_v56 = vor.u32 %v2299_v43, %v2296_v42  ;;  %v425_v63 = vshll.u32 %v222_v30, 16  ;;  %v435_v3 = vshrl.u32 %v223_v53, 16  ;;  %v424_v9 = vrot.slane %v422_v61, 4  ;;  %v225_v43 = vld [vmem:[%s7231_s14 + $0x58] sm:$0xf] }
  0x46   : > { %6502 = vmatpush3.bf16.msra.mxu0 %v6988_v48  ;;  %v2305_v50 = vrot.slane %v2303_v39, 5  ;;  %v410_v48 = vsel %vm7263_vm2, %v405_v40, %v409_v17  ;;  %v2309_v57 = vrot.slane %v2307_v44, 4  ;;  %6467 = vmatprep.mubr.bf16.mxu0 %v5612_v55  ;;  %v441_v11 = vshll.u32 %v264_v54, 16  ;;  %v5581_v52 = vld [vmem:[%s7231_s14 + $0x60] sm:$0xf] }
  0x47   : > { %6312 = vmatpush3.bf16.msra.mxu1 %v6996_v35  ;;  %v413_v35 = vrot.slane %v411_v18, 4  ;;  %6503 = vmatprep.subr.bf16.mxu0 %v6990_v15  ;;  %v2301_v1 = vrot.slane %v2300_v56, 4  ;;  %v427_v10 = vrot.slane %v425_v63, 5  ;;  %v437_v18 = vrot.slane %v435_v3, 4 }
  0x48   : > { %6313 = vmatprep.subr.bf16.mxu1 %v6998_v2  ;;  %v2310_v5 = vor.u32 %v2309_v57, %v2305_v50  ;;  %v443_v21 = vrot.slane %v441_v11, 5  ;;  %v2318_v25 = vshrl.u32 %v5578_v58, 16  ;;  %v2321_v29 = vshll.u32 %v5578_v58, 16 }
  0x49   : > { %v414_v49 = vor.u32 %v413_v35, %v409_v17  ;;  %v2306_v13 = vsel %vm7263_vm2, %v2301_v1, %v2305_v50  ;;  %v428_v17 = vor.u32 %v427_v10, %v424_v9  ;;  %v2327_v30 = vshll.u32 %v7447_v0, 16  ;;  %v224_v35 = vld [vmem:[%s7231_s14 + $0x54] sm:$0xf]  ;;  %v265_v50 = vld [vmem:[%s7231_s14 + $0x5c] sm:$0x1] }
  0x4a   : > { %6504 = vmatpush3.bf16.msra.mxu0 %v6990_v15  ;;  %v2311_v15 = vrot.slane %v2310_v5, 4  ;;  %v2331_v34 = vshrl.u32 %v7447_v0, 16  ;;  %v2320_v42 = vrot.slane %v2318_v25, 4  ;;  %v446_v55 = vshrl.u32 %v224_v35, 16  ;;  %v7487_v25 = vld [vmem:[%s7231_s14 + $0x60] sm:$0xf] }
  0x4b   : > { %6314 = vmatpush3.bf16.msra.mxu1 %v6998_v2  ;;  %v415_v59 = vrot.slane %v414_v49, 4  ;;  %v431_v2 = vshll.u32 %v223_v53, 16  ;;  %6505 = vmatprep.subr.bf16.mxu0 %v6991_v31  ;;  %v429_v39 = vrot.slane %v428_v17, 4  ;;  %v2329_v44 = vrot.slane %v2327_v30, 5  ;;  %v7483_v17 = vld [vmem:[%s7231_s14 + $0x68] sm:$0x1] }
  0x4c   : > { %6347 = vmatprep.subr.bf16.mxu1 %v7433_v4  ;;  %v2316_v26 = vsel %vm7263_vm2, %v2311_v15, %v2315_v60  ;;  %v2333_v47 = vrot.slane %v2331_v34, 4  ;;  %v2337_v49 = vshll.u32 %v7459_v20, 16  ;;  %v7474_v60 = vld [vmem:[%s7231_s14 + $0x64] sm:$0xf]  ;;  %v448_v63 = vrot.slane %v446_v55, 4 }
  0x4d   : > { %v420_v7 = vsel %vm7263_vm2, %v415_v59, %v419_v38  ;;  %v433_v16 = vrot.slane %v431_v2, 5  ;;  %v5613_v38 = vcombine.low %v2306_v13, %v2316_v26  ;;  %v455_v59 = vshll.u32 %v225_v43, 16 }
  0x4e   : > { %v5421_v12 = vcombine.low %v410_v48, %v420_v7  ;;  %6506 = vmatpush3.bf16.msra.mxu0 %v6991_v31  ;;  %v2323_v31 = vrot.slane %v2321_v29, 5  ;;  %v449_v48 = vshll.u32 %v224_v35, 16  ;;  %v2334_v57 = vor.u32 %v2333_v47, %v2329_v44  ;;  %v7490_v35 = vld [vmem:[%s7231_s14 + $0x64] sm:$0xf] }
  0x4f   : > { %6539 = vmatprep.subr.bf16.mxu0 %v7452_v6  ;;  %v438_v40 = vor.u32 %v437_v18, %v433_v16  ;;  %6468 = vmatmul.mubr.bf16.gmra.mrb[8].mxu0 %v5613_v38  ;;  %v434_v53 = vsel %vm7263_vm2, %v429_v39, %v433_v16  ;;  %v2339_v58 = vrot.slane %v2337_v49, 5  ;;  %v459_v5 = vshrl.u32 %v225_v43, 16  ;;  %v266_v43 = vld [vmem:[%s7231_s14 + $0x68] sm:$0x1] }
  0x50   : > { %6276 = vmatmul.mubr.bf16.gmra.mrb[8].mxu1 %v5421_v12  ;;  %v2324_v56 = vor.u32 %v2323_v31, %v2320_v42  ;;  %v451_v1 = vrot.slane %v449_v48, 5  ;;  %v2335_v7 = vrot.slane %v2334_v57, 4  ;;  %v457_v9 = vrot.slane %v455_v59, 5 }
  0x51   : > { %v439_v54 = vrot.slane %v438_v40, 4  ;;  %v461_v11 = vrot.slane %v459_v5, 4  ;;  %v465_v12 = vshll.u32 %v265_v50, 16  ;;  %v2342_v13 = vshrl.u32 %v5581_v52, 16  ;;  %v5632_v50 = vld [vmem:[%s7231_s14 + $0xc] sm:$0xe] }
  0x52   : > { %v2325_v3 = vrot.slane %v2324_v56, 4  ;;  %v452_v10 = vor.u32 %v451_v1, %v448_v63  ;;  %v2340_v16 = vsel %vm7263_vm2, %v2335_v7, %v2339_v58  ;;  %v2345_v18 = vshll.u32 %v5581_v52, 16  ;;  %v7505_v5 = vld [vmem:[%s7231_s14 + $0x6c] sm:$0xf] }
  0x53   : > { %v444_v61 = vsel %vm7263_vm2, %v439_v54, %v443_v21  ;;  %v2351_v21 = vshll.u32 %v7474_v60, 16  ;;  %v462_v30 = vor.u32 %v461_v11, %v457_v9  ;;  %v467_v34 = vrot.slane %v465_v12, 5 }
  0x54   : > { %v5422_v2 = vcombine.low %v434_v53, %v444_v61  ;;  %v2330_v15 = vsel %vm7263_vm2, %v2325_v3, %v2329_v44  ;;  %v453_v29 = vrot.slane %v452_v10, 4  ;;  %v2344_v38 = vrot.slane %v2342_v13, 4 }
  0x55   : > { %v5614_v26 = vcombine.low %v2330_v15, %v2340_v16  ;;  %v2347_v39 = vrot.slane %v2345_v18, 5  ;;  %v2353_v40 = vrot.slane %v2351_v21, 5  ;;  %v2355_v42 = vshrl.u32 %v7474_v60, 16  ;;  %v7517_v21 = vld [vmem:[%s7231_s14 + $0x70] sm:$0xf] }
  0x56   : > { %6279 = vmatprep.mubr.bf16.mxu1 %v5422_v2  ;;  %v458_v31 = vsel %vm7263_vm2, %v453_v29, %v457_v9  ;;  %v463_v44 = vrot.slane %v462_v30, 4  ;;  %v2361_v47 = vshll.u32 %v7483_v17, 16  ;;  %v470_v49 = vshrl.u32 %v7487_v25, 16  ;;  %v7082_v9 = vld [vmem:[%s7231_s14 + $0xb4] sm:$0xff]  }
  0x57   : > { %6471 = vmatprep.mubr.bf16.mxu0 %v5614_v26  ;;  %v2348_v52 = vor.u32 %v2347_v39, %v2344_v38  ;;  %v2357_v53 = vrot.slane %v2355_v42, 4  ;;  %v473_v54 = vshll.u32 %v7487_v25, 16  ;;  %v479_v55 = vshll.u32 %v7490_v35, 16 }
  0x58   : > { %v468_v48 = vsel %vm7263_vm2, %v463_v44, %v467_v34  ;;  %v2363_v56 = vrot.slane %v2361_v47, 5  ;;  %v472_v57 = vrot.slane %v470_v49, 4  ;;  %v483_v58 = vshrl.u32 %v7490_v35, 16  ;;  %v7528_v47 = vld [vmem:[%s7231_s14 + $0x78] sm:$0xf] }
  0x59   : > { %v5423_v59 = vcombine.low %v458_v31, %v468_v48  ;;  %v2349_v61 = vrot.slane %v2348_v52, 4  ;;  %v2358_v63 = vor.u32 %v2357_v53, %v2353_v40  ;;  %v475_v1 = vrot.slane %v473_v54, 5  ;;  %v7539_v54 = vld [vmem:[%s7231_s14 + $0x7c] sm:$0xf] }
  0x5a   : > { %v481_v2 = vrot.slane %v479_v55, 5  ;;  %v485_v3 = vrot.slane %v483_v58, 4  ;;  %v489_v7 = vshll.u32 %v266_v43, 16  ;;  %v5648_v10 = vrot.slane %v5632_v50, 9  ;;  %v268_v58 = vld [vmem:[%s7231_s14 + $0x80] sm:$0x1] }
  0x5b   : > { %6280 = vmatmul.mubr.bf16.gmra.mrb[12].mxu1 %v5423_v59  ;;  %v2354_v11 = vsel %vm7263_vm2, %v2349_v61, %v2353_v40  ;;  %v2359_v12 = vrot.slane %v2358_v63, 4  ;;  %v476_v13 = vor.u32 %v475_v1, %v472_v57  ;;  %v2944_v15 = vrot.slane %v7244_v23, 5  ;;  %v267_v40 = vld [vmem:[%s7231_s14 + $0x74] sm:$0x1]  ;;  %v5633_v23 = vld [vmem:[%s7231_s14 + $0x18] sm:$0xe] }
  0x5c   : > { %v486_v16 = vor.u32 %v485_v3, %v481_v2  ;;  %v491_v18 = vrot.slane %v489_v7, 5  ;;  %v494_v26 = vshrl.u32 %v7505_v5, 16  ;;  %v497_v29 = vshll.u32 %v7505_v5, 16 }
  0x5d   : > { %v2364_v30 = vsel %vm7263_vm2, %v2359_v12, %v2363_v56  ;;  %v477_v34 = vrot.slane %v476_v13, 4  ;;  %v2945_v38 = vsel %vm7509_vm5, %v5648_v10, %v2944_v15  ;;  %v2946_v39 = vrot.slane %v2944_v15, 4  ;;  %v5634_v13 = vld [vmem:[%s7231_s14 + $0x24] sm:$0xe] }
  0x5e   : > { %v5615_v42 = vcombine.low %v2354_v11, %v2364_v30  ;;  %v487_v43 = vrot.slane %v486_v16, 4  ;;  %v496_v31 = vrot.slane %v494_v26, 4  ;;  %v499_v44 = vrot.slane %v497_v29, 5  ;;  %v7561_v16 = vld [vmem:[%s7231_s14 + $0x84] sm:$0xf]  ;;  %v6995_v29 = vld [vmem:[%s9047_s1 + $0x188] sm:$0xff]  }
  0x5f   : > { %v482_v49 = vsel %vm7263_vm2, %v477_v34, %v481_v2  ;;  %v2948_v50 = vsel %vm7509_vm5, %v2946_v39, %v2947_v41  ;;  %v503_v52 = vshll.u32 %v7517_v21, 16  ;;  %v507_v53 = vshrl.u32 %v7517_v21, 16 }
  0x60   : > { %6472 = vmatmul.mubr.bf16.gmra.mrb[12].mxu0 %v5615_v42  ;;  %v492_v55 = vsel %vm7263_vm2, %v487_v43, %v491_v18  ;;  %v5664_v48 = vcombine.low %v2945_v38, %v2948_v50  ;;  %v500_v56 = vor.u32 %v499_v44, %v496_v31  ;;  %v513_v57 = vshll.u32 %v267_v40, 16  ;;  %v7569_v40 = vld [vmem:[%s7231_s14 + $0x88] sm:$0xf]  ;;  %v269_v31 = vld [vmem:[%s7231_s14 + $0x8c] sm:$0x1] }
  0x61   : > { %v5424_v59 = vcombine.low %v482_v49, %v492_v55  ;;  %v505_v24 = vrot.slane %v503_v52, 5  ;;  %v509_v61 = vrot.slane %v507_v53, 4  ;;  %v5649_v63 = vrot.slane %v5633_v23, 9 }
  0x62   : > { %6507 = vmatprep.mubr.bf16.mxu0 %v5664_v48  ;;  %v501_v41 = vrot.slane %v500_v56, 4  ;;  %v515_v1 = vrot.slane %v513_v57, 5  ;;  %v2955_v2 = vsel %vm7509_vm5, %v7312_v36, %v2954_v32  ;;  %v518_v3 = vshrl.u32 %v7528_v47, 16 }
  0x63   : > { %6283 = vmatprep.mubr.bf16.mxu1 %v5424_v59  ;;  %v510_v7 = vor.u32 %v509_v61, %v505_v24  ;;  %v2952_v10 = vsel %vm7509_vm5, %v5649_v63, %v2951_v27  ;;  %v521_v11 = vshll.u32 %v7528_v47, 16  ;;  %v527_v12 = vshll.u32 %v7539_v54, 16 }
  0x64   : > { %v506_v8 = vsel %vm7263_vm2, %v501_v41, %v505_v24  ;;  %v5665_v15 = vcombine.low %v2952_v10, %v2955_v2  ;;  %v520_v32 = vrot.slane %v518_v3, 4  ;;  %v531_v36 = vshrl.u32 %v7539_v54, 16  ;;  %v7590_v2 = vld [vmem:[%s7231_s14 + $0x90] sm:$0xf]  ;;  %v7593_v3 = vld [vmem:[%s7231_s14 + $0x94] sm:$0xf] }
  0x65   : > { %v511_v62 = vrot.slane %v510_v7, 4  ;;  %v523_v18 = vrot.slane %v521_v11, 5  ;;  %v529_v26 = vrot.slane %v527_v12, 5  ;;  %v537_v27 = vshll.u32 %v268_v58, 16 }
  0x66   : > { %v533_v30 = vrot.slane %v531_v36, 4  ;;  %v5650_v34 = vrot.slane %v5634_v13, 9  ;;  %v2958_v38 = vrot.slane %v7316_v45, 5  ;;  %v2961_v39 = vrot.slane %v7322_v51, 5  ;;  %v5635_v45 = vld [vmem:[%s7231_s14 + $0x30] sm:$0xe] }
  0x67   : > { %v516_v23 = vsel %vm7263_vm2, %v511_v62, %v515_v1  ;;  %v524_v42 = vor.u32 %v523_v18, %v520_v32  ;;  %v539_v43 = vrot.slane %v537_v27, 5  ;;  %v542_v44 = vshrl.u32 %v7561_v16, 16  ;;  %v270_v62 = vld [vmem:[%s7231_s14 + $0x98] sm:$0x1] }
  0x68   : > { %v5425_v49 = vcombine.low %v506_v8, %v516_v23  ;;  %6508 = vmatmul.mubr.bf16.vlgmr.msra.gmra.mrb[0].mxu0 %v5665_v15  ;;  %v534_v50 = vor.u32 %v533_v30, %v529_v26  ;;  %v2959_v52 = vsel %vm7509_vm5, %v5650_v34, %v2958_v38  ;;  %v2960_v53 = vrot.slane %v2958_v38, 4  ;;  %v6999_v30 = vld [vmem:[%s9047_s1 + $0x198] sm:$0xff]  }
  0x69   : > { %6540 = vmatpush3.bf16.msra.mxu0 %v7452_v6  ;;  %v525_v51 = vrot.slane %v524_v42, 4  ;;  %v544_v55 = vrot.slane %v542_v44, 4  ;;  %v545_v48 = vshll.u32 %v7561_v16, 16  ;;  %v551_v56 = vshll.u32 %v7569_v40, 16  ;;  %v6997_v6 = vld [vmem:[%s9047_s1 + $0x190] sm:$0xff]  }
  0x6a   : > { %6284 = vmatmul.mubr.bf16.gmra.mrb[16].mxu1 %v5425_v49  ;;  %v535_v57 = vrot.slane %v534_v50, 4  ;;  %v2962_v58 = vsel %vm7509_vm5, %v2960_v53, %v2961_v39  ;;  %v555_v59 = vshrl.u32 %v7569_v40, 16  ;;  %v561_v24 = vshll.u32 %v269_v31, 16  ;;  %6541 = vmatprep.subr.bf16.mxu0 %v6995_v29  ;;  %v5636_v38 = vld [vmem:[%s7231_s14 + $0x3c] sm:$0xe] }
  0x6b   : > { %v530_v61 = vsel %vm7263_vm2, %v525_v51, %v529_v26  ;;  %v5666_v63 = vcombine.low %v2959_v52, %v2962_v58  ;;  %v547_v41 = vrot.slane %v545_v48, 5  ;;  %v553_v1 = vrot.slane %v551_v56, 5  ;;  %v7611_v31 = vld [vmem:[%s7231_s14 + $0x9c] sm:$0xf]  ;;  %v7620_v48 = vld [vmem:[%s7231_s14 + $0xa0] sm:$0xf] }
  0x6c   : > { %v540_v7 = vsel %vm7263_vm2, %v535_v57, %v539_v43  ;;  %v557_v10 = vrot.slane %v555_v59, 4  ;;  %v563_v11 = vrot.slane %v561_v24, 5  ;;  %v5651_v12 = vrot.slane %v5635_v45, 9  ;;  %v7003_v56 = vld [vmem:[%s9047_s1 + $0x1a0] sm:$0xff]  }
  0x6d   : > { %v5426_v13 = vcombine.low %v530_v61, %v540_v7  ;;  %6511 = vmatprep.mubr.bf16.mxu0 %v5666_v63  ;;  %v548_v8 = vor.u32 %v547_v41, %v544_v55  ;;  %v2965_v15 = vrot.slane %v7347_v33, 5  ;;  %v2968_v32 = vrot.slane %v7358_v46, 5  ;;  %6542 = vmatpush3.bf16.msra.mxu0 %v6995_v29  ;;  %v271_v61 = vld [vmem:[%s7231_s14 + $0xa4] sm:$0x1] }
  0x6e   : > { %v558_v36 = vor.u32 %v557_v10, %v553_v1  ;;  %v566_v18 = vshrl.u32 %v7590_v2, 16  ;;  %v569_v26 = vshll.u32 %v7590_v2, 16  ;;  %v575_v27 = vshll.u32 %v7593_v3, 16  ;;  %6543 = vmatprep.subr.bf16.mxu0 %v6997_v6 }
  0x6f   : > { %6287 = vmatprep.mubr.bf16.mxu1 %v5426_v13  ;;  %v549_v34 = vrot.slane %v548_v8, 4  ;;  %v2966_v33 = vsel %vm7509_vm5, %v5651_v12, %v2965_v15  ;;  %v2967_v46 = vrot.slane %v2965_v15, 4  ;;  %v579_v29 = vshrl.u32 %v7593_v3, 16  ;;  %v5637_v15 = vld [vmem:[%s7231_s14 + $0x48] sm:$0xe] }
  0x70   : > { %v559_v39 = vrot.slane %v558_v36, 4  ;;  %v568_v23 = vrot.slane %v566_v18, 4  ;;  %v571_v42 = vrot.slane %v569_v26, 5  ;;  %v577_v43 = vrot.slane %v575_v27, 5  ;;  %v7645_v27 = vld [vmem:[%s7231_s14 + $0xa8] sm:$0xf] }
  0x71   : > { %v554_v44 = vsel %vm7263_vm2, %v549_v34, %v553_v1  ;;  %v2969_v49 = vsel %vm7509_vm5, %v2967_v46, %v2968_v32  ;;  %v581_v50 = vrot.slane %v579_v29, 4  ;;  %v585_v52 = vshll.u32 %v270_v62, 16  ;;  %6544 = vmatpush3.bf16.msra.mxu0 %v6997_v6  ;;  %v7007_v32 = vld [vmem:[%s9047_s1 + $0x1a8] sm:$0xff]  }
  0x72   : > { %v564_v53 = vsel %vm7263_vm2, %v559_v39, %v563_v11  ;;  %v5667_v45 = vcombine.low %v2966_v33, %v2969_v49  ;;  %v572_v51 = vor.u32 %v571_v42, %v568_v23  ;;  %v5652_v55 = vrot.slane %v5636_v38, 9  ;;  %6545 = vmatprep.subr.bf16.mxu0 %v6999_v30  ;;  %v7648_v29 = vld [vmem:[%s7231_s14 + $0xac] sm:$0xf] }
  0x73   : > { %v5427_v57 = vcombine.low %v554_v44, %v564_v53  ;;  %v582_v58 = vor.u32 %v581_v50, %v577_v43  ;;  %v587_v59 = vrot.slane %v585_v52, 5  ;;  %v2972_v24 = vrot.slane %v7381_v19, 5  ;;  %v5638_v53 = vld [vmem:[%s7231_s14 + $0x54] sm:$0xe] }
  0x74   : > { %6512 = vmatmul.mubr.bf16.gmra.mrb[4].mxu0 %v5667_v45  ;;  %v573_v6 = vrot.slane %v572_v51, 4  ;;  %v2975_v63 = vrot.slane %v7389_v28, 5  ;;  %v590_v41 = vshrl.u32 %v7611_v31, 16  ;;  %v593_v1 = vshll.u32 %v7611_v31, 16  ;;  %v7011_v45 = vld [vmem:[%s9047_s1 + $0x1b0] sm:$0xff]  }
  0x75   : > { %6288 = vmatmul.mubr.bf16.gmra.mrb[20].mxu1 %v5427_v57  ;;  %v583_v7 = vrot.slane %v582_v58, 4  ;;  %v2973_v10 = vsel %vm7509_vm5, %v5652_v55, %v2972_v24  ;;  %v2974_v11 = vrot.slane %v2972_v24, 4  ;;  %v599_v12 = vshll.u32 %v7620_v48, 16  ;;  %6546 = vmatpush3.bf16.msra.mxu0 %v6999_v30 }
  0x76   : > { %v578_v19 = vsel %vm7263_vm2, %v573_v6, %v577_v43  ;;  %v592_v13 = vrot.slane %v590_v41, 4  ;;  %v595_v28 = vrot.slane %v593_v1, 5  ;;  %v603_v8 = vshrl.u32 %v7620_v48, 16  ;;  %6547 = vmatprep.subr.bf16.mxu0 %v7003_v56  ;;  %v272_v43 = vld [vmem:[%s7231_s14 + $0xb0] sm:$0x1] }
  0x77   : > { %v588_v36 = vsel %vm7263_vm2, %v583_v7, %v587_v59  ;;  %v2976_v62 = vsel %vm7509_vm5, %v2974_v11, %v2975_v63  ;;  %v601_v18 = vrot.slane %v599_v12, 5  ;;  %v609_v26 = vshll.u32 %v271_v61, 16  ;;  %v7668_v41 = vld [vmem:[%s7231_s14 + $0xb4] sm:$0xf]  ;;  %v7673_v12 = vld [vmem:[%s7231_s14 + $0xb8] sm:$0xf] }
  0x78   : > { %v5428_v30 = vcombine.low %v578_v19, %v588_v36  ;;  %v5668_v34 = vcombine.low %v2973_v10, %v2976_v62  ;;  %v596_v33 = vor.u32 %v595_v28, %v592_v13  ;;  %v605_v46 = vrot.slane %v603_v8, 4  ;;  %v273_v19 = vld [vmem:[%s7231_s14 + $0xbc] sm:$0x1] }
  0x79   : > { %v611_v38 = vrot.slane %v609_v26, 5  ;;  %v5653_v39 = vrot.slane %v5637_v15, 9  ;;  %v2979_v23 = vrot.slane %v7416_v14, 5  ;;  %v2982_v42 = vrot.slane %v7422_v22, 5  ;;  %6548 = vmatpush3.bf16.msra.mxu0 %v7003_v56  ;;  %v7015_v13 = vld [vmem:[%s9047_s1 + $0x1b8] sm:$0xff]  }
  0x7a   : > { %6291 = vmatprep.mubr.bf16.mxu1 %v5428_v30  ;;  %6515 = vmatprep.mubr.bf16.mxu0 %v5668_v34  ;;  %v597_v44 = vrot.slane %v596_v33, 4  ;;  %v606_v49 = vor.u32 %v605_v46, %v601_v18  ;;  %v614_v50 = vshrl.u32 %v7645_v27, 16  ;;  %v617_v52 = vshll.u32 %v7645_v27, 16  ;;  %v5639_v30 = vld [vmem:[%s7231_s14 + $0x60] sm:$0xe] }
  0x7b   : > { %v2980_v14 = vsel %vm7509_vm5, %v5653_v39, %v2979_v23  ;;  %v2981_v22 = vrot.slane %v2979_v23, 4  ;;  %v623_v51 = vshll.u32 %v7648_v29, 16  ;;  %v627_v55 = vshrl.u32 %v7648_v29, 16  ;;  %6549 = vmatprep.subr.bf16.mxu0 %v7007_v32  ;;  %v5585_v39 = vld [vmem:[%s7231_s14 + $0x70] sm:$0xf] }
  0x7c   : > { %v602_v56 = vsel %vm7263_vm2, %v597_v44, %v601_v18  ;;  %v607_v57 = vrot.slane %v606_v49, 4  ;;  %v616_v58 = vrot.slane %v614_v50, 4  ;;  %v619_v59 = vrot.slane %v617_v52, 5  ;;  %v7695_v44 = vld [vmem:[%s9047_s1 + $0x1c0] sm:$0xff]  }
  0x7d   : > { %v2983_v24 = vsel %vm7509_vm5, %v2981_v22, %v2982_v42  ;;  %v625_v61 = vrot.slane %v623_v51, 5  ;;  %v629_v6 = vrot.slane %v627_v55, 4  ;;  %v633_v63 = vshll.u32 %v272_v43, 16  ;;  %6550 = vmatpush3.bf16.msra.mxu0 %v7007_v32  ;;  %v5640_v43 = vld [vmem:[%s7231_s14 + $0x6c] sm:$0xe] }
  0x7e   : > { %v612_v1 = vsel %vm7263_vm2, %v607_v57, %v611_v38  ;;  %v5669_v7 = vcombine.low %v2980_v14, %v2983_v24  ;;  %v620_v10 = vor.u32 %v619_v59, %v616_v58  ;;  %v5654_v11 = vrot.slane %v5638_v53, 9  ;;  %6551 = vmatprep.subr.bf16.mxu0 %v7011_v45  ;;  %v5586_v55 = vld [vmem:[%s7231_s14 + $0x74] sm:$0x1]  ;;  %v5641_v24 = vld [vmem:[%s7231_s14 + $0x78] sm:$0xe] }
  0x7f   : > { %v5429_v28 = vcombine.low %v602_v56, %v612_v1  ;;  %v630_v8 = vor.u32 %v629_v6, %v625_v61  ;;  %v635_v15 = vrot.slane %v633_v63, 5  ;;  %v2986_v32 = vrot.slane %v7447_v0, 5 }
  0x80   : > { %6516 = vmatmul.mubr.bf16.gmra.mrb[8].mxu0 %v5669_v7  ;;  %v621_v36 = vrot.slane %v620_v10, 4  ;;  %v2989_v62 = vrot.slane %v7459_v20, 5  ;;  %v638_v18 = vshrl.u32 %v7668_v41, 16  ;;  %v641_v26 = vshll.u32 %v7668_v41, 16 }
  0x81   : > { %6292 = vmatmul.mubr.bf16.gmra.mrb[24].mxu1 %v5429_v28  ;;  %v631_v34 = vrot.slane %v630_v8, 4  ;;  %v2987_v33 = vsel %vm7509_vm5, %v5654_v11, %v2986_v32  ;;  %v2988_v46 = vrot.slane %v2986_v32, 4  ;;  %v647_v38 = vshll.u32 %v7673_v12, 16  ;;  %6552 = vmatpush3.bf16.msra.mxu0 %v7011_v45  ;;  %v7708_v11 = vld [vmem:[%s7231_s14 + $0x7c] sm:$0xf] }
  0x82   : > { %v626_v0 = vsel %vm7263_vm2, %v621_v36, %v625_v61  ;;  %v640_v20 = vrot.slane %v638_v18, 4  ;;  %v643_v23 = vrot.slane %v641_v26, 5  ;;  %v651_v42 = vshrl.u32 %v7673_v12, 16  ;;  %6553 = vmatprep.subr.bf16.mxu0 %v7015_v13  ;;  %v7084_v36 = vld [vmem:[%s7231_s14] sm:$0xf] }
  0x83   : > { %v636_v49 = vsel %vm7263_vm2, %v631_v34, %v635_v15  ;;  %v2990_v50 = vsel %vm7509_vm5, %v2988_v46, %v2989_v62  ;;  %v649_v52 = vrot.slane %v647_v38, 5  ;;  %v657_v53 = vshll.u32 %v273_v19, 16  ;;  %v5591_v15 = vld [vmem:[%s7231_s14 + $0x88] sm:$0xf]  ;;  %v7723_v62 = vld [vmem:[%s7231_s14 + $0x4] sm:$0xf] }
  0x84   : > { %v5430_v45 = vcombine.low %v626_v0, %v636_v49  ;;  %v5670_v14 = vcombine.low %v2987_v33, %v2990_v50  ;;  %v644_v22 = vor.u32 %v643_v23, %v640_v20  ;;  %v653_v51 = vrot.slane %v651_v42, 4  ;;  %v5592_v26 = vld [vmem:[%s7231_s14 + $0x8c] sm:$0x1]  ;;  %v5595_v23 = vld [vmem:[%s7231_s14 + $0x98] sm:$0x1] }
  0x85   : > { %v659_v56 = vrot.slane %v657_v53, 5  ;;  %v5655_v57 = vrot.slane %v5639_v30, 9  ;;  %v2993_v58 = vrot.slane %v7474_v60, 5  ;;  %v2996_v59 = vrot.slane %v7483_v17, 5  ;;  %6554 = vmatpush3.bf16.msra.mxu0 %v7015_v13  ;;  %v7711_v17 = vld [vmem:[%s7231_s14 + $0x80] sm:$0x1] }
  0x86   : > { %6295 = vmatprep.mubr.bf16.mxu1 %v5430_v45  ;;  %6519 = vmatprep.mubr.bf16.mxu0 %v5670_v14  ;;  %v645_v61 = vrot.slane %v644_v22, 4  ;;  %v654_v6 = vor.u32 %v653_v51, %v649_v52  ;;  %v5656_v63 = vrot.slane %v5640_v43, 9  ;;  %v3000_v1 = vrot.slane %v5585_v39, 5  ;;  %v5642_v30 = vld [vmem:[%s7231_s14 + $0x84] sm:$0xe] }
  0x87   : > { %v2994_v7 = vsel %vm7509_vm5, %v5655_v57, %v2993_v58  ;;  %v2995_v10 = vrot.slane %v2993_v58, 4  ;;  %v3003_v60 = vrot.slane %v5586_v55, 5  ;;  %6587 = vmatprep.subr.bf16.mxu0 %v7695_v44  ;;  %v5440_v18 = vcombine.low %v7084_v36, %v7723_v62  ;;  %v5594_v39 = vld [vmem:[%s7231_s14 + $0x94] sm:$0xf]  ;;  %v5643_v42 = vld [vmem:[%s7231_s14 + $0x90] sm:$0xe] }
  0x88   : > { %v650_v19 = vsel %vm7263_vm2, %v645_v61, %v649_v52  ;;  %v655_v13 = vrot.slane %v654_v6, 4  ;;  %v3001_v28 = vsel %vm7509_vm5, %v5656_v63, %v3000_v1  ;;  %v3002_v8 = vrot.slane %v3000_v1, 4  ;;  %v5644_v50 = vld [vmem:[%s7231_s14 + $0x9c] sm:$0xe]  ;;  %v5597_v14 = vld [vmem:[%s7231_s14 + $0xa0] sm:$0xf] }
  0x89   : > { %v2997_v32 = vsel %vm7509_vm5, %v2995_v10, %v2996_v59  ;;  %v5657_v38 = vrot.slane %v5641_v24, 9  ;;  %v3007_v43 = vrot.slane %v7708_v11, 5  ;;  %v3010_v49 = vrot.slane %v7711_v17, 5  ;;  %v5598_v22 = vld [vmem:[%s7231_s14 + $0xa4] sm:$0x1] }
  0x8a   : > { %v660_v34 = vsel %vm7263_vm2, %v655_v13, %v659_v56  ;;  %v5671_v33 = vcombine.low %v2994_v7, %v2997_v32  ;;  %v3004_v46 = vsel %vm7509_vm5, %v3002_v8, %v3003_v60  ;;  %v5658_v52 = vrot.slane %v5642_v30, 9  ;;  %v5600_v59 = vld [vmem:[%s7231_s14 + $0xac] sm:$0xf]  ;;  %v7747_v61 = vld [vmem:[%s7231_s14 + $0x10] sm:$0xf] }
  0x8b   : > { %v5431_v0 = vcombine.low %v650_v19, %v660_v34  ;;  %v5672_v20 = vcombine.low %v3001_v28, %v3004_v46  ;;  %v3014_v53 = vrot.slane %v5591_v15, 5  ;;  %v3017_v45 = vrot.slane %v5592_v26, 5  ;;  %v7086_v24 = vld [vmem:[%s7231_s14 + $0xc] sm:$0xf]  ;;  %v7088_v8 = vld [vmem:[%s7231_s14 + $0x18] sm:$0xf] }
  0x8c   : > { %6520 = vmatmul.mubr.bf16.gmra.mrb[12].mxu0 %v5671_v33  ;;  %v3008_v51 = vsel %vm7509_vm5, %v5657_v38, %v3007_v43  ;;  %v3009_v55 = vrot.slane %v3007_v43, 4  ;;  %v3021_v58 = vrot.slane %v5594_v39, 5  ;;  %v5441_v6 = vcombine.low %v7086_v24, %v7747_v61  ;;  %v7006_v19 = vld [vmem:[%s9047_s1 + $0x88] sm:$0xff]   ;;  %v7759_v15 = vld [vmem:[%s7231_s14 + $0x1c] sm:$0xf] }
  0x8d   : > { %6296 = vmatmul.mubr.bf16.gmra.mrb[28].mxu1 %v5431_v0  ;;  %6523 = vmatprep.mubr.bf16.mxu0 %v5672_v20  ;;  %v3015_v56 = vsel %vm7509_vm5, %v5658_v52, %v3014_v53  ;;  %v3016_v57 = vrot.slane %v3014_v53, 4  ;;  %v5659_v1 = vrot.slane %v5643_v42, 9  ;;  %v3024_v7 = vrot.slane %v5595_v23, 5  ;;  %v5601_v30 = vld [vmem:[%s7231_s14 + $0xb0] sm:$0x1] }
  0x8e   : > { %6315 = vmatprep.mubr.bf16.mxu1 %v5440_v18  ;;  %v3011_v63 = vsel %vm7509_vm5, %v3009_v55, %v3010_v49  ;;  %v3023_v13 = vrot.slane %v3021_v58, 4  ;;  %v5660_v28 = vrot.slane %v5644_v50, 9  ;;  %v5442_v32 = vcombine.low %v7088_v8, %v7759_v15  ;;  %v5645_v34 = vld [vmem:[%s7231_s14 + $0xa8] sm:$0xe]  ;;  %v5603_v33 = vld [vmem:[%s7231_s14 + $0xb8] sm:$0xf] }
  0x8f   : > { %v5673_v10 = vcombine.low %v3008_v51, %v3011_v63  ;;  %v3018_v60 = vsel %vm7509_vm5, %v3016_v57, %v3017_v45  ;;  %v3028_v18 = vrot.slane %v5597_v14, 5  ;;  %v3031_v26 = vrot.slane %v5598_v22, 5  ;;  %v5604_v20 = vld [vmem:[%s7231_s14 + $0xbc] sm:$0x1]  ;;  %v5646_v23 = vld [vmem:[%s7231_s14 + $0xb4] sm:$0xe] }
  0x90   : > { %v5674_v36 = vcombine.low %v3015_v56, %v3018_v60  ;;  %v3035_v38 = vrot.slane %v5600_v59, 5  ;;  %v3022_v39 = vsel %vm7509_vm5, %v5659_v1, %v3021_v58  ;;  %v3025_v0 = vsel %vm7509_vm5, %v3023_v13, %v3024_v7  ;;  %v7010_v50 = vld [vmem:[%s9047_s1 + $0x90] sm:$0xff]   ;;  %v5606_v53 = vld [vmem:[%s7231_s14 + $0xc4] sm:$0xf]  ;;  %v7782_v51 = vld [vmem:[%s7231_s14 + $0x28] sm:$0xf] }
  0x91   : > { %v3030_v46 = vrot.slane %v3028_v18, 4  ;;  %v3029_v42 = vsel %vm7509_vm5, %v5660_v28, %v3028_v18  ;;  %v3042_v49 = vrot.slane %v5603_v33, 5  ;;  %v5661_v52 = vrot.slane %v5645_v34, 9  ;;  %v7090_v22 = vld [vmem:[%s7231_s14 + $0x24] sm:$0xf]  ;;  %v7014_v1 = vld [vmem:[%s9047_s1 + $0x98] sm:$0xff]  }
  0x92   : > { %v5675_v45 = vcombine.low %v3022_v39, %v3025_v0  ;;  %v3037_v14 = vrot.slane %v3035_v38, 4  ;;  %v5443_v55 = vcombine.low %v7090_v22, %v7782_v51  ;;  %v7092_v57 = vld [vmem:[%s7231_s14 + $0x30] sm:$0xf]  ;;  %v7787_v58 = vld [vmem:[%s7231_s14 + $0x34] sm:$0xf]  ;;  %v5662_v24 = vrot.slane %v5646_v23, 9 }
  0x93   : > { %v3032_v43 = vsel %vm7509_vm5, %v3030_v46, %v3031_v26  ;;  %v5444_v59 = vcombine.low %v7092_v57, %v7787_v58  ;;  %v3045_v63 = vrot.slane %v5604_v20, 5  ;;  %v5647_v7 = vld [vmem:[%s7231_s14 + $0xc0] sm:$0xe]  ;;  %v3036_v60 = vsel %vm7509_vm5, %v5661_v52, %v3035_v38  ;;  %v5607_v8 = vld [vmem:[%s7231_s14 + $0xc8] sm:$0x1]  ;;  %v7017_v22 = vld [vmem:[%s7231_s14 + $0x18] sm:$0xff]  }
  0x94   : > { %6524 = vmatmul.mubr.bf16.gmra.mrb[16].mxu0 %v5673_v10  ;;  %v5676_v56 = vcombine.low %v3029_v42, %v3032_v43  ;;  %v3049_v10 = vrot.slane %v5606_v53, 5  ;;  %v3043_v13 = vsel %vm7509_vm5, %v5662_v24, %v3042_v49  ;;  %v5663_v18 = vrot.slane %v5647_v7, 9  ;;  %v7094_v26 = vld [vmem:[%s7231_s14 + $0x3c] sm:$0xf]  ;;  %v7096_v39 = vld [vmem:[%s7231_s14 + $0x48] sm:$0xf] }
  0x95   : > { %6316 = vmatmul.mubr.bf16.vlgmr.msra.gmra.mrb[0].mxu1 %v5441_v6  ;;  %6527 = vmatprep.mubr.bf16.mxu0 %v5674_v36  ;;  %v3044_v6 = vrot.slane %v3042_v49, 4  ;;  %v3052_v38 = vrot.slane %v5607_v8, 5  ;;  %v7813_v0 = vld [vmem:[%s7231_s14 + $0x4c] sm:$0xf]  ;;  %v7031_v49 = vld [vmem:[%s9047_s1 + $0xb0] sm:$0xff]   ;;  %v2403_v52 = vshrl.u32 %v7708_v11, 16 }
  0x96   : > { %6348 = vmatpush3.bf16.msra.mxu1 %v7433_v4  ;;  %6319 = vmatprep.mubr.bf16.mxu1 %v5442_v32  ;;  %v3038_v4 = vrot.slane %v5601_v30, 5  ;;  %v7019_v32 = vld [vmem:[%s9047_s1 + $0xa0] sm:$0xff]   ;;  %v3051_v46 = vrot.slane %v3049_v10, 4  ;;  %v5446_v20 = vcombine.low %v7096_v39, %v7813_v0  ;;  %v7025_v23 = vld [vmem:[%s9047_s1 + $0xa8] sm:$0xff]   ;;  %v3050_v42 = vsel %vm7509_vm5, %v5663_v18, %v3049_v10  ;;  %v7023_v18 = vld [vmem:[%s7231_s14 + $0x30] sm:$0xff]  }
  0x97   : > { %6349 = vmatprep.subr.bf16.mxu1 %v7006_v19  ;;  %v3046_v28 = vsel %vm7509_vm5, %v3044_v6, %v3045_v63  ;;  %v7808_v30 = vld [vmem:[%s7231_s14 + $0x40] sm:$0xf]  ;;  %v7841_v57 = vrot.slane %v2403_v52, 4  ;;  %v7020_v6 = vld [vmem:[%s7231_s14 + $0x24] sm:$0xff]   ;;  %v1315_v7 = vrot.slane %v7747_v61, 5  ;;  %v2409_v8 = vshll.u32 %v7711_v17, 16 }
  0x98   : > { %v5445_v34 = vcombine.low %v7094_v26, %v7808_v30  ;;  %v5678_v33 = vcombine.low %v3043_v13, %v3046_v28  ;;  %v3053_v43 = vsel %vm7509_vm5, %v3051_v46, %v3052_v38  ;;  %v1255_v63 = vld [vmem:[%s7231_s14] sm:$0xe]  ;;  %v1256_v10 = vld [vmem:[%s7231_s14 + $0xc] sm:$0xe]  ;;  %v1322_v13 = vrot.slane %v7759_v15, 5 }
  0x99   : > { %v5679_v53 = vcombine.low %v3050_v42, %v3053_v43  ;;  %v1258_v61 = vld [vmem:[%s7231_s14 + $0x24] sm:$0xe]  ;;  %v5451_v15 = vcombine.low %v7561_v16, %v7569_v40  ;;  %v5452_v26 = vcombine.low %v7590_v2, %v7593_v3  ;;  %v5464_v17 = vrot.slane %v1255_v63, 9  ;;  %v7102_v38 = vld [vmem:[%s7231_s14 + $0x20] sm:$0x1]  ;;  %v7032_v2 = vld [vmem:[%s7231_s14 + $0x54] sm:$0xff]  }
  0x9a   : > { %6350 = vmatpush3.bf16.msra.mxu1 %v7006_v19  ;;  %v3039_v19 = vsel %vm7509_vm5, %v3037_v14, %v3038_v4  ;;  %v7830_v14 = vld [vmem:[%s7231_s14 + $0x58] sm:$0xf]  ;;  %v1324_v46 = vrot.slane %v1322_v13, 4  ;;  %v1325_v39 = vrot.slane %v7102_v38, 5  ;;  %v7103_v43 = vld [vmem:[%s7231_s14 + $0x2c] sm:$0x1] }
  0x9b   : > { %6351 = vmatprep.subr.bf16.mxu1 %v7010_v50  ;;  %v5677_v36 = vcombine.low %v3036_v60, %v3039_v19  ;;  %v7856_v60 = vld [vmem:[%s9047_s1 + $0xc0] sm:$0xff]   ;;  %v1257_v19 = vld [vmem:[%s7231_s14 + $0x18] sm:$0xe]  ;;  %v7106_v38 = vld [vmem:[%s7231_s14 + $0x50] sm:$0x1]  ;;  %v1357_v16 = vrot.slane %v7830_v14, 5 }
  0x9c   : > { %6528 = vmatmul.mubr.bf16.gmra.mrb[20].mxu0 %v5675_v45  ;;  %v7098_v45 = vld [vmem:[%s7231_s14 + $0x54] sm:$0xf]  ;;  %v7979_v40 = vld [vmem:[%s7231_s14 + $0x64] sm:$0xf] }
  0x9d   : > { %6320 = vmatmul.mubr.bf16.gmra.mrb[4].mxu1 %v5443_v55  ;;  %6531 = vmatprep.mubr.bf16.mxu0 %v5676_v56  ;;  %v5447_v4 = vcombine.low %v7098_v45, %v7830_v14  ;;  %v5448_v55 = vcombine.low %v7487_v25, %v7490_v35  ;;  %v7037_v56 = vld [vmem:[%s9047_s1 + $0xb8] sm:$0xff]   ;;  %v7101_v25 = vld [vmem:[%s7231_s14 + $0x14] sm:$0x1]  ;;  %v7035_v3 = vld [vmem:[%s7231_s14 + $0x60] sm:$0xff]  }
  0x9e   : > { %6323 = vmatprep.mubr.bf16.mxu1 %v5444_v59  ;;  %6352 = vmatpush3.bf16.msra.mxu1 %v7010_v50  ;;  %v2399_v50 = vshll.u32 %v7708_v11, 16  ;;  %v7844_v59 = vld [vmem:[%s7231_s14 + $0x8] sm:$0x1]  ;;  %v1318_v35 = vrot.slane %v7101_v25, 5 }
  0x9f   : > { %6353 = vmatprep.subr.bf16.mxu1 %v7014_v1  ;;  %v1311_v24 = vrot.slane %v7844_v59, 5 }
  0xa0   : > { %v7839_v11 = vrot.slane %v2399_v50, 5 }
  0xa2   : > { %6354 = vmatpush3.bf16.msra.mxu1 %v7014_v1  ;;  %v1308_v1 = vrot.slane %v7723_v62, 5  ;;  %v5449_v62 = vcombine.low %v7505_v5, %v7517_v21  ;;  %v5465_v21 = vrot.slane %v1256_v10, 9  ;;  %v5744_v10 = vld [vmem:[%s7231_s14 + $0x18] sm:$0xf] }
  0xa3   : > { %6355 = vmatprep.subr.bf16.mxu1 %v7019_v32 }
  0xa4   : > { %6532 = vmatmul.mubr.bf16.gmra.mrb[24].mxu0 %v5677_v36  ;;  %v5450_v36 = vcombine.low %v7528_v47, %v7539_v54  ;;  %v1310_v5 = vrot.slane %v1308_v1, 4  ;;  %v7027_v47 = vld [vmem:[%s9047_s1 + $0x1c8] sm:$0xff]   ;;  %v5466_v54 = vrot.slane %v1257_v19, 9  ;;  %v7899_v59 = vsel %vm7509_vm5, %v5464_v17, %v1308_v1  ;;  %v5745_v19 = vld [vmem:[%s7231_s14 + $0x1c] sm:$0xf] }
  0xa5   : > { %6324 = vmatmul.mubr.bf16.gmra.mrb[8].mxu1 %v5445_v34  ;;  %6535 = vmatprep.mubr.bf16.mxu0 %v5678_v33  ;;  %v1336_v34 = vrot.slane %v7787_v58, 5  ;;  %v1317_v33 = vrot.slane %v1315_v7, 4  ;;  %v5467_v58 = vrot.slane %v1258_v61, 9  ;;  %v1350_v1 = vrot.slane %v7813_v0, 5  ;;  %v7029_v0 = vld [vmem:[%s7231_s14 + $0x48] sm:$0xff]  }
  0xa6   : > { %6327 = vmatprep.mubr.bf16.mxu1 %v5446_v20  ;;  %6356 = vmatpush3.bf16.msra.mxu1 %v7019_v32  ;;  %v1329_v32 = vrot.slane %v7782_v51, 5  ;;  %v1259_v51 = vld [vmem:[%s7231_s14 + $0x30] sm:$0xe]  ;;  %v5453_v20 = vcombine.low %v7611_v31, %v7620_v48  ;;  %v7907_v25 = vsel %vm7509_vm5, %v1310_v5, %v1311_v24  ;;  %v7915_v63 = vsel %vm7509_vm5, %v5466_v54, %v1322_v13  ;;  %v1261_v13 = vld [vmem:[%s7231_s14 + $0x48] sm:$0xe] }
  0xa7   : > { %6357 = vmatprep.subr.bf16.mxu1 %v7025_v23  ;;  %v5468_v50 = vrot.slane %v1259_v51, 9  ;;  %v1338_v52 = vrot.slane %v1336_v34, 4  ;;  %v3810_v5 = vshrl.u32 %v5744_v10, 16  ;;  %v3823_v51 = vshrl.u32 %v5745_v19, 16  ;;  %v7038_v48 = vld [vmem:[%s7231_s14 + $0x6c] sm:$0xff]  }
  0xa8   : > { %v1331_v42 = vrot.slane %v1329_v32, 4  ;;  %v7927_v24 = vsel %vm7509_vm5, %v5467_v58, %v1329_v32  ;;  %v7105_v32 = vld [vmem:[%s7231_s14 + $0x44] sm:$0x1]  ;;  %v5470_v54 = vrot.slane %v1261_v13, 9  ;;  %v5748_v13 = vld [vmem:[%s7231_s14 + $0x28] sm:$0xf] }
  0xa9   : > { %v7937_v61 = vsel %vm7509_vm5, %v5468_v50, %v1336_v34  ;;  %v1346_v17 = vrot.slane %v7105_v32, 5  ;;  %v5746_v50 = vld [vmem:[%s7231_s14 + $0x20] sm:$0x1]  ;;  %v1263_v32 = vld [vmem:[%s7231_s14 + $0x60] sm:$0xe] }
  0xaa   : > { %6358 = vmatpush3.bf16.msra.mxu1 %v7025_v23  ;;  %v5454_v23 = vcombine.low %v7645_v27, %v7648_v29 }
  0xab   : > { %6359 = vmatprep.subr.bf16.mxu1 %v7031_v49 }
  0xac   : > { %6536 = vmatmul.mubr.bf16.gmra.mrb[28].mxu0 %v5679_v53  ;;  %v7104_v53 = vld [vmem:[%s7231_s14 + $0x38] sm:$0x1] }
  0xad   : > { %6328 = vmatmul.mubr.bf16.gmra.mrb[12].mxu1 %v5447_v4  ;;  %6555 = vmatprep.mubr.bf16.mxu0 %v7017_v22  ;;  %v1339_v45 = vrot.slane %v7104_v53, 5  ;;  %v1260_v4 = vld [vmem:[%s7231_s14 + $0x3c] sm:$0xe]  ;;  %v1343_v22 = vrot.slane %v7808_v30, 5  ;;  %v7903_v30 = vsel %vm7509_vm5, %v5465_v21, %v1315_v7  ;;  %v3813_v21 = vshll.u32 %v5744_v10, 16  ;;  %v7043_v53 = vld [vmem:[%s9047_s1 + $0x1e0] sm:$0xff]  }
  0xae   : > { %6331 = vmatprep.mubr.bf16.mxu1 %v5448_v55  ;;  %6360 = vmatpush3.bf16.msra.mxu1 %v7031_v49  ;;  %v1332_v49 = vrot.slane %v7103_v43, 5  ;;  %v7890_v55 = vrot.slane %v2409_v8, 5  ;;  %v7026_v7 = vld [vmem:[%s7231_s14 + $0x3c] sm:$0xff]   ;;  %v7923_v8 = vsel %vm7509_vm5, %v1324_v46, %v1325_v39  ;;  %v1352_v46 = vrot.slane %v1350_v1, 4  ;;  %v5750_v43 = vld [vmem:[%s7231_s14 + $0x30] sm:$0xf] }
  0xaf   : > { %6361 = vmatprep.subr.bf16.mxu1 %v7037_v56  ;;  %v1353_v39 = vrot.slane %v7106_v38, 5  ;;  %v3812_v10 = vrot.slane %v3810_v5, 4 }
  0xb0   : > { %9069 = vst [vmem:[#allocation2_spill] sm:$0xff] %v7890_v55 }
  0xb2   : > { %6362 = vmatpush3.bf16.msra.mxu1 %v7037_v56  ;;  %v7033_v56 = vld [vmem:[%s9047_s1 + $0x1d0] sm:$0xff]  }
  0xb3   : > { %6395 = vmatprep.subr.bf16.mxu1 %v7856_v60 }
  0xb4   : > { %6556 = vmatmul.mubr.bf16.vlgmr.msra.gmra.mrb[0].mxu0 %v7020_v6  ;;  %v7911_v6 = vsel %vm7509_vm5, %v1317_v33, %v1318_v35  ;;  %v7931_v35 = vsel %vm7509_vm5, %v1331_v42, %v1332_v49  ;;  %v3819_v33 = vshll.u32 %v5745_v19, 16  ;;  %v3815_v19 = vrot.slane %v3813_v21, 5  ;;  %v1264_v21 = vld [vmem:[%s7231_s14 + $0x6c] sm:$0xe] }
  0xb5   : > { %6332 = vmatmul.mubr.bf16.gmra.mrb[16].mxu1 %v5449_v62  ;;  %6588 = vmatpush3.bf16.msra.mxu0 %v7695_v44  ;;  %v5469_v62 = vrot.slane %v1260_v4, 9  ;;  %v5473_v58 = vrot.slane %v1264_v21, 9 }
  0xb6   : > { %6335 = vmatprep.mubr.bf16.mxu1 %v5450_v36  ;;  %6559 = vmatprep.mubr.bf16.mxu0 %v7023_v18  ;;  %v7941_v36 = vsel %vm7509_vm5, %v1338_v52, %v1339_v45  ;;  %v1345_v18 = vrot.slane %v1343_v22, 4  ;;  %v5747_v52 = vld [vmem:[%s7231_s14 + $0x24] sm:$0xf]  ;;  %v3847_v45 = vshrl.u32 %v5748_v13, 16 }
  0xb7   : > { %6589 = vmatprep.subr.bf16.mxu0 %v7027_v47  ;;  %v7958_v49 = vsel %vm7509_vm5, %v5469_v62, %v1343_v22  ;;  %v7975_v22 = vld [vmem:[%s7231_s14 + $0x54] sm:$0xe]  ;;  %v3825_v62 = vrot.slane %v3823_v51, 4  ;;  %v3834_v38 = vshrl.u32 %v5747_v52, 16  ;;  %v3837_v28 = vshll.u32 %v5747_v52, 16 }
  0xb8   : > { %v7972_v4 = vsel %vm7509_vm5, %v1345_v18, %v1346_v17  ;;  %v3829_v17 = vshll.u32 %v5746_v50, 16  ;;  %v5471_v5 = vrot.slane %v7975_v22, 9  ;;  %v7047_v50 = vld [vmem:[%s9047_s1 + $0x1e8] sm:$0xff]   ;;  %v1359_v52 = vrot.slane %v1357_v16, 4 }
  0xb9   : > { %6590 = vmatpush3.bf16.msra.mxu0 %v7027_v47  ;;  %v7039_v47 = vld [vmem:[%s9047_s1 + $0x1d8] sm:$0xff]   ;;  %v3816_v22 = vor.u32 %v3815_v19, %v3812_v10  ;;  %v3836_v34 = vrot.slane %v3834_v38, 4  ;;  %v3839_v44 = vrot.slane %v3837_v28, 5  ;;  %v7111_v10 = vld [vmem:[%s7231_s14 + $0x74] sm:$0x1]  ;;  %v3849_v28 = vrot.slane %v3847_v45, 4 }
  0xba   : > { %6591 = vmatprep.subr.bf16.mxu0 %v7033_v56  ;;  %v8013_v42 = vrot.slane %v3829_v17, 5  ;;  %v1374_v19 = vrot.slane %v7111_v10, 5  ;;  %v3858_v38 = vshrl.u32 %v5750_v43, 16  ;;  %v8038_v27 = vsel %vm7509_vm5, %v5471_v5, %v1357_v16 }
  0xbb   : > { %v3817_v21 = vrot.slane %v3816_v22, 4 }
  0xbc   : > { %6560 = vmatmul.mubr.bf16.gmra.mrb[4].mxu0 %v7026_v7  ;;  %v7985_v7 = vrot.slane %v3819_v33, 5  ;;  %v7109_v33 = vld [vmem:[%s7231_s14 + $0x70] sm:$0xf] }
  0xbd   : > { %6336 = vmatmul.mubr.bf16.gmra.mrb[20].mxu1 %v5451_v15  ;;  %6563 = vmatprep.mubr.bf16.mxu0 %v7029_v0  ;;  %v1364_v15 = vrot.slane %v7979_v40, 5  ;;  %v7108_v0 = vld [vmem:[%s7231_s14 + $0x5c] sm:$0x1]  ;;  %v1371_v51 = vrot.slane %v7109_v33, 5 }
  0xbe   : > { %6339 = vmatprep.mubr.bf16.mxu1 %v5452_v26  ;;  %6592 = vmatpush3.bf16.msra.mxu0 %v7033_v56  ;;  %v1360_v18 = vrot.slane %v7108_v0, 5  ;;  %v7994_v26 = vsel %vm7509_vm5, %v5470_v54, %v1350_v1  ;;  %v7998_v56 = vsel %vm7509_vm5, %v1352_v46, %v1353_v39  ;;  %v7110_v1 = vld [vmem:[%s7231_s14 + $0x68] sm:$0x1]  ;;  %v3843_v0 = vshll.u32 %v5748_v13, 16  ;;  %v7055_v40 = vld [vmem:[%s9047_s1 + $0x1f8] sm:$0xff]  }
  0xbf   : > { %6593 = vmatprep.subr.bf16.mxu0 %v7039_v47  ;;  %v1367_v54 = vrot.slane %v7110_v1, 5  ;;  %v5472_v46 = vrot.slane %v1263_v32, 9  ;;  %v1366_v39 = vrot.slane %v1364_v15, 4  ;;  %v3826_v33 = vor.u32 %v3825_v62, %v7985_v7  ;;  %v5751_v1 = vld [vmem:[%s7231_s14 + $0x34] sm:$0xf] }
  0xc0   : > { %v1373_v32 = vrot.slane %v1371_v51, 4  ;;  %v5749_v62 = vld [vmem:[%s7231_s14 + $0x2c] sm:$0x1]  ;;  %v8025_v17 = vrot.slane %v3843_v0, 5  ;;  %v3867_v13 = vshll.u32 %v5751_v1, 16  ;;  %v3871_v31 = vshrl.u32 %v5751_v1, 16 }
  0xc1   : > { %v3827_v10 = vrot.slane %v3826_v33, 4  ;;  %v8042_v29 = vsel %vm7509_vm5, %v1359_v52, %v1360_v18  ;;  %v8049_v45 = vsel %vm7509_vm5, %v5472_v46, %v1364_v15  ;;  %v8053_v14 = vsel %vm7509_vm5, %v1366_v39, %v1367_v54  ;;  %v1265_v18 = vld [vmem:[%s7231_s14 + $0x78] sm:$0xe] }
  0xc2   : > { %6594 = vmatpush3.bf16.msra.mxu0 %v7039_v47  ;;  %v8057_v16 = vsel %vm7509_vm5, %v5473_v58, %v1371_v51  ;;  %v8067_v15 = vsel %vm7509_vm5, %v1373_v32, %v1374_v19  ;;  %v3850_v5 = vor.u32 %v3849_v28, %v8025_v17  ;;  %v3860_v52 = vrot.slane %v3858_v38, 4  ;;  %v5753_v58 = vld [vmem:[%s7231_s14 + $0x3c] sm:$0xf]  ;;  %v5754_v51 = vld [vmem:[%s7231_s14 + $0x40] sm:$0xf] }
  0xc3   : > { %6595 = vmatprep.subr.bf16.mxu0 %v7043_v53  ;;  %v3822_v0 = vsel %vm7263_vm2, %v3817_v21, %v7985_v7  ;;  %v3832_v46 = vsel %vm7263_vm2, %v3827_v10, %v8013_v42  ;;  %v8078_v39 = vrot.slane %v3867_v13, 5  ;;  %v3873_v22 = vrot.slane %v3871_v31, 4  ;;  %v7113_v19 = vld [vmem:[%s7231_s14 + $0x80] sm:$0x1]  ;;  %v8237_v47 = vld [vmem:[%s7231_s14 + $0x68] sm:$0x1] }
  0xc4   : > { %6564 = vmatmul.mubr.bf16.gmra.mrb[8].mxu0 %v7032_v2  ;;  %v3861_v2 = vshll.u32 %v5750_v43, 16  ;;  %v3853_v43 = vshll.u32 %v5749_v62, 16  ;;  %v5474_v32 = vrot.slane %v1265_v18, 9  ;;  %v1266_v62 = vld [vmem:[%s7231_s14 + $0x84] sm:$0xe]  ;;  %v3882_v28 = vshrl.u32 %v5753_v58, 16 }
  0xc5   : > { %6340 = vmatmul.mubr.bf16.gmra.mrb[24].mxu1 %v5453_v20  ;;  %6567 = vmatprep.mubr.bf16.mxu0 %v7035_v3  ;;  %v7051_v20 = vld [vmem:[%s9047_s1 + $0x1f0] sm:$0xff]   ;;  %v7112_v3 = vld [vmem:[%s7231_s14 + $0x7c] sm:$0xf]  ;;  %v3885_v7 = vshll.u32 %v5753_v58, 16  ;;  %v3891_v38 = vshll.u32 %v5754_v51, 16  ;;  %v9070_v42 = vcombine.low %v7668_v41, %v7673_v12  ;;  %v8089_v13 = vrot.slane %v3850_v5, 4 }
  0xc6   : > { %6343 = vmatprep.mubr.bf16.mxu1 %v5454_v23  ;;  %6596 = vmatpush3.bf16.msra.mxu0 %v7043_v53  ;;  %v3840_v23 = vor.u32 %v3839_v44, %v3836_v34  ;;  %v7040_v53 = vld [vmem:[%s7231_s14 + $0x78] sm:$0xff]   ;;  %v1378_v44 = vrot.slane %v7112_v3, 5  ;;  %v3863_v54 = vrot.slane %v3861_v2, 5  ;;  %v8082_v1 = vrot.slane %v3853_v43, 5  ;;  %v8094_v21 = vld [vmem:[%s9047_s1 + $0x200] sm:$0xff]   ;;  %9078 = vst [vmem:[#allocation5_spill] sm:$0xff] %v8237_v47 }
  0xc7   : > { %6597 = vmatprep.subr.bf16.mxu0 %v7047_v50  ;;  %v5752_v34 = vld [vmem:[%s7231_s14 + $0x38] sm:$0x1]  ;;  %v3895_v2 = vshrl.u32 %v5754_v51, 16  ;;  %v7042_v43 = vld [vmem:[%s7231_s14 + $0x84] sm:$0xff]   ;;  %v3874_v12 = vor.u32 %v3873_v22, %v8078_v39  ;;  %v3887_v58 = vrot.slane %v3885_v7, 5  ;;  %v8116_v51 = vrot.slane %v3891_v38, 5 }
  0xc8   : > { %v8080_v33 = vrot.slane %v3840_v23, 4  ;;  %v1380_v10 = vrot.slane %v1378_v44, 4  ;;  %v3864_v31 = vor.u32 %v3863_v54, %v3860_v52  ;;  %v9071_v23 = vcombine.low %v7899_v59, %v7907_v25  ;;  %v7114_v18 = vld [vmem:[%s7231_s14 + $0x88] sm:$0xf]  ;;  %v5755_v5 = vld [vmem:[%s7231_s14 + $0x44] sm:$0x1] }
  0xc9   : > { %v1385_v3 = vrot.slane %v7114_v18, 5  ;;  %v8107_v59 = vcombine.low %v3822_v0, %v3832_v46  ;;  %v5756_v52 = vld [vmem:[%s7231_s14 + $0x48] sm:$0xf]  ;;  %v3884_v54 = vrot.slane %v3882_v28, 4  ;;  %v3897_v22 = vrot.slane %v3895_v2, 4 }
  0xca   : > { %6598 = vmatpush3.bf16.msra.mxu0 %v7047_v50  ;;  %v1381_v50 = vrot.slane %v7113_v19, 5  ;;  %v7044_v19 = vld [vmem:[%s7231_s14 + $0x90] sm:$0xff]   ;;  %v3846_v0 = vsel %vm7263_vm2, %v8080_v33, %v8025_v17  ;;  %v3865_v46 = vrot.slane %v3864_v31, 4  ;;  %v3856_v28 = vsel %vm7263_vm2, %v8089_v13, %v8082_v1  ;;  %v8138_v33 = vld [vmem:[%s7231_s14 + $0x58] sm:$0xf]  ;;  %v7045_v31 = vld [vmem:[%s9047_s1 + $0xc8] sm:$0xff]  }
  0xcb   : > { %6599 = vmatprep.subr.bf16.mxu0 %v7051_v20  ;;  %v3875_v38 = vrot.slane %v3874_v12, 4  ;;  %v1387_v2 = vrot.slane %v1385_v3, 4  ;;  %v5759_v17 = vld [vmem:[%s7231_s14 + $0x54] sm:$0xf]  ;;  %v3901_v1 = vshll.u32 %v5755_v5, 16  ;;  %v3906_v13 = vshrl.u32 %v5756_v52, 16 }
  0xcc   : > { %6568 = vmatmul.mubr.bf16.gmra.mrb[12].mxu0 %v7038_v48  ;;  %v3877_v48 = vshll.u32 %v5752_v34, 16  ;;  %v8134_v7 = vsel %vm7509_vm5, %v1380_v10, %v1381_v50  ;;  %v3909_v50 = vshll.u32 %v5756_v52, 16  ;;  %v3888_v10 = vor.u32 %v3887_v58, %v3884_v54  ;;  %v7046_v54 = vld [vmem:[%s7231_s14 + $0x9c] sm:$0xff]   ;;  %v7120_v41 = vld [vmem:[%s7231_s14 + $0xac] sm:$0xf] }
  0xcd   : > { %6344 = vmatmul.mubr.bf16.gmra.mrb[28].mxu1 %v9070_v42  ;;  %6571 = vmatprep.mubr.bf16.mxu0 %v7040_v53  ;;  %v5475_v53 = vrot.slane %v1266_v62, 9  ;;  %v7115_v42 = vld [vmem:[%s7231_s14 + $0x8c] sm:$0x1]  ;;  %v3939_v5 = vshll.u32 %v8138_v33, 16  ;;  %v9073_v52 = vcombine.low %v7915_v63, %v7923_v8  ;;  %v8174_v63 = vld [vmem:[%s7231_s14 + $0x50] sm:$0x1] }
  0xce   : > { %6363 = vmatprep.mubr.bf16.mxu1 %v9071_v23  ;;  %6600 = vmatpush3.bf16.msra.mxu0 %v7051_v20  ;;  %v8113_v20 = vsel %vm7509_vm5, %v5474_v32, %v1378_v44  ;;  %v3879_v62 = vrot.slane %v3877_v48, 5  ;;  %v1388_v23 = vrot.slane %v7115_v42, 5  ;;  %v1267_v44 = vld [vmem:[%s7231_s14 + $0x90] sm:$0xe]  ;;  %v8126_v32 = vld [vmem:[%s7231_s14 + $0x4c] sm:$0xf]  ;;  %v3898_v48 = vor.u32 %v3897_v22, %v8116_v51 }
  0xcf   : > { %6601 = vmatprep.subr.bf16.mxu0 %v7055_v40  ;;  %v3915_v12 = vshll.u32 %v8126_v32, 16  ;;  %v3919_v18 = vshrl.u32 %v8126_v32, 16  ;;  %v9072_v42 = vcombine.low %v7903_v30, %v7911_v6  ;;  %v7049_v30 = vld [vmem:[%s9047_s1 + $0xd0] sm:$0xff]   ;;  %v3870_v6 = vsel %vm7263_vm2, %v3865_v46, %v8078_v39  ;;  %v7048_v8 = vld [vmem:[%s7231_s14 + $0xa8] sm:$0xff]   ;;  %v8181_v39 = vld [vmem:[%s7231_s14 + $0x5c] sm:$0x1] }
  0xd0   : > { %v3880_v58 = vsel %vm7263_vm2, %v3875_v38, %v3879_v62  ;;  %v5476_v22 = vrot.slane %v1267_v44, 9  ;;  %v3911_v25 = vrot.slane %v3909_v50, 5  ;;  %9074 = vst [vmem:[#allocation3_spill] sm:$0xff] %v8181_v39  ;;  %v3889_v46 = vrot.slane %v3888_v10, 4 }
  0xd1   : > { %v3899_v62 = vrot.slane %v3898_v48, 4  ;;  %v8183_v38 = vrot.slane %v3915_v12, 5  ;;  %v8185_v34 = vrot.slane %v3939_v5, 5  ;;  %v8190_v50 = vcombine.low %v3846_v0, %v3856_v28  ;;  %v5762_v28 = vld [vmem:[%s7231_s14 + $0x60] sm:$0xf] }
  0xd2   : > { %6602 = vmatpush3.bf16.msra.mxu0 %v7055_v40  ;;  %v8146_v40 = vsel %vm7509_vm5, %v5475_v53, %v1385_v3  ;;  %v3930_v53 = vshrl.u32 %v5759_v17, 16  ;;  %v3933_v3 = vshll.u32 %v5759_v17, 16  ;;  %v7116_v17 = vld [vmem:[%s7231_s14 + $0x94] sm:$0xf]  ;;  %v8194_v48 = vcombine.low %v3870_v6, %v3880_v58 }
  0xd3   : > { %6635 = vmatprep.subr.bf16.mxu0 %v8094_v21  ;;  %v3925_v0 = vshll.u32 %v8174_v63, 16  ;;  %v3894_v6 = vsel %vm7263_vm2, %v3889_v46, %v8116_v51  ;;  %v9077_v46 = vcombine.low %v7937_v61, %v7941_v36 }
  0xd4   : > { %6572 = vmatmul.mubr.bf16.gmra.mrb[16].mxu0 %v7042_v43  ;;  %v3943_v43 = vshrl.u32 %v8138_v33, 16  ;;  %v3932_v44 = vrot.slane %v3930_v53, 4  ;;  %v7117_v53 = vld [vmem:[%s7231_s14 + $0x98] sm:$0x1] }
  0xd5   : > { %6364 = vmatmul.mubr.bf16.vlgmr.msra.gmra.mrb[0].mxu1 %v9072_v42  ;;  %6575 = vmatprep.mubr.bf16.mxu0 %v7044_v19  ;;  %v8177_v19 = vrot.slane %v3901_v1, 5  ;;  %v1392_v42 = vrot.slane %v7116_v17, 5  ;;  %v7118_v17 = vld [vmem:[%s7231_s14 + $0xa0] sm:$0xf]  ;;  %v3927_v36 = vrot.slane %v3925_v0, 5 }
  0xd6   : > { %6396 = vmatpush3.bf16.msra.mxu1 %v7856_v60  ;;  %6367 = vmatprep.mubr.bf16.mxu1 %v9073_v52  ;;  %v8171_v60 = vsel %vm7509_vm5, %v1387_v2, %v1388_v23  ;;  %v3908_v52 = vrot.slane %v3906_v13, 4  ;;  %v3921_v23 = vrot.slane %v3919_v18, 4  ;;  %v3935_v2 = vrot.slane %v3933_v3, 5  ;;  %v7053_v13 = vld [vmem:[%s9047_s1 + $0xd8] sm:$0xff]  }
  0xd7   : > { %6397 = vmatprep.subr.bf16.mxu1 %v7045_v31  ;;  %v3945_v1 = vrot.slane %v3943_v43, 4  ;;  %v1268_v18 = vld [vmem:[%s7231_s14 + $0x9c] sm:$0xe]  ;;  %v1395_v3 = vrot.slane %v7117_v53, 5  ;;  %v8207_v43 = vld [vmem:[%s7231_s14 + $0x64] sm:$0xf] }
  0xd8   : > { %v3912_v5 = vor.u32 %v3911_v25, %v3908_v52  ;;  %9075 = vst [vmem:[#allocation4_spill] sm:$0xff] %v8207_v43  ;;  %v3922_v58 = vor.u32 %v3921_v23, %v8183_v38  ;;  %v1399_v12 = vrot.slane %v7118_v17, 5  ;;  %v9076_v25 = vcombine.low %v7927_v24, %v7931_v35  ;;  %v7050_v23 = vld [vmem:[%s7231_s14 + $0xb4] sm:$0xff]   ;;  %v7056_v24 = vld [vmem:[%s9047_s1 + $0xe0] sm:$0xff]   ;;  %v5765_v17 = vld [vmem:[%s7231_s14 + $0x6c] sm:$0xf] }
  0xd9   : > { %v1394_v52 = vrot.slane %v1392_v42, 4  ;;  %v3936_v53 = vor.u32 %v3935_v2, %v3932_v44  ;;  %v3946_v51 = vor.u32 %v3945_v1, %v8185_v34  ;;  %v3954_v35 = vshrl.u32 %v5762_v28, 16  ;;  %v7119_v2 = vld [vmem:[%s7231_s14 + $0xa4] sm:$0x1] }
  0xda   : > { %6398 = vmatpush3.bf16.msra.mxu1 %v7045_v31  ;;  %v8201_v31 = vsel %vm7509_vm5, %v5476_v22, %v1392_v42  ;;  %v3949_v22 = vshll.u32 %v8181_v39, 16  ;;  %v3967_v42 = vshrl.u32 %v8207_v43, 16  ;;  %v3913_v61 = vrot.slane %v3912_v5, 4  ;;  %v8376_v39 = vld [vmem:[%s7231_s14 + $0x98] sm:$0x1] }
  0xdb   : > { %6399 = vmatprep.subr.bf16.mxu1 %v7049_v30  ;;  %v5477_v44 = vrot.slane %v1268_v18, 9  ;;  %v1402_v1 = vrot.slane %v7119_v2, 5  ;;  %v3937_v5 = vrot.slane %v3936_v53, 4  ;;  %v3947_v18 = vrot.slane %v3946_v51, 4  ;;  %9091 = vst [vmem:[#allocation14_spill] sm:$0xff] %v8376_v39 }
  0xdc   : > { %6576 = vmatmul.mubr.bf16.gmra.mrb[20].mxu0 %v7046_v54  ;;  %v3904_v54 = vsel %vm7263_vm2, %v3899_v62, %v8177_v19  ;;  %v3963_v19 = vshll.u32 %v8207_v43, 16  ;;  %v7052_v62 = vld [vmem:[%s7231_s14 + $0xc0] sm:$0xff]   ;;  %v3951_v10 = vrot.slane %v3949_v22, 5  ;;  %v8243_v43 = vsel %vm7509_vm5, %v1394_v52, %v1395_v3 }
  0xdd   : > { %6368 = vmatmul.mubr.bf16.gmra.mrb[4].mxu1 %v9076_v25  ;;  %6579 = vmatprep.mubr.bf16.mxu0 %v7048_v8  ;;  %v3957_v8 = vshll.u32 %v5762_v28, 16  ;;  %v3923_v25 = vrot.slane %v3922_v58, 4  ;;  %v1406_v28 = vrot.slane %v7120_v41, 5  ;;  %v8239_v55 = vcombine.low %v3894_v6, %v3904_v54  ;;  %v7058_v41 = vld [vmem:[%s9047_s1 + $0xe8] sm:$0xff]  }
  0xde   : > { %6371 = vmatprep.mubr.bf16.mxu1 %v9077_v46  ;;  %6400 = vmatpush3.bf16.msra.mxu1 %v7049_v30  ;;  %v1269_v30 = vld [vmem:[%s7231_s14 + $0xa8] sm:$0xe]  ;;  %v1401_v46 = vrot.slane %v1399_v12, 4  ;;  %v3956_v0 = vrot.slane %v3954_v35, 4  ;;  %v8245_v58 = vrot.slane %v3963_v19, 5  ;;  %v3969_v22 = vrot.slane %v3967_v42, 4 }
  0xdf   : > { %6401 = vmatprep.subr.bf16.mxu1 %v7053_v13  ;;  %v3959_v2 = vrot.slane %v3957_v8, 5  ;;  %v3918_v3 = vsel %vm7263_vm2, %v3913_v61, %v8183_v38  ;;  %v8255_v6 = vsel %vm7509_vm5, %v5477_v44, %v1399_v12  ;;  %v3978_v54 = vshrl.u32 %v5765_v17, 16  ;;  %v7121_v38 = vld [vmem:[%s7231_s14 + $0xb0] sm:$0x1]  ;;  %v1270_v19 = vld [vmem:[%s7231_s14 + $0xb4] sm:$0xe] }
  0xe0   : > { %v3981_v52 = vshll.u32 %v5765_v17, 16  ;;  %v3928_v53 = vsel %vm7263_vm2, %v3923_v25, %v3927_v36  ;;  %v8264_v51 = vsel %vm7509_vm5, %v1401_v46, %v1402_v1  ;;  %v5478_v35 = vrot.slane %v1269_v30, 9  ;;  %v8286_v30 = vld [vmem:[%s7231_s14 + $0x74] sm:$0x1]  ;;  %v7122_v25 = vld [vmem:[%s7231_s14 + $0xb8] sm:$0xf] }
  0xe1   : > { %v1409_v8 = vrot.slane %v7121_v38, 5  ;;  %v9080_v12 = vcombine.low %v7958_v49, %v7972_v4  ;;  %v3942_v42 = vsel %vm7263_vm2, %v3937_v5, %v8185_v34  ;;  %v3952_v61 = vsel %vm7263_vm2, %v3947_v18, %v3951_v10  ;;  %v7054_v4 = vld [vmem:[%s7231_s14 + $0xcc] sm:$0xff]   ;;  %9082 = vst [vmem:[#allocation7_spill] sm:$0xff] %v8286_v30  ;;  %v5771_v38 = vld [vmem:[%s7231_s14 + $0x84] sm:$0xf] }
  0xe2   : > { %6402 = vmatpush3.bf16.msra.mxu1 %v7053_v13  ;;  %v8258_v13 = vld [vmem:[%s7231_s14 + $0x70] sm:$0xf]  ;;  %v1408_v36 = vrot.slane %v1406_v28, 4  ;;  %v3973_v44 = vshll.u32 %v8237_v47, 16  ;;  %v9081_v49 = vcombine.low %v7994_v26, %v7998_v56  ;;  %v3970_v1 = vor.u32 %v3969_v22, %v8245_v58  ;;  %v8303_v22 = vld [vmem:[%s7231_s14 + $0x7c] sm:$0xf] }
  0xe3   : > { %6403 = vmatprep.subr.bf16.mxu1 %v7056_v24  ;;  %9079 = vst [vmem:[#allocation6_spill] sm:$0xff] %v8258_v13  ;;  %v3987_v34 = vshll.u32 %v8258_v13, 16  ;;  %v3991_v10 = vshrl.u32 %v8258_v13, 16  ;;  %v5479_v17 = vrot.slane %v1270_v19, 9  ;;  %v1413_v46 = vrot.slane %v7122_v25, 5  ;;  %9083 = vst [vmem:[#allocation8_spill] sm:$0xff] %v8303_v22 }
  0xe4   : > { %6580 = vmatmul.mubr.bf16.gmra.mrb[24].mxu0 %v7050_v23  ;;  %v7060_v23 = vld [vmem:[%s9047_s1 + $0xf0] sm:$0xff]   ;;  %v3980_v26 = vrot.slane %v3978_v54, 4  ;;  %v3983_v56 = vrot.slane %v3981_v52, 5  ;;  %v8294_v18 = vcombine.low %v3918_v3, %v3928_v53  ;;  %v8306_v19 = vcombine.low %v3942_v42, %v3952_v61  ;;  %v7123_v3 = vld [vmem:[%s7231_s14 + $0xbc] sm:$0x1] }
  0xe5   : > { %6372 = vmatmul.mubr.bf16.gmra.mrb[8].mxu1 %v9080_v12  ;;  %6583 = vmatprep.mubr.bf16.mxu0 %v7052_v62  ;;  %v3960_v62 = vor.u32 %v3959_v2, %v3956_v0  ;;  %v8300_v2 = vsel %vm7509_vm5, %v5478_v35, %v1406_v28  ;;  %v8310_v54 = vsel %vm7509_vm5, %v1408_v36, %v1409_v8  ;;  %v8312_v52 = vrot.slane %v3973_v44, 5  ;;  %v7062_v12 = vld [vmem:[%s9047_s1 + $0xf8] sm:$0xff]   ;;  %v8319_v28 = vld [vmem:[%s7231_s14 + $0x88] sm:$0xf] }
  0xe6   : > { %6375 = vmatprep.mubr.bf16.mxu1 %v9081_v49  ;;  %6404 = vmatpush3.bf16.msra.mxu1 %v7056_v24  ;;  %v5768_v24 = vld [vmem:[%s7231_s14 + $0x78] sm:$0xf]  ;;  %v1416_v53 = vrot.slane %v7123_v3, 5  ;;  %9084 = vst [vmem:[#allocation9_spill] sm:$0xff] %v8319_v28  ;;  %v8323_v42 = vrot.slane %v3970_v1, 4  ;;  %v8325_v61 = vrot.slane %v3987_v34, 5  ;;  %v8329_v36 = vsel %vm7509_vm5, %v5479_v17, %v1413_v46 }
  0xe7   : > { %6405 = vmatprep.subr.bf16.mxu1 %v7058_v41  ;;  %v8321_v35 = vrot.slane %v3960_v62, 4  ;;  %v3993_v8 = vrot.slane %v3991_v10, 4  ;;  %v1415_v44 = vrot.slane %v1413_v46, 4  ;;  %v3984_v49 = vor.u32 %v3983_v56, %v3980_v26  ;;  %v5774_v3 = vld [vmem:[%s7231_s14 + $0x90] sm:$0xf] }
  0xe8   : > { %v3997_v25 = vshll.u32 %v8286_v30, 16  ;;  %v4005_v0 = vshll.u32 %v5768_v24, 16  ;;  %v4011_v62 = vshll.u32 %v8303_v22, 16  ;;  %v4015_v1 = vshrl.u32 %v8303_v22, 16  ;;  %v8336_v34 = vld [vmem:[%s7231_s14 + $0x94] sm:$0xf] }
  0xe9   : > { %9085 = vst [vmem:[#allocation10_spill] sm:$0xff] %v8336_v34  ;;  %v9086_v10 = vcombine.low %v8038_v27, %v8042_v29  ;;  %v4026_v17 = vshrl.u32 %v5771_v38, 16  ;;  %v4029_v46 = vshll.u32 %v5771_v38, 16  ;;  %v4039_v26 = vshrl.u32 %v8319_v28, 16  ;;  %v5777_v38 = vld [vmem:[%s7231_s14 + $0x9c] sm:$0xf] }
  0xea   : > { %6406 = vmatpush3.bf16.msra.mxu1 %v7058_v41  ;;  %v4002_v41 = vshrl.u32 %v5768_v24, 16  ;;  %v9087_v56 = vcombine.low %v8049_v45, %v8053_v14  ;;  %v3994_v29 = vor.u32 %v3993_v8, %v8325_v61  ;;  %v4053_v24 = vshll.u32 %v5774_v3, 16  ;;  %v8358_v45 = vld [vmem:[%s7231_s14 + $0x80] sm:$0x1] }
  0xeb   : > { %6407 = vmatprep.subr.bf16.mxu1 %v7060_v23  ;;  %v8355_v5 = vrot.slane %v3997_v25, 5  ;;  %9088 = vst [vmem:[#allocation11_spill] sm:$0xff] %v8358_v45  ;;  %v4059_v14 = vshll.u32 %v8336_v34, 16  ;;  %v4007_v27 = vrot.slane %v4005_v0, 5  ;;  %v4017_v8 = vrot.slane %v4015_v1, 4 }
  0xec   : > { %6584 = vmatmul.mubr.bf16.gmra.mrb[28].mxu0 %v7054_v4  ;;  %v4035_v4 = vshll.u32 %v8319_v28, 16  ;;  %v8362_v28 = vrot.slane %v4011_v62, 5  ;;  %v8368_v22 = vld [vmem:[%s7231_s14 + $0xa0] sm:$0xf]  ;;  %v4028_v25 = vrot.slane %v4026_v17, 4  ;;  %v4031_v30 = vrot.slane %v4029_v46, 5 }
  0xed   : > { %6376 = vmatmul.mubr.bf16.gmra.mrb[12].mxu1 %v9086_v10  ;;  %6603 = vmatprep.mubr.bf16.mxu0 %v8107_v59  ;;  %v4050_v59 = vshrl.u32 %v5774_v3, 16  ;;  %v8353_v10 = vrot.slane %v3984_v49, 4  ;;  %v8365_v3 = vld [vmem:[%s7231_s14 + $0x8c] sm:$0x1]  ;;  %9090 = vst [vmem:[#allocation13_spill] sm:$0xff] %v8368_v22  ;;  %v4041_v47 = vrot.slane %v4039_v26, 4  ;;  %v8385_v62 = vsel %vm7509_vm5, %v1415_v44, %v1416_v53 }
  0xee   : > { %6379 = vmatprep.mubr.bf16.mxu1 %v9087_v56  ;;  %6408 = vmatpush3.bf16.msra.mxu1 %v7060_v23  ;;  %v4063_v23 = vshrl.u32 %v8336_v34, 16  ;;  %v4004_v56 = vrot.slane %v4002_v41, 4  ;;  %9089 = vst [vmem:[#allocation12_spill] sm:$0xff] %v8365_v3  ;;  %v7059_v49 = vld [vmem:[%s9047_s1 + $0x208] sm:$0xff]   ;;  %v8373_v13 = vrot.slane %v4035_v4, 5  ;;  %v4055_v34 = vrot.slane %v4053_v24, 5 }
  0xef   : > { %6409 = vmatprep.subr.bf16.mxu1 %v7062_v12  ;;  %v5780_v41 = vld [vmem:[%s7231_s14 + $0xa8] sm:$0xf]  ;;  %v4052_v1 = vrot.slane %v4050_v59, 4  ;;  %v8390_v17 = vld [vmem:[%s9047_s1 + $0x100] sm:$0xff]   ;;  %v8393_v46 = vrot.slane %v4059_v14, 5  ;;  %v4074_v26 = vshrl.u32 %v5777_v38, 16  ;;  %v9093_v24 = vcombine.low %v8057_v16, %v8067_v15 }
  0xf0   : > { %9092 = vst [vmem:[#allocation15_spill] sm:$0xff] %v8390_v17  ;;  %v4065_v4 = vrot.slane %v4063_v23, 4  ;;  %v4077_v0 = vshll.u32 %v5777_v38, 16  ;;  %v8396_v53 = vrot.slane %v3994_v29, 4  ;;  %v4083_v44 = vshll.u32 %v8368_v22, 16  ;;  %v7061_v16 = vld [vmem:[%s9047_s1 + $0x210] sm:$0xff]  }
  0xf1   : > { %v4087_v59 = vshrl.u32 %v8368_v22, 16  ;;  %v4008_v14 = vor.u32 %v4007_v27, %v4004_v56  ;;  %v4018_v38 = vor.u32 %v4017_v8, %v8362_v28  ;;  %v4032_v23 = vor.u32 %v4031_v30, %v4028_v25  ;;  %v8408_v29 = vld [vmem:[%s7231_s14 + $0xac] sm:$0xf]  ;;  %v8421_v25 = vld [vmem:[%s7231_s14 + $0xa4] sm:$0x1] }
  0xf2   : > { %6410 = vmatpush3.bf16.msra.mxu1 %v7062_v12  ;;  %v4021_v12 = vshll.u32 %v8358_v45, 16  ;;  %9094 = vst [vmem:[#allocation16_spill] sm:$0xff] %v8408_v29  ;;  %v4042_v15 = vor.u32 %v4041_v47, %v8373_v13  ;;  %v4098_v27 = vshrl.u32 %v5780_v41, 16  ;;  %v4101_v30 = vshll.u32 %v5780_v41, 16 }
  0xf3   : > { %6683 = vmatprep.subr.bf16.mxu1 %v8390_v17  ;;  %v9095_v17 = vcombine.low %v8113_v20, %v8134_v7  ;;  %v4056_v56 = vor.u32 %v4055_v34, %v4052_v1  ;;  %v4066_v8 = vor.u32 %v4065_v4, %v8393_v46  ;;  %v4076_v20 = vrot.slane %v4074_v26, 4 }
  0xf4   : > { %6604 = vmatmul.mubr.bf16.vlgmr.msra.gmra.mrb[0].mxu0 %v8190_v50  ;;  %v4045_v50 = vshll.u32 %v8365_v3, 16  ;;  %v4079_v7 = vrot.slane %v4077_v0, 5  ;;  %v4111_v22 = vshrl.u32 %v8408_v29, 16  ;;  %v4009_v47 = vrot.slane %v4008_v14, 4  ;;  %v7063_v0 = vld [vmem:[%s9047_s1 + $0x218] sm:$0xff]  }
  0xf5   : > { %6380 = vmatmul.mubr.bf16.gmra.mrb[16].mxu1 %v9093_v24  ;;  %6636 = vmatpush3.bf16.msra.mxu0 %v8094_v21  ;;  %v4069_v21 = vshll.u32 %v8376_v39, 16  ;;  %v4107_v24 = vshll.u32 %v8408_v29, 16  ;;  %v4019_v39 = vrot.slane %v4018_v38, 4  ;;  %v4023_v3 = vrot.slane %v4021_v12, 5 }
  0xf6   : > { %6383 = vmatprep.mubr.bf16.mxu1 %v9095_v17  ;;  %6607 = vmatprep.mubr.bf16.mxu0 %v8194_v48  ;;  %v8423_v17 = vrot.slane %v4083_v44, 5  ;;  %v4089_v48 = vrot.slane %v4087_v59, 4  ;;  %v4047_v41 = vrot.slane %v4045_v50, 5  ;;  %v4033_v34 = vrot.slane %v4032_v23, 4 }
  0xf7   : > { %6637 = vmatprep.subr.bf16.mxu0 %v7059_v49  ;;  %v4043_v1 = vrot.slane %v4042_v15, 4  ;;  %v4100_v4 = vrot.slane %v4098_v27, 4  ;;  %v4103_v45 = vrot.slane %v4101_v30, 5  ;;  %v4057_v26 = vrot.slane %v4056_v56, 4  ;;  %v8489_v27 = vld [vmem:[%s7231_s14 + $0xbc] sm:$0x1] }
  0xf8   : > { %v4071_v44 = vrot.slane %v4069_v21, 5  ;;  %v4080_v59 = vor.u32 %v4079_v7, %v4076_v20  ;;  %v4093_v29 = vshll.u32 %v8421_v25, 16  ;;  %v4090_v12 = vor.u32 %v4089_v48, %v8423_v17  ;;  %v8456_v21 = vld [vmem:[%s7231_s14 + $0xb0] sm:$0x1] }
  0xf9   : > { %6638 = vmatpush3.bf16.msra.mxu0 %v7059_v49  ;;  %v4067_v49 = vrot.slane %v4066_v8, 4  ;;  %v8433_v14 = vrot.slane %v4107_v24, 5  ;;  %v4113_v38 = vrot.slane %v4111_v22, 4  ;;  %v9096_v23 = vor.u32 %v7841_v57, %v7839_v11 }
  0xfa   : > { %6639 = vmatprep.subr.bf16.mxu0 %v7061_v16  ;;  %v9097_v15 = vcombine.low %v8146_v40, %v8171_v60  ;;  %v4000_v22 = vsel %vm7263_vm2, %v8396_v53, %v8355_v5  ;;  %v4014_v57 = vsel %vm7263_vm2, %v4009_v47, %v8362_v28  ;;  %v9098_v40 = vcombine.low %v8201_v31, %v8243_v43  ;;  %v7066_v31 = vld [vmem:[%s9047_s1 + $0x220] sm:$0xff]  }
  0xfb   : > { %v8438_v50 = vrot.slane %v9096_v23, 4  ;;  %v4024_v60 = vsel %vm7263_vm2, %v4019_v39, %v4023_v3  ;;  %v4104_v5 = vor.u32 %v4103_v45, %v4100_v4  ;;  %v4048_v28 = vsel %vm7263_vm2, %v4043_v1, %v4047_v41  ;;  %v5820_v41 = vld [vmem:[%s7231_s14 + $0x48] sm:$0xe] }
  0xfc   : > { %6608 = vmatmul.mubr.bf16.gmra.mrb[4].mxu0 %v8239_v55  ;;  %v3990_v55 = vsel %vm7263_vm2, %v8353_v10, %v8325_v61  ;;  %v5783_v61 = vld [vmem:[%s7231_s14 + $0xb4] sm:$0xf]  ;;  %v8468_v10 = vld [vmem:[%s7231_s14 + $0xb8] sm:$0xf]  ;;  %v4062_v39 = vsel %vm7263_vm2, %v4057_v26, %v8393_v46  ;;  %v8478_v43 = vrot.slane %v4080_v59, 4  ;;  %v8480_v3 = vrot.slane %v4093_v29, 5 }
  0xfd   : > { %6384 = vmatmul.mubr.bf16.gmra.mrb[20].mxu1 %v9097_v15  ;;  %6611 = vmatprep.mubr.bf16.mxu0 %v8294_v18  ;;  %v4038_v18 = vsel %vm7263_vm2, %v4033_v34, %v8373_v13  ;;  %v4072_v13 = vsel %vm7263_vm2, %v4067_v49, %v4071_v44  ;;  %v8484_v45 = vrot.slane %v4090_v12, 4  ;;  %v4114_v53 = vor.u32 %v4113_v38, %v8433_v14  ;;  %v5821_v26 = vld [vmem:[%s7231_s14 + $0x54] sm:$0xe] }
  0xfe   : > { %6387 = vmatprep.mubr.bf16.mxu1 %v9098_v40  ;;  %6640 = vmatpush3.bf16.msra.mxu0 %v7061_v16  ;;  %v4117_v16 = vshll.u32 %v8456_v21, 16  ;;  %v9099_v46 = vsel %vm7263_vm2, %v8323_v42, %v8312_v52  ;;  %v9100_v29 = vsel %vm7263_vm2, %v8321_v35, %v8245_v58  ;;  %v4122_v56 = vshrl.u32 %v5783_v61, 16 }
  0xff   : > { %6641 = vmatprep.subr.bf16.mxu0 %v7063_v0  ;;  %v5798_v30 = vcombine.low %v9100_v29, %v9099_v46  ;;  %v4125_v8 = vshll.u32 %v5783_v61, 16  ;;  %v4131_v20 = vshll.u32 %v8468_v10, 16  ;;  %v5494_v7 = vcombine.low %v8300_v2, %v8310_v54  ;;  %v7069_v2 = vld [vmem:[%s9047_s1 + $0x228] sm:$0xff]   ;;  %v5786_v54 = vld [vmem:[%s7231_s14 + $0xc0] sm:$0xf]  ;;  %v9104_v29 = vld [vmem:[#allocation5_spill] sm:$0xff] }
 0x100   : > { %v5495_v48 = vcombine.low %v8329_v36, %v8385_v62  ;;  %v5799_v24 = vcombine.low %v3990_v55, %v4000_v22  ;;  %v8506_v52 = vrot.slane %v4104_v5, 4  ;;  %v5800_v42 = vcombine.low %v4014_v57, %v4024_v60 }
 0x101   : > { %v8508_v58 = vcombine.low %v4038_v18, %v4048_v28  ;;  %v8510_v35 = vcombine.low %v4062_v39, %v4072_v13  ;;  %v4086_v47 = vsel %vm7263_vm2, %v8478_v43, %v8423_v17  ;;  %v4096_v34 = vsel %vm7263_vm2, %v8484_v45, %v8480_v3  ;;  %v5823_v28 = vld [vmem:[%s7231_s14 + $0x6c] sm:$0xe] }
 0x102   : > { %6642 = vmatpush3.bf16.msra.mxu0 %v7063_v0  ;;  %v8526_v1 = vrot.slane %v4114_v53, 4  ;;  %v8528_v4 = vrot.slane %v4117_v16, 5  ;;  %v4135_v0 = vshrl.u32 %v8468_v10, 16  ;;  %v9101_v44 = vcombine.low %v8255_v6, %v8264_v51  ;;  %v7072_v6 = vld [vmem:[%s9047_s1 + $0x230] sm:$0xff]   ;;  %v8550_v51 = vld [vmem:[%s7231_s14 + $0xc4] sm:$0xf] }
 0x103   : > { %6643 = vmatprep.subr.bf16.mxu0 %v7066_v31  ;;  %v8535_v59 = vrot.slane %v4122_v56, 4  ;;  %v8539_v49 = vrot.slane %v4131_v20, 5  ;;  %v4141_v12 = vshll.u32 %v8489_v27, 16  ;;  %v4110_v38 = vsel %vm7263_vm2, %v8506_v52, %v8433_v14  ;;  %v5822_v14 = vld [vmem:[%s7231_s14 + $0x60] sm:$0xe]  ;;  %v9102_v39 = vld [vmem:[#allocation3_spill] sm:$0xff] }
 0x104   : > { %6612 = vmatmul.mubr.bf16.gmra.mrb[8].mxu0 %v8306_v19  ;;  %v8537_v19 = vrot.slane %v4125_v8, 5  ;;  %v4146_v23 = vshrl.u32 %v5786_v54, 16  ;;  %v5836_v15 = vrot.slane %v5820_v41, 9  ;;  %v4608_v55 = vrot.slane %v8126_v32, 5  ;;  %v7064_v13 = vld [vmem:[%s7231_s14 + $0xc] sm:$0xff]   ;;  %v7075_v56 = vld [vmem:[%s9047_s1 + $0x238] sm:$0xff]  }
 0x105   : > { %6388 = vmatmul.mubr.bf16.gmra.mrb[24].mxu1 %v9101_v44  ;;  %6615 = vmatprep.mubr.bf16.mxu0 %v5798_v30  ;;  %v4149_v22 = vshll.u32 %v5786_v54, 16  ;;  %v4611_v57 = vrot.slane %v8174_v63, 5  ;;  %v5837_v40 = vrot.slane %v5821_v26, 9  ;;  %v4615_v60 = vrot.slane %v8138_v33, 5  ;;  %v9103_v16 = vld [vmem:[#allocation4_spill] sm:$0xff]  ;;  %v9105_v52 = vld [vmem:[#allocation6_spill] sm:$0xff] }
 0x106   : > { %6391 = vmatprep.mubr.bf16.mxu1 %v5494_v7  ;;  %6644 = vmatpush3.bf16.msra.mxu0 %v7066_v31  ;;  %v4120_v18 = vsel %vm7263_vm2, %v8526_v1, %v8528_v4  ;;  %v8560_v5 = vrot.slane %v4135_v0, 4  ;;  %v8564_v61 = vsel %vm7509_vm5, %v5836_v15, %v4608_v55  ;;  %v4610_v32 = vrot.slane %v4608_v55, 4  ;;  %v9106_v4 = vld [vmem:[#allocation7_spill] sm:$0xff] }
 0x107   : > { %6645 = vmatprep.subr.bf16.mxu0 %v7069_v2  ;;  %v4155_v31 = vshll.u32 %v8550_v51, 16  ;;  %v8570_v63 = vsel %vm7509_vm5, %v5837_v40, %v4615_v60  ;;  %v4617_v33 = vrot.slane %v4615_v60, 4  ;;  %v4618_v3 = vrot.slane %v9102_v39, 5  ;;  %v8601_v26 = vld [vmem:[%s7231_s14 + $0xc8] sm:$0x1]  ;;  %v7065_v40 = vld [vmem:[%s7231_s14 + $0x18] sm:$0xff]  }
 0x108   : > { %v8576_v45 = vsel %vm7509_vm5, %v4610_v32, %v4611_v57  ;;  %v5838_v53 = vrot.slane %v5822_v14, 9  ;;  %v4622_v46 = vrot.slane %v9103_v16, 5  ;;  %v4625_v30 = vrot.slane %v9104_v29, 5  ;;  %v7067_v39 = vld [vmem:[%s7231_s14 + $0x24] sm:$0xff]  }
 0x109   : > { %v5852_v8 = vcombine.low %v8564_v61, %v8576_v45  ;;  %v8587_v20 = vsel %vm7509_vm5, %v4617_v33, %v4618_v3  ;;  %v5839_v7 = vrot.slane %v5823_v28, 9  ;;  %v4632_v0 = vrot.slane %v9106_v4, 5  ;;  %v9108_v28 = vld [vmem:[#allocation11_spill] sm:$0xff]  ;;  %v5593_v61 = vld [vmem:[%s7231_s14 + $0x90] sm:$0xf] }
 0x10a   : > { %6646 = vmatpush3.bf16.msra.mxu0 %v7069_v2  ;;  %v4629_v2 = vrot.slane %v9105_v52, 5  ;;  %v5853_v54 = vcombine.low %v8570_v63, %v8587_v20  ;;  %v8594_v41 = vsel %vm7509_vm5, %v5838_v53, %v4622_v46  ;;  %v4624_v1 = vrot.slane %v4622_v46, 4  ;;  %v9109_v53 = vld [vmem:[#allocation2_spill] sm:$0xff]  ;;  %v7081_v45 = vld [vmem:[%s7231_s14 + $0xa8] sm:$0xff]  }
 0x10b   : > { %6647 = vmatprep.subr.bf16.mxu0 %v7072_v6  ;;  %v8603_v44 = vrot.slane %v4146_v23, 4  ;;  %v8616_v36 = vcombine.low %v4086_v47, %v4096_v34  ;;  %v4128_v62 = vor.u32 %v8537_v19, %v8535_v59  ;;  %v5824_v23 = vld [vmem:[%s7231_s14 + $0x78] sm:$0xe]  ;;  %v8628_v57 = vrot.slane %v4141_v12, 5  ;;  %v5789_v12 = vld [vmem:[%s7231_s14 + $0xcc] sm:$0xf] }
 0x10c   : > { %6616 = vmatmul.mubr.bf16.gmra.mrb[12].mxu0 %v5799_v24  ;;  %v8605_v24 = vrot.slane %v4149_v22, 5  ;;  %v8609_v15 = vsel %vm7509_vm5, %v5839_v7, %v4629_v2  ;;  %v4631_v55 = vrot.slane %v4629_v2, 4  ;;  %v8626_v22 = vcombine.low %v4110_v38, %v4120_v18  ;;  %v5587_v47 = vld [vmem:[%s7231_s14 + $0x78] sm:$0xf]  ;;  %v9107_v18 = vld [vmem:[#allocation8_spill] sm:$0xff] }
 0x10d   : > { %6392 = vmatmul.mubr.bf16.gmra.mrb[28].mxu1 %v5495_v48  ;;  %6619 = vmatprep.mubr.bf16.mxu0 %v5800_v42  ;;  %v4159_v48 = vshrl.u32 %v8550_v51, 16  ;;  %v8623_v42 = vsel %vm7509_vm5, %v4624_v1, %v4625_v30  ;;  %v4138_v34 = vor.u32 %v8560_v5, %v8539_v49  ;;  %v8639_v59 = vrot.slane %v4155_v31, 5  ;;  %v8653_v31 = vld [vmem:[%s7231_s14 + $0xd0] sm:$0xf]  ;;  %v9110_v1 = vld [vmem:[#allocation9_spill] sm:$0xff] }
 0x10e   : > { %6411 = vmatprep.mubr.bf16.mxu1 %v7064_v13  ;;  %6648 = vmatpush3.bf16.msra.mxu0 %v7072_v6  ;;  %v5854_v17 = vcombine.low %v8594_v41, %v8623_v42  ;;  %v8634_v43 = vsel %vm7509_vm5, %v4631_v55, %v4632_v0  ;;  %v4165_v19 = vshll.u32 %v8601_v26, 16  ;;  %v5825_v6 = vld [vmem:[%s7231_s14 + $0x84] sm:$0xe]  ;;  %v4152_v60 = vor.u32 %v8605_v24, %v8603_v44  ;;  %v9111_v24 = vld [vmem:[#allocation12_spill] sm:$0xff]  ;;  %v7145_v63 = vld [vmem:[%s7231_s14 + $0x8c] sm:$0x1] }
 0x10f   : > { %6649 = vmatprep.subr.bf16.mxu0 %v7075_v56  ;;  %v5855_v38 = vcombine.low %v8609_v15, %v8634_v43  ;;  %v5840_v14 = vrot.slane %v5824_v23, 9  ;;  %v4636_v32 = vrot.slane %v9107_v18, 5  ;;  %v4639_v33 = vrot.slane %v9108_v28, 5 }
 0x110   : > { %v4161_v5 = vrot.slane %v4159_v48, 4  ;;  %v2390_v3 = vshrl.u32 %v5587_v47, 16  ;;  %v2393_v13 = vshll.u32 %v5587_v47, 16  ;;  %v2412_v16 = vsel %vm7263_vm2, %v8438_v50, %v9109_v53 }
 0x111   : > { %v4170_v46 = vshrl.u32 %v5789_v12, 16  ;;  %v8661_v29 = vsel %vm7509_vm5, %v5840_v14, %v4636_v32  ;;  %v4638_v30 = vrot.slane %v4636_v32, 4  ;;  %v5841_v7 = vrot.slane %v5825_v6, 9  ;;  %v7125_v6 = vld [vmem:[%s9047_s1 + $0x108] sm:$0xff]  }
 0x112   : > { %6650 = vmatpush3.bf16.msra.mxu0 %v7075_v56  ;;  %v4173_v52 = vshll.u32 %v5789_v12, 16  ;;  %v2392_v2 = vrot.slane %v2390_v3, 4  ;;  %v2395_v56 = vrot.slane %v2393_v13, 5  ;;  %v4643_v4 = vrot.slane %v9110_v1, 5  ;;  %v5826_v12 = vld [vmem:[%s7231_s14 + $0x90] sm:$0xe] }
 0x113   : > { %v4179_v50 = vshll.u32 %v8653_v31, 16  ;;  %v4183_v0 = vshrl.u32 %v8653_v31, 16  ;;  %v8670_v44 = vsel %vm7509_vm5, %v4638_v30, %v4639_v33  ;;  %v4646_v55 = vrot.slane %v9111_v24, 5  ;;  %v7068_v3 = vld [vmem:[%s7231_s14 + $0x30] sm:$0xff]  }
 0x114   : > { %6620 = vmatmul.mubr.bf16.gmra.mrb[16].mxu0 %v8508_v58  ;;  %v9112_v58 = vld [vmem:[#allocation15_spill] sm:$0xff]  ;;  %v4162_v48 = vor.u32 %v4161_v5, %v8639_v59  ;;  %v2396_v23 = vor.u32 %v2395_v56, %v2392_v2  ;;  %v4645_v47 = vrot.slane %v4643_v4, 4  ;;  %v4139_v14 = vrot.slane %v4138_v34, 4  ;;  %v8691_v13 = vld [vmem:[%s7231_s14 + $0xd4] sm:$0x1]  ;;  %v9113_v2 = vld [vmem:[#allocation10_spill] sm:$0xff] }
 0x115   : > { %6412 = vmatmul.mubr.bf16.vlgmr.msra.gmra.mrb[0].mxu1 %v7065_v40  ;;  %6623 = vmatprep.mubr.bf16.mxu0 %v8510_v35  ;;  %v5856_v35 = vcombine.low %v8661_v29, %v8670_v44  ;;  %v4129_v40 = vrot.slane %v4128_v62, 4  ;;  %v4167_v18 = vrot.slane %v4165_v19, 5  ;;  %v8683_v32 = vsel %vm7509_vm5, %v5841_v7, %v4643_v4  ;;  %v7070_v19 = vld [vmem:[%s7231_s14 + $0x3c] sm:$0xff]   ;;  %v7126_v1 = vld [vmem:[%s9047_s1 + $0x110] sm:$0xff]  }
 0x116   : > { %6691 = vmatpush3.bf16.msra.mxu1 %v9112_v58  ;;  %6415 = vmatprep.mubr.bf16.mxu1 %v7067_v39  ;;  %v4172_v28 = vrot.slane %v4170_v46, 4  ;;  %v4175_v33 = vrot.slane %v4173_v52, 5  ;;  %v2397_v39 = vrot.slane %v2396_v23, 4  ;;  %v8687_v5 = vsel %vm7509_vm5, %v4645_v47, %v4646_v55  ;;  %v7127_v47 = vld [vmem:[%s7231_s14 + $0x1c] sm:$0xf] }
 0x117   : > { %6684 = vmatprep.subr.bf16.mxu1 %v7125_v6  ;;  %v8693_v53 = vrot.slane %v4179_v50, 5  ;;  %v4185_v30 = vrot.slane %v4183_v0, 4  ;;  %v5857_v62 = vcombine.low %v8683_v32, %v8687_v5  ;;  %v5842_v34 = vrot.slane %v5826_v12, 9 }
 0x118   : > { %v4153_v7 = vrot.slane %v4152_v60, 4  ;;  %v4163_v46 = vrot.slane %v4162_v48, 4  ;;  %v2402_v52 = vsel %vm7263_vm2, %v2397_v39, %v7839_v11  ;;  %v4650_v56 = vrot.slane %v9113_v2, 5  ;;  %v9114_v11 = vld [vmem:[#allocation14_spill] sm:$0xff]  ;;  %v7071_v39 = vld [vmem:[%s7231_s14 + $0x48] sm:$0xff]  }
 0x119   : > { %v4134_v4 = vsel %vm7263_vm2, %v4129_v40, %v8539_v49  ;;  %v4144_v60 = vsel %vm7263_vm2, %v4139_v14, %v8628_v57  ;;  %v8711_v50 = vcombine.low %v2402_v52, %v2412_v16  ;;  %v4653_v0 = vrot.slane %v9114_v11, 5  ;;  %v5816_v57 = vld [vmem:[%s7231_s14 + $0x18] sm:$0xe]  ;;  %v5827_v16 = vld [vmem:[%s7231_s14 + $0x9c] sm:$0xe] }
 0x11a   : > { %6692 = vmatpush3.bf16.msra.mxu1 %v7125_v6  ;;  %v4176_v24 = vor.u32 %v4175_v33, %v4172_v28  ;;  %v4189_v55 = vshll.u32 %v8691_v13, 16  ;;  %v8718_v58 = vsel %vm7509_vm5, %v5842_v34, %v4650_v56  ;;  %v4652_v48 = vrot.slane %v4650_v56, 4  ;;  %v7128_v40 = vld [vmem:[%s9047_s1 + $0x118] sm:$0xff]   ;;  %v7129_v2 = vld [vmem:[%s7231_s14 + $0x20] sm:$0x1] }
 0x11b   : > { %6685 = vmatprep.subr.bf16.mxu1 %v7126_v1  ;;  %v4186_v49 = vor.u32 %v4185_v30, %v8693_v53  ;;  %v4168_v23 = vsel %vm7263_vm2, %v4163_v46, %v4167_v18  ;;  %v4580_v12 = vrot.slane %v7127_v47, 5  ;;  %v5805_v6 = vcombine.low %v4134_v4, %v4144_v60  ;;  %v9115_v34 = vld [vmem:[#allocation13_spill] sm:$0xff]  ;;  %v5828_v11 = vld [vmem:[%s7231_s14 + $0xa8] sm:$0xe] }
 0x11c   : > { %6624 = vmatmul.mubr.bf16.gmra.mrb[20].mxu0 %v8616_v36  ;;  %v4158_v36 = vsel %vm7263_vm2, %v4153_v7, %v8639_v59  ;;  %v4177_v14 = vrot.slane %v4176_v24, 4  ;;  %v4191_v28 = vrot.slane %v4189_v55, 5  ;;  %v5832_v18 = vrot.slane %v5816_v57, 9  ;;  %v7073_v46 = vld [vmem:[%s7231_s14 + $0x54] sm:$0xff]   ;;  %v5817_v55 = vld [vmem:[%s7231_s14 + $0x24] sm:$0xe] }
 0x11d   : > { %6416 = vmatmul.mubr.bf16.gmra.mrb[4].mxu1 %v7068_v3  ;;  %6627 = vmatprep.mubr.bf16.mxu0 %v8626_v22  ;;  %v8732_v22 = vsel %vm7509_vm5, %v4652_v48, %v4653_v0  ;;  %v5843_v33 = vrot.slane %v5827_v16, 9  ;;  %v5806_v3 = vcombine.low %v4158_v36, %v4168_v23  ;;  %v4187_v30 = vrot.slane %v4186_v49, 4  ;;  %v7131_v48 = vld [vmem:[%s7231_s14 + $0x28] sm:$0xf]  ;;  %v7132_v36 = vld [vmem:[%s7231_s14 + $0x34] sm:$0xf] }
 0x11e   : > { %6419 = vmatprep.mubr.bf16.mxu1 %v7070_v19  ;;  %6693 = vmatpush3.bf16.msra.mxu1 %v7126_v1  ;;  %v5858_v59 = vcombine.low %v8718_v58, %v8732_v22  ;;  %v4657_v19 = vrot.slane %v9115_v34, 5  ;;  %v4660_v7 = vrot.slane %v8421_v25, 5  ;;  %v4582_v52 = vrot.slane %v4580_v12, 4  ;;  %v7130_v1 = vld [vmem:[%s9047_s1 + $0x120] sm:$0xff]  }
 0x11f   : > { %6686 = vmatprep.subr.bf16.mxu1 %v7128_v40  ;;  %v4583_v56 = vrot.slane %v7129_v2, 5  ;;  %v4581_v25 = vsel %vm7509_vm5, %v5832_v18, %v4580_v12  ;;  %v4182_v0 = vsel %vm7263_vm2, %v4177_v14, %v8693_v53  ;;  %v4192_v24 = vsel %vm7263_vm2, %v4187_v30, %v4191_v28  ;;  %v5818_v12 = vld [vmem:[%s7231_s14 + $0x30] sm:$0xe]  ;;  %v7074_v30 = vld [vmem:[%s7231_s14 + $0x60] sm:$0xff]  }
 0x120   : > { %v8749_v4 = vsel %vm7509_vm5, %v5843_v33, %v4657_v19  ;;  %v4659_v60 = vrot.slane %v4657_v19, 4  ;;  %v4587_v49 = vrot.slane %v7131_v48, 5  ;;  %v4594_v23 = vrot.slane %v7132_v36, 5  ;;  %v7134_v33 = vld [vmem:[%s7231_s14 + $0x2c] sm:$0x1] }
 0x121   : > { %v4584_v16 = vsel %vm7509_vm5, %v4582_v52, %v4583_v56  ;;  %v5844_v47 = vrot.slane %v5828_v11, 9  ;;  %v5807_v28 = vcombine.low %v4182_v0, %v4192_v24  ;;  %v5833_v18 = vrot.slane %v5817_v55, 9  ;;  %v7076_v52 = vld [vmem:[%s7231_s14 + $0x6c] sm:$0xff]   ;;  %v5829_v11 = vld [vmem:[%s7231_s14 + $0xb4] sm:$0xe] }
 0x122   : > { %6694 = vmatpush3.bf16.msra.mxu1 %v7128_v40  ;;  %v8763_v57 = vsel %vm7509_vm5, %v4659_v60, %v4660_v7  ;;  %v9116_v40 = vld [vmem:[#allocation16_spill] sm:$0xff]  ;;  %v5848_v34 = vcombine.low %v4581_v25, %v4584_v16  ;;  %v4589_v19 = vrot.slane %v4587_v49, 4  ;;  %v5834_v2 = vrot.slane %v5818_v12, 9  ;;  %v5819_v0 = vld [vmem:[%s7231_s14 + $0x3c] sm:$0xe] }
 0x123   : > { %6687 = vmatprep.subr.bf16.mxu1 %v7130_v1  ;;  %v5859_v53 = vcombine.low %v8749_v4, %v8763_v57  ;;  %v4664_v14 = vrot.slane %v9116_v40, 5  ;;  %v4596_v56 = vrot.slane %v4594_v23, 4  ;;  %v7136_v24 = vld [vmem:[%s7231_s14 + $0x40] sm:$0xf]  ;;  %v4588_v48 = vsel %vm7509_vm5, %v5833_v18, %v4587_v49  ;;  %v7138_v18 = vld [vmem:[%s7231_s14 + $0x44] sm:$0x1] }
 0x124   : > { %6628 = vmatmul.mubr.bf16.gmra.mrb[24].mxu0 %v5805_v6  ;;  %v7133_v6 = vld [vmem:[%s9047_s1 + $0x128] sm:$0xff]   ;;  %v4601_v55 = vrot.slane %v7136_v24, 5  ;;  %v4671_v12 = vrot.slane %v8468_v10, 5  ;;  %v4595_v49 = vsel %vm7509_vm5, %v5834_v2, %v4594_v23  ;;  %v7139_v10 = vld [vmem:[%s9047_s1 + $0x138] sm:$0xff]   ;;  %v5830_v23 = vld [vmem:[%s7231_s14 + $0xc0] sm:$0xe] }
 0x125   : > { %6420 = vmatmul.mubr.bf16.gmra.mrb[8].mxu1 %v7071_v39  ;;  %6631 = vmatprep.mubr.bf16.mxu0 %v5806_v3  ;;  %v4590_v39 = vrot.slane %v7134_v33, 5  ;;  %v4667_v3 = vrot.slane %v8456_v21, 5  ;;  %v8780_v7 = vsel %vm7509_vm5, %v5844_v47, %v4664_v14  ;;  %v7137_v21 = vld [vmem:[%s9047_s1 + $0x130] sm:$0xff]   ;;  %v5845_v47 = vrot.slane %v5829_v11, 9 }
 0x126   : > { %6423 = vmatprep.mubr.bf16.mxu1 %v7073_v46  ;;  %6695 = vmatpush3.bf16.msra.mxu1 %v7130_v1  ;;  %v4666_v46 = vrot.slane %v4664_v14, 4  ;;  %v7135_v1 = vld [vmem:[%s7231_s14 + $0x38] sm:$0x1]  ;;  %v5835_v14 = vrot.slane %v5819_v0, 9  ;;  %v4604_v33 = vrot.slane %v7138_v18, 5  ;;  %v4678_v11 = vrot.slane %v8550_v51, 5 }
 0x127   : > { %6688 = vmatprep.subr.bf16.mxu1 %v7133_v6  ;;  %v4597_v60 = vrot.slane %v7135_v1, 5  ;;  %v4591_v36 = vsel %vm7509_vm5, %v4589_v19, %v4590_v39  ;;  %v4673_v39 = vrot.slane %v4671_v12, 4  ;;  %v5584_v19 = vld [vmem:[%s7231_s14 + $0x6c] sm:$0xf]  ;;  %v7079_v18 = vld [vmem:[%s7231_s14 + $0x90] sm:$0xff]   ;;  %v2433_v20 = vshll.u32 %v7145_v63, 16 }
 0x128   : > { %v8792_v25 = vsel %vm7509_vm5, %v4666_v46, %v4667_v3  ;;  %v5849_v3 = vcombine.low %v4588_v48, %v4591_v36  ;;  %v4602_v1 = vsel %vm7509_vm5, %v5835_v14, %v4601_v55  ;;  %v2366_v0 = vshrl.u32 %v5584_v19, 16  ;;  %v5831_v51 = vld [vmem:[%s7231_s14 + $0xcc] sm:$0xe] }
 0x129   : > { %v5860_v16 = vcombine.low %v8780_v7, %v8792_v25  ;;  %v4598_v40 = vsel %vm7509_vm5, %v4596_v56, %v4597_v60  ;;  %v5846_v56 = vrot.slane %v5830_v23, 9  ;;  %v2369_v24 = vshll.u32 %v5584_v19, 16 }
 0x12a   : > { %6696 = vmatpush3.bf16.msra.mxu1 %v7133_v6  ;;  %v4674_v6 = vrot.slane %v8489_v27, 5  ;;  %v8812_v27 = vsel %vm7509_vm5, %v5845_v47, %v4671_v12  ;;  %v4681_v36 = vrot.slane %v8601_v26, 5  ;;  %v4680_v12 = vrot.slane %v4678_v11, 4 }
 0x12b   : > { %6689 = vmatprep.subr.bf16.mxu1 %v7137_v21  ;;  %v2371_v26 = vrot.slane %v2369_v24, 5  ;;  %v4688_v23 = vrot.slane %v8691_v13, 5 }
 0x12c   : > { %6632 = vmatmul.mubr.bf16.gmra.mrb[28].mxu0 %v5807_v28  ;;  %v4603_v28 = vrot.slane %v4601_v55, 4  ;;  %v8819_v46 = vsel %vm7509_vm5, %v4673_v39, %v4674_v6  ;;  %v8833_v55 = vsel %vm7509_vm5, %v5846_v56, %v4678_v11  ;;  %v4685_v39 = vrot.slane %v8653_v31, 5  ;;  %v7141_v56 = vld [vmem:[%s7231_s14 + $0x74] sm:$0x1] }
 0x12d   : > { %6424 = vmatmul.mubr.bf16.gmra.mrb[12].mxu1 %v7074_v30  ;;  %6651 = vmatprep.mubr.bf16.mxu0 %v5848_v34  ;;  %v7077_v30 = vld [vmem:[%s7231_s14 + $0x78] sm:$0xff]   ;;  %v5850_v34 = vcombine.low %v4595_v49, %v4598_v40  ;;  %v5861_v2 = vcombine.low %v8812_v27, %v8819_v46  ;;  %v8838_v49 = vsel %vm7509_vm5, %v4680_v12, %v4681_v36  ;;  %v2368_v40 = vrot.slane %v2366_v0, 4  ;;  %v7142_v0 = vld [vmem:[%s7231_s14 + $0x88] sm:$0xf] }
 0x12e   : > { %6427 = vmatprep.mubr.bf16.mxu1 %v7076_v52  ;;  %6697 = vmatpush3.bf16.msra.mxu1 %v7137_v21  ;;  %v7078_v52 = vld [vmem:[%s7231_s14 + $0x84] sm:$0xff]   ;;  %v4605_v60 = vsel %vm7509_vm5, %v4603_v28, %v4604_v33  ;;  %v7140_v21 = vld [vmem:[%s7231_s14 + $0x70] sm:$0xf]  ;;  %v5862_v28 = vcombine.low %v8833_v55, %v8838_v49  ;;  %v4687_v19 = vrot.slane %v4685_v39, 4  ;;  %v2423_v24 = vshll.u32 %v7142_v0, 16 }
 0x12f   : > { %6690 = vmatprep.subr.bf16.mxu1 %v7139_v10  ;;  %v2375_v48 = vshll.u32 %v7140_v21, 16  ;;  %v2379_v47 = vshrl.u32 %v7140_v21, 16  ;;  %v5851_v6 = vcombine.low %v4602_v1, %v4605_v60  ;;  %v2385_v1 = vshll.u32 %v7141_v56, 16 }
 0x130   : > { %v8860_v11 = vsel %vm7509_vm5, %v4687_v19, %v4688_v23  ;;  %v2427_v21 = vshrl.u32 %v7142_v0, 16  ;;  %v7144_v19 = vld [vmem:[%s7231_s14 + $0xa0] sm:$0xf] }
 0x131   : > { %v8840_v14 = vrot.slane %v2375_v48, 5  ;;  %v2381_v33 = vrot.slane %v2379_v47, 4  ;;  %v2475_v56 = vshrl.u32 %v7144_v19, 16 }
 0x132   : > { %6698 = vmatpush3.bf16.msra.mxu1 %v7139_v10  ;;  %v5847_v10 = vrot.slane %v5831_v51, 9 }
 0x133   : > { %v2382_v31 = vor.u32 %v2381_v33, %v8840_v14  ;;  %v2441_v33 = vshll.u32 %v5593_v61, 16 }
 0x134   : > { %6652 = vmatmul.mubr.bf16.vlgmr.msra.gmra.mrb[0].mxu0 %v5849_v3  ;;  %v7080_v3 = vld [vmem:[%s7231_s14 + $0x9c] sm:$0xff]  }
 0x135   : > { %6428 = vmatmul.mubr.bf16.gmra.mrb[16].mxu1 %v7077_v30  ;;  %6655 = vmatprep.mubr.bf16.mxu0 %v5850_v34  ;;  %v5590_v30 = vld [vmem:[%s7231_s14 + $0x84] sm:$0xf]  ;;  %v8851_v34 = vsel %vm7509_vm5, %v5847_v10, %v4685_v39  ;;  %v2383_v47 = vrot.slane %v2382_v31, 4  ;;  %v7143_v10 = vld [vmem:[%s7231_s14 + $0x94] sm:$0xf]  ;;  %v2443_v0 = vrot.slane %v2441_v33, 5 }
 0x136   : > { %6431 = vmatprep.mubr.bf16.mxu1 %v7078_v52  ;;  %v2372_v52 = vor.u32 %v2371_v26, %v2368_v40  ;;  %v2414_v13 = vshrl.u32 %v5590_v30, 16  ;;  %v2417_v60 = vshll.u32 %v5590_v30, 16  ;;  %v5863_v48 = vcombine.low %v8851_v34, %v8860_v11 }
 0x137   : > { %v8869_v40 = vrot.slane %v2423_v24, 5  ;;  %v2429_v26 = vrot.slane %v2427_v21, 4  ;;  %v2447_v39 = vshll.u32 %v7143_v10, 16  ;;  %v2451_v23 = vshrl.u32 %v7143_v10, 16  ;;  %v7147_v10 = vld [vmem:[%s7231_s14 + $0xa4] sm:$0x1] }
 0x138   : > { %v2373_v36 = vrot.slane %v2372_v52, 4  ;;  %v2416_v12 = vrot.slane %v2414_v13, 4  ;;  %v2419_v51 = vrot.slane %v2417_v60, 5  ;;  %v2471_v52 = vshll.u32 %v7144_v19, 16  ;;  %v7148_v19 = vld [vmem:[%s7231_s14 + $0xac] sm:$0xf] }
 0x139   : > { %v2430_v13 = vor.u32 %v2429_v26, %v8869_v40  ;;  %v8886_v41 = vrot.slane %v2447_v39, 5  ;;  %v2453_v42 = vrot.slane %v2451_v23, 4  ;;  %v2477_v21 = vrot.slane %v2475_v56, 4  ;;  %v5602_v23 = vld [vmem:[%s7231_s14 + $0xb4] sm:$0xf] }
 0x13a   : > { %v2481_v39 = vshll.u32 %v7147_v10, 16  ;;  %v2499_v15 = vshrl.u32 %v7148_v19, 16  ;;  %v2513_v63 = vshll.u32 %v5602_v23, 16 }
 0x13b   : > { %v2454_v26 = vor.u32 %v2453_v42, %v8886_v41 }
 0x13c   : > { %6656 = vmatmul.mubr.bf16.gmra.mrb[4].mxu0 %v5851_v6  ;;  %v5596_v6 = vld [vmem:[%s7231_s14 + $0x9c] sm:$0xf] }
 0x13d   : > { %6432 = vmatmul.mubr.bf16.gmra.mrb[20].mxu1 %v7079_v18  ;;  %6659 = vmatprep.mubr.bf16.mxu0 %v5852_v8  ;;  %v2387_v8 = vrot.slane %v2385_v1, 5  ;;  %v2438_v18 = vshrl.u32 %v5593_v61, 16  ;;  %v2465_v30 = vshll.u32 %v5596_v6, 16  ;;  %v2378_v1 = vsel %vm7263_vm2, %v2373_v36, %v8840_v14  ;;  %v7083_v61 = vld [vmem:[%s7231_s14 + $0xc0] sm:$0xff]  }
 0x13e   : > { %6435 = vmatprep.mubr.bf16.mxu1 %v7080_v3  ;;  %v2462_v3 = vshrl.u32 %v5596_v6, 16  ;;  %v8888_v14 = vrot.slane %v2471_v52, 5  ;;  %v2495_v52 = vshll.u32 %v7148_v19, 16 }
 0x13f   : > { %v2388_v31 = vsel %vm7263_vm2, %v2383_v47, %v2387_v8  ;;  %v2440_v60 = vrot.slane %v2438_v18, 4  ;;  %v2467_v24 = vrot.slane %v2465_v30, 5  ;;  %v2435_v8 = vrot.slane %v2433_v20, 5  ;;  %v7149_v20 = vld [vmem:[%s7231_s14 + $0xb8] sm:$0xf] }
 0x140   : > { %v2431_v47 = vrot.slane %v2430_v13, 4  ;;  %v2478_v33 = vor.u32 %v2477_v21, %v8888_v14  ;;  %v2519_v29 = vshll.u32 %v7149_v20, 16  ;;  %v2523_v44 = vshrl.u32 %v7149_v20, 16 }
 0x142   : > { %v2479_v13 = vrot.slane %v2478_v33, 4 }
 0x144   : > { %6660 = vmatmul.mubr.bf16.gmra.mrb[8].mxu0 %v5853_v54  ;;  %v2420_v54 = vor.u32 %v2419_v51, %v2416_v12  ;;  %v2444_v12 = vor.u32 %v2443_v0, %v2440_v60  ;;  %v7146_v51 = vld [vmem:[%s7231_s14 + $0x98] sm:$0x1]  ;;  %v2483_v60 = vrot.slane %v2481_v39, 5 }
 0x145   : > { %6436 = vmatmul.mubr.bf16.gmra.mrb[24].mxu1 %v7081_v45  ;;  %6663 = vmatprep.mubr.bf16.mxu0 %v5854_v17  ;;  %v2464_v17 = vrot.slane %v2462_v3, 4  ;;  %v5616_v45 = vcombine.low %v2378_v1, %v2388_v31  ;;  %v2457_v6 = vshll.u32 %v7146_v51, 16  ;;  %v2510_v31 = vshrl.u32 %v5602_v23, 16 }
 0x146   : > { %6439 = vmatprep.mubr.bf16.mxu1 %v7082_v9  ;;  %v2421_v36 = vrot.slane %v2420_v54, 4  ;;  %v5599_v9 = vld [vmem:[%s7231_s14 + $0xa8] sm:$0xf]  ;;  %v2445_v56 = vrot.slane %v2444_v12, 4  ;;  %v2484_v32 = vsel %vm7263_vm2, %v2479_v13, %v2483_v60 }
 0x147   : > { %v2468_v18 = vor.u32 %v2467_v24, %v2464_v17  ;;  %v2486_v3 = vshrl.u32 %v5599_v9, 16  ;;  %v2489_v30 = vshll.u32 %v5599_v9, 16  ;;  %v2459_v1 = vrot.slane %v2457_v6, 5 }
 0x148   : > { %v2426_v43 = vsel %vm7263_vm2, %v2421_v36, %v8869_v40  ;;  %v2497_v17 = vrot.slane %v2495_v52, 5  ;;  %v2501_v24 = vrot.slane %v2499_v15, 4  ;;  %v2512_v21 = vrot.slane %v2510_v31, 4  ;;  %v5605_v36 = vld [vmem:[%s7231_s14 + $0xc0] sm:$0xf] }
 0x149   : > { %v2469_v54 = vrot.slane %v2468_v18, 4  ;;  %v2488_v0 = vrot.slane %v2486_v3, 4  ;;  %v2491_v42 = vrot.slane %v2489_v30, 5  ;;  %v2534_v9 = vshrl.u32 %v5605_v36, 16  ;;  %v7151_v18 = vld [vmem:[%s7231_s14 + $0xc4] sm:$0xf] }
 0x14a   : > { %v2543_v33 = vshll.u32 %v7151_v18, 16 }
 0x14b   : > { %v2474_v51 = vsel %vm7263_vm2, %v2469_v54, %v8888_v14  ;;  %v2492_v5 = vor.u32 %v2491_v42, %v2488_v0  ;;  %v2547_v14 = vshrl.u32 %v7151_v18, 16  ;;  %v2536_v19 = vrot.slane %v2534_v9, 4 }
 0x14c   : > { %6664 = vmatmul.mubr.bf16.gmra.mrb[12].mxu0 %v5855_v38  ;;  %v2436_v38 = vsel %vm7263_vm2, %v2431_v47, %v2435_v8  ;;  %v2525_v8 = vrot.slane %v2523_v44, 4  ;;  %v2450_v47 = vsel %vm7263_vm2, %v2445_v56, %v8886_v41  ;;  %v7150_v41 = vld [vmem:[%s7231_s14 + $0xb0] sm:$0x1]  ;;  %v5620_v58 = vcombine.low %v2474_v51, %v2484_v32  ;;  %v7153_v44 = vld [vmem:[%s7231_s14 + $0xc8] sm:$0x1] }
 0x14d   : > { %6440 = vmatmul.mubr.bf16.gmra.mrb[28].mxu1 %v7083_v61  ;;  %6667 = vmatprep.mubr.bf16.mxu0 %v5856_v35  ;;  %v2455_v35 = vrot.slane %v2454_v26, 4  ;;  %v5618_v40 = vcombine.low %v2426_v43, %v2436_v38  ;;  %v2515_v61 = vrot.slane %v2513_v63, 5  ;;  %v2505_v6 = vshll.u32 %v7150_v41, 16 }
 0x14e   : > { %6475 = vmatprep.mubr.bf16.mxu1 %v5616_v45  ;;  %v2521_v45 = vrot.slane %v2519_v29, 5  ;;  %v2537_v26 = vshll.u32 %v5605_v36, 16  ;;  %v2493_v22 = vrot.slane %v2492_v5, 4  ;;  %v2545_v15 = vrot.slane %v2543_v33, 5  ;;  %v8976_v36 = vld [vmem:[%s9048_s2] ss:$0 sm:$0xff] }
 0x14f   : > { %v2460_v12 = vsel %vm7263_vm2, %v2455_v35, %v2459_v1  ;;  %v2516_v10 = vor.u32 %v2515_v61, %v2512_v21  ;;  %v2507_v30 = vrot.slane %v2505_v6, 5  ;;  %v2549_v43 = vrot.slane %v2547_v14, 4 }
 0x150   : > { %v2526_v39 = vor.u32 %v2525_v8, %v2521_v45  ;;  %v5619_v3 = vcombine.low %v2450_v47, %v2460_v12  ;;  %v2539_v52 = vrot.slane %v2537_v26, 5  ;;  %v2498_v31 = vsel %vm7263_vm2, %v2493_v22, %v2497_v17 }
 0x151   : > { %v2517_v38 = vrot.slane %v2516_v10, 4  ;;  %v2550_v29 = vor.u32 %v2549_v43, %v2545_v15  ;;  %v2553_v35 = vshll.u32 %v7153_v44, 16 }
 0x152   : > { %v2527_v56 = vrot.slane %v2526_v39, 4  ;;  %v2540_v20 = vor.u32 %v2539_v52, %v2536_v19 }
 0x153   : > { %v2522_v4 = vsel %vm7263_vm2, %v2517_v38, %v2521_v45  ;;  %v2555_v54 = vrot.slane %v2553_v35, 5 }
 0x154   : > { %6668 = vmatmul.mubr.bf16.gmra.mrb[16].mxu0 %v5857_v62  ;;  %v2502_v62 = vor.u32 %v2501_v24, %v2497_v17  ;;  %v2541_v25 = vrot.slane %v2540_v20, 4 }
 0x155   : > { %6476 = vmatmul.mubr.bf16.vlgmr.msra.gmra.mrb[16].mxu1 %v8711_v50  ;;  %6671 = vmatprep.mubr.bf16.mxu0 %v5858_v59  ;;  %v7152_v50 = vld [vmem:[%s7231_s14 + $0xbc] sm:$0x1] }
 0x156   : > { %6479 = vmatprep.mubr.bf16.mxu1 %v5618_v40  ;;  %v2529_v23 = vshll.u32 %v7152_v50, 16  ;;  %v2503_v59 = vrot.slane %v2502_v62, 4  ;;  %v2546_v13 = vsel %vm7263_vm2, %v2541_v25, %v2545_v15 }
 0x158   : > { %v2531_v1 = vrot.slane %v2529_v23, 5  ;;  %v2508_v63 = vsel %vm7263_vm2, %v2503_v59, %v2507_v30 }
 0x15a   : > { %v2532_v57 = vsel %vm7263_vm2, %v2527_v56, %v2531_v1 }
 0x15b   : > { %v5622_v7 = vcombine.low %v2522_v4, %v2532_v57 }
 0x15c   : > { %6672 = vmatmul.mubr.bf16.gmra.mrb[20].mxu0 %v5859_v53  ;;  %v5621_v53 = vcombine.low %v2498_v31, %v2508_v63 }
 0x15d   : > { %6480 = vmatmul.mubr.bf16.gmra.mrb[20].mxu1 %v5619_v3  ;;  %6675 = vmatprep.mubr.bf16.mxu0 %v5860_v16  ;;  %v2551_v16 = vrot.slane %v2550_v29, 4 }
 0x15e   : > { %6483 = vmatprep.mubr.bf16.mxu1 %v5620_v58 }
 0x15f   : > { %v2556_v60 = vsel %vm7263_vm2, %v2551_v16, %v2555_v54 }
 0x160   : > { %v5623_v0 = vcombine.low %v2546_v13, %v2556_v60 }
 0x164   : > { %6676 = vmatmul.mubr.bf16.gmra.mrb[24].mxu0 %v5861_v2 }
 0x165   : > { %6484 = vmatmul.mubr.bf16.gmra.mrb[24].mxu1 %v5621_v53  ;;  %6679 = vmatprep.mubr.bf16.mxu0 %v5862_v28 }
 0x166   : > { %6487 = vmatprep.mubr.bf16.mxu1 %v5622_v7 }
 0x16c   : > { %6680 = vmatmul.mubr.bf16.gmra.mrb[28].mxu0 %v5863_v48 }
 0x16d   : > { %6488 = vmatmul.mubr.bf16.gmra.mrb[28].mxu1 %v5623_v0 }
 0x1e8   : > { %v6413_v27 = vpop.f32.mrb[0].mxu1 }
 0x1e9   : > { %v1966_v46 = vpop.f32.mrb[1].mxu1 }
 0x1ea   : > { %v6414_v2 = vpop.f32.mrb[2].mxu1 }
 0x1eb   : > { %v1969_v42 = vpop.f32.mrb[3].mxu1 }
 0x1f0   : > { %v6417_v17 = vpop.f32.mrb[4].mxu1 }
 0x1f1   : > { %v1982_v55 = vpop.f32.mrb[5].mxu1 }
 0x1f2   : > { %v6418_v49 = vpop.f32.mrb[6].mxu1 }
 0x1f3   : > { %v1985_v28 = vpop.f32.mrb[7].mxu1 }
 0x1f8   : > { %v6421_v24 = vpop.f32.mrb[8].mxu1 }
 0x1f9   : > { %v8959_v40 = vpop.f32.mrb[9].mxu1 }
 0x1fa   : > { %v8961_v37 = vpop.f32.mrb[10].mxu1 }
 0x1fb   : > { %v8963_v21 = vpop.f32.mrb[11].mxu1 }
 0x200   : > { %v8965_v61 = vpop.f32.mrb[12].mxu1 }
 0x201   : > { %v8967_v34 = vpop.f32.mrb[13].mxu1 }
 0x202   : > { %v8969_v11 = vpop.f32.mrb[14].mxu1 }
 0x203   : > { %v8971_v48 = vpop.f32.mrb[15].mxu1 }
 0x207   : > { %v6653_v45 = vpop.f32.mrb[0].mxu0 }
 0x208   : > { %v6699_v8 = vadd.f32 %v6653_v45, %v6413_v27  ;;  %v4852_v47 = vpop.f32.mrb[1].mxu0 }
 0x209   : > { %v6700_v12 = vadd.f32 %v4852_v47, %v1966_v46  ;;  %v6654_v51 = vpop.f32.mrb[2].mxu0 }
 0x20a   : > { %v6701_v32 = vadd.f32 %v6654_v51, %v6414_v2  ;;  %v4855_v5 = vpop.f32.mrb[3].mxu0  ;;  %v5020_v6 = vadd.f32 %v6699_v8, %v8976_v36 }
 0x20b   : > { %v5018_v62 = vadd.f32 %v6700_v12, %v8976_v36  ;;  %v6702_v41 = vadd.f32 %v4855_v5, %v1969_v42 }
 0x20c   : > { %v5021_v9 = vadd.f32 %v6701_v32, %v8976_v36  ;;  %v5249_v58 = vmul.f32 %v5020_v6, %v5020_v6 }
 0x20d   : > { %v5019_v26 = vadd.f32 %v6702_v41, %v8976_v36  ;;  %v5247_v33 = vmul.f32 %v5018_v62, %v5018_v62 }
 0x20e   : > { %v5948_v18 = vpack.c.bf16 %v5021_v9, %v5020_v6  ;;  %v5250_v52 = vmul.f32 %v5021_v9, %v5021_v9 }
 0x20f   : > { %v5943_v14 = vpack.c.bf16 %v5019_v26, %v5018_v62  ;;  %v5210_v10 = vadd.f32 %v5019_v26, %v5018_v62  ;;  %v5248_v39 = vmul.f32 %v5019_v26, %v5019_v26  ;;  %v6657_v50 = vpop.f32.mrb[4].mxu0 }
 0x210   : > { %6020 = vst [vmem:[%s8985_s23 + $0x8] sm:$0xff] %v5948_v18   ;;  %v6703_v23 = vadd.f32 %v6657_v50, %v6417_v17  ;;  %v4868_v3 = vpop.f32.mrb[5].mxu0 }
 0x211   : > { %5944 = vst [vmem:[%s8985_s23] sm:$0xff] %v5943_v14   ;;  %v5211_v22 = vadd.f32 %v5210_v10, %v5020_v6  ;;  %v5279_v59 = vadd.f32 %v5248_v39, %v5247_v33  ;;  %v6704_v30 = vadd.f32 %v4868_v3, %v1982_v55  ;;  %v6658_v19 = vpop.f32.mrb[6].mxu0 }
 0x212   : > { %v6705_v15 = vadd.f32 %v6658_v19, %v6418_v49  ;;  %v4871_v43 = vpop.f32.mrb[7].mxu0  ;;  %v5024_v63 = vadd.f32 %v6703_v23, %v8976_v36 }
 0x213   : > { %v5280_v38 = vadd.f32 %v5279_v59, %v5249_v58  ;;  %v5022_v56 = vadd.f32 %v6704_v30, %v8976_v36  ;;  %v5212_v1 = vadd.f32 %v5211_v22, %v5021_v9  ;;  %v6706_v31 = vadd.f32 %v4871_v43, %v1985_v28 }
 0x214   : > { %v5025_v20 = vadd.f32 %v6705_v15, %v8976_v36  ;;  %v5253_v0 = vmul.f32 %v5024_v63, %v5024_v63 }
 0x215   : > { %v5213_v29 = vadd.f32 %v5212_v1, %v5022_v56  ;;  %v5251_v44 = vmul.f32 %v5022_v56, %v5022_v56  ;;  %v5281_v35 = vadd.f32 %v5280_v38, %v5250_v52  ;;  %v5023_v4 = vadd.f32 %v6706_v31, %v8976_v36 }
 0x216   : > { %v5958_v57 = vpack.c.bf16 %v5025_v20, %v5024_v63  ;;  %v5254_v17 = vmul.f32 %v5025_v20, %v5025_v20 }
 0x217   : > { %v5282_v53 = vadd.f32 %v5281_v35, %v5251_v44  ;;  %v5953_v7 = vpack.c.bf16 %v5023_v4, %v5022_v56  ;;  %v5214_v25 = vadd.f32 %v5213_v29, %v5023_v4  ;;  %v5252_v16 = vmul.f32 %v5023_v4, %v5023_v4  ;;  %v6661_v54 = vpop.f32.mrb[8].mxu0 }
 0x218   : > { %6022 = vst [vmem:[%s8985_s23 + $0x18] sm:$0xff] %v5958_v57   ;;  %v6707_v13 = vadd.f32 %v6661_v54, %v6421_v24  ;;  %v4884_v60 = vpop.f32.mrb[9].mxu0 }
 0x219   : > { %6021 = vst [vmem:[%s8985_s23 + $0x10] sm:$0xff] %v5953_v7   ;;  %v5215_v27 = vadd.f32 %v5214_v25, %v5024_v63  ;;  %v5283_v46 = vadd.f32 %v5282_v53, %v5252_v16  ;;  %v6708_v2 = vadd.f32 %v4884_v60, %v8959_v40  ;;  %v6662_v42 = vpop.f32.mrb[10].mxu0 }
 0x21a   : > { %v6709_v55 = vadd.f32 %v6662_v42, %v8961_v37  ;;  %v4887_v49 = vpop.f32.mrb[11].mxu0  ;;  %v5028_v24 = vadd.f32 %v6707_v13, %v8976_v36 }
 0x21b   : > { %v5284_v28 = vadd.f32 %v5283_v46, %v5253_v0  ;;  %v5026_v45 = vadd.f32 %v6708_v2, %v8976_v36  ;;  %v5216_v8 = vadd.f32 %v5215_v27, %v5025_v20  ;;  %v6710_v47 = vadd.f32 %v4887_v49, %v8963_v21 }
 0x21c   : > { %v5029_v12 = vadd.f32 %v6709_v55, %v8976_v36  ;;  %v5257_v33 = vmul.f32 %v5028_v24, %v5028_v24 }
 0x21d   : > { %v5217_v51 = vadd.f32 %v5216_v8, %v5026_v45  ;;  %v5255_v32 = vmul.f32 %v5026_v45, %v5026_v45  ;;  %v5285_v40 = vadd.f32 %v5284_v28, %v5254_v17  ;;  %v5027_v5 = vadd.f32 %v6710_v47, %v8976_v36 }
 0x21e   : > { %v5968_v62 = vpack.c.bf16 %v5029_v12, %v5028_v24  ;;  %v5258_v23 = vmul.f32 %v5029_v12, %v5029_v12 }
 0x21f   : > { %v5286_v37 = vadd.f32 %v5285_v40, %v5255_v32  ;;  %v5963_v41 = vpack.c.bf16 %v5027_v5, %v5026_v45  ;;  %v5218_v6 = vadd.f32 %v5217_v51, %v5027_v5  ;;  %v5256_v9 = vmul.f32 %v5027_v5, %v5027_v5  ;;  %v6665_v26 = vpop.f32.mrb[12].mxu0 }
 0x220   : > { %6024 = vst [vmem:[%s8985_s23 + $0x28] sm:$0xff] %v5968_v62   ;;  %v6711_v18 = vadd.f32 %v6665_v26, %v8965_v61  ;;  %v4900_v21 = vpop.f32.mrb[13].mxu0 }
 0x221   : > { %6023 = vst [vmem:[%s8985_s23 + $0x20] sm:$0xff] %v5963_v41   ;;  %v5219_v14 = vadd.f32 %v5218_v6, %v5028_v24  ;;  %v5287_v10 = vadd.f32 %v5286_v37, %v5256_v9  ;;  %v6712_v39 = vadd.f32 %v4900_v21, %v8967_v34  ;;  %v6666_v50 = vpop.f32.mrb[14].mxu0 }
 0x222   : > { %v6713_v3 = vadd.f32 %v6666_v50, %v8969_v11  ;;  %v4903_v58 = vpop.f32.mrb[15].mxu0  ;;  %v5032_v61 = vadd.f32 %v6711_v18, %v8976_v36 }
 0x223   : > { %v5288_v22 = vadd.f32 %v5287_v10, %v5257_v33  ;;  %v5030_v59 = vadd.f32 %v6712_v39, %v8976_v36  ;;  %v5220_v30 = vadd.f32 %v5219_v14, %v5029_v12  ;;  %v6714_v19 = vadd.f32 %v4903_v58, %v8971_v48 }
 0x224   : > { %v5033_v52 = vadd.f32 %v6713_v3, %v8976_v36  ;;  %v5261_v48 = vmul.f32 %v5032_v61, %v5032_v61 }
 0x225   : > { %v5221_v15 = vadd.f32 %v5220_v30, %v5030_v59  ;;  %v5259_v43 = vmul.f32 %v5030_v59, %v5030_v59  ;;  %v5289_v34 = vadd.f32 %v5288_v22, %v5258_v23  ;;  %v5031_v38 = vadd.f32 %v6714_v19, %v8976_v36 }
 0x226   : > { %v5978_v56 = vpack.c.bf16 %v5033_v52, %v5032_v61  ;;  %v5262_v13 = vmul.f32 %v5033_v52, %v5033_v52 }
 0x227   : > { %v5290_v11 = vadd.f32 %v5289_v34, %v5259_v43  ;;  %v5973_v1 = vpack.c.bf16 %v5031_v38, %v5030_v59  ;;  %v5222_v31 = vadd.f32 %v5221_v15, %v5031_v38  ;;  %v5260_v63 = vmul.f32 %v5031_v38, %v5031_v38  ;;  %v6669_v20 = vpop.f32.mrb[16].mxu0 }
 0x228   : > { %6026 = vst [vmem:[%s8985_s23 + $0x38] sm:$0xff] %v5978_v56   ;;  %v6477_v29 = vpop.f32.mrb[16].mxu1  ;;  %v4916_v44 = vpop.f32.mrb[17].mxu0 }
 0x229   : > { %6025 = vst [vmem:[%s8985_s23 + $0x30] sm:$0xff] %v5973_v1   ;;  %v5223_v35 = vadd.f32 %v5222_v31, %v5032_v61  ;;  %v5291_v4 = vadd.f32 %v5290_v11, %v5260_v63  ;;  %v6715_v57 = vadd.f32 %v6669_v20, %v6477_v29  ;;  %v2783_v53 = vpop.f32.mrb[17].mxu1  ;;  %v6670_v7 = vpop.f32.mrb[18].mxu0 }
 0x22a   : > { %v6716_v25 = vadd.f32 %v4916_v44, %v2783_v53  ;;  %v6478_v16 = vpop.f32.mrb[18].mxu1  ;;  %v4919_v54 = vpop.f32.mrb[19].mxu0 }
 0x22b   : > { %v5292_v60 = vadd.f32 %v5291_v4, %v5261_v48  ;;  %v5224_v0 = vadd.f32 %v5223_v35, %v5033_v52  ;;  %v6717_v27 = vadd.f32 %v6670_v7, %v6478_v16  ;;  %v2786_v46 = vpop.f32.mrb[19].mxu1  ;;  %v5036_v17 = vadd.f32 %v6715_v57, %v8976_v36 }
 0x22c   : > { %v5034_v2 = vadd.f32 %v6716_v25, %v8976_v36  ;;  %v6718_v42 = vadd.f32 %v4919_v54, %v2786_v46 }
 0x22d   : > { %v5293_v55 = vadd.f32 %v5292_v60, %v5262_v13  ;;  %v5037_v49 = vadd.f32 %v6717_v27, %v8976_v36  ;;  %v5265_v9 = vmul.f32 %v5036_v17, %v5036_v17 }
 0x22e   : > { %v5225_v28 = vadd.f32 %v5224_v0, %v5034_v2  ;;  %v5263_v45 = vmul.f32 %v5034_v2, %v5034_v2  ;;  %v5035_v8 = vadd.f32 %v6718_v42, %v8976_v36 }
 0x22f   : > { %v5988_v47 = vpack.c.bf16 %v5037_v49, %v5036_v17  ;;  %v6673_v24 = vpop.f32.mrb[20].mxu0  ;;  %v5266_v10 = vmul.f32 %v5037_v49, %v5037_v49 }
 0x230   : > { %v5294_v12 = vadd.f32 %v5293_v55, %v5263_v45  ;;  %v5983_v51 = vpack.c.bf16 %v5035_v8, %v5034_v2  ;;  %v5226_v32 = vadd.f32 %v5225_v28, %v5035_v8  ;;  %v5264_v40 = vmul.f32 %v5035_v8, %v5035_v8  ;;  %v6481_v5 = vpop.f32.mrb[20].mxu1  ;;  %v4932_v62 = vpop.f32.mrb[21].mxu0 }
 0x231   : > { %6028 = vst [vmem:[%s8985_s23 + $0x48] sm:$0xff] %v5988_v47   ;;  %v6719_v37 = vadd.f32 %v6673_v24, %v6481_v5  ;;  %v2799_v41 = vpop.f32.mrb[21].mxu1  ;;  %v6674_v6 = vpop.f32.mrb[22].mxu0 }
 0x232   : > { %6027 = vst [vmem:[%s8985_s23 + $0x40] sm:$0xff] %v5983_v51   ;;  %v5227_v26 = vadd.f32 %v5226_v32, %v5036_v17  ;;  %v5295_v18 = vadd.f32 %v5294_v12, %v5264_v40  ;;  %v6720_v21 = vadd.f32 %v4932_v62, %v2799_v41  ;;  %v6482_v33 = vpop.f32.mrb[22].mxu1  ;;  %v4935_v14 = vpop.f32.mrb[23].mxu0 }
 0x233   : > { %v6721_v39 = vadd.f32 %v6674_v6, %v6482_v33  ;;  %v2802_v50 = vpop.f32.mrb[23].mxu1  ;;  %v5040_v59 = vadd.f32 %v6719_v37, %v8976_v36 }
 0x234   : > { %v5296_v23 = vadd.f32 %v5295_v18, %v5265_v9  ;;  %v5038_v3 = vadd.f32 %v6720_v21, %v8976_v36  ;;  %v5228_v58 = vadd.f32 %v5227_v26, %v5037_v49  ;;  %v6722_v22 = vadd.f32 %v4935_v14, %v2802_v50 }
 0x235   : > { %v5041_v30 = vadd.f32 %v6721_v39, %v8976_v36  ;;  %v5269_v48 = vmul.f32 %v5040_v59, %v5040_v59 }
 0x236   : > { %v5229_v19 = vadd.f32 %v5228_v58, %v5038_v3  ;;  %v5267_v61 = vmul.f32 %v5038_v3, %v5038_v3  ;;  %v5297_v52 = vadd.f32 %v5296_v23, %v5266_v10  ;;  %v5039_v15 = vadd.f32 %v6722_v22, %v8976_v36 }
 0x237   : > { %v5998_v43 = vpack.c.bf16 %v5041_v30, %v5040_v59  ;;  %v6677_v34 = vpop.f32.mrb[24].mxu0  ;;  %v5270_v25 = vmul.f32 %v5041_v30, %v5041_v30 }
 0x238   : > { %v5298_v38 = vadd.f32 %v5297_v52, %v5267_v61  ;;  %v5993_v56 = vpack.c.bf16 %v5039_v15, %v5038_v3  ;;  %v5230_v11 = vadd.f32 %v5229_v19, %v5039_v15  ;;  %v5268_v1 = vmul.f32 %v5039_v15, %v5039_v15  ;;  %v6485_v31 = vpop.f32.mrb[24].mxu1  ;;  %v4948_v63 = vpop.f32.mrb[25].mxu0 }
 0x239   : > { %6030 = vst [vmem:[%s8985_s23 + $0x58] sm:$0xff] %v5998_v43   ;;  %v6723_v20 = vadd.f32 %v6677_v34, %v6485_v31  ;;  %v2815_v29 = vpop.f32.mrb[25].mxu1  ;;  %v6678_v44 = vpop.f32.mrb[26].mxu0 }
 0x23a   : > { %6029 = vst [vmem:[%s8985_s23 + $0x50] sm:$0xff] %v5993_v56   ;;  %v5231_v35 = vadd.f32 %v5230_v11, %v5040_v59  ;;  %v5299_v4 = vadd.f32 %v5298_v38, %v5268_v1  ;;  %v6724_v57 = vadd.f32 %v4948_v63, %v2815_v29  ;;  %v6486_v53 = vpop.f32.mrb[26].mxu1  ;;  %v4951_v7 = vpop.f32.mrb[27].mxu0 }
 0x23b   : > { %v6725_v16 = vadd.f32 %v6678_v44, %v6486_v53  ;;  %v2818_v54 = vpop.f32.mrb[27].mxu1  ;;  %v5044_v46 = vadd.f32 %v6723_v20, %v8976_v36 }
 0x23c   : > { %v5300_v13 = vadd.f32 %v5299_v4, %v5269_v48  ;;  %v5042_v60 = vadd.f32 %v6724_v57, %v8976_v36  ;;  %v5232_v0 = vadd.f32 %v5231_v35, %v5041_v30  ;;  %v6726_v27 = vadd.f32 %v4951_v7, %v2818_v54 }
 0x23d   : > { %v5045_v2 = vadd.f32 %v6725_v16, %v8976_v36  ;;  %v5273_v37 = vmul.f32 %v5044_v46, %v5044_v46 }
 0x23e   : > { %v5233_v42 = vadd.f32 %v5232_v0, %v5042_v60  ;;  %v5271_v17 = vmul.f32 %v5042_v60, %v5042_v60  ;;  %v5301_v55 = vadd.f32 %v5300_v13, %v5270_v25  ;;  %v5043_v49 = vadd.f32 %v6726_v27, %v8976_v36 }
 0x23f   : > { %v6008_v28 = vpack.c.bf16 %v5045_v2, %v5044_v46  ;;  %v6681_v45 = vpop.f32.mrb[28].mxu0  ;;  %v5274_v21 = vmul.f32 %v5045_v2, %v5045_v2 }
 0x240   : > { %v5302_v8 = vadd.f32 %v5301_v55, %v5271_v17  ;;  %v6003_v47 = vpack.c.bf16 %v5043_v49, %v5042_v60  ;;  %v5234_v24 = vadd.f32 %v5233_v42, %v5043_v49  ;;  %v5272_v12 = vmul.f32 %v5043_v49, %v5043_v49  ;;  %v6489_v51 = vpop.f32.mrb[28].mxu1  ;;  %v4964_v32 = vpop.f32.mrb[29].mxu0 }
 0x241   : > { %6032 = vst [vmem:[%s8985_s23 + $0x68] sm:$0xff] %v6008_v28   ;;  %v6727_v40 = vadd.f32 %v6681_v45, %v6489_v51  ;;  %v2831_v5 = vpop.f32.mrb[29].mxu1  ;;  %v6682_v62 = vpop.f32.mrb[30].mxu0 }
 0x242   : > { %6031 = vst [vmem:[%s8985_s23 + $0x60] sm:$0xff] %v6003_v47   ;;  %v5235_v41 = vadd.f32 %v5234_v24, %v5044_v46  ;;  %v5303_v6 = vadd.f32 %v5302_v8, %v5272_v12  ;;  %v6728_v9 = vadd.f32 %v4964_v32, %v2831_v5  ;;  %v6490_v26 = vpop.f32.mrb[30].mxu1  ;;  %v4967_v18 = vpop.f32.mrb[31].mxu0 }
 0x243   : > { %v6729_v33 = vadd.f32 %v6682_v62, %v6490_v26  ;;  %v2834_v14 = vpop.f32.mrb[31].mxu1  ;;  %v5048_v3 = vadd.f32 %v6727_v40, %v8976_v36 }
 0x244   : > { %v5304_v10 = vadd.f32 %v5303_v6, %v5273_v37  ;;  %v5046_v39 = vadd.f32 %v6728_v9, %v8976_v36  ;;  %v5236_v50 = vadd.f32 %v5235_v41, %v5045_v2  ;;  %v6730_v23 = vadd.f32 %v4967_v18, %v2834_v14 }
 0x245   : > { %v5049_v58 = vadd.f32 %v6729_v33, %v8976_v36  ;;  %v5277_v38 = vmul.f32 %v5048_v3, %v5048_v3 }
 0x246   : > { %v5237_v22 = vadd.f32 %v5236_v50, %v5046_v39  ;;  %v5275_v59 = vmul.f32 %v5046_v39, %v5046_v39  ;;  %v5305_v30 = vadd.f32 %v5304_v10, %v5274_v21  ;;  %v5047_v19 = vadd.f32 %v6730_v23, %v8976_v36 }
 0x247   : > { %v6018_v61 = vpack.c.bf16 %v5049_v58, %v5048_v3  ;;  %v5278_v1 = vmul.f32 %v5049_v58, %v5049_v58 }
 0x248   : > { %v5306_v52 = vadd.f32 %v5305_v30, %v5275_v59  ;;  %v6013_v15 = vpack.c.bf16 %v5047_v19, %v5046_v39  ;;  %v5238_v43 = vadd.f32 %v5237_v22, %v5047_v19  ;;  %v5276_v34 = vmul.f32 %v5047_v19, %v5047_v19 }
 0x249   : > { %6034 = vst [vmem:[%s8985_s23 + $0x78] sm:$0xff] %v6018_v61  }
 0x24a   : > { %6033 = vst [vmem:[%s8985_s23 + $0x70] sm:$0xff] %v6013_v15   ;;  %v5239_v56 = vadd.f32 %v5238_v43, %v5048_v3  ;;  %v5307_v11 = vadd.f32 %v5306_v52, %v5276_v34 }
 0x24c   : > { %v5240_v31 = vadd.f32 %v5239_v56, %v5049_v58  ;;  %v5308_v63 = vadd.f32 %v5307_v11, %v5277_v38 }
 0x24e   : > { %v5241_v20 = vrot.slane %v5240_v31, 4  ;;  %v5309_v29 = vadd.f32 %v5308_v63, %v5278_v1 }
 0x250   : > { %v5242_v44 = vadd.f32 %v5241_v20, %v5240_v31  ;;  %v5310_v48 = vrot.slane %v5309_v29, 4 }
 0x252   : > { %v5243_v35 = vrot.slane %v5242_v44, 2  ;;  %v5311_v36 = vadd.f32 %v5310_v48, %v5309_v29 }
 0x254   : > { %v5244_v4 = vadd.f32 %v5243_v35, %v5242_v44  ;;  %v5312_v57 = vrot.slane %v5311_v36, 2 }
 0x256   : > { %v5245_v53 = vrot.slane %v5244_v4, 1  ;;  %v5313_v7 = vadd.f32 %v5312_v57, %v5311_v36 }
 0x258   : > { %v5314_v25 = vrot.slane %v5313_v7, 1  ;;  %v5246_v16 = vadd.f32 %v5245_v53, %v5244_v4 }
 0x25a   : > { %v5315_v54 = vadd.f32 %v5314_v25, %v5313_v7 }
 0x25c   : > { %v5317_v13 = vsel %vm5316_vm6, %v5246_v16, %v5315_v54 }
 0x25d   : > { %v5319_v60 = vsel %vm5318_vm7, %v5317_v13, 0.0 }
 0x25e   : > { %5320 = vst [vmem:[%s208_s27] sm:$0xff] %v5319_v60 }
 0x25f PF: > { %s15_s15 = sadd.s32 1, %s7160_s15  }
 0x260   : > { %p12_p4 = scmp.ge.s32.totalorder %s15_s15, 4  }
 0x262   :  { %14 = sbr.rel (!%p12_p4) target bundleno = 1 (0x1), region = 76 }

</bundles_post_ra>
